<compile_context>
chip_gen: v6e
topology: v6e:2x2x1
jax: 0.10.0
libtpu: 0.0.40
codegen_flags: <defaults>
</compile_context>

<pallas_src>
import functools

import jax
import jax.numpy as jnp
from jax.experimental import pallas as pl
from jax.experimental.pallas import tpu as pltpu


# ----------------------------- in-kernel helpers -----------------------------

def _gn_swish(h, gamma_row, beta_row, n_groups, m_ref, mt_ref, eps=1e-5):
    """Per-image GroupNorm (biased variance, like PyTorch) followed by Swish.

    h: (Nb, HW, C) f32.  gamma/beta: (1, C) rows.  m_ref/mt_ref: [C,G]/[G,C]
    one-hot channel->group maps (precomputed in the wrapper; ignored when
    C == G, where GroupNorm degenerates to per-channel stats).
    """
    _, HW, C = h.shape
    s = jnp.sum(h, axis=1)                         # (Nb, C)
    ss = jnp.sum(h * h, axis=1)                    # (Nb, C)
    if C == n_groups:
        # One channel per group: no group pooling matmuls needed.
        cnt = jnp.float32(HW)
        mean_c = s / cnt
        var_c = ss / cnt - mean_c * mean_c
        inv_c = jax.lax.rsqrt(jnp.maximum(var_c, 0.0) + eps)
    else:
        cg = C // n_groups
        cnt = jnp.float32(HW * cg)
        m = m_ref[...]                             # [C, G]
        mean_g = jnp.dot(s, m, preferred_element_type=jnp.float32) / cnt
        ms_g = jnp.dot(ss, m, preferred_element_type=jnp.float32) / cnt
        var_g = ms_g - mean_g * mean_g
        inv_g = jax.lax.rsqrt(jnp.maximum(var_g, 0.0) + eps)
        mt = mt_ref[...]                           # [G, C]
        mean_c = jnp.dot(mean_g, mt, preferred_element_type=jnp.float32)
        inv_c = jnp.dot(inv_g, mt, preferred_element_type=jnp.float32)
    hn = (h - mean_c[:, None, :]) * inv_c[:, None, :] * gamma_row + beta_row
    return hn * jax.nn.sigmoid(hn)


def _scatter_to_pad(pad_ref, h2, Nb, H, W):
    """Row-wise stores of compact [Nb*H*W, C] activations into the flat
    zero-padded slab (pixel (n,i,j) -> slab row n*(H+2)*(W+2)+(i+1)*(W+2)+(j+1))."""
    ws = W + 2
    img = (H + 2) * ws
    for n in range(Nb):
        for i in range(H):
            dst = n * img + (i + 1) * ws + 1
            src = (n * H + i) * W
            pad_ref[pl.ds(dst, W), :] = h2[src:src + W, :]


def _conv3x3(pad_ref, w_ref, rows, W, Cout):
    """3x3 same-padding conv: 9 contiguous row-window matmuls over the slab."""
    ws = W + 2
    acc = jnp.zeros((rows, Cout), jnp.float32)
    for kk in range(9):
        off = (kk // 3) * ws + (kk % 3)            # static tap offset
        patch = pad_ref[pl.ds(off, rows), :]       # (rows, Cin) bf16, contiguous
        acc = acc + jnp.dot(patch, w_ref[kk],
                            preferred_element_type=jnp.float32)
    return acc                                     # (rows, Cout) f32


def _gather_valid(acc, Nb, H, W):
    """Discard the pad rows: pixel (n,i,j) sits at slab row n*(H+2)*(W+2)+i*(W+2)+j,
    so per (n,i) the W valid rows are one contiguous slice."""
    ws = W + 2
    img = (H + 2) * ws
    rows = [acc[n * img + i * ws: n * img + i * ws + W, :]
            for n in range(Nb) for i in range(H)]
    out = jnp.concatenate(rows, axis=0)            # (Nb*H*W, Cout)
    return out.reshape(Nb, H * W, acc.shape[-1])


# --------------------------------- kernel ------------------------------------

def upblock_kernel(x_ref, temb_ref,
                   g1_ref, b1_ref, m1_ref, m1t_ref, w1_ref,
                   g2_ref, b2_ref, m2_ref, m2t_ref, w2_ref,
                   ws_ref, bout_ref,
                   o_ref,
                   pad1_ref, pad2_ref,
                   *, Nb, H, W, Cin, Cout, G):
    HW = H * W
    rows = Nb * (H + 2) * (W + 2)

    # The pad slabs need zero borders every step.  NOTE: zeroing only once
    # under pl.when(program_id==0) would be unsafe with a "parallel" grid axis
    # (on a 2-TensorCore chip the second core never executes program_id 0 and
    # scratch is per-core), so we zero per step; in bf16 the slabs are tiny.
    pad1_ref[...] = jnp.zeros_like(pad1_ref)
    pad2_ref[...] = jnp.zeros_like(pad2_ref)

    x3 = x_ref[...].astype(jnp.float32)                          # (Nb, HW, Cin)

    # ---- GroupNorm1 + Swish + Conv3x3 #1 ----
    h = _gn_swish(x3, g1_ref[...], b1_ref[...], G, m1_ref, m1t_ref)
    _scatter_to_pad(pad1_ref,
                    h.astype(jnp.bfloat16).reshape(Nb * HW, Cin), Nb, H, W)
    h = _gather_valid(_conv3x3(pad1_ref, w1_ref, rows, W, Cout), Nb, H, W)

    # time embedding (precomputed in the wrapper; conv1 bias folded in)
    h = h + temb_ref[0][:, None, :]                              # (Nb,1,Cout)

    # ---- GroupNorm2 + Swish + Conv3x3 #2 ----
    # TODO(synk): nn.Dropout(0.1) is identity in eval mode; training-mode RNG
    # dropout is not implemented.
    h = _gn_swish(h, g2_ref[...], b2_ref[...], G, m2_ref, m2t_ref)
    _scatter_to_pad(pad2_ref,
                    h.astype(jnp.bfloat16).reshape(Nb * HW, Cout), Nb, H, W)
    h = _gather_valid(_conv3x3(pad2_ref, w2_ref, rows, W, Cout), Nb, H, W)

    # ---- 1x1 skip conv on the original input + (conv2 bias + skip bias) ----
    skip = jnp.dot(x3.reshape(Nb * HW, Cin).astype(jnp.bfloat16), ws_ref[...],
                   preferred_element_type=jnp.float32).reshape(Nb, HW, Cout)

    o_ref[...] = (h + skip + bout_ref[...]).astype(o_ref.dtype)


# --------------------------------- wrapper -----------------------------------

def _one_hot_group_masks(C, G):
    ch = jnp.arange(C)[:, None]
    gr = jnp.arange(G)[None, :]
    m = (ch // (C // G) == gr).astype(jnp.float32)               # [C, G]
    return m, m.T


def upblock_forward(x_nchw, t, params, *, n_groups=32, batch_block=None):
    N, Cin, H, W = x_nchw.shape
    Cout = params["conv1_w"].shape[0]
    HW = H * W

    # Batch folding (perf review): fold Nb images into the matmul M dimension,
    # keeping >= 2 grid steps when possible so both TensorCores of a v7x chip
    # (megacore, "parallel" axis) get work.
    if batch_block is None:
        batch_block = 1
        for nb in (4, 2):
            if N % nb == 0 and N // nb >= 2:
                batch_block = nb
                break
    Nb = batch_block
    assert N % Nb == 0, (N, Nb)

    rows_out = Nb * (H + 2) * (W + 2)
    rows_pad = rows_out + 3 * (W + 2)          # head-room for the largest tap shift
    rows_pad = (rows_pad + 7) // 8 * 8

    # ---- glue / repack (plain JAX, outside the kernel) ----
    x = jnp.transpose(x_nchw, (0, 2, 3, 1)).reshape(N, HW, Cin).astype(jnp.float32)

    # time embedding precomputed for the whole batch; conv1 bias folded in.
    t32 = t.astype(jnp.float32)
    temb = (t32 * jax.nn.sigmoid(t32)) @ params["time_w"].T.astype(jnp.float32)
    temb = temb + params["time_b"] + params["conv1_b"]
    temb = temb.reshape(N // Nb, Nb, Cout).astype(jnp.float32)

    # conv weights repacked to [tap, Cin, Cout]; bf16 MXU operands.
    w1 = jnp.transpose(params["conv1_w"], (2, 3, 1, 0)).reshape(9, Cin, Cout)
    w2 = jnp.transpose(params["conv2_w"], (2, 3, 1, 0)).reshape(9, Cout, Cout)
    ws = jnp.transpose(params["skip_w"][:, :, 0, 0], (1, 0))     # [Cin, Cout]
    w1 = w1.astype(jnp.bfloat16)
    w2 = w2.astype(jnp.bfloat16)
    ws = ws.astype(jnp.bfloat16)

    # GroupNorm channel->group one-hot maps (hoisted out of the kernel body).
    m1, m1t = _one_hot_group_masks(Cin, n_groups)
    m2, m2t = _one_hot_group_masks(Cout, n_groups)

    row = lambda v: v.reshape(1, -1).astype(jnp.float32)
    bias_out = row(params["conv2_b"] + params["skip_b"])

    kernel = functools.partial(upblock_kernel, Nb=Nb, H=H, W=W,
                               Cin=Cin, Cout=Cout, G=n_groups)
    const = lambda rank: (lambda n: (0,) * rank)

    out = pl.pallas_call(
        kernel,
        out_shape=jax.ShapeDtypeStruct((N, HW, Cout), jnp.float32),
        grid=(N // Nb,),
        in_specs=[
            pl.BlockSpec((Nb, HW, Cin), lambda n: (n, 0, 0)),    # x
            pl.BlockSpec((1, Nb, Cout), lambda n: (n, 0, 0)),    # temb (+conv1 b)
            pl.BlockSpec((1, Cin), const(2)),                    # gn1 gamma
            pl.BlockSpec((1, Cin), const(2)),                    # gn1 beta
            pl.BlockSpec((Cin, n_groups), const(2)),             # gn1 group mask
            pl.BlockSpec((n_groups, Cin), const(2)),             # gn1 mask^T
            pl.BlockSpec((9, Cin, Cout), const(3)),              # conv1 w (bf16)
            pl.BlockSpec((1, Cout), const(2)),                   # gn2 gamma
            pl.BlockSpec((1, Cout), const(2)),                   # gn2 beta
            pl.BlockSpec((Cout, n_groups), const(2)),            # gn2 group mask
            pl.BlockSpec((n_groups, Cout), const(2)),            # gn2 mask^T
            pl.BlockSpec((9, Cout, Cout), const(3)),             # conv2 w (bf16)
            pl.BlockSpec((Cin, Cout), const(2)),                 # skip w (bf16)
            pl.BlockSpec((1, Cout), const(2)),                   # conv2 b + skip b
        ],
        out_specs=pl.BlockSpec((Nb, HW, Cout), lambda n: (n, 0, 0)),
        scratch_shapes=[
            pltpu.VMEM((rows_pad, Cin), jnp.bfloat16),           # padded slab 1
            pltpu.VMEM((rows_pad, Cout), jnp.bfloat16),          # padded slab 2
        ],
        compiler_params=pltpu.CompilerParams(
            dimension_semantics=("parallel",),
            vmem_limit_bytes=32 * 1024 * 1024,
        ),
        # TODO(synk): at realistic UNet sizes (H=W>=32, C>=256) add an H-tile
        # grid axis with a 1-row halo instead of holding whole padded slabs.
    )(
        x, temb,
        row(params["gn1_g"]), row(params["gn1_b"]), m1, m1t, w1,
        row(params["gn2_g"]), row(params["gn2_b"]), m2, m2t, w2,
        ws, bias_out,
    )

    # (N, HW, Cout) -> NCHW to match the PyTorch output convention.
    return jnp.transpose(out.reshape(N, H, W, Cout), (0, 3, 1, 2))


# ----------------------------- pure-JAX reference ----------------------------

def ref_forward(x_nchw, t, params, n_groups=32):
    def gn(x, gamma, beta, G, eps=1e-5):
        N, C, H, W = x.shape
        xg = x.reshape(N, G, (C // G) * H * W)
        mean = xg.mean(axis=2, keepdims=True)
        var = xg.var(axis=2, keepdims=True)
        xn = ((xg - mean) / jnp.sqrt(var + eps)).reshape(N, C, H, W)
        return xn * gamma[None, :, None, None] + beta[None, :, None, None]

    def swish(v):
        return v * jax.nn.sigmoid(v)

    def conv(x, w, b, pad):
        y = jax.lax.conv_general_dilated(
            x, w, (1, 1), [(pad, pad), (pad, pad)],
            dimension_numbers=("NCHW", "OIHW", "NCHW"))
        return y + b[None, :, None, None]

    h = conv(swish(gn(x_nchw, params["gn1_g"], params["gn1_b"], n_groups)),
             params["conv1_w"], params["conv1_b"], 1)
    temb = swish(t) @ params["time_w"].T + params["time_b"]
    h = h + temb[:, :, None, None]
    h = conv(swish(gn(h, params["gn2_g"], params["gn2_b"], n_groups)),
             params["conv2_w"], params["conv2_b"], 1)
    skip = conv(x_nchw, params["skip_w"], params["skip_b"], 0)
    return h + skip


# ------------------------------------ main ------------------------------------

if __name__ == "__main__":
    # UpBlock(in_channels=32, out_channels=32, time_channels=32)
    # => ResidualBlock(in=64, out=32, time=32), so x has 64 channels.
    N, H, W = 4, 8, 8
    in_ch, out_ch, time_ch = 32, 32, 32
    Cin = in_ch + out_ch          # 64
    Cout = out_ch                 # 32
    Tc = time_ch                  # 32

    key = jax.random.PRNGKey(0)
    ks = jax.random.split(key, 12)
    params = {
        "gn1_g": jnp.ones((Cin,), jnp.float32),
        "gn1_b": jnp.zeros((Cin,), jnp.float32),
        "conv1_w": 0.05 * jax.random.normal(ks[0], (Cout, Cin, 3, 3), jnp.float32),
        "conv1_b": 0.05 * jax.random.normal(ks[1], (Cout,), jnp.float32),
        "time_w": 0.05 * jax.random.normal(ks[2], (Cout, Tc), jnp.float32),
        "time_b": 0.05 * jax.random.normal(ks[3], (Cout,), jnp.float32),
        "gn2_g": 1.0 + 0.05 * jax.random.normal(ks[4], (Cout,), jnp.float32),
        "gn2_b": 0.05 * jax.random.normal(ks[5], (Cout,), jnp.float32),
        "conv2_w": 0.05 * jax.random.normal(ks[6], (Cout, Cout, 3, 3), jnp.float32),
        "conv2_b": 0.05 * jax.random.normal(ks[7], (Cout,), jnp.float32),
        "skip_w": 0.05 * jax.random.normal(ks[8], (Cout, Cin, 1, 1), jnp.float32),
        "skip_b": 0.05 * jax.random.normal(ks[9], (Cout,), jnp.float32),
    }

    x = jax.random.normal(ks[10], (N, Cin, H, W), jnp.float32)   # PyTorch NCHW
    t = jax.random.normal(ks[11], (N, Tc), jnp.float32)

    out = upblock_forward(x, t, params)
    out = jax.block_until_ready(out)

    ref = ref_forward(x, t, params)
    assert out.shape == (N, Cout, H, W), out.shape
    # bf16 matmul operands with f32 accumulation -> slightly looser tolerance
    # than a pure-f32 kernel.
    max_err = float(jnp.max(jnp.abs(out - ref)))
    assert max_err < 3e-2, f"mismatch vs reference: {max_err}"

    print("KERNEL_OK")
</pallas_src>

<mosaic_0001>
module attributes {stable_mosaic.version = 11 : i64} {
  func.func @upblock_kernel(%arg0: i32, %arg1: memref<2x64x64xf32, #tpu.memory_space<vmem>>, %arg2: memref<1x2x32xf32, #tpu.memory_space<vmem>>, %arg3: memref<1x64xf32, #tpu.memory_space<vmem>>, %arg4: memref<1x64xf32, #tpu.memory_space<vmem>>, %arg5: memref<64x32xf32, #tpu.memory_space<vmem>>, %arg6: memref<32x64xf32, #tpu.memory_space<vmem>>, %arg7: memref<9x64x32xbf16, #tpu.memory_space<vmem>>, %arg8: memref<1x32xf32, #tpu.memory_space<vmem>>, %arg9: memref<1x32xf32, #tpu.memory_space<vmem>>, %arg10: memref<32x32xf32, #tpu.memory_space<vmem>>, %arg11: memref<32x32xf32, #tpu.memory_space<vmem>>, %arg12: memref<9x32x32xbf16, #tpu.memory_space<vmem>>, %arg13: memref<64x32xbf16, #tpu.memory_space<vmem>>, %arg14: memref<1x32xf32, #tpu.memory_space<vmem>>, %arg15: memref<2x64x32xf32, #tpu.memory_space<vmem>>, %arg16: memref<232x64xbf16, #tpu.memory_space<vmem>>, %arg17: memref<232x32xbf16, #tpu.memory_space<vmem>>) attributes {dimension_semantics = [#tpu.dimension_semantics<parallel>], iteration_bounds = array<i64: 2>, scalar_prefetch = 0 : i64, scratch_operands = 2 : i64, tpu.core_type = #tpu.core_type<tc>, window_params = [{transform_indices = @transform_0, window_bounds = array<i64: 2, 64, 64>}, {transform_indices = @transform_1, window_bounds = array<i64: 1, 2, 32>}, {pipeline_mode = #tpu.pipeline_mode<synchronous>, transform_indices = @transform_2, window_bounds = array<i64: 1, 64>}, {pipeline_mode = #tpu.pipeline_mode<synchronous>, transform_indices = @transform_3, window_bounds = array<i64: 1, 64>}, {pipeline_mode = #tpu.pipeline_mode<synchronous>, transform_indices = @transform_4, window_bounds = array<i64: 64, 32>}, {pipeline_mode = #tpu.pipeline_mode<synchronous>, transform_indices = @transform_5, window_bounds = array<i64: 32, 64>}, {pipeline_mode = #tpu.pipeline_mode<synchronous>, transform_indices = @transform_6, window_bounds = array<i64: 9, 64, 32>}, {pipeline_mode = #tpu.pipeline_mode<synchronous>, transform_indices = @transform_7, window_bounds = array<i64: 1, 32>}, {pipeline_mode = #tpu.pipeline_mode<synchronous>, transform_indices = @transform_8, window_bounds = array<i64: 1, 32>}, {pipeline_mode = #tpu.pipeline_mode<synchronous>, transform_indices = @transform_9, window_bounds = array<i64: 32, 32>}, {pipeline_mode = #tpu.pipeline_mode<synchronous>, transform_indices = @transform_10, window_bounds = array<i64: 32, 32>}, {pipeline_mode = #tpu.pipeline_mode<synchronous>, transform_indices = @transform_11, window_bounds = array<i64: 9, 32, 32>}, {pipeline_mode = #tpu.pipeline_mode<synchronous>, transform_indices = @transform_12, window_bounds = array<i64: 64, 32>}, {pipeline_mode = #tpu.pipeline_mode<synchronous>, transform_indices = @transform_13, window_bounds = array<i64: 1, 32>}, {transform_indices = @transform_14, window_bounds = array<i64: 2, 64, 32>}]} {
    %cst = arith.constant 0.000000e+00 : bf16
    %0 = vector.broadcast %cst : bf16 to vector<232x64xbf16>
    %c0 = arith.constant 0 : index
    %c0_0 = arith.constant 0 : index
    %1 = vector.load %arg16[%c0, %c0_0] : memref<232x64xbf16, #tpu.memory_space<vmem>>, vector<232x64xbf16>
    tpu.vector_store %arg16[%c0, %c0_0], %0 {strides = array<i32>} : memref<232x64xbf16, #tpu.memory_space<vmem>>, vector<232x64xbf16>,
    %cst_1 = arith.constant 0.000000e+00 : bf16
    %2 = vector.broadcast %cst_1 : bf16 to vector<232x32xbf16>
    %c0_2 = arith.constant 0 : index
    %c0_3 = arith.constant 0 : index
    %3 = vector.load %arg17[%c0_2, %c0_3] : memref<232x32xbf16, #tpu.memory_space<vmem>>, vector<232x32xbf16>
    tpu.vector_store %arg17[%c0_2, %c0_3], %2 {strides = array<i32>} : memref<232x32xbf16, #tpu.memory_space<vmem>>, vector<232x32xbf16>,
    %c0_4 = arith.constant 0 : index
    %c0_5 = arith.constant 0 : index
    %c0_6 = arith.constant 0 : index
    %4 = vector.load %arg1[%c0_4, %c0_5, %c0_6] : memref<2x64x64xf32, #tpu.memory_space<vmem>>, vector<2x64x64xf32>
    %c0_7 = arith.constant 0 : index
    %c0_8 = arith.constant 0 : index
    %5 = vector.load %arg3[%c0_7, %c0_8] : memref<1x64xf32, #tpu.memory_space<vmem>>, vector<1x64xf32>
    %c0_9 = arith.constant 0 : index
    %c0_10 = arith.constant 0 : index
    %6 = vector.load %arg4[%c0_9, %c0_10] : memref<1x64xf32, #tpu.memory_space<vmem>>, vector<1x64xf32>
    %cst_11 = arith.constant dense<0.000000e+00> : vector<2x64xf32>
    %7 = vector.multi_reduction <add>, %4, %cst_11 [1] : vector<2x64x64xf32> to vector<2x64xf32>
    %8 = arith.mulf %4, %4 : vector<2x64x64xf32>
    %cst_12 = arith.constant dense<0.000000e+00> : vector<2x64xf32>
    %9 = vector.multi_reduction <add>, %8, %cst_12 [1] : vector<2x64x64xf32> to vector<2x64xf32>
    %c0_13 = arith.constant 0 : index
    %c0_14 = arith.constant 0 : index
    %10 = vector.load %arg5[%c0_13, %c0_14] : memref<64x32xf32, #tpu.memory_space<vmem>>, vector<64x32xf32>
    %cst_15 = arith.constant dense<0.000000e+00> : vector<2x32xf32>
    %11 = tpu.matmul %7, %10, %cst_15 {dimension_numbers = #tpu.dot_dimension_numbers<[1], [0], [0], [1], [0, 0, 1, 1], [], []>} : vector<2x64xf32>, vector<64x32xf32>, vector<2x32xf32> -> vector<2x32xf32>
    %cst_16 = arith.constant 1.280000e+02 : f32
    %12 = vector.broadcast %cst_16 : f32 to vector<2x32xf32>
    %13 = arith.divf %11, %12 : vector<2x32xf32>
    %cst_17 = arith.constant dense<0.000000e+00> : vector<2x32xf32>
    %14 = tpu.matmul %9, %10, %cst_17 {dimension_numbers = #tpu.dot_dimension_numbers<[1], [0], [0], [1], [0, 0, 1, 1], [], []>} : vector<2x64xf32>, vector<64x32xf32>, vector<2x32xf32> -> vector<2x32xf32>
    %cst_18 = arith.constant 1.280000e+02 : f32
    %15 = vector.broadcast %cst_18 : f32 to vector<2x32xf32>
    %16 = arith.divf %14, %15 : vector<2x32xf32>
    %17 = arith.mulf %13, %13 : vector<2x32xf32>
    %18 = arith.subf %16, %17 : vector<2x32xf32>
    %cst_19 = arith.constant 0.000000e+00 : f32
    %19 = vector.broadcast %cst_19 : f32 to vector<2x32xf32>
    %20 = arith.maximumf %18, %19 : vector<2x32xf32>
    %cst_20 = arith.constant 9.99999974E-6 : f32
    %21 = vector.broadcast %cst_20 : f32 to vector<2x32xf32>
    %22 = arith.addf %20, %21 : vector<2x32xf32>
    %23 = math.rsqrt %22 : vector<2x32xf32>
    %c0_21 = arith.constant 0 : index
    %c0_22 = arith.constant 0 : index
    %24 = vector.load %arg6[%c0_21, %c0_22] : memref<32x64xf32, #tpu.memory_space<vmem>>, vector<32x64xf32>
    %cst_23 = arith.constant dense<0.000000e+00> : vector<2x64xf32>
    %25 = tpu.matmul %13, %24, %cst_23 {dimension_numbers = #tpu.dot_dimension_numbers<[1], [0], [0], [1], [0, 0, 1, 1], [], []>} : vector<2x32xf32>, vector<32x64xf32>, vector<2x64xf32> -> vector<2x64xf32>
    %cst_24 = arith.constant dense<0.000000e+00> : vector<2x64xf32>
    %26 = tpu.matmul %23, %24, %cst_24 {dimension_numbers = #tpu.dot_dimension_numbers<[1], [0], [0], [1], [0, 0, 1, 1], [], []>} : vector<2x32xf32>, vector<32x64xf32>, vector<2x64xf32> -> vector<2x64xf32>
    %27 = vector.shape_cast %25 : vector<2x64xf32> to vector<2x1x64xf32>
    %28 = vector.broadcast %27 : vector<2x1x64xf32> to vector<2x64x64xf32>
    %29 = arith.subf %4, %28 : vector<2x64x64xf32>
    %30 = vector.shape_cast %26 : vector<2x64xf32> to vector<2x1x64xf32>
    %31 = vector.broadcast %30 : vector<2x1x64xf32> to vector<2x64x64xf32>
    %32 = arith.mulf %29, %31 : vector<2x64x64xf32>
    %33 = vector.shape_cast %5 : vector<1x64xf32> to vector<1x1x64xf32>
    %34 = vector.broadcast %33 : vector<1x1x64xf32> to vector<2x64x64xf32>
    %35 = arith.mulf %32, %34 : vector<2x64x64xf32>
    %36 = vector.shape_cast %6 : vector<1x64xf32> to vector<1x1x64xf32>
    %37 = vector.broadcast %36 : vector<1x1x64xf32> to vector<2x64x64xf32>
    %38 = arith.addf %35, %37 : vector<2x64x64xf32>
    %39 = arith.negf %38 : vector<2x64x64xf32>
    %40 = math.exp %39 : vector<2x64x64xf32>
    %cst_25 = arith.constant 1.000000e+00 : f32
    %41 = vector.broadcast %cst_25 : f32 to vector<2x64x64xf32>
    %42 = arith.addf %41, %40 : vector<2x64x64xf32>
    %43 = arith.divf %41, %42 : vector<2x64x64xf32>
    %44 = arith.mulf %38, %43 : vector<2x64x64xf32>
    %45 = arith.truncf %44 : vector<2x64x64xf32> to vector<2x64x64xbf16>
    %46 = vector.shape_cast %45 : vector<2x64x64xbf16> to vector<128x64xbf16>
    %47 = vector.extract_strided_slice %46 {offsets = [0, 0], sizes = [8, 64], strides = [1, 1]} : vector<128x64xbf16> to vector<8x64xbf16>
    %c11 = arith.constant 11 : index
    %c0_26 = arith.constant 0 : index
    %48 = vector.load %arg16[%c11, %c0_26] : memref<232x64xbf16, #tpu.memory_space<vmem>>, vector<8x64xbf16>
    tpu.vector_store %arg16[%c11, %c0_26], %47 {strides = array<i32>} : memref<232x64xbf16, #tpu.memory_space<vmem>>, vector<8x64xbf16>,
    %49 = vector.extract_strided_slice %46 {offsets = [8, 0], sizes = [8, 64], strides = [1, 1]} : vector<128x64xbf16> to vector<8x64xbf16>
    %c21 = arith.constant 21 : index
    %c0_27 = arith.constant 0 : index
    %50 = vector.load %arg16[%c21, %c0_27] : memref<232x64xbf16, #tpu.memory_space<vmem>>, vector<8x64xbf16>
    tpu.vector_store %arg16[%c21, %c0_27], %49 {strides = array<i32>} : memref<232x64xbf16, #tpu.memory_space<vmem>>, vector<8x64xbf16>,
    %51 = vector.extract_strided_slice %46 {offsets = [16, 0], sizes = [8, 64], strides = [1, 1]} : vector<128x64xbf16> to vector<8x64xbf16>
    %c31 = arith.constant 31 : index
    %c0_28 = arith.constant 0 : index
    %52 = vector.load %arg16[%c31, %c0_28] : memref<232x64xbf16, #tpu.memory_space<vmem>>, vector<8x64xbf16>
    tpu.vector_store %arg16[%c31, %c0_28], %51 {strides = array<i32>} : memref<232x64xbf16, #tpu.memory_space<vmem>>, vector<8x64xbf16>,
    %53 = vector.extract_strided_slice %46 {offsets = [24, 0], sizes = [8, 64], strides = [1, 1]} : vector<128x64xbf16> to vector<8x64xbf16>
    %c41 = arith.constant 41 : index
    %c0_29 = arith.constant 0 : index
    %54 = vector.load %arg16[%c41, %c0_29] : memref<232x64xbf16, #tpu.memory_space<vmem>>, vector<8x64xbf16>
    tpu.vector_store %arg16[%c41, %c0_29], %53 {strides = array<i32>} : memref<232x64xbf16, #tpu.memory_space<vmem>>, vector<8x64xbf16>,
    %55 = vector.extract_strided_slice %46 {offsets = [32, 0], sizes = [8, 64], strides = [1, 1]} : vector<128x64xbf16> to vector<8x64xbf16>
    %c51 = arith.constant 51 : index
    %c0_30 = arith.constant 0 : index
    %56 = vector.load %arg16[%c51, %c0_30] : memref<232x64xbf16, #tpu.memory_space<vmem>>, vector<8x64xbf16>
    tpu.vector_store %arg16[%c51, %c0_30], %55 {strides = array<i32>} : memref<232x64xbf16, #tpu.memory_space<vmem>>, vector<8x64xbf16>,
    %57 = vector.extract_strided_slice %46 {offsets = [40, 0], sizes = [8, 64], strides = [1, 1]} : vector<128x64xbf16> to vector<8x64xbf16>
    %c61 = arith.constant 61 : index
    %c0_31 = arith.constant 0 : index
    %58 = vector.load %arg16[%c61, %c0_31] : memref<232x64xbf16, #tpu.memory_space<vmem>>, vector<8x64xbf16>
    tpu.vector_store %arg16[%c61, %c0_31], %57 {strides = array<i32>} : memref<232x64xbf16, #tpu.memory_space<vmem>>, vector<8x64xbf16>,
    %59 = vector.extract_strided_slice %46 {offsets = [48, 0], sizes = [8, 64], strides = [1, 1]} : vector<128x64xbf16> to vector<8x64xbf16>
    %c71 = arith.constant 71 : index
    %c0_32 = arith.constant 0 : index
    %60 = vector.load %arg16[%c71, %c0_32] : memref<232x64xbf16, #tpu.memory_space<vmem>>, vector<8x64xbf16>
    tpu.vector_store %arg16[%c71, %c0_32], %59 {strides = array<i32>} : memref<232x64xbf16, #tpu.memory_space<vmem>>, vector<8x64xbf16>,
    %61 = vector.extract_strided_slice %46 {offsets = [56, 0], sizes = [8, 64], strides = [1, 1]} : vector<128x64xbf16> to vector<8x64xbf16>
    %c81 = arith.constant 81 : index
    %c0_33 = arith.constant 0 : index
    %62 = vector.load %arg16[%c81, %c0_33] : memref<232x64xbf16, #tpu.memory_space<vmem>>, vector<8x64xbf16>
    tpu.vector_store %arg16[%c81, %c0_33], %61 {strides = array<i32>} : memref<232x64xbf16, #tpu.memory_space<vmem>>, vector<8x64xbf16>,
    %63 = vector.extract_strided_slice %46 {offsets = [64, 0], sizes = [8, 64], strides = [1, 1]} : vector<128x64xbf16> to vector<8x64xbf16>
    %c111 = arith.constant 111 : index
    %c0_34 = arith.constant 0 : index
    %64 = vector.load %arg16[%c111, %c0_34] : memref<232x64xbf16, #tpu.memory_space<vmem>>, vector<8x64xbf16>
    tpu.vector_store %arg16[%c111, %c0_34], %63 {strides = array<i32>} : memref<232x64xbf16, #tpu.memory_space<vmem>>, vector<8x64xbf16>,
    %65 = vector.extract_strided_slice %46 {offsets = [72, 0], sizes = [8, 64], strides = [1, 1]} : vector<128x64xbf16> to vector<8x64xbf16>
    %c121 = arith.constant 121 : index
    %c0_35 = arith.constant 0 : index
    %66 = vector.load %arg16[%c121, %c0_35] : memref<232x64xbf16, #tpu.memory_space<vmem>>, vector<8x64xbf16>
    tpu.vector_store %arg16[%c121, %c0_35], %65 {strides = array<i32>} : memref<232x64xbf16, #tpu.memory_space<vmem>>, vector<8x64xbf16>,
    %67 = vector.extract_strided_slice %46 {offsets = [80, 0], sizes = [8, 64], strides = [1, 1]} : vector<128x64xbf16> to vector<8x64xbf16>
    %c131 = arith.constant 131 : index
    %c0_36 = arith.constant 0 : index
    %68 = vector.load %arg16[%c131, %c0_36] : memref<232x64xbf16, #tpu.memory_space<vmem>>, vector<8x64xbf16>
    tpu.vector_store %arg16[%c131, %c0_36], %67 {strides = array<i32>} : memref<232x64xbf16, #tpu.memory_space<vmem>>, vector<8x64xbf16>,
    %69 = vector.extract_strided_slice %46 {offsets = [88, 0], sizes = [8, 64], strides = [1, 1]} : vector<128x64xbf16> to vector<8x64xbf16>
    %c141 = arith.constant 141 : index
    %c0_37 = arith.constant 0 : index
    %70 = vector.load %arg16[%c141, %c0_37] : memref<232x64xbf16, #tpu.memory_space<vmem>>, vector<8x64xbf16>
    tpu.vector_store %arg16[%c141, %c0_37], %69 {strides = array<i32>} : memref<232x64xbf16, #tpu.memory_space<vmem>>, vector<8x64xbf16>,
    %71 = vector.extract_strided_slice %46 {offsets = [96, 0], sizes = [8, 64], strides = [1, 1]} : vector<128x64xbf16> to vector<8x64xbf16>
    %c151 = arith.constant 151 : index
    %c0_38 = arith.constant 0 : index
    %72 = vector.load %arg16[%c151, %c0_38] : memref<232x64xbf16, #tpu.memory_space<vmem>>, vector<8x64xbf16>
    tpu.vector_store %arg16[%c151, %c0_38], %71 {strides = array<i32>} : memref<232x64xbf16, #tpu.memory_space<vmem>>, vector<8x64xbf16>,
    %73 = vector.extract_strided_slice %46 {offsets = [104, 0], sizes = [8, 64], strides = [1, 1]} : vector<128x64xbf16> to vector<8x64xbf16>
    %c161 = arith.constant 161 : index
    %c0_39 = arith.constant 0 : index
    %74 = vector.load %arg16[%c161, %c0_39] : memref<232x64xbf16, #tpu.memory_space<vmem>>, vector<8x64xbf16>
    tpu.vector_store %arg16[%c161, %c0_39], %73 {strides = array<i32>} : memref<232x64xbf16, #tpu.memory_space<vmem>>, vector<8x64xbf16>,
    %75 = vector.extract_strided_slice %46 {offsets = [112, 0], sizes = [8, 64], strides = [1, 1]} : vector<128x64xbf16> to vector<8x64xbf16>
    %c171 = arith.constant 171 : index
    %c0_40 = arith.constant 0 : index
    %76 = vector.load %arg16[%c171, %c0_40] : memref<232x64xbf16, #tpu.memory_space<vmem>>, vector<8x64xbf16>
    tpu.vector_store %arg16[%c171, %c0_40], %75 {strides = array<i32>} : memref<232x64xbf16, #tpu.memory_space<vmem>>, vector<8x64xbf16>,
    %77 = vector.extract_strided_slice %46 {offsets = [120, 0], sizes = [8, 64], strides = [1, 1]} : vector<128x64xbf16> to vector<8x64xbf16>
    %c181 = arith.constant 181 : index
    %c0_41 = arith.constant 0 : index
    %78 = vector.load %arg16[%c181, %c0_41] : memref<232x64xbf16, #tpu.memory_space<vmem>>, vector<8x64xbf16>
    tpu.vector_store %arg16[%c181, %c0_41], %77 {strides = array<i32>} : memref<232x64xbf16, #tpu.memory_space<vmem>>, vector<8x64xbf16>,
    %cst_42 = arith.constant 0.000000e+00 : f32
    %79 = vector.broadcast %cst_42 : f32 to vector<200x32xf32>
    %c0_43 = arith.constant 0 : index
    %c0_44 = arith.constant 0 : index
    %80 = vector.load %arg16[%c0_43, %c0_44] : memref<232x64xbf16, #tpu.memory_space<vmem>>, vector<200x64xbf16>
    %c0_45 = arith.constant 0 : index
    %c0_46 = arith.constant 0 : index
    %c0_47 = arith.constant 0 : index
    %81 = vector.load %arg7[%c0_45, %c0_46, %c0_47] : memref<9x64x32xbf16, #tpu.memory_space<vmem>>, vector<1x64x32xbf16>
    %82 = vector.shape_cast %81 : vector<1x64x32xbf16> to vector<64x32xbf16>
    %cst_48 = arith.constant dense<0.000000e+00> : vector<200x32xf32>
    %83 = tpu.matmul %80, %82, %cst_48 {dimension_numbers = #tpu.dot_dimension_numbers<[1], [0], [0], [1], [0, 0, 1, 1], [], []>} : vector<200x64xbf16>, vector<64x32xbf16>, vector<200x32xf32> -> vector<200x32xf32>
    %84 = arith.addf %79, %83 : vector<200x32xf32>
    %c1 = arith.constant 1 : index
    %c0_49 = arith.constant 0 : index
    %85 = vector.load %arg16[%c1, %c0_49] : memref<232x64xbf16, #tpu.memory_space<vmem>>, vector<200x64xbf16>
    %c1_50 = arith.constant 1 : index
    %c0_51 = arith.constant 0 : index
    %c0_52 = arith.constant 0 : index
    %86 = vector.load %arg7[%c1_50, %c0_51, %c0_52] : memref<9x64x32xbf16, #tpu.memory_space<vmem>>, vector<1x64x32xbf16>
    %87 = vector.shape_cast %86 : vector<1x64x32xbf16> to vector<64x32xbf16>
    %cst_53 = arith.constant dense<0.000000e+00> : vector<200x32xf32>
    %88 = tpu.matmul %85, %87, %cst_53 {dimension_numbers = #tpu.dot_dimension_numbers<[1], [0], [0], [1], [0, 0, 1, 1], [], []>} : vector<200x64xbf16>, vector<64x32xbf16>, vector<200x32xf32> -> vector<200x32xf32>
    %89 = arith.addf %84, %88 : vector<200x32xf32>
    %c2 = arith.constant 2 : index
    %c0_54 = arith.constant 0 : index
    %90 = vector.load %arg16[%c2, %c0_54] : memref<232x64xbf16, #tpu.memory_space<vmem>>, vector<200x64xbf16>
    %c2_55 = arith.constant 2 : index
    %c0_56 = arith.constant 0 : index
    %c0_57 = arith.constant 0 : index
    %91 = vector.load %arg7[%c2_55, %c0_56, %c0_57] : memref<9x64x32xbf16, #tpu.memory_space<vmem>>, vector<1x64x32xbf16>
    %92 = vector.shape_cast %91 : vector<1x64x32xbf16> to vector<64x32xbf16>
    %cst_58 = arith.constant dense<0.000000e+00> : vector<200x32xf32>
    %93 = tpu.matmul %90, %92, %cst_58 {dimension_numbers = #tpu.dot_dimension_numbers<[1], [0], [0], [1], [0, 0, 1, 1], [], []>} : vector<200x64xbf16>, vector<64x32xbf16>, vector<200x32xf32> -> vector<200x32xf32>
    %94 = arith.addf %89, %93 : vector<200x32xf32>
    %c10 = arith.constant 10 : index
    %c0_59 = arith.constant 0 : index
    %95 = vector.load %arg16[%c10, %c0_59] : memref<232x64xbf16, #tpu.memory_space<vmem>>, vector<200x64xbf16>
    %c3 = arith.constant 3 : index
    %c0_60 = arith.constant 0 : index
    %c0_61 = arith.constant 0 : index
    %96 = vector.load %arg7[%c3, %c0_60, %c0_61] : memref<9x64x32xbf16, #tpu.memory_space<vmem>>, vector<1x64x32xbf16>
    %97 = vector.shape_cast %96 : vector<1x64x32xbf16> to vector<64x32xbf16>
    %cst_62 = arith.constant dense<0.000000e+00> : vector<200x32xf32>
    %98 = tpu.matmul %95, %97, %cst_62 {dimension_numbers = #tpu.dot_dimension_numbers<[1], [0], [0], [1], [0, 0, 1, 1], [], []>} : vector<200x64xbf16>, vector<64x32xbf16>, vector<200x32xf32> -> vector<200x32xf32>
    %99 = arith.addf %94, %98 : vector<200x32xf32>
    %c11_63 = arith.constant 11 : index
    %c0_64 = arith.constant 0 : index
    %100 = vector.load %arg16[%c11_63, %c0_64] : memref<232x64xbf16, #tpu.memory_space<vmem>>, vector<200x64xbf16>
    %c4 = arith.constant 4 : index
    %c0_65 = arith.constant 0 : index
    %c0_66 = arith.constant 0 : index
    %101 = vector.load %arg7[%c4, %c0_65, %c0_66] : memref<9x64x32xbf16, #tpu.memory_space<vmem>>, vector<1x64x32xbf16>
    %102 = vector.shape_cast %101 : vector<1x64x32xbf16> to vector<64x32xbf16>
    %cst_67 = arith.constant dense<0.000000e+00> : vector<200x32xf32>
    %103 = tpu.matmul %100, %102, %cst_67 {dimension_numbers = #tpu.dot_dimension_numbers<[1], [0], [0], [1], [0, 0, 1, 1], [], []>} : vector<200x64xbf16>, vector<64x32xbf16>, vector<200x32xf32> -> vector<200x32xf32>
    %104 = arith.addf %99, %103 : vector<200x32xf32>
    %c12 = arith.constant 12 : index
    %c0_68 = arith.constant 0 : index
    %105 = vector.load %arg16[%c12, %c0_68] : memref<232x64xbf16, #tpu.memory_space<vmem>>, vector<200x64xbf16>
    %c5 = arith.constant 5 : index
    %c0_69 = arith.constant 0 : index
    %c0_70 = arith.constant 0 : index
    %106 = vector.load %arg7[%c5, %c0_69, %c0_70] : memref<9x64x32xbf16, #tpu.memory_space<vmem>>, vector<1x64x32xbf16>
    %107 = vector.shape_cast %106 : vector<1x64x32xbf16> to vector<64x32xbf16>
    %cst_71 = arith.constant dense<0.000000e+00> : vector<200x32xf32>
    %108 = tpu.matmul %105, %107, %cst_71 {dimension_numbers = #tpu.dot_dimension_numbers<[1], [0], [0], [1], [0, 0, 1, 1], [], []>} : vector<200x64xbf16>, vector<64x32xbf16>, vector<200x32xf32> -> vector<200x32xf32>
    %109 = arith.addf %104, %108 : vector<200x32xf32>
    %c20 = arith.constant 20 : index
    %c0_72 = arith.constant 0 : index
    %110 = vector.load %arg16[%c20, %c0_72] : memref<232x64xbf16, #tpu.memory_space<vmem>>, vector<200x64xbf16>
    %c6 = arith.constant 6 : index
    %c0_73 = arith.constant 0 : index
    %c0_74 = arith.constant 0 : index
    %111 = vector.load %arg7[%c6, %c0_73, %c0_74] : memref<9x64x32xbf16, #tpu.memory_space<vmem>>, vector<1x64x32xbf16>
    %112 = vector.shape_cast %111 : vector<1x64x32xbf16> to vector<64x32xbf16>
    %cst_75 = arith.constant dense<0.000000e+00> : vector<200x32xf32>
    %113 = tpu.matmul %110, %112, %cst_75 {dimension_numbers = #tpu.dot_dimension_numbers<[1], [0], [0], [1], [0, 0, 1, 1], [], []>} : vector<200x64xbf16>, vector<64x32xbf16>, vector<200x32xf32> -> vector<200x32xf32>
    %114 = arith.addf %109, %113 : vector<200x32xf32>
    %c21_76 = arith.constant 21 : index
    %c0_77 = arith.constant 0 : index
    %115 = vector.load %arg16[%c21_76, %c0_77] : memref<232x64xbf16, #tpu.memory_space<vmem>>, vector<200x64xbf16>
    %c7 = arith.constant 7 : index
    %c0_78 = arith.constant 0 : index
    %c0_79 = arith.constant 0 : index
    %116 = vector.load %arg7[%c7, %c0_78, %c0_79] : memref<9x64x32xbf16, #tpu.memory_space<vmem>>, vector<1x64x32xbf16>
    %117 = vector.shape_cast %116 : vector<1x64x32xbf16> to vector<64x32xbf16>
    %cst_80 = arith.constant dense<0.000000e+00> : vector<200x32xf32>
    %118 = tpu.matmul %115, %117, %cst_80 {dimension_numbers = #tpu.dot_dimension_numbers<[1], [0], [0], [1], [0, 0, 1, 1], [], []>} : vector<200x64xbf16>, vector<64x32xbf16>, vector<200x32xf32> -> vector<200x32xf32>
    %119 = arith.addf %114, %118 : vector<200x32xf32>
    %c22 = arith.constant 22 : index
    %c0_81 = arith.constant 0 : index
    %120 = vector.load %arg16[%c22, %c0_81] : memref<232x64xbf16, #tpu.memory_space<vmem>>, vector<200x64xbf16>
    %c8 = arith.constant 8 : index
    %c0_82 = arith.constant 0 : index
    %c0_83 = arith.constant 0 : index
    %121 = vector.load %arg7[%c8, %c0_82, %c0_83] : memref<9x64x32xbf16, #tpu.memory_space<vmem>>, vector<1x64x32xbf16>
    %122 = vector.shape_cast %121 : vector<1x64x32xbf16> to vector<64x32xbf16>
    %cst_84 = arith.constant dense<0.000000e+00> : vector<200x32xf32>
    %123 = tpu.matmul %120, %122, %cst_84 {dimension_numbers = #tpu.dot_dimension_numbers<[1], [0], [0], [1], [0, 0, 1, 1], [], []>} : vector<200x64xbf16>, vector<64x32xbf16>, vector<200x32xf32> -> vector<200x32xf32>
    %124 = arith.addf %119, %123 : vector<200x32xf32>
    %125 = vector.extract_strided_slice %124 {offsets = [0, 0], sizes = [8, 32], strides = [1, 1]} : vector<200x32xf32> to vector<8x32xf32>
    %126 = vector.extract_strided_slice %124 {offsets = [10, 0], sizes = [8, 32], strides = [1, 1]} : vector<200x32xf32> to vector<8x32xf32>
    %127 = vector.extract_strided_slice %124 {offsets = [20, 0], sizes = [8, 32], strides = [1, 1]} : vector<200x32xf32> to vector<8x32xf32>
    %128 = vector.extract_strided_slice %124 {offsets = [30, 0], sizes = [8, 32], strides = [1, 1]} : vector<200x32xf32> to vector<8x32xf32>
    %129 = vector.extract_strided_slice %124 {offsets = [40, 0], sizes = [8, 32], strides = [1, 1]} : vector<200x32xf32> to vector<8x32xf32>
    %130 = vector.extract_strided_slice %124 {offsets = [50, 0], sizes = [8, 32], strides = [1, 1]} : vector<200x32xf32> to vector<8x32xf32>
    %131 = vector.extract_strided_slice %124 {offsets = [60, 0], sizes = [8, 32], strides = [1, 1]} : vector<200x32xf32> to vector<8x32xf32>
    %132 = vector.extract_strided_slice %124 {offsets = [70, 0], sizes = [8, 32], strides = [1, 1]} : vector<200x32xf32> to vector<8x32xf32>
    %133 = vector.extract_strided_slice %124 {offsets = [100, 0], sizes = [8, 32], strides = [1, 1]} : vector<200x32xf32> to vector<8x32xf32>
    %134 = vector.extract_strided_slice %124 {offsets = [110, 0], sizes = [8, 32], strides = [1, 1]} : vector<200x32xf32> to vector<8x32xf32>
    %135 = vector.extract_strided_slice %124 {offsets = [120, 0], sizes = [8, 32], strides = [1, 1]} : vector<200x32xf32> to vector<8x32xf32>
    %136 = vector.extract_strided_slice %124 {offsets = [130, 0], sizes = [8, 32], strides = [1, 1]} : vector<200x32xf32> to vector<8x32xf32>
    %137 = vector.extract_strided_slice %124 {offsets = [140, 0], sizes = [8, 32], strides = [1, 1]} : vector<200x32xf32> to vector<8x32xf32>
    %138 = vector.extract_strided_slice %124 {offsets = [150, 0], sizes = [8, 32], strides = [1, 1]} : vector<200x32xf32> to vector<8x32xf32>
    %139 = vector.extract_strided_slice %124 {offsets = [160, 0], sizes = [8, 32], strides = [1, 1]} : vector<200x32xf32> to vector<8x32xf32>
    %140 = vector.extract_strided_slice %124 {offsets = [170, 0], sizes = [8, 32], strides = [1, 1]} : vector<200x32xf32> to vector<8x32xf32>
    %141 = tpu.concatenate %125, %126, %127, %128, %129, %130, %131, %132, %133, %134, %135, %136, %137, %138, %139, %140 in 0 : vector<8x32xf32>, vector<8x32xf32>, vector<8x32xf32>, vector<8x32xf32>, vector<8x32xf32>, vector<8x32xf32>, vector<8x32xf32>, vector<8x32xf32>, vector<8x32xf32>, vector<8x32xf32>, vector<8x32xf32>, vector<8x32xf32>, vector<8x32xf32>, vector<8x32xf32>, vector<8x32xf32>, vector<8x32xf32> -> vector<128x32xf32>
    %142 = vector.shape_cast %141 : vector<128x32xf32> to vector<2x64x32xf32>
    %c0_85 = arith.constant 0 : index
    %c0_86 = arith.constant 0 : index
    %c0_87 = arith.constant 0 : index
    %143 = vector.load %arg2[%c0_85, %c0_86, %c0_87] : memref<1x2x32xf32, #tpu.memory_space<vmem>>, vector<1x2x32xf32>
    %144 = vector.shape_cast %143 : vector<1x2x32xf32> to vector<2x32xf32>
    %145 = vector.shape_cast %144 : vector<2x32xf32> to vector<2x1x32xf32>
    %146 = vector.broadcast %145 : vector<2x1x32xf32> to vector<2x64x32xf32>
    %147 = arith.addf %142, %146 : vector<2x64x32xf32>
    %c0_88 = arith.constant 0 : index
    %c0_89 = arith.constant 0 : index
    %148 = vector.load %arg8[%c0_88, %c0_89] : memref<1x32xf32, #tpu.memory_space<vmem>>, vector<1x32xf32>
    %c0_90 = arith.constant 0 : index
    %c0_91 = arith.constant 0 : index
    %149 = vector.load %arg9[%c0_90, %c0_91] : memref<1x32xf32, #tpu.memory_space<vmem>>, vector<1x32xf32>
    %cst_92 = arith.constant dense<0.000000e+00> : vector<2x32xf32>
    %150 = vector.multi_reduction <add>, %147, %cst_92 [1] : vector<2x64x32xf32> to vector<2x32xf32>
    %151 = arith.mulf %147, %147 : vector<2x64x32xf32>
    %cst_93 = arith.constant dense<0.000000e+00> : vector<2x32xf32>
    %152 = vector.multi_reduction <add>, %151, %cst_93 [1] : vector<2x64x32xf32> to vector<2x32xf32>
    %cst_94 = arith.constant 6.400000e+01 : f32
    %153 = vector.broadcast %cst_94 : f32 to vector<2x32xf32>
    %154 = arith.divf %150, %153 : vector<2x32xf32>
    %cst_95 = arith.constant 6.400000e+01 : f32
    %155 = vector.broadcast %cst_95 : f32 to vector<2x32xf32>
    %156 = arith.divf %152, %155 : vector<2x32xf32>
    %157 = arith.mulf %154, %154 : vector<2x32xf32>
    %158 = arith.subf %156, %157 : vector<2x32xf32>
    %cst_96 = arith.constant 0.000000e+00 : f32
    %159 = vector.broadcast %cst_96 : f32 to vector<2x32xf32>
    %160 = arith.maximumf %158, %159 : vector<2x32xf32>
    %cst_97 = arith.constant 9.99999974E-6 : f32
    %161 = vector.broadcast %cst_97 : f32 to vector<2x32xf32>
    %162 = arith.addf %160, %161 : vector<2x32xf32>
    %163 = math.rsqrt %162 : vector<2x32xf32>
    %164 = vector.shape_cast %154 : vector<2x32xf32> to vector<2x1x32xf32>
    %165 = vector.broadcast %164 : vector<2x1x32xf32> to vector<2x64x32xf32>
    %166 = arith.subf %147, %165 : vector<2x64x32xf32>
    %167 = vector.shape_cast %163 : vector<2x32xf32> to vector<2x1x32xf32>
    %168 = vector.broadcast %167 : vector<2x1x32xf32> to vector<2x64x32xf32>
    %169 = arith.mulf %166, %168 : vector<2x64x32xf32>
    %170 = vector.shape_cast %148 : vector<1x32xf32> to vector<1x1x32xf32>
    %171 = vector.broadcast %170 : vector<1x1x32xf32> to vector<2x64x32xf32>
    %172 = arith.mulf %169, %171 : vector<2x64x32xf32>
    %173 = vector.shape_cast %149 : vector<1x32xf32> to vector<1x1x32xf32>
    %174 = vector.broadcast %173 : vector<1x1x32xf32> to vector<2x64x32xf32>
    %175 = arith.addf %172, %174 : vector<2x64x32xf32>
    %176 = arith.negf %175 : vector<2x64x32xf32>
    %177 = math.exp %176 : vector<2x64x32xf32>
    %cst_98 = arith.constant 1.000000e+00 : f32
    %178 = vector.broadcast %cst_98 : f32 to vector<2x64x32xf32>
    %179 = arith.addf %178, %177 : vector<2x64x32xf32>
    %180 = arith.divf %178, %179 : vector<2x64x32xf32>
    %181 = arith.mulf %175, %180 : vector<2x64x32xf32>
    %182 = arith.truncf %181 : vector<2x64x32xf32> to vector<2x64x32xbf16>
    %183 = vector.shape_cast %182 : vector<2x64x32xbf16> to vector<128x32xbf16>
    %184 = vector.extract_strided_slice %183 {offsets = [0, 0], sizes = [8, 32], strides = [1, 1]} : vector<128x32xbf16> to vector<8x32xbf16>
    %c11_99 = arith.constant 11 : index
    %c0_100 = arith.constant 0 : index
    %185 = vector.load %arg17[%c11_99, %c0_100] : memref<232x32xbf16, #tpu.memory_space<vmem>>, vector<8x32xbf16>
    tpu.vector_store %arg17[%c11_99, %c0_100], %184 {strides = array<i32>} : memref<232x32xbf16, #tpu.memory_space<vmem>>, vector<8x32xbf16>,
    %186 = vector.extract_strided_slice %183 {offsets = [8, 0], sizes = [8, 32], strides = [1, 1]} : vector<128x32xbf16> to vector<8x32xbf16>
    %c21_101 = arith.constant 21 : index
    %c0_102 = arith.constant 0 : index
    %187 = vector.load %arg17[%c21_101, %c0_102] : memref<232x32xbf16, #tpu.memory_space<vmem>>, vector<8x32xbf16>
    tpu.vector_store %arg17[%c21_101, %c0_102], %186 {strides = array<i32>} : memref<232x32xbf16, #tpu.memory_space<vmem>>, vector<8x32xbf16>,
    %188 = vector.extract_strided_slice %183 {offsets = [16, 0], sizes = [8, 32], strides = [1, 1]} : vector<128x32xbf16> to vector<8x32xbf16>
    %c31_103 = arith.constant 31 : index
    %c0_104 = arith.constant 0 : index
    %189 = vector.load %arg17[%c31_103, %c0_104] : memref<232x32xbf16, #tpu.memory_space<vmem>>, vector<8x32xbf16>
    tpu.vector_store %arg17[%c31_103, %c0_104], %188 {strides = array<i32>} : memref<232x32xbf16, #tpu.memory_space<vmem>>, vector<8x32xbf16>,
    %190 = vector.extract_strided_slice %183 {offsets = [24, 0], sizes = [8, 32], strides = [1, 1]} : vector<128x32xbf16> to vector<8x32xbf16>
    %c41_105 = arith.constant 41 : index
    %c0_106 = arith.constant 0 : index
    %191 = vector.load %arg17[%c41_105, %c0_106] : memref<232x32xbf16, #tpu.memory_space<vmem>>, vector<8x32xbf16>
    tpu.vector_store %arg17[%c41_105, %c0_106], %190 {strides = array<i32>} : memref<232x32xbf16, #tpu.memory_space<vmem>>, vector<8x32xbf16>,
    %192 = vector.extract_strided_slice %183 {offsets = [32, 0], sizes = [8, 32], strides = [1, 1]} : vector<128x32xbf16> to vector<8x32xbf16>
    %c51_107 = arith.constant 51 : index
    %c0_108 = arith.constant 0 : index
    %193 = vector.load %arg17[%c51_107, %c0_108] : memref<232x32xbf16, #tpu.memory_space<vmem>>, vector<8x32xbf16>
    tpu.vector_store %arg17[%c51_107, %c0_108], %192 {strides = array<i32>} : memref<232x32xbf16, #tpu.memory_space<vmem>>, vector<8x32xbf16>,
    %194 = vector.extract_strided_slice %183 {offsets = [40, 0], sizes = [8, 32], strides = [1, 1]} : vector<128x32xbf16> to vector<8x32xbf16>
    %c61_109 = arith.constant 61 : index
    %c0_110 = arith.constant 0 : index
    %195 = vector.load %arg17[%c61_109, %c0_110] : memref<232x32xbf16, #tpu.memory_space<vmem>>, vector<8x32xbf16>
    tpu.vector_store %arg17[%c61_109, %c0_110], %194 {strides = array<i32>} : memref<232x32xbf16, #tpu.memory_space<vmem>>, vector<8x32xbf16>,
    %196 = vector.extract_strided_slice %183 {offsets = [48, 0], sizes = [8, 32], strides = [1, 1]} : vector<128x32xbf16> to vector<8x32xbf16>
    %c71_111 = arith.constant 71 : index
    %c0_112 = arith.constant 0 : index
    %197 = vector.load %arg17[%c71_111, %c0_112] : memref<232x32xbf16, #tpu.memory_space<vmem>>, vector<8x32xbf16>
    tpu.vector_store %arg17[%c71_111, %c0_112], %196 {strides = array<i32>} : memref<232x32xbf16, #tpu.memory_space<vmem>>, vector<8x32xbf16>,
    %198 = vector.extract_strided_slice %183 {offsets = [56, 0], sizes = [8, 32], strides = [1, 1]} : vector<128x32xbf16> to vector<8x32xbf16>
    %c81_113 = arith.constant 81 : index
    %c0_114 = arith.constant 0 : index
    %199 = vector.load %arg17[%c81_113, %c0_114] : memref<232x32xbf16, #tpu.memory_space<vmem>>, vector<8x32xbf16>
    tpu.vector_store %arg17[%c81_113, %c0_114], %198 {strides = array<i32>} : memref<232x32xbf16, #tpu.memory_space<vmem>>, vector<8x32xbf16>,
    %200 = vector.extract_strided_slice %183 {offsets = [64, 0], sizes = [8, 32], strides = [1, 1]} : vector<128x32xbf16> to vector<8x32xbf16>
    %c111_115 = arith.constant 111 : index
    %c0_116 = arith.constant 0 : index
    %201 = vector.load %arg17[%c111_115, %c0_116] : memref<232x32xbf16, #tpu.memory_space<vmem>>, vector<8x32xbf16>
    tpu.vector_store %arg17[%c111_115, %c0_116], %200 {strides = array<i32>} : memref<232x32xbf16, #tpu.memory_space<vmem>>, vector<8x32xbf16>,
    %202 = vector.extract_strided_slice %183 {offsets = [72, 0], sizes = [8, 32], strides = [1, 1]} : vector<128x32xbf16> to vector<8x32xbf16>
    %c121_117 = arith.constant 121 : index
    %c0_118 = arith.constant 0 : index
    %203 = vector.load %arg17[%c121_117, %c0_118] : memref<232x32xbf16, #tpu.memory_space<vmem>>, vector<8x32xbf16>
    tpu.vector_store %arg17[%c121_117, %c0_118], %202 {strides = array<i32>} : memref<232x32xbf16, #tpu.memory_space<vmem>>, vector<8x32xbf16>,
    %204 = vector.extract_strided_slice %183 {offsets = [80, 0], sizes = [8, 32], strides = [1, 1]} : vector<128x32xbf16> to vector<8x32xbf16>
    %c131_119 = arith.constant 131 : index
    %c0_120 = arith.constant 0 : index
    %205 = vector.load %arg17[%c131_119, %c0_120] : memref<232x32xbf16, #tpu.memory_space<vmem>>, vector<8x32xbf16>
    tpu.vector_store %arg17[%c131_119, %c0_120], %204 {strides = array<i32>} : memref<232x32xbf16, #tpu.memory_space<vmem>>, vector<8x32xbf16>,
    %206 = vector.extract_strided_slice %183 {offsets = [88, 0], sizes = [8, 32], strides = [1, 1]} : vector<128x32xbf16> to vector<8x32xbf16>
    %c141_121 = arith.constant 141 : index
    %c0_122 = arith.constant 0 : index
    %207 = vector.load %arg17[%c141_121, %c0_122] : memref<232x32xbf16, #tpu.memory_space<vmem>>, vector<8x32xbf16>
    tpu.vector_store %arg17[%c141_121, %c0_122], %206 {strides = array<i32>} : memref<232x32xbf16, #tpu.memory_space<vmem>>, vector<8x32xbf16>,
    %208 = vector.extract_strided_slice %183 {offsets = [96, 0], sizes = [8, 32], strides = [1, 1]} : vector<128x32xbf16> to vector<8x32xbf16>
    %c151_123 = arith.constant 151 : index
    %c0_124 = arith.constant 0 : index
    %209 = vector.load %arg17[%c151_123, %c0_124] : memref<232x32xbf16, #tpu.memory_space<vmem>>, vector<8x32xbf16>
    tpu.vector_store %arg17[%c151_123, %c0_124], %208 {strides = array<i32>} : memref<232x32xbf16, #tpu.memory_space<vmem>>, vector<8x32xbf16>,
    %210 = vector.extract_strided_slice %183 {offsets = [104, 0], sizes = [8, 32], strides = [1, 1]} : vector<128x32xbf16> to vector<8x32xbf16>
    %c161_125 = arith.constant 161 : index
    %c0_126 = arith.constant 0 : index
    %211 = vector.load %arg17[%c161_125, %c0_126] : memref<232x32xbf16, #tpu.memory_space<vmem>>, vector<8x32xbf16>
    tpu.vector_store %arg17[%c161_125, %c0_126], %210 {strides = array<i32>} : memref<232x32xbf16, #tpu.memory_space<vmem>>, vector<8x32xbf16>,
    %212 = vector.extract_strided_slice %183 {offsets = [112, 0], sizes = [8, 32], strides = [1, 1]} : vector<128x32xbf16> to vector<8x32xbf16>
    %c171_127 = arith.constant 171 : index
    %c0_128 = arith.constant 0 : index
    %213 = vector.load %arg17[%c171_127, %c0_128] : memref<232x32xbf16, #tpu.memory_space<vmem>>, vector<8x32xbf16>
    tpu.vector_store %arg17[%c171_127, %c0_128], %212 {strides = array<i32>} : memref<232x32xbf16, #tpu.memory_space<vmem>>, vector<8x32xbf16>,
    %214 = vector.extract_strided_slice %183 {offsets = [120, 0], sizes = [8, 32], strides = [1, 1]} : vector<128x32xbf16> to vector<8x32xbf16>
    %c181_129 = arith.constant 181 : index
    %c0_130 = arith.constant 0 : index
    %215 = vector.load %arg17[%c181_129, %c0_130] : memref<232x32xbf16, #tpu.memory_space<vmem>>, vector<8x32xbf16>
    tpu.vector_store %arg17[%c181_129, %c0_130], %214 {strides = array<i32>} : memref<232x32xbf16, #tpu.memory_space<vmem>>, vector<8x32xbf16>,
    %cst_131 = arith.constant 0.000000e+00 : f32
    %216 = vector.broadcast %cst_131 : f32 to vector<200x32xf32>
    %c0_132 = arith.constant 0 : index
    %c0_133 = arith.constant 0 : index
    %217 = vector.load %arg17[%c0_132, %c0_133] : memref<232x32xbf16, #tpu.memory_space<vmem>>, vector<200x32xbf16>
    %c0_134 = arith.constant 0 : index
    %c0_135 = arith.constant 0 : index
    %c0_136 = arith.constant 0 : index
    %218 = vector.load %arg12[%c0_134, %c0_135, %c0_136] : memref<9x32x32xbf16, #tpu.memory_space<vmem>>, vector<1x32x32xbf16>
    %219 = vector.shape_cast %218 : vector<1x32x32xbf16> to vector<32x32xbf16>
    %cst_137 = arith.constant dense<0.000000e+00> : vector<200x32xf32>
    %220 = tpu.matmul %217, %219, %cst_137 {dimension_numbers = #tpu.dot_dimension_numbers<[1], [0], [0], [1], [0, 0, 1, 1], [], []>} : vector<200x32xbf16>, vector<32x32xbf16>, vector<200x32xf32> -> vector<200x32xf32>
    %221 = arith.addf %216, %220 : vector<200x32xf32>
    %c1_138 = arith.constant 1 : index
    %c0_139 = arith.constant 0 : index
    %222 = vector.load %arg17[%c1_138, %c0_139] : memref<232x32xbf16, #tpu.memory_space<vmem>>, vector<200x32xbf16>
    %c1_140 = arith.constant 1 : index
    %c0_141 = arith.constant 0 : index
    %c0_142 = arith.constant 0 : index
    %223 = vector.load %arg12[%c1_140, %c0_141, %c0_142] : memref<9x32x32xbf16, #tpu.memory_space<vmem>>, vector<1x32x32xbf16>
    %224 = vector.shape_cast %223 : vector<1x32x32xbf16> to vector<32x32xbf16>
    %cst_143 = arith.constant dense<0.000000e+00> : vector<200x32xf32>
    %225 = tpu.matmul %222, %224, %cst_143 {dimension_numbers = #tpu.dot_dimension_numbers<[1], [0], [0], [1], [0, 0, 1, 1], [], []>} : vector<200x32xbf16>, vector<32x32xbf16>, vector<200x32xf32> -> vector<200x32xf32>
    %226 = arith.addf %221, %225 : vector<200x32xf32>
    %c2_144 = arith.constant 2 : index
    %c0_145 = arith.constant 0 : index
    %227 = vector.load %arg17[%c2_144, %c0_145] : memref<232x32xbf16, #tpu.memory_space<vmem>>, vector<200x32xbf16>
    %c2_146 = arith.constant 2 : index
    %c0_147 = arith.constant 0 : index
    %c0_148 = arith.constant 0 : index
    %228 = vector.load %arg12[%c2_146, %c0_147, %c0_148] : memref<9x32x32xbf16, #tpu.memory_space<vmem>>, vector<1x32x32xbf16>
    %229 = vector.shape_cast %228 : vector<1x32x32xbf16> to vector<32x32xbf16>
    %cst_149 = arith.constant dense<0.000000e+00> : vector<200x32xf32>
    %230 = tpu.matmul %227, %229, %cst_149 {dimension_numbers = #tpu.dot_dimension_numbers<[1], [0], [0], [1], [0, 0, 1, 1], [], []>} : vector<200x32xbf16>, vector<32x32xbf16>, vector<200x32xf32> -> vector<200x32xf32>
    %231 = arith.addf %226, %230 : vector<200x32xf32>
    %c10_150 = arith.constant 10 : index
    %c0_151 = arith.constant 0 : index
    %232 = vector.load %arg17[%c10_150, %c0_151] : memref<232x32xbf16, #tpu.memory_space<vmem>>, vector<200x32xbf16>
    %c3_152 = arith.constant 3 : index
    %c0_153 = arith.constant 0 : index
    %c0_154 = arith.constant 0 : index
    %233 = vector.load %arg12[%c3_152, %c0_153, %c0_154] : memref<9x32x32xbf16, #tpu.memory_space<vmem>>, vector<1x32x32xbf16>
    %234 = vector.shape_cast %233 : vector<1x32x32xbf16> to vector<32x32xbf16>
    %cst_155 = arith.constant dense<0.000000e+00> : vector<200x32xf32>
    %235 = tpu.matmul %232, %234, %cst_155 {dimension_numbers = #tpu.dot_dimension_numbers<[1], [0], [0], [1], [0, 0, 1, 1], [], []>} : vector<200x32xbf16>, vector<32x32xbf16>, vector<200x32xf32> -> vector<200x32xf32>
    %236 = arith.addf %231, %235 : vector<200x32xf32>
    %c11_156 = arith.constant 11 : index
    %c0_157 = arith.constant 0 : index
    %237 = vector.load %arg17[%c11_156, %c0_157] : memref<232x32xbf16, #tpu.memory_space<vmem>>, vector<200x32xbf16>
    %c4_158 = arith.constant 4 : index
    %c0_159 = arith.constant 0 : index
    %c0_160 = arith.constant 0 : index
    %238 = vector.load %arg12[%c4_158, %c0_159, %c0_160] : memref<9x32x32xbf16, #tpu.memory_space<vmem>>, vector<1x32x32xbf16>
    %239 = vector.shape_cast %238 : vector<1x32x32xbf16> to vector<32x32xbf16>
    %cst_161 = arith.constant dense<0.000000e+00> : vector<200x32xf32>
    %240 = tpu.matmul %237, %239, %cst_161 {dimension_numbers = #tpu.dot_dimension_numbers<[1], [0], [0], [1], [0, 0, 1, 1], [], []>} : vector<200x32xbf16>, vector<32x32xbf16>, vector<200x32xf32> -> vector<200x32xf32>
    %241 = arith.addf %236, %240 : vector<200x32xf32>
    %c12_162 = arith.constant 12 : index
    %c0_163 = arith.constant 0 : index
    %242 = vector.load %arg17[%c12_162, %c0_163] : memref<232x32xbf16, #tpu.memory_space<vmem>>, vector<200x32xbf16>
    %c5_164 = arith.constant 5 : index
    %c0_165 = arith.constant 0 : index
    %c0_166 = arith.constant 0 : index
    %243 = vector.load %arg12[%c5_164, %c0_165, %c0_166] : memref<9x32x32xbf16, #tpu.memory_space<vmem>>, vector<1x32x32xbf16>
    %244 = vector.shape_cast %243 : vector<1x32x32xbf16> to vector<32x32xbf16>
    %cst_167 = arith.constant dense<0.000000e+00> : vector<200x32xf32>
    %245 = tpu.matmul %242, %244, %cst_167 {dimension_numbers = #tpu.dot_dimension_numbers<[1], [0], [0], [1], [0, 0, 1, 1], [], []>} : vector<200x32xbf16>, vector<32x32xbf16>, vector<200x32xf32> -> vector<200x32xf32>
    %246 = arith.addf %241, %245 : vector<200x32xf32>
    %c20_168 = arith.constant 20 : index
    %c0_169 = arith.constant 0 : index
    %247 = vector.load %arg17[%c20_168, %c0_169] : memref<232x32xbf16, #tpu.memory_space<vmem>>, vector<200x32xbf16>
    %c6_170 = arith.constant 6 : index
    %c0_171 = arith.constant 0 : index
    %c0_172 = arith.constant 0 : index
    %248 = vector.load %arg12[%c6_170, %c0_171, %c0_172] : memref<9x32x32xbf16, #tpu.memory_space<vmem>>, vector<1x32x32xbf16>
    %249 = vector.shape_cast %248 : vector<1x32x32xbf16> to vector<32x32xbf16>
    %cst_173 = arith.constant dense<0.000000e+00> : vector<200x32xf32>
    %250 = tpu.matmul %247, %249, %cst_173 {dimension_numbers = #tpu.dot_dimension_numbers<[1], [0], [0], [1], [0, 0, 1, 1], [], []>} : vector<200x32xbf16>, vector<32x32xbf16>, vector<200x32xf32> -> vector<200x32xf32>
    %251 = arith.addf %246, %250 : vector<200x32xf32>
    %c21_174 = arith.constant 21 : index
    %c0_175 = arith.constant 0 : index
    %252 = vector.load %arg17[%c21_174, %c0_175] : memref<232x32xbf16, #tpu.memory_space<vmem>>, vector<200x32xbf16>
    %c7_176 = arith.constant 7 : index
    %c0_177 = arith.constant 0 : index
    %c0_178 = arith.constant 0 : index
    %253 = vector.load %arg12[%c7_176, %c0_177, %c0_178] : memref<9x32x32xbf16, #tpu.memory_space<vmem>>, vector<1x32x32xbf16>
    %254 = vector.shape_cast %253 : vector<1x32x32xbf16> to vector<32x32xbf16>
    %cst_179 = arith.constant dense<0.000000e+00> : vector<200x32xf32>
    %255 = tpu.matmul %252, %254, %cst_179 {dimension_numbers = #tpu.dot_dimension_numbers<[1], [0], [0], [1], [0, 0, 1, 1], [], []>} : vector<200x32xbf16>, vector<32x32xbf16>, vector<200x32xf32> -> vector<200x32xf32>
    %256 = arith.addf %251, %255 : vector<200x32xf32>
    %c22_180 = arith.constant 22 : index
    %c0_181 = arith.constant 0 : index
    %257 = vector.load %arg17[%c22_180, %c0_181] : memref<232x32xbf16, #tpu.memory_space<vmem>>, vector<200x32xbf16>
    %c8_182 = arith.constant 8 : index
    %c0_183 = arith.constant 0 : index
    %c0_184 = arith.constant 0 : index
    %258 = vector.load %arg12[%c8_182, %c0_183, %c0_184] : memref<9x32x32xbf16, #tpu.memory_space<vmem>>, vector<1x32x32xbf16>
    %259 = vector.shape_cast %258 : vector<1x32x32xbf16> to vector<32x32xbf16>
    %cst_185 = arith.constant dense<0.000000e+00> : vector<200x32xf32>
    %260 = tpu.matmul %257, %259, %cst_185 {dimension_numbers = #tpu.dot_dimension_numbers<[1], [0], [0], [1], [0, 0, 1, 1], [], []>} : vector<200x32xbf16>, vector<32x32xbf16>, vector<200x32xf32> -> vector<200x32xf32>
    %261 = arith.addf %256, %260 : vector<200x32xf32>
    %262 = vector.extract_strided_slice %261 {offsets = [0, 0], sizes = [8, 32], strides = [1, 1]} : vector<200x32xf32> to vector<8x32xf32>
    %263 = vector.extract_strided_slice %261 {offsets = [10, 0], sizes = [8, 32], strides = [1, 1]} : vector<200x32xf32> to vector<8x32xf32>
    %264 = vector.extract_strided_slice %261 {offsets = [20, 0], sizes = [8, 32], strides = [1, 1]} : vector<200x32xf32> to vector<8x32xf32>
    %265 = vector.extract_strided_slice %261 {offsets = [30, 0], sizes = [8, 32], strides = [1, 1]} : vector<200x32xf32> to vector<8x32xf32>
    %266 = vector.extract_strided_slice %261 {offsets = [40, 0], sizes = [8, 32], strides = [1, 1]} : vector<200x32xf32> to vector<8x32xf32>
    %267 = vector.extract_strided_slice %261 {offsets = [50, 0], sizes = [8, 32], strides = [1, 1]} : vector<200x32xf32> to vector<8x32xf32>
    %268 = vector.extract_strided_slice %261 {offsets = [60, 0], sizes = [8, 32], strides = [1, 1]} : vector<200x32xf32> to vector<8x32xf32>
    %269 = vector.extract_strided_slice %261 {offsets = [70, 0], sizes = [8, 32], strides = [1, 1]} : vector<200x32xf32> to vector<8x32xf32>
    %270 = vector.extract_strided_slice %261 {offsets = [100, 0], sizes = [8, 32], strides = [1, 1]} : vector<200x32xf32> to vector<8x32xf32>
    %271 = vector.extract_strided_slice %261 {offsets = [110, 0], sizes = [8, 32], strides = [1, 1]} : vector<200x32xf32> to vector<8x32xf32>
    %272 = vector.extract_strided_slice %261 {offsets = [120, 0], sizes = [8, 32], strides = [1, 1]} : vector<200x32xf32> to vector<8x32xf32>
    %273 = vector.extract_strided_slice %261 {offsets = [130, 0], sizes = [8, 32], strides = [1, 1]} : vector<200x32xf32> to vector<8x32xf32>
    %274 = vector.extract_strided_slice %261 {offsets = [140, 0], sizes = [8, 32], strides = [1, 1]} : vector<200x32xf32> to vector<8x32xf32>
    %275 = vector.extract_strided_slice %261 {offsets = [150, 0], sizes = [8, 32], strides = [1, 1]} : vector<200x32xf32> to vector<8x32xf32>
    %276 = vector.extract_strided_slice %261 {offsets = [160, 0], sizes = [8, 32], strides = [1, 1]} : vector<200x32xf32> to vector<8x32xf32>
    %277 = vector.extract_strided_slice %261 {offsets = [170, 0], sizes = [8, 32], strides = [1, 1]} : vector<200x32xf32> to vector<8x32xf32>
    %278 = tpu.concatenate %262, %263, %264, %265, %266, %267, %268, %269, %270, %271, %272, %273, %274, %275, %276, %277 in 0 : vector<8x32xf32>, vector<8x32xf32>, vector<8x32xf32>, vector<8x32xf32>, vector<8x32xf32>, vector<8x32xf32>, vector<8x32xf32>, vector<8x32xf32>, vector<8x32xf32>, vector<8x32xf32>, vector<8x32xf32>, vector<8x32xf32>, vector<8x32xf32>, vector<8x32xf32>, vector<8x32xf32>, vector<8x32xf32> -> vector<128x32xf32>
    %279 = vector.shape_cast %278 : vector<128x32xf32> to vector<2x64x32xf32>
    %280 = vector.shape_cast %4 : vector<2x64x64xf32> to vector<128x64xf32>
    %281 = arith.truncf %280 : vector<128x64xf32> to vector<128x64xbf16>
    %c0_186 = arith.constant 0 : index
    %c0_187 = arith.constant 0 : index
    %282 = vector.load %arg13[%c0_186, %c0_187] : memref<64x32xbf16, #tpu.memory_space<vmem>>, vector<64x32xbf16>
    %cst_188 = arith.constant dense<0.000000e+00> : vector<128x32xf32>
    %283 = tpu.matmul %281, %282, %cst_188 {dimension_numbers = #tpu.dot_dimension_numbers<[1], [0], [0], [1], [0, 0, 1, 1], [], []>} : vector<128x64xbf16>, vector<64x32xbf16>, vector<128x32xf32> -> vector<128x32xf32>
    %284 = vector.shape_cast %283 : vector<128x32xf32> to vector<2x64x32xf32>
    %285 = arith.addf %279, %284 : vector<2x64x32xf32>
    %c0_189 = arith.constant 0 : index
    %c0_190 = arith.constant 0 : index
    %286 = vector.load %arg14[%c0_189, %c0_190] : memref<1x32xf32, #tpu.memory_space<vmem>>, vector<1x32xf32>
    %287 = vector.shape_cast %286 : vector<1x32xf32> to vector<1x1x32xf32>
    %288 = vector.broadcast %287 : vector<1x1x32xf32> to vector<2x64x32xf32>
    %289 = arith.addf %285, %288 : vector<2x64x32xf32>
    %c0_191 = arith.constant 0 : index
    %c0_192 = arith.constant 0 : index
    %c0_193 = arith.constant 0 : index
    %290 = vector.load %arg15[%c0_191, %c0_192, %c0_193] : memref<2x64x32xf32, #tpu.memory_space<vmem>>, vector<2x64x32xf32>
    tpu.vector_store %arg15[%c0_191, %c0_192, %c0_193], %289 {strides = array<i32>} : memref<2x64x32xf32, #tpu.memory_space<vmem>>, vector<2x64x32xf32>,
    return
  }
  func.func @transform_0(%arg0: i32) -> (i32, i32, i32) {
    %c0_i32 = arith.constant 0 : i32
    %c0_i32_0 = arith.constant 0 : i32
    %c0_i32_1 = arith.constant 0 : i32
    return %arg0, %c0_i32, %c0_i32_0 : i32, i32, i32
  }
  func.func @transform_1(%arg0: i32) -> (i32, i32, i32) {
    %c0_i32 = arith.constant 0 : i32
    %c0_i32_0 = arith.constant 0 : i32
    %c0_i32_1 = arith.constant 0 : i32
    return %arg0, %c0_i32, %c0_i32_0 : i32, i32, i32
  }
  func.func @transform_2(%arg0: i32) -> (i32, i32) {
    %c0_i32 = arith.constant 0 : i32
    %c0_i32_0 = arith.constant 0 : i32
    %c0_i32_1 = arith.constant 0 : i32
    return %c0_i32, %c0_i32_0 : i32, i32
  }
  func.func @transform_3(%arg0: i32) -> (i32, i32) {
    %c0_i32 = arith.constant 0 : i32
    %c0_i32_0 = arith.constant 0 : i32
    %c0_i32_1 = arith.constant 0 : i32
    return %c0_i32, %c0_i32_0 : i32, i32
  }
  func.func @transform_4(%arg0: i32) -> (i32, i32) {
    %c0_i32 = arith.constant 0 : i32
    %c0_i32_0 = arith.constant 0 : i32
    %c0_i32_1 = arith.constant 0 : i32
    return %c0_i32, %c0_i32_0 : i32, i32
  }
  func.func @transform_5(%arg0: i32) -> (i32, i32) {
    %c0_i32 = arith.constant 0 : i32
    %c0_i32_0 = arith.constant 0 : i32
    %c0_i32_1 = arith.constant 0 : i32
    return %c0_i32, %c0_i32_0 : i32, i32
  }
  func.func @transform_6(%arg0: i32) -> (i32, i32, i32) {
    %c0_i32 = arith.constant 0 : i32
    %c0_i32_0 = arith.constant 0 : i32
    %c0_i32_1 = arith.constant 0 : i32
    %c0_i32_2 = arith.constant 0 : i32
    return %c0_i32, %c0_i32_0, %c0_i32_1 : i32, i32, i32
  }
  func.func @transform_7(%arg0: i32) -> (i32, i32) {
    %c0_i32 = arith.constant 0 : i32
    %c0_i32_0 = arith.constant 0 : i32
    %c0_i32_1 = arith.constant 0 : i32
    return %c0_i32, %c0_i32_0 : i32, i32
  }
  func.func @transform_8(%arg0: i32) -> (i32, i32) {
    %c0_i32 = arith.constant 0 : i32
    %c0_i32_0 = arith.constant 0 : i32
    %c0_i32_1 = arith.constant 0 : i32
    return %c0_i32, %c0_i32_0 : i32, i32
  }
  func.func @transform_9(%arg0: i32) -> (i32, i32) {
    %c0_i32 = arith.constant 0 : i32
    %c0_i32_0 = arith.constant 0 : i32
    %c0_i32_1 = arith.constant 0 : i32
    return %c0_i32, %c0_i32_0 : i32, i32
  }
  func.func @transform_10(%arg0: i32) -> (i32, i32) {
    %c0_i32 = arith.constant 0 : i32
    %c0_i32_0 = arith.constant 0 : i32
    %c0_i32_1 = arith.constant 0 : i32
    return %c0_i32, %c0_i32_0 : i32, i32
  }
  func.func @transform_11(%arg0: i32) -> (i32, i32, i32) {
    %c0_i32 = arith.constant 0 : i32
    %c0_i32_0 = arith.constant 0 : i32
    %c0_i32_1 = arith.constant 0 : i32
    %c0_i32_2 = arith.constant 0 : i32
    return %c0_i32, %c0_i32_0, %c0_i32_1 : i32, i32, i32
  }
  func.func @transform_12(%arg0: i32) -> (i32, i32) {
    %c0_i32 = arith.constant 0 : i32
    %c0_i32_0 = arith.constant 0 : i32
    %c0_i32_1 = arith.constant 0 : i32
    return %c0_i32, %c0_i32_0 : i32, i32
  }
  func.func @transform_13(%arg0: i32) -> (i32, i32) {
    %c0_i32 = arith.constant 0 : i32
    %c0_i32_0 = arith.constant 0 : i32
    %c0_i32_1 = arith.constant 0 : i32
    return %c0_i32, %c0_i32_0 : i32, i32
  }
  func.func @transform_14(%arg0: i32) -> (i32, i32, i32) {
    %c0_i32 = arith.constant 0 : i32
    %c0_i32_0 = arith.constant 0 : i32
    %c0_i32_1 = arith.constant 0 : i32
    return %arg0, %c0_i32, %c0_i32_0 : i32, i32, i32
  }
}

</mosaic_0001>

<bundles_post_ra>
// kernel: tpu_custom_call.1
= control target key start
LH: loop header
LB: loop body
LE: loop exit
PB: predicated region body
PF: predicated region fallthrough
CT: control target
= control target key end

     0   :  { %19 = vsyncpa [#allocation5], 0  ;;  %s14570_s0 = inlined_call_operand.vmem [shape: f32[4,64,64], index: 0, kind: input, shape index: {}]   ;;  %s14571_s1 = inlined_call_operand.vmem [shape: f32[2,2,32], index: 1, kind: input, shape index: {}]   ;;  %s14572_s2 = inlined_call_operand.vmem [shape: f32[1,64], index: 2, kind: input, shape index: {}]   ;;  %s14573_s3 = inlined_call_operand.hbm [shape: f32[1,64], index: 3, kind: input, shape index: {}]   ;;  %s14574_s4 = inlined_call_operand.vmem [shape: f32[64,32], index: 4, kind: input, shape index: {}]   ;;  %s14575_s5 = inlined_call_operand.vmem [shape: f32[32,64], index: 5, kind: input, shape index: {}]   ;;  %s14576_s6 = inlined_call_operand.vmem [shape: bf16[9,64,32], index: 6, kind: input, shape index: {}]   ;;  %s14577_s7 = inlined_call_operand.hbm [shape: f32[1,32], index: 7, kind: input, shape index: {}]   ;;  %s14578_s8 = inlined_call_operand.hbm [shape: f32[1,32], index: 8, kind: input, shape index: {}]   ;;  %s14579_s9 = inlined_call_operand.hbm [shape: f32[32,32], index: 9, kind: input, shape index: {}]   ;;  %s14580_s10 = inlined_call_operand.hbm [shape: f32[32,32], index: 10, kind: input, shape index: {}]   ;;  %s14581_s11 = inlined_call_operand.vmem [shape: bf16[9,32,32], index: 11, kind: input, shape index: {}]   ;;  %s14582_s12 = inlined_call_operand.vmem [shape: bf16[64,32], index: 12, kind: input, shape index: {}]   ;;  %s14583_s13 = inlined_call_operand.hbm [shape: f32[1,32], index: 13, kind: input, shape index: {}]   ;;  %s14584_s14 = inlined_call_operand.vmem [shape: f32[4,64,32], index: 14, kind: output, shape index: {}]  }
   0x1   :  { %20 = vsyncpa [#allocation7], 0 }
   0x2   :  { %21 = vsyncpa [#allocation10], 0 }
   0x3   :  { %22 = vsyncpa [#allocation13], 0  ;;  %s10866_s29 = smov 0  }
   0x4 LB: > { %s10779_s30 = smov [#allocation6]   ;;  %s10872_s16 = sadd.s32 4294967295, %s10777_s29   ;;  %s10777_s29 = sphi %s10866_s29, %s28_s29  }
   0x5   : > { %s399_s15 = sshll.u32 %s10779_s30, 4  ;;  %p8141_p0 = scmp.ge.s32.totalorder %s10777_s29, 1  ;;  %s400_s15 = int_to_ptr.vmem [resolvable:$true] %s399_s15 }
   0x6   : > { %p363_p1 = scmp.lt.s32.totalorder %s10777_s29, 3  ;;  %p10258_p2 = scmp.eq.s32.totalorder %s10872_s16, 0 }
   0x7   : > { %s10780_s18 = smov [#allocation9]   ;;  %s10781_s21 = smov [#allocation4]  }
   0x8   : > { %p10877_p3 = pnand %p8141_p0, %p363_p1  ;;  %s420_s19 = sshll.u32 %s10780_s18, 4  ;;  %s10883_s19 = int_to_ptr.vmem [resolvable:$true] %s420_s19 }
   0x9   : > { %s379_s22 = sshll.u32 %s10781_s21, 4  ;;  %s10782_s23 = smov [#allocation8]   ;;  %s10891_s22 = int_to_ptr.vmem [resolvable:$true] %s379_s22 }
   0xa   : > { %p10239_p4 = pneg %p10877_p3  ;;  %s10893_s24 = sshll.u32 %s10782_s23, 4  ;;  %s411_s24 = int_to_ptr.vmem [resolvable:$true] %s10893_s24 }
   0xb   : > { %s10610_s26 = scalar_lea.vmem %s400_s15, 16  ;;  %s10617_s27 = scalar_lea.vmem %s400_s15, 32 }
   0xc   : > { %p10887_p5 = pnand %p10258_p2, %p10239_p4  ;;  %p10611_p7 = scmp.ne.s32.totalorder %s400_s15, %s10610_s26 }
   0xd   : > { %p10618_p10 = scmp.lt.s32.totalorder %s400_s15, %s400_s15  ;;  %p10619_p11 = scmp.lt.s32.totalorder %s10617_s27, %s10610_s26 }
   0xe   : > { %p10897_p6 = pneg %p10887_p5 }
   0xf   : > { %p10620_p12 = por %p10619_p11, %p10618_p10 }
  0x10   : > { %p10613_p8 = pnand %p10611_p7, %p10897_p6 }
  0x12   : > { %p10614_p9 = pneg %p10613_p8 }
  0x14   : > { %p10621_p13 = pnand %p10620_p12, %p10614_p9 }
  0x16   : > { %10624 = shalt.err (!%p10621_p13)
}
  0x17   : > { %10245 = dma.hbm_to_vmem [thread:$0]  (!%p10887_p5), %s14577_s7, 16, %s400_s15, [#allocation7]  }
  0x18   : > { %s10636_s18 = scalar_lea.vmem %s10883_s19, 512  ;;  %p10644_p7 = scmp.lt.s32.totalorder %s10883_s19, %s10883_s19 }
  0x19   : > { %p10637_p0 = scmp.ne.s32.totalorder %s10883_s19, %s10636_s18  ;;  %p10645_p8 = scmp.lt.s32.totalorder %s10636_s18, %s10636_s18 }
  0x1b   : > { %p10639_p1 = pnand %p10637_p0, %p10897_p6  ;;  %p10646_p9 = por %p10645_p8, %p10644_p7 }
  0x1d   : > { %p10640_p4 = pneg %p10639_p1 }
  0x1f   : > { %p10647_p10 = pnand %p10646_p9, %p10640_p4 }
  0x21   : > { %10650 = shalt.err (!%p10647_p10)
}
  0x22   : > { %s14585_s21 = smov 128   ;;  %s10784_s15 = smov 8  }
  0x23   : > { %10251 = dma.hbm_to_vmem [thread:$0]  (!%p10887_p5), %s14579_s9, 512, %s10883_s19, [#allocation10], %s14585_s21, %s14585_s21, %s10784_s15  }
  0x24   : > { %s10662_s27 = scalar_lea.vmem %s10891_s22, 16  ;;  %s10669_s28 = scalar_lea.vmem %s10891_s22, 32 }
  0x25   : > { %p10663_p11 = scmp.ne.s32.totalorder %s10891_s22, %s10662_s27  ;;  %p10670_p0 = scmp.lt.s32.totalorder %s10891_s22, %s10891_s22 }
  0x26   : > { %p10671_p1 = scmp.lt.s32.totalorder %s10669_s28, %s10662_s27 }
  0x27   : > { %p10665_p12 = pnand %p10663_p11, %p10897_p6 }
  0x28   : > { %p10672_p4 = por %p10671_p1, %p10670_p0 }
  0x29   : > { %p10666_p13 = pneg %p10665_p12 }
  0x2b   : > { %p10673_p7 = pnand %p10672_p4, %p10666_p13 }
  0x2d   : > { %10676 = shalt.err (!%p10673_p7)
}
  0x2e   : > { %10242 = dma.hbm_to_vmem [thread:$0]  (!%p10887_p5), %s14573_s3, 16, %s10891_s22, [#allocation5]  }
  0x2f   : > { %s10688_s19 = scalar_lea.vmem %s411_s24, 16  ;;  %s10695_s23 = scalar_lea.vmem %s411_s24, 32 }
  0x30   : > { %p10689_p8 = scmp.ne.s32.totalorder %s411_s24, %s10688_s19  ;;  %p10696_p11 = scmp.lt.s32.totalorder %s411_s24, %s411_s24 }
  0x31   : > { %p10697_p12 = scmp.lt.s32.totalorder %s10695_s23, %s10688_s19 }
  0x32   : > { %p10691_p9 = pnand %p10689_p8, %p10897_p6 }
  0x33   : > { %p10698_p13 = por %p10697_p12, %p10696_p11 }
  0x34   : > { %p10692_p10 = pneg %p10691_p9 }
  0x36   : > { %p10699_p0 = pnand %p10698_p13, %p10692_p10 }
  0x38   : > { %10702 = shalt.err (!%p10699_p0)
}
  0x39   : > { %10248 = dma.hbm_to_vmem [thread:$0]  (!%p10887_p5), %s14578_s8, 16, %s411_s24, [#allocation7]  }
  0x3a   : > { %s10785_s22 = smov [#allocation11]   ;;  %s10786_s30 = smov [#allocation12]  }
  0x3b   : > { %s433_s28 = sshll.u32 %s10785_s22, 4  ;;  %s453_s18 = sshll.u32 %s10786_s30, 4  ;;  %s434_s28 = int_to_ptr.vmem [resolvable:$true] %s433_s28  ;;  %s454_s18 = int_to_ptr.vmem [resolvable:$true] %s453_s18 }
  0x3c   : > { %s10714_s21 = scalar_lea.vmem %s434_s28, 512  ;;  %p10722_p8 = scmp.lt.s32.totalorder %s434_s28, %s434_s28 }
  0x3d   : > { %p10715_p1 = scmp.ne.s32.totalorder %s434_s28, %s10714_s21  ;;  %p10723_p9 = scmp.lt.s32.totalorder %s10714_s21, %s10714_s21 }
  0x3f   : > { %p10717_p4 = pnand %p10715_p1, %p10897_p6  ;;  %p10724_p10 = por %p10723_p9, %p10722_p8 }
  0x41   : > { %p10718_p7 = pneg %p10717_p4 }
  0x43   : > { %p10725_p11 = pnand %p10724_p10, %p10718_p7 }
  0x45   : > { %10728 = shalt.err (!%p10725_p11)
}
  0x46   : > { %s14632_s19 = smov 128   ;;  %s10740_s26 = scalar_lea.vmem %s454_s18, 16 }
  0x47   : > { %10254 = dma.hbm_to_vmem [thread:$0]  (!%p10887_p5), %s14580_s10, 512, %s434_s28, [#allocation10], %s14632_s19, %s14632_s19, %s10784_s15  }
  0x48   : > { %p10741_p12 = scmp.ne.s32.totalorder %s454_s18, %s10740_s26  ;;  %s10747_s21 = scalar_lea.vmem %s454_s18, 32 }
  0x49   : > { %p10748_p1 = scmp.lt.s32.totalorder %s454_s18, %s454_s18  ;;  %p10749_p4 = scmp.lt.s32.totalorder %s10747_s21, %s10740_s26 }
  0x4a   : > { %p10743_p13 = pnand %p10741_p12, %p10897_p6 }
  0x4b   : > { %p10750_p7 = por %p10749_p4, %p10748_p1 }
  0x4c   : > { %p10744_p0 = pneg %p10743_p13 }
  0x4e   : > { %p10751_p8 = pnand %p10750_p7, %p10744_p0 }
  0x50   : > { %10754 = shalt.err (!%p10751_p8)
}
  0x51   : > { %10257 = dma.hbm_to_vmem [thread:$0]  (!%p10887_p5), %s14583_s13, 16, %s454_s18, [#allocation13]  }
  0x52   : > { %483 = sbr.rel (%p10877_p3) target bundleno = 2142 (0x85e), region = 76 }
  0x57   : > { %10760 = dma.done.wait (%p10258_p2), [#allocation5], 16  }
  0x58   : > { %10762 = vsyncadd (%p10258_p2), [#allocation5], 4294967280 }
  0x59   : > { %10764 = dma.done.wait (%p10258_p2), [#allocation7], 32  }
  0x5a   : > { %10766 = vsyncadd (%p10258_p2), [#allocation7], 4294967264 }
  0x5b   : > { %10768 = dma.done.wait (%p10258_p2), [#allocation10], 1024  }
  0x5c   : > { %10770 = vsyncadd (%p10258_p2), [#allocation10], 4294966272 }
  0x5d   : > { %10772 = dma.done.wait (%p10258_p2), [#allocation13], 16  }
  0x5e   : > { %10774 = vsyncadd (%p10258_p2), [#allocation13], 4294967280  ;;  %vm574_vm0 = vcmask 519168   ;;  %vm14586_vm1 = vcmask 257024   ;;  %v10787_v0 = vmov 0   ;;  %v14597_v1 = vmov 0.0  }
  0x5f   : > { %575 = vst.msk [vmem:[#allocation2] sm:$0xf] %vm574_vm0, %v10787_v0  ;;  %576 = vst.msk [vmem:[#allocation2 + $0x4] sm:$0xf] %vm574_vm0, %v10787_v0  ;;  %9087 = vmatprep.subr.mxu1 %v14597_v1  ;;  %s8156_s17 = sshll.u32 %s10872_s16, 1  ;;  %9125 = vmatprep.subr.mxu0 %v14597_v1  ;;  %vm14588_vm2 = vmmov 0  }
  0x60   : > { %577 = vst.msk [vmem:[#allocation2 + $0x8] sm:$0xf] %vm574_vm0, %v10787_v0  ;;  %578 = vst.msk [vmem:[#allocation2 + $0xc] sm:$0xf] %vm574_vm0, %v10787_v0  ;;  %9103 = vmatprep.mubr.msk.f32.mxu1 %vm14588_vm2, %v14597_v1  ;;  %p556_p2 = scmp.lt.s32.totalorder %s8156_s17, 3  ;;  %9133 = vmatprep.mubr.msk.f32.mxu0 %vm14588_vm2, %v14597_v1  ;;  %v11048_v2 = vld [vmem:[%s14574_s4 + $0x38] sm:$0xff] }
  0x61   : > { %579 = vst.msk [vmem:[#allocation2 + $0x10] sm:$0xf] %vm574_vm0, %v10787_v0  ;;  %580 = vst.msk [vmem:[#allocation2 + $0x14] sm:$0xf] %vm574_vm0, %v10787_v0  ;;  %v11053_v3 = vld [vmem:[%s14574_s4 + $0x30] sm:$0xff]  ;;  %vm14590_vm3 = vcmask 523264   ;;  %9088 = vmatpush3.msra.mxu1 %v11048_v2 }
  0x62   : > { %581 = vst.msk [vmem:[#allocation2 + $0x18] sm:$0xf] %vm574_vm0, %v10787_v0  ;;  %582 = vst.msk [vmem:[#allocation2 + $0x1c] sm:$0xf] %vm574_vm0, %v10787_v0  ;;  %s15078_s17 = smov (!%p556_p2, %s8156_s17), 3  ;;  %9089 = vmatprep.subr.mxu1 %v14597_v1  ;;  %v11067_v4 = vld [vmem:[%s14574_s4 + $0x28] sm:$0xff] }
  0x63   : > { %583 = vst.msk [vmem:[#allocation2 + $0x20] sm:$0xf] %vm574_vm0, %v10787_v0  ;;  %584 = vst.msk [vmem:[#allocation2 + $0x24] sm:$0xf] %vm574_vm0, %v10787_v0  ;;  %s8725_s20 = sshll.u32 %s15078_s17, 6  ;;  %v11072_v5 = vld [vmem:[%s14574_s4 + $0x20] sm:$0xff]  ;;  %9090 = vmatpush3.msra.mxu1 %v11053_v3 }
  0x64   : > { %585 = vst.msk [vmem:[#allocation2 + $0x28] sm:$0xf] %vm574_vm0, %v10787_v0  ;;  %586 = vst.msk [vmem:[#allocation2 + $0x2c] sm:$0xf] %vm574_vm0, %v10787_v0  ;;  %s11060_s24 = scalar_lea.vmem %s14570_s0, %s8725_s20  ;;  %9091 = vmatprep.subr.mxu1 %v14597_v1  ;;  %v11097_v12 = vld [vmem:[%s14574_s4 + $0x18] sm:$0xff]  ;;  %v11136_v27 = vld [vmem:[%s14574_s4 + $0x10] sm:$0xff]  ;;  %s14485_s28 = scalar_lea.vmem %s14584_s14, %s8725_s20 }
  0x65   : > { %587 = vst.msk [vmem:[#allocation2 + $0x30] sm:$0xf] %vm574_vm0, %v10787_v0  ;;  %588 = vst.msk [vmem:[#allocation2 + $0x34] sm:$0xf] %vm574_vm0, %v10787_v0  ;;  %v11075_v6 = vld [vmem:[%s11060_s24] sm:$0xff]  ;;  %v11079_v7 = vld [vmem:[%s11060_s24 + $0x8] sm:$0xff]  ;;  %9092 = vmatpush3.msra.mxu1 %v11067_v4 }
  0x66   : > { %589 = vst.msk [vmem:[#allocation2 + $0x38] sm:$0xf] %vm574_vm0, %v10787_v0  ;;  %590 = vst.msk [vmem:[#allocation2 + $0x3c] sm:$0xf] %vm574_vm0, %v10787_v0  ;;  %v11082_v8 = vld [vmem:[%s11060_s24 + $0x10] sm:$0xff]  ;;  %v11085_v9 = vld [vmem:[%s11060_s24 + $0x18] sm:$0xff]  ;;  %v11091_v11 = vmul.f32 %v11075_v6, %v11075_v6  ;;  %v696_v19 = vmul.f32 %v11079_v7, %v11079_v7  ;;  %9093 = vmatprep.subr.mxu1 %v14597_v1 }
  0x67   : > { %591 = vst.msk [vmem:[#allocation2 + $0x40] sm:$0xf] %vm574_vm0, %v10787_v0  ;;  %592 = vst.msk [vmem:[#allocation2 + $0x44] sm:$0xf] %vm574_vm0, %v10787_v0  ;;  %v653_v10 = vsel %vm14590_vm3, %v11075_v6, 0.0  ;;  %v11100_v13 = vld [vmem:[%s11060_s24 + $0x20] sm:$0xff]  ;;  %v697_v34 = vmul.f32 %v11082_v8, %v11082_v8  ;;  %9094 = vmatpush3.msra.mxu1 %v11072_v5  ;;  %v698_v50 = vmul.f32 %v11085_v9, %v11085_v9 }
  0x68   : > { %593 = vst.msk [vmem:[#allocation2 + $0x48] sm:$0xf] %vm574_vm0, %v10787_v0  ;;  %594 = vst.msk [vmem:[#allocation2 + $0x4c] sm:$0xf] %vm574_vm0, %v10787_v0  ;;  %v11103_v14 = vld [vmem:[%s11060_s24 + $0x28] sm:$0xff]  ;;  %v11106_v15 = vld [vmem:[%s11060_s24 + $0x30] sm:$0xff]  ;;  %9095 = vmatprep.subr.mxu1 %v14597_v1  ;;  %v699_v51 = vmul.f32 %v11100_v13, %v11100_v13 }
  0x69   : > { %595 = vst.msk [vmem:[#allocation2 + $0x50] sm:$0xf] %vm574_vm0, %v10787_v0  ;;  %596 = vst.msk [vmem:[#allocation2 + $0x54] sm:$0xf] %vm574_vm0, %v10787_v0  ;;  %v654_v16 = vsel %vm14590_vm3, %v11079_v7, 0.0  ;;  %v656_v17 = vsel %vm14590_vm3, %v11082_v8, 0.0  ;;  %9096 = vmatpush3.msra.mxu1 %v11097_v12  ;;  %v700_v53 = vmul.f32 %v11103_v14, %v11103_v14  ;;  %v701_v54 = vmul.f32 %v11106_v15, %v11106_v15 }
  0x6a   : > { %597 = vst.msk [vmem:[#allocation2 + $0x58] sm:$0xf] %vm574_vm0, %v10787_v0  ;;  %598 = vst.msk [vmem:[#allocation2 + $0x5c] sm:$0xf] %vm574_vm0, %v10787_v0  ;;  %v658_v18 = vsel %vm14590_vm3, %v11085_v9, 0.0  ;;  %v11118_v20 = vld [vmem:[%s11060_s24 + $0x38] sm:$0xff]  ;;  %v655_v23 = vadd.f32 %v654_v16, %v653_v10  ;;  %9097 = vmatprep.subr.mxu1 %v14597_v1 }
  0x6b   : > { %599 = vst.msk [vmem:[#allocation2 + $0x60] sm:$0xf] %vm574_vm0, %v10787_v0  ;;  %600 = vst.msk [vmem:[#allocation2 + $0x64] sm:$0xf] %vm574_vm0, %v10787_v0  ;;  %v11121_v21 = vld [vmem:[%s11060_s24 + $0x40] sm:$0xff]  ;;  %v11124_v22 = vld [vmem:[%s11060_s24 + $0x48] sm:$0xff]  ;;  %v702_v55 = vmul.f32 %v11118_v20, %v11118_v20  ;;  %9098 = vmatpush3.msra.mxu1 %v11136_v27 }
  0x6c   : > { %601 = vst.msk [vmem:[#allocation2 + $0x68] sm:$0xf] %vm574_vm0, %v10787_v0  ;;  %602 = vst.msk [vmem:[#allocation2 + $0x6c] sm:$0xf] %vm574_vm0, %v10787_v0  ;;  %v660_v24 = vsel %vm14590_vm3, %v11100_v13, 0.0  ;;  %v662_v25 = vsel %vm14590_vm3, %v11103_v14, 0.0  ;;  %v657_v38 = vadd.f32 %v656_v17, %v655_v23  ;;  %v703_v56 = vmul.f32 %v11121_v21, %v11121_v21  ;;  %9099 = vmatprep.subr.mxu1 %v14597_v1 }
  0x6d   : > { %605 = vst.msk [vmem:[#allocation3] sm:$0xf] %vm14586_vm1, %v10787_v0  ;;  %606 = vst.msk [vmem:[#allocation3 + $0x4] sm:$0xf] %vm14586_vm1, %v10787_v0  ;;  %v664_v26 = vsel %vm14590_vm3, %v11106_v15, 0.0  ;;  %v11139_v28 = vld [vmem:[%s11060_s24 + $0x50] sm:$0xff]  ;;  %v704_v60 = vmul.f32 %v11124_v22, %v11124_v22 }
  0x6e   : > { %607 = vst.msk [vmem:[#allocation3 + $0x8] sm:$0xf] %vm14586_vm1, %v10787_v0  ;;  %608 = vst.msk [vmem:[#allocation3 + $0xc] sm:$0xf] %vm14586_vm1, %v10787_v0  ;;  %v11142_v29 = vld [vmem:[%s11060_s24 + $0x58] sm:$0xff]  ;;  %v11145_v30 = vld [vmem:[%s11060_s24 + $0x60] sm:$0xff]  ;;  %v659_v48 = vadd.f32 %v658_v18, %v657_v38  ;;  %v705_v61 = vmul.f32 %v11139_v28, %v11139_v28 }
  0x6f   : > { %609 = vst.msk [vmem:[#allocation3 + $0x10] sm:$0xf] %vm14586_vm1, %v10787_v0  ;;  %610 = vst.msk [vmem:[#allocation3 + $0x14] sm:$0xf] %vm14586_vm1, %v10787_v0  ;;  %v11149_v31 = vsel %vm14590_vm3, %v11118_v20, 0.0  ;;  %v674_v32 = vsel %vm14590_vm3, %v11121_v21, 0.0  ;;  %v706_v62 = vmul.f32 %v11142_v29, %v11142_v29  ;;  %v707_v63 = vmul.f32 %v11145_v30, %v11145_v30 }
  0x70   : > { %611 = vst.msk [vmem:[#allocation3 + $0x18] sm:$0xf] %vm14586_vm1, %v10787_v0  ;;  %612 = vst.msk [vmem:[#allocation3 + $0x1c] sm:$0xf] %vm14586_vm1, %v10787_v0  ;;  %v675_v33 = vsel %vm14590_vm3, %v11124_v22, 0.0  ;;  %v11159_v35 = vld [vmem:[%s11060_s24 + $0x68] sm:$0xff]  ;;  %v661_v58 = vadd.f32 %v660_v24, %v659_v48 }
  0x71   : > { %613 = vst.msk [vmem:[#allocation3 + $0x20] sm:$0xf] %vm14586_vm1, %v10787_v0  ;;  %614 = vst.msk [vmem:[#allocation3 + $0x24] sm:$0xf] %vm14586_vm1, %v10787_v0  ;;  %v11162_v36 = vld [vmem:[%s11060_s24 + $0x70] sm:$0xff]  ;;  %v11165_v37 = vld [vmem:[%s11060_s24 + $0x78] sm:$0xff]  ;;  %v676_v39 = vadd.f32 %v675_v33, %v674_v32 }
  0x72   : > { %615 = vst.msk [vmem:[#allocation3 + $0x28] sm:$0xf] %vm14586_vm1, %v10787_v0  ;;  %616 = vst.msk [vmem:[#allocation3 + $0x2c] sm:$0xf] %vm14586_vm1, %v10787_v0  ;;  %v677_v40 = vsel %vm14590_vm3, %v11139_v28, 0.0  ;;  %v679_v41 = vsel %vm14590_vm3, %v11142_v29, 0.0  ;;  %v709_v10 = vmul.f32 %v11162_v36, %v11162_v36  ;;  %v663_v16 = vadd.f32 %v662_v25, %v661_v58 }
  0x73   : > { %617 = vst.msk [vmem:[#allocation3 + $0x30] sm:$0xf] %vm14586_vm1, %v10787_v0  ;;  %618 = vst.msk [vmem:[#allocation3 + $0x34] sm:$0xf] %vm14586_vm1, %v10787_v0  ;;  %v11175_v42 = vld [vmem:[%s14574_s4 + $0x8] sm:$0xff]  ;;  %v681_v43 = vsel %vm14590_vm3, %v11145_v30, 0.0  ;;  %v678_v49 = vadd.f32 %v677_v40, %v676_v39  ;;  %v710_v18 = vmul.f32 %v11165_v37, %v11165_v37 }
  0x74   : > { %619 = vst.msk [vmem:[#allocation3 + $0x38] sm:$0xf] %vm14586_vm1, %v10787_v0  ;;  %620 = vst.msk [vmem:[#allocation3 + $0x3c] sm:$0xf] %vm14586_vm1, %v10787_v0  ;;  %v683_v44 = vsel %vm14590_vm3, %v11159_v35, 0.0  ;;  %v685_v45 = vsel %vm14590_vm3, %v11162_v36, 0.0  ;;  %9100 = vmatpush3.msra.mxu1 %v11175_v42  ;;  %v665_v25 = vadd.f32 %v664_v26, %v663_v16 }
  0x75   : > { %621 = vst.msk [vmem:[#allocation3 + $0x40] sm:$0xf] %vm14586_vm1, %v10787_v0  ;;  %622 = vst.msk [vmem:[#allocation3 + $0x44] sm:$0xf] %vm14586_vm1, %v10787_v0  ;;  %v687_v46 = vsel %vm14590_vm3, %v11165_v37, 0.0  ;;  %v11188_v47 = vld [vmem:[%s14575_s5 + $0x18] sm:$0xff]  ;;  %v680_v59 = vadd.f32 %v679_v41, %v678_v49  ;;  %9101 = vmatprep.subr.mxu1 %v14597_v1 }
  0x76   : > { %623 = vst.msk [vmem:[#allocation3 + $0x48] sm:$0xf] %vm14586_vm1, %v10787_v0  ;;  %624 = vst.msk [vmem:[#allocation3 + $0x4c] sm:$0xf] %vm14586_vm1, %v10787_v0  ;;  %v11199_v52 = vld [vmem:[%s14574_s4] sm:$0xff]  ;;  %v11212_v57 = vld [vmem:[%s14575_s5 + $0x10] sm:$0xff]  ;;  %9126 = vmatpush3.msra.mxu0 %v11188_v47  ;;  %v667_v26 = vadd.f32 %v11149_v31, %v665_v25 }
  0x77   : > { %625 = vst.msk [vmem:[#allocation3 + $0x50] sm:$0xf] %vm14586_vm1, %v10787_v0  ;;  %626 = vst.msk [vmem:[#allocation3 + $0x54] sm:$0xf] %vm14586_vm1, %v10787_v0  ;;  %v682_v17 = vadd.f32 %v681_v43, %v680_v59  ;;  %v711_v23 = vsel %vm14590_vm3, %v11091_v11, 0.0  ;;  %v712_v24 = vsel %vm14590_vm3, %v696_v19, 0.0  ;;  %9127 = vmatprep.subr.mxu0 %v14597_v1  ;;  %9102 = vmatpush3.msra.mxu1 %v11199_v52 }
  0x78   : > { %627 = vst.msk [vmem:[#allocation3 + $0x58] sm:$0xf] %vm14586_vm1, %v10787_v0  ;;  %628 = vst.msk [vmem:[#allocation3 + $0x5c] sm:$0xf] %vm14586_vm1, %v10787_v0  ;;  %v714_v32 = vsel %vm14590_vm3, %v697_v34, 0.0  ;;  %v716_v33 = vsel %vm14590_vm3, %v698_v50, 0.0  ;;  %v713_v40 = vadd.f32 %v712_v24, %v711_v23  ;;  %9128 = vmatpush3.msra.mxu0 %v11212_v57  ;;  %9106 = vmatprep.subr.mxu1 %v14597_v1 }
  0x79   : > { %629 = vst.msk [vmem:[#allocation3 + $0x60] sm:$0xf] %vm14586_vm1, %v10787_v0  ;;  %630 = vst.msk [vmem:[#allocation3 + $0x64] sm:$0xf] %vm14586_vm1, %v10787_v0  ;;  %v718_v38 = vsel %vm14590_vm3, %v699_v51, 0.0  ;;  %v684_v39 = vadd.f32 %v683_v44, %v682_v17  ;;  %v720_v11 = vsel %vm14590_vm3, %v700_v53, 0.0  ;;  %9129 = vmatprep.subr.mxu0 %v14597_v1 }
  0x7a   : > { %631 = vst.msk [vmem:[#allocation3 + $0x68] sm:$0xf] %vm14586_vm1, %v10787_v0  ;;  %632 = vst.msk [vmem:[#allocation3 + $0x6c] sm:$0xf] %vm14586_vm1, %v10787_v0  ;;  %v708_v0 = vmul.f32 %v11159_v35, %v11159_v35  ;;  %v722_v19 = vsel %vm14590_vm3, %v701_v54, 0.0  ;;  %v724_v34 = vsel %vm14590_vm3, %v702_v55, 0.0  ;;  %v715_v48 = vadd.f32 %v714_v32, %v713_v40 }
  0x7b   : > { %v732_v41 = vsel %vm14590_vm3, %v703_v56, 0.0  ;;  %v733_v43 = vsel %vm14590_vm3, %v704_v60, 0.0  ;;  %v686_v44 = vadd.f32 %v685_v45, %v684_v39  ;;  %v735_v50 = vsel %vm14590_vm3, %v705_v61, 0.0  ;;  %p562_p3 = scmp.lt.s32.totalorder %s10872_s16, 1 }
  0x7c   : > { %v734_v49 = vadd.f32 %v733_v43, %v732_v41  ;;  %v737_v51 = vsel %vm14590_vm3, %v706_v62, 0.0  ;;  %v739_v53 = vsel %vm14590_vm3, %v707_v63, 0.0  ;;  %v741_v54 = vsel %vm14590_vm3, %v708_v0, 0.0 }
  0x7d   : > { %v668_v55 = vrot.slane %v667_v26, 4  ;;  %v688_v58 = vadd.f32 %v687_v46, %v686_v44  ;;  %v717_v56 = vadd.f32 %v716_v33, %v715_v48  ;;  %v743_v60 = vsel %vm14590_vm3, %v709_v10, 0.0  ;;  %s15080_s16 = smov (!%p562_p3, %s10872_s16), 1 }
  0x7e   : > { %v736_v59 = vadd.f32 %v735_v50, %v734_v49  ;;  %v745_v16 = vsel %vm14590_vm3, %v710_v18, 0.0  ;;  %vm763_vm4 = vcmask 1041409   ;;  %vm14587_vm5 = vcmask 261120   ;;  %s8159_s15 = sshll.u32 %s15080_s16, 1 }
  0x7f   : > { %v669_v31 = vadd.f32 %v668_v55, %v667_v26  ;;  %v689_v45 = vrot.slane %v688_v58, 4  ;;  %v719_v17 = vadd.f32 %v718_v38, %v717_v56  ;;  %vm1353_vm6 = vcmask 517120   ;;  %s565_s18 = scalar_lea.vmem %s14571_s1, %s8159_s15 }
  0x80   : > { %v738_v23 = vadd.f32 %v737_v51, %v736_v59  ;;  %vm1354_vm7 = vsmask.f32 1280  ;;  %vm1372_vm8 = vcmask 519170   ;;  %vm1373_vm9 = vsmask.f32 7946 }
  0x81   : > { %v670_v61 = vrot.slane %v669_v31, 2  ;;  %v690_v24 = vadd.f32 %v689_v45, %v688_v58  ;;  %v721_v62 = vadd.f32 %v720_v11, %v719_v17  ;;  %v10291_v45 = vld [vmem:[%s14576_s6 + $0x10] sm:$0xff]   ;;  %v10292_v17 = vld [vmem:[%s14576_s6 + $0x38] sm:$0xff]   ;;  %vm1378_vm10 = vcmask 518144  }
  0x82   : > { %v740_v32 = vadd.f32 %v739_v53, %v738_v23  ;;  %v10293_v23 = vld [vmem:[%s14576_s6 + $0x8] sm:$0xff]   ;;  %vm14591_vm11 = vsmask.f32 2304  ;;  %vm1398_vm12 = vcmask 519171   ;;  %vm1399_vm13 = vsmask.f32 7950 }
  0x83   : > { %v671_v63 = vadd.f32 %v670_v61, %v669_v31  ;;  %v691_v25 = vrot.slane %v690_v24, 2  ;;  %v723_v0 = vadd.f32 %v722_v19, %v721_v62  ;;  %v10290_v31 = vld [vmem:[%s14576_s6 + $0x18] sm:$0xff]   ;;  %v10295_v62 = vld [vmem:[%s14576_s6] sm:$0xff]   ;;  %vm1427_vm14 = vcmask 516096  }
  0x84   : > { %v742_v39 = vadd.f32 %v741_v54, %v740_v32  ;;  %vm1405_vm15 = vsmask.f32 3328  ;;  %vm1428_vm1 = vsmask.f32 256 }
  0x85   : > { %v672_v46 = vrot.slane %v671_v63, 1  ;;  %v692_v33 = vadd.f32 %v691_v25, %v690_v24  ;;  %v725_v40 = vadd.f32 %v724_v34, %v723_v0  ;;  %v10294_v24 = vld [vmem:[%s14576_s6 + $0x30] sm:$0xff]   ;;  %v10298_v25 = vld [vmem:[%s14576_s6 + $0x20] sm:$0xff]   ;;  %v10790_v0 = vmov 1966171168  }
  0x86   : > { %v744_v41 = vadd.f32 %v743_v60, %v742_v39  ;;  %v1073_v39 = vunpack.c.l.s4 %v10790_v0 }
  0x87   : > { %v673_v10 = vadd.f32 %v672_v46, %v671_v63  ;;  %v693_v43 = vrot.slane %v692_v33, 1  ;;  %v726_v18 = vrot.slane %v725_v40, 4  ;;  %v10296_v63 = vld [vmem:[%s14576_s6 + $0x28] sm:$0xff]   ;;  %v1075_v46 = vlaneseq }
  0x88   : > { %v746_v26 = vadd.f32 %v745_v16, %v744_v41 }
  0x89   : > { %v694_v44 = vadd.f32 %v693_v43, %v692_v33  ;;  %v727_v38 = vadd.f32 %v726_v18, %v725_v40  ;;  %v1074_v33 = vunpack.c.0.s8 %v1073_v39  ;;  %v1076_v40 = vshrl.u32 %v1075_v46, 7 }
  0x8a   : > { %v747_v48 = vrot.slane %v746_v26, 4 }
  0x8b   : > { %v764_v49 = vsel %vm763_vm4, %v694_v44, %v673_v10  ;;  %v728_v50 = vrot.slane %v727_v38, 2  ;;  %v11332_v41 = vsub.s32 %v1074_v33, %v1076_v40  ;;  %v11336_v18 = vsub.s32 0, %v1076_v40 }
  0x8c   : > { %v748_v11 = vadd.f32 %v747_v48, %v746_v26  ;;  %9104 = vmatmul.mubr.msk.f32.vlgmr.msra.gmra.mxu1 %vm14590_vm3, %v764_v49 }
  0x8d   : > { %9107 = vmatpush3.msra.mxu1 %v11048_v2  ;;  %9122 = vmatprep.mubr.msk.f32.mxu1 %vm14588_vm2, %v14597_v1  ;;  %v729_v19 = vadd.f32 %v728_v50, %v727_v38  ;;  %14633 = vst [vmem:[#allocation18_spill] sm:$0xff] %v11332_v41  ;;  %14634 = vst [vmem:[#allocation19_spill] sm:$0xff] %v11336_v18 }
  0x8e   : > { %v749_v34 = vrot.slane %v748_v11, 2  ;;  %9108 = vmatprep.subr.mxu1 %v14597_v1 }
  0x8f   : > { %9109 = vmatpush3.msra.mxu1 %v11053_v3  ;;  %v730_v53 = vrot.slane %v729_v19, 1 }
  0x90   : > { %v750_v51 = vadd.f32 %v749_v34, %v748_v11  ;;  %9110 = vmatprep.subr.mxu1 %v14597_v1 }
  0x91   : > { %9111 = vmatpush3.msra.mxu1 %v11067_v4  ;;  %v731_v2 = vadd.f32 %v730_v53, %v729_v19  ;;  %v921_v4 = vld [vmem:[%s14575_s5 + $0x8] sm:$0xff] }
  0x92   : > { %v751_v54 = vrot.slane %v750_v51, 1  ;;  %9112 = vmatprep.subr.mxu1 %v14597_v1  ;;  %9130 = vmatpush3.msra.mxu0 %v921_v4 }
  0x93   : > { %9113 = vmatpush3.msra.mxu1 %v11072_v5  ;;  %9131 = vmatprep.subr.mxu0 %v14597_v1  ;;  %v920_v5 = vld [vmem:[%s14575_s5] sm:$0xff] }
  0x94   : > { %9114 = vmatprep.subr.mxu1 %v14597_v1  ;;  %v752_v55 = vadd.f32 %v751_v54, %v750_v51  ;;  %9132 = vmatpush3.msra.mxu0 %v920_v5 }
  0x95   : > { %9115 = vmatpush3.msra.mxu1 %v11097_v12  ;;  %9147 = vmatprep.subr.bf16.mxu0 %v14597_v1 }
  0x96   : > { %9116 = vmatprep.subr.mxu1 %v14597_v1  ;;  %v841_v3 = vsel %vm763_vm4, %v752_v55, %v731_v2  ;;  %vm1422_vm4 = vsmask.f32 7938 }
  0x97   : > { %9117 = vmatpush3.msra.mxu1 %v11136_v27 }
  0x98   : > { %9118 = vmatprep.subr.mxu1 %v14597_v1 }
  0x99   : > { %9119 = vmatpush3.msra.mxu1 %v11175_v42 }
  0x9a   : > { %9120 = vmatprep.subr.mxu1 %v14597_v1 }
  0x9b   : > { %9121 = vmatpush3.msra.mxu1 %v11199_v52 }
  0x9c   : > { %9123 = vmatmul.mubr.msk.f32.vlgmr.msra.gmra.mxu1 %vm14590_vm3, %v841_v3  ;;  %9136 = vmatprep.subr.mxu1 %v14597_v1  ;;  %vm11425_vm3 = vmand %vm1398_vm12, %vm1399_vm13 }
  0x9d   : > { %9137 = vmatpush3.msra.mxu1 %v11188_v47  ;;  %9144 = vmatprep.mubr.msk.f32.mxu1 %vm14588_vm2, %v14597_v1  ;;  %vm11441_vm12 = vmand %vm1378_vm10, %vm14591_vm11 }
  0x9e   : > { %9138 = vmatprep.subr.mxu1 %v14597_v1  ;;  %vm11459_vm10 = vmand %vm1427_vm14, %vm1428_vm1  ;;  %vm1348_vm14 = vsmask.f32 7942 }
  0x9f   : > { %9139 = vmatpush3.msra.mxu1 %v11212_v57  ;;  %vm11468_vm11 = vmand %vm574_vm0, %vm1405_vm15 }
  0xa0   : > { %9140 = vmatprep.subr.mxu1 %v14597_v1 }
  0xa1   : > { %9141 = vmatpush3.msra.mxu1 %v921_v4 }
  0xa2   : > { %9142 = vmatprep.subr.mxu1 %v14597_v1 }
  0xa3   : > { %9143 = vmatpush3.msra.mxu1 %v920_v5 }
  0xa4   : > { %9207 = vmatprep.subr.bf16.mxu1 %v14597_v1 }
 0x14c   : > { %v833_v12 = vpop.f32.mrf.mxu1 }
 0x14d   : > { %v838_v27 = vmul.f32 0.0078125, %v833_v12 }
 0x14e   : > { %v9105_v42 = vpop.f32.mrf.mxu1 }
 0x14f   : > { %9134 = vmatmul.mubr.msk.f32.vlgmr.msra.gmra.mxu0 %vm14587_vm5, %v838_v27  ;;  %v915_v52 = vmul.f32 %v838_v27, %v838_v27 }
 0x150   : > { %9155 = vmatprep.mubr.msk.bf16.mxu0 %vm14588_vm2, %v14597_v1  ;;  %9148 = vmatpush3.bf16.msra.mxu0 %v10292_v17 }
 0x151   : > { %9149 = vmatprep.subr.bf16.mxu0 %v14597_v1 }
 0x154   : > { %9150 = vmatpush3.bf16.msra.mxu0 %v10294_v24 }
 0x155   : > { %9151 = vmatprep.subr.bf16.mxu0 %v14597_v1 }
 0x158   : > { %9152 = vmatpush3.bf16.msra.mxu0 %v10296_v63 }
 0x159   : > { %9153 = vmatprep.subr.bf16.mxu0 %v14597_v1 }
 0x15c   : > { %v910_v47 = vpop.f32.mrf.mxu1  ;;  %9154 = vmatpush3.bf16.msra.mxu0 %v10298_v25 }
 0x15d   : > { %v914_v57 = vmul.f32 0.0078125, %v910_v47  ;;  %9267 = vmatprep.subr.bf16.mxu0 %v14597_v1 }
 0x15e   : > { %v9124_v58 = vpop.f32.mrf.mxu1 }
 0x15f   : > { %v916_v56 = vsub.f32 %v914_v57, %v915_v52 }
 0x161   : > { %v917_v59 = vmax.f32 %v916_v56, 0.0 }
 0x163   : > { %v918_v60 = vadd.f32 1e-05, %v917_v59 }
 0x165   : > { %10438 = vrsqrt.f32 %v918_v60 }
 0x172   : > { %v10439_v16 = vpop.eup %10438 }
 0x173   : > { %9145 = vmatmul.mubr.msk.f32.vlgmr.msra.gmra.mxu1 %vm14587_vm5, %v10439_v16  ;;  %vm11419_vm5 = vmand %vm1353_vm6, %vm1354_vm7 }
 0x174   : > { %9215 = vmatprep.mubr.msk.bf16.mxu1 %vm14588_vm2, %v14597_v1  ;;  %9208 = vmatpush3.bf16.msra.mxu1 %v10290_v31  ;;  %vm1347_vm2 = vcmask 519169   ;;  %vm11433_vm6 = vmand %vm1372_vm8, %vm1373_vm9 }
 0x175   : > { %9209 = vmatprep.subr.bf16.mxu1 %v14597_v1  ;;  %vm11450_vm8 = vmand %vm574_vm0, %vm1422_vm4 }
 0x176   : > { %vm11485_vm0 = vmand %vm1347_vm2, %vm1348_vm14  ;;  %vm14651_vm2 = vcmask 523264  }
 0x178   : > { %9210 = vmatpush3.bf16.msra.mxu1 %v10291_v45  ;;  %v8168_v45 = vld [vmem:[#allocation4] ss:$0 sm:$0xff] }
 0x179   : > { %9211 = vmatprep.subr.bf16.mxu1 %v14597_v1 }
 0x17c   : > { %9212 = vmatpush3.bf16.msra.mxu1 %v10293_v23 }
 0x17d   : > { %9213 = vmatprep.subr.bf16.mxu1 %v14597_v1 }
 0x180   : > { %9214 = vmatpush3.bf16.msra.mxu1 %v10295_v62 }
 0x181   : > { %9327 = vmatprep.subr.bf16.mxu1 %v14597_v1 }
 0x20f   : > { %v994_v61 = vpop.f32.mrf.mxu0 }
 0x210   : > { %v1078_v10 = vrot.slane %v994_v61, %v11332_v41 }
 0x211   : > { %v9135_v32 = vpop.f32.mrf.mxu0 }
 0x212   : > { %v1086_v43 = vrot.slane %v1078_v10, %v11332_v41  ;;  %v1079_v26 = vcombine.high %v1078_v10, %v1078_v10 }
 0x214   : > { %v1097_v44 = vrot.slane %v1086_v43, %v11336_v18  ;;  %v1093_v49 = vrot.slane %v1079_v26, %v11332_v41 }
 0x216   : > { %v1104_v34 = vsub.f32 %v11075_v6, %v1097_v44  ;;  %v1105_v51 = vsub.f32 %v11079_v7, %v1097_v44  ;;  %v1106_v53 = vsub.f32 %v11082_v8, %v1097_v44  ;;  %v1101_v55 = vrot.slane %v1093_v49, %v11336_v18  ;;  %v8167_v6 = vld [vmem:[%s14572_s2] ss:$0 sm:$0xff] }
 0x217   : > { %v1107_v3 = vsub.f32 %v11085_v9, %v1097_v44  ;;  %v1108_v4 = vsub.f32 %v11100_v13, %v1097_v44  ;;  %v1109_v42 = vsub.f32 %v11103_v14, %v1097_v44  ;;  %v1110_v8 = vsub.f32 %v11106_v15, %v1097_v44 }
 0x218   : > { %v1111_v57 = vsub.f32 %v11118_v20, %v1097_v44  ;;  %v1112_v9 = vsub.f32 %v11121_v21, %v1101_v55  ;;  %v1113_v13 = vsub.f32 %v11124_v22, %v1101_v55  ;;  %v1114_v16 = vsub.f32 %v11139_v28, %v1101_v55 }
 0x219   : > { %v1115_v31 = vsub.f32 %v11142_v29, %v1101_v55  ;;  %v1116_v23 = vsub.f32 %v11145_v30, %v1101_v55  ;;  %v1117_v20 = vsub.f32 %v11159_v35, %v1101_v55  ;;  %v1118_v22 = vsub.f32 %v11162_v36, %v1101_v55 }
 0x21a   : > { %v1119_v0 = vsub.f32 %v11165_v37, %v1101_v55 }
 0x233   : > { %v1067_v38 = vpop.f32.mrf.mxu1 }
 0x234   : > { %v1127_v48 = vrot.slane %v1067_v38, %v11332_v41 }
 0x235   : > { %v9146_v50 = vpop.f32.mrf.mxu1 }
 0x236   : > { %v1128_v11 = vcombine.high %v1127_v48, %v1127_v48  ;;  %v1135_v19 = vrot.slane %v1127_v48, %v11332_v41 }
 0x238   : > { %v1142_v54 = vrot.slane %v1128_v11, %v11332_v41  ;;  %v1146_v2 = vrot.slane %v1135_v19, %v11336_v18 }
 0x23a   : > { %v1153_v5 = vmul.f32 %v1146_v2, %v1104_v34  ;;  %v1154_v12 = vmul.f32 %v1146_v2, %v1105_v51  ;;  %v1155_v27 = vmul.f32 %v1146_v2, %v1106_v53  ;;  %v1156_v7 = vmul.f32 %v1146_v2, %v1107_v3 }
 0x23b   : > { %v1150_v47 = vrot.slane %v1142_v54, %v11336_v18  ;;  %v1157_v52 = vmul.f32 %v1146_v2, %v1108_v4  ;;  %v1158_v58 = vmul.f32 %v1146_v2, %v1109_v42  ;;  %v1159_v56 = vmul.f32 %v1146_v2, %v1110_v8 }
 0x23c   : > { %v1175_v59 = vmul.f32 %v8167_v6, %v1153_v5  ;;  %v1176_v14 = vmul.f32 %v8167_v6, %v1154_v12  ;;  %v1177_v60 = vmul.f32 %v8167_v6, %v1155_v27  ;;  %v1160_v15 = vmul.f32 %v1146_v2, %v1111_v57 }
 0x23d   : > { %v1178_v17 = vmul.f32 %v8167_v6, %v1156_v7  ;;  %v1161_v61 = vmul.f32 %v1150_v47, %v1112_v9  ;;  %v1179_v21 = vmul.f32 %v8167_v6, %v1157_v52  ;;  %v1162_v24 = vmul.f32 %v1150_v47, %v1113_v13 }
 0x23e   : > { %v1163_v62 = vmul.f32 %v1150_v47, %v1114_v16  ;;  %v1180_v32 = vmul.f32 %v8167_v6, %v1158_v58  ;;  %v1181_v63 = vmul.f32 %v8167_v6, %v1159_v56  ;;  %v11364_v25 = vadd.f32 %v8168_v45, %v1175_v59 }
 0x23f   : > { %v11366_v28 = vadd.f32 %v8168_v45, %v1176_v14  ;;  %v11368_v29 = vadd.f32 %v8168_v45, %v1177_v60  ;;  %v1164_v39 = vmul.f32 %v1150_v47, %v1115_v31  ;;  %v1182_v30 = vmul.f32 %v8167_v6, %v1160_v15 }
 0x240   : > { %v11371_v46 = vadd.f32 %v8168_v45, %v1178_v17  ;;  %v1165_v35 = vmul.f32 %v1150_v47, %v1116_v23  ;;  %v1166_v33 = vmul.f32 %v1150_v47, %v1117_v20  ;;  %v1183_v40 = vmul.f32 %v8167_v6, %v1161_v61 }
 0x241   : > { %v11373_v36 = vadd.f32 %v8168_v45, %v1179_v21  ;;  %v1167_v10 = vmul.f32 %v1150_v47, %v1118_v22  ;;  %v1184_v43 = vmul.f32 %v8167_v6, %v1162_v24  ;;  %v1185_v26 = vmul.f32 %v8167_v6, %v1163_v62 }
 0x242   : > { %v11375_v44 = vadd.f32 %v8168_v45, %v1180_v32  ;;  %v11377_v38 = vadd.f32 %v8168_v45, %v1181_v63  ;;  %v8169_v48 = vmul.f32 -1.442695, %v11364_v25  ;;  %v8170_v37 = vmul.f32 -1.442695, %v11366_v28 }
 0x243   : > { %v8171_v49 = vmul.f32 -1.442695, %v11368_v29  ;;  %v1168_v50 = vmul.f32 %v1150_v47, %v1119_v0  ;;  %v1186_v11 = vmul.f32 %v8167_v6, %v1164_v39  ;;  %v11382_v19 = vadd.f32 %v8168_v45, %v1182_v30 }
 0x244   : > { %v8172_v34 = vmul.f32 -1.442695, %v11371_v46  ;;  %v1187_v51 = vmul.f32 %v8167_v6, %v1165_v35  ;;  %v11385_v53 = vadd.f32 %v8168_v45, %v1183_v40  ;;  %10440 = vpow2.f32 %v8169_v48 }
 0x245   : > { %v8173_v54 = vmul.f32 -1.442695, %v11373_v36  ;;  %v1188_v2 = vmul.f32 %v8167_v6, %v1166_v33  ;;  %v11388_v55 = vadd.f32 %v8168_v45, %v1184_v43  ;;  %10442 = vpow2.f32 %v8170_v37 }
 0x246   : > { %v8174_v3 = vmul.f32 -1.442695, %v11375_v44  ;;  %v1189_v4 = vmul.f32 %v8167_v6, %v1167_v10  ;;  %v11391_v5 = vadd.f32 %v8168_v45, %v1185_v26  ;;  %10444 = vpow2.f32 %v8171_v49 }
 0x247   : > { %v8175_v12 = vmul.f32 -1.442695, %v11377_v38  ;;  %v1190_v27 = vmul.f32 %v8167_v6, %v1168_v50  ;;  %v11394_v42 = vadd.f32 %v8168_v45, %v1186_v11  ;;  %10446 = vpow2.f32 %v8172_v34 }
 0x248   : > { %v8176_v7 = vmul.f32 -1.442695, %v11382_v19  ;;  %v11397_v8 = vadd.f32 %v8168_v45, %v1187_v51  ;;  %10448 = vpow2.f32 %v8173_v54  ;;  %v8177_v47 = vmul.f32 -1.442695, %v11385_v53 }
 0x249   : > { %v11400_v52 = vadd.f32 %v8168_v45, %v1188_v2  ;;  %10450 = vpow2.f32 %v8174_v3  ;;  %v8178_v57 = vmul.f32 -1.442695, %v11388_v55  ;;  %v11403_v9 = vadd.f32 %v8168_v45, %v1189_v4 }
 0x24a   : > { %10452 = vpow2.f32 %v8175_v12  ;;  %v8179_v6 = vmul.f32 -1.442695, %v11391_v5  ;;  %v11406_v13 = vadd.f32 %v8168_v45, %v1190_v27  ;;  %v8180_v58 = vmul.f32 -1.442695, %v11394_v42 }
 0x24b   : > { %10454 = vpow2.f32 %v8176_v7  ;;  %v8181_v56 = vmul.f32 -1.442695, %v11397_v8  ;;  %v8182_v59 = vmul.f32 -1.442695, %v11400_v52  ;;  %v8183_v14 = vmul.f32 -1.442695, %v11403_v9 }
 0x24c   : > { %10456 = vpow2.f32 %v8177_v47  ;;  %v8184_v60 = vmul.f32 -1.442695, %v11406_v13 }
 0x24d   : > { %10458 = vpow2.f32 %v8178_v57 }
 0x24e   : > { %10460 = vpow2.f32 %v8179_v6 }
 0x24f   : > { %10462 = vpow2.f32 %v8180_v58 }
 0x250   : > { %10464 = vpow2.f32 %v8181_v56 }
 0x251   : > { %v10441_v16 = vpop.eup %10440  ;;  %10466 = vpow2.f32 %v8182_v59 }
 0x252   : > { %v10443_v31 = vpop.eup %10442  ;;  %10468 = vpow2.f32 %v8183_v14  ;;  %v1261_v45 = vadd.f32 1.0, %v10441_v16 }
 0x253   : > { %v10445_v15 = vpop.eup %10444  ;;  %10470 = vpow2.f32 %v8184_v60  ;;  %v1262_v17 = vadd.f32 1.0, %v10443_v31 }
 0x254   : > { %v10447_v23 = vpop.eup %10446  ;;  %v1263_v20 = vadd.f32 1.0, %v10445_v15  ;;  %10472 = vrcp.f32 %v1261_v45 }
 0x255   : > { %v10449_v61 = vpop.eup %10448  ;;  %v1264_v21 = vadd.f32 1.0, %v10447_v23  ;;  %10474 = vrcp.f32 %v1262_v17  ;;  %v10318_v17 = vld [vmem:[%s14576_s6 + $0x68] sm:$0xff]  }
 0x256   : > { %v10451_v22 = vpop.eup %10450  ;;  %v1265_v24 = vadd.f32 1.0, %v10449_v61  ;;  %10476 = vrcp.f32 %v1263_v20 }
 0x257   : > { %v10453_v62 = vpop.eup %10452  ;;  %v1266_v32 = vadd.f32 1.0, %v10451_v22  ;;  %10478 = vrcp.f32 %v1264_v21  ;;  %v1401_v22 = vld [vmem:[#allocation2 + $0xc] sm:$0x8] }
 0x258   : > { %v10455_v63 = vpop.eup %10454  ;;  %v1267_v39 = vadd.f32 1.0, %v10453_v62  ;;  %10480 = vrcp.f32 %v1265_v24 }
 0x259   : > { %v10457_v0 = vpop.eup %10456  ;;  %v1268_v35 = vadd.f32 1.0, %v10455_v63  ;;  %10482 = vrcp.f32 %v1266_v32  ;;  %v1375_v63 = vld [vmem:[#allocation2 + $0x8] sm:$0xc]  ;;  %v11610_v32 = vld [vmem:[#allocation2 + $0x64] sm:$0xf] }
 0x25a   : > { %v10459_v30 = vpop.eup %10458  ;;  %v1269_v40 = vadd.f32 1.0, %v10457_v0  ;;  %10484 = vrcp.f32 %v1267_v39 }
 0x25b   : > { %v10461_v33 = vpop.eup %10460  ;;  %v1270_v26 = vadd.f32 1.0, %v10459_v30  ;;  %10486 = vrcp.f32 %v1268_v35 }
 0x25c   : > { %v10463_v10 = vpop.eup %10462  ;;  %v1271_v49 = vadd.f32 1.0, %v10461_v33  ;;  %10488 = vrcp.f32 %v1269_v40  ;;  %v1356_v40 = vld [vmem:[#allocation2 + $0x8] sm:$0x3] }
 0x25d   : > { %v10465_v43 = vpop.eup %10464  ;;  %v1272_v34 = vadd.f32 1.0, %v10463_v10  ;;  %10490 = vrcp.f32 %v1270_v26 }
 0x25e   : > { %v10467_v48 = vpop.eup %10466  ;;  %v1273_v3 = vadd.f32 1.0, %v10465_v43  ;;  %10492 = vrcp.f32 %v1271_v49  ;;  %v1381_v49 = vld [vmem:[#allocation2 + $0xc] sm:$0x7] }
 0x25f   : > { %v10469_v37 = vpop.eup %10468  ;;  %v1274_v27 = vadd.f32 1.0, %v10467_v48  ;;  %10494 = vrcp.f32 %v1272_v34 }
 0x260   : > { %v10471_v50 = vpop.eup %10470  ;;  %v1275_v57 = vadd.f32 1.0, %v10469_v37  ;;  %10496 = vrcp.f32 %v1273_v3  ;;  %v1424_v3 = vld [vmem:[#allocation2 + $0x14] sm:$0xf] }
 0x261   : > { %v10473_v11 = vpop.eup %10472  ;;  %v1276_v58 = vadd.f32 1.0, %v10471_v50  ;;  %10498 = vrcp.f32 %v1274_v27 }
 0x262   : > { %v10475_v51 = vpop.eup %10474  ;;  %v1309_v54 = vmul.f32 %v10473_v11, %v11364_v25  ;;  %10500 = vrcp.f32 %v1275_v57  ;;  %v1407_v57 = vld [vmem:[#allocation2 + $0x10] sm:$0xf] }
 0x263   : > { %v10477_v2 = vpop.eup %10476  ;;  %v1310_v4 = vmul.f32 %v10475_v51, %v11366_v28  ;;  %10502 = vrcp.f32 %v1276_v58 }
 0x264   : > { %v10479_v12 = vpop.eup %10478  ;;  %v1311_v7 = vmul.f32 %v10477_v2, %v11368_v29  ;;  %v8727_v47 = vpack.c.bf16 %v1309_v54, %v1309_v54 }
 0x265   : > { %v1312_v25 = vmul.f32 %v10479_v12, %v11371_v46  ;;  %v8728_v6 = vpack.c.bf16 %v1310_v4, %v1310_v4  ;;  %v10481_v60 = vpop.eup %10480  ;;  %v1430_v12 = vld [vmem:[#allocation2 + $0x18] sm:$0x1] }
 0x266   : > { %v1337_v56 = vshrl.u32 %v8727_v47, 16  ;;  %v1340_v59 = vshll.u32 %v8727_v47, 16  ;;  %v8729_v14 = vpack.c.bf16 %v1311_v7, %v1311_v7  ;;  %v10483_v45 = vpop.eup %10482  ;;  %v1313_v35 = vmul.f32 %v10481_v60, %v11373_v36  ;;  %v10315_v47 = vld [vmem:[%s14576_s6 + $0x70] sm:$0xff]  }
 0x267   : > { %v1362_v28 = vshrl.u32 %v8728_v6, 16  ;;  %v1365_v16 = vshll.u32 %v8728_v6, 16  ;;  %v8730_v31 = vpack.c.bf16 %v1312_v25, %v1312_v25  ;;  %v10485_v24 = vpop.eup %10484  ;;  %v1314_v33 = vmul.f32 %v10483_v45, %v11375_v44 }
 0x268   : > { %v1339_v15 = vrot.slane %v1337_v56, 6  ;;  %v1342_v29 = vrot.slane %v1340_v59, 7  ;;  %v1388_v46 = vshll.u32 %v8729_v14, 16  ;;  %v1391_v61 = vshrl.u32 %v8729_v14, 16  ;;  %v10487_v30 = vpop.eup %10486 }
 0x269   : > { %v1364_v23 = vrot.slane %v1362_v28, 5  ;;  %v1367_v20 = vrot.slane %v1365_v16, 6  ;;  %v1413_v39 = vshrl.u32 %v8730_v31, 16  ;;  %v10489_v48 = vpop.eup %10488  ;;  %v1416_v36 = vshll.u32 %v8730_v31, 16 }
 0x26a   : > { %v11429_v62 = vor.u32 %v1342_v29, %v1339_v15  ;;  %v1390_v0 = vrot.slane %v1388_v46, 5  ;;  %v1393_v26 = vrot.slane %v1391_v61, 4  ;;  %v1315_v34 = vmul.f32 %v10485_v24, %v11377_v38  ;;  %v10491_v27 = vpop.eup %10490 }
 0x26b   : > { %v1368_v10 = vor.u32 %v1367_v20, %v1364_v23  ;;  %v1415_v11 = vrot.slane %v1413_v39, 7  ;;  %v1316_v7 = vmul.f32 %v10487_v30, %v11382_v19  ;;  %v1317_v58 = vmul.f32 %v10489_v48, %v11385_v53  ;;  %v10493_v14 = vpop.eup %10492  ;;  %v1447_v30 = vld [vmem:[#allocation2 + $0x18] sm:$0xe] }
 0x26c   : > { %v1344_v37 = vrot.slane %v11429_v62, 4  ;;  %v1402_v50 = vsel %vm11425_vm3, %v1390_v0, %v1401_v22  ;;  %v1394_v2 = vor.u32 %v1393_v26, %v1390_v0  ;;  %v8731_v19 = vpack.c.bf16 %v1313_v35, %v1313_v35  ;;  %v10495_v29 = vpop.eup %10494 }
 0x26d   : > { %v1369_v51 = vrot.slane %v1368_v10, 4  ;;  %v1376_v54 = vsel %vm11433_vm6, %v1368_v10, %v1375_v63  ;;  %1403 = vst [vmem:[#allocation2 + $0xc] sm:$0x8] %v1402_v50  ;;  %v1418_v25 = vor.u32 %v1416_v36, %v1415_v11  ;;  %v1419_v6 = vrot.slane %v1415_v11, 4  ;;  %v10497_v39 = vpop.eup %10496 }
 0x26e   : > { %v1357_v38 = vsel %vm11419_vm5, %v1344_v37, %v1356_v40  ;;  %1377 = vst [vmem:[#allocation2 + $0x8] sm:$0xc] %v1376_v54  ;;  %v1395_v59 = vrot.slane %v1394_v2, 4  ;;  %v8732_v16 = vpack.c.bf16 %v1314_v33, %v1314_v33  ;;  %v1318_v31 = vmul.f32 %v10491_v27, %v11388_v55  ;;  %v10499_v26 = vpop.eup %10498 }
 0x26f   : > { %v1382_v56 = vsel %vm11441_vm12, %v1369_v51, %v1381_v49  ;;  %1358 = vst [vmem:[#allocation2 + $0x8] sm:$0x3] %v1357_v38  ;;  %v1425_v60 = vsel %vm11450_vm8, %v1418_v25, %v1424_v3  ;;  %v1431_v28 = vsel %vm11459_vm10, %v1419_v6, %v1430_v12  ;;  %v1437_v45 = vshrl.u32 %v8731_v19, 16  ;;  %v1486_v49 = vld [vmem:[#allocation2 + $0x20] sm:$0x8]  ;;  %v10501_v36 = vpop.eup %10500 }
 0x270   : > { %1383 = vst [vmem:[#allocation2 + $0xc] sm:$0x7] %v1382_v56  ;;  %v1408_v53 = vsel %vm11468_vm11, %v1395_v59, %v1407_v57  ;;  %v1440_v15 = vshll.u32 %v8731_v19, 16  ;;  %1426 = vst [vmem:[#allocation2 + $0x14] sm:$0xf] %v1425_v60  ;;  %v1456_v46 = vshrl.u32 %v8732_v16, 16  ;;  %v8733_v20 = vpack.c.bf16 %v1315_v34, %v1315_v34  ;;  %v10503_v3 = vpop.eup %10502 }
 0x271   : > { %1432 = vst [vmem:[#allocation2 + $0x18] sm:$0x1] %v1431_v28  ;;  %v1459_v23 = vshll.u32 %v8732_v16, 16  ;;  %v8734_v61 = vpack.c.bf16 %v1316_v7, %v1316_v7  ;;  %1409 = vst [vmem:[#allocation2 + $0x10] sm:$0xf] %v1408_v53  ;;  %v1319_v22 = vmul.f32 %v10493_v14, %v11391_v5  ;;  %v1439_v24 = vrot.slane %v1437_v45, 6 }
 0x272   : > { %v1442_v63 = vrot.slane %v1440_v15, 7  ;;  %v8735_v0 = vpack.c.bf16 %v1317_v58, %v1317_v58  ;;  %v1458_v35 = vrot.slane %v1456_v46, 5  ;;  %v1476_v40 = vshll.u32 %v8733_v20, 16  ;;  %v1466_v5 = vld [vmem:[#allocation2 + $0x1c] sm:$0xc] }
 0x273   : > { %v1461_v33 = vrot.slane %v1459_v23, 6  ;;  %v1479_v10 = vshrl.u32 %v8733_v20, 16  ;;  %v1320_v48 = vmul.f32 %v10495_v29, %v11394_v42  ;;  %v1495_v50 = vshrl.u32 %v8734_v61, 16  ;;  %v1504_v58 = vld [vmem:[#allocation2 + $0x28] sm:$0xf] }
 0x274   : > { %v11490_v37 = vor.u32 %v1442_v63, %v1439_v24  ;;  %v1514_v11 = vshll.u32 %v8735_v0, 16  ;;  %v1478_v51 = vrot.slane %v1476_v40, 5  ;;  %v1517_v2 = vshrl.u32 %v8735_v0, 16  ;;  %v1601_v63 = vld [vmem:[#allocation2 + $0x48] sm:$0x8] }
 0x275   : > { %v11492_v34 = vor.u32 %v1461_v33, %v1458_v35  ;;  %v1481_v54 = vrot.slane %v1479_v10, 4  ;;  %v1321_v12 = vmul.f32 %v10497_v39, %v11397_v8  ;;  %v11498_v42 = vrot.slane %v1495_v50, 7  ;;  %v1489_v8 = vld [vmem:[#allocation2 + $0x24] sm:$0xf] }
 0x276   : > { %v1448_v27 = vsel %vm11485_vm0, %v11490_v37, %v1447_v30  ;;  %v1498_v7 = vshll.u32 %v8734_v61, 16  ;;  %v1322_v38 = vmul.f32 %v10499_v26, %v11400_v52  ;;  %v1487_v6 = vsel %vm11425_vm3, %v1478_v51, %v1486_v49  ;;  %v1350_v61 = vld [vmem:[#allocation2 + $0x4] sm:$0xe] }
 0x277   : > { %v1467_v57 = vsel %vm11433_vm6, %v11492_v34, %v1466_v5  ;;  %v1482_v25 = vor.u32 %v1481_v54, %v1478_v51  ;;  %1449 = vst [vmem:[#allocation2 + $0x18] sm:$0xe] %v1448_v27  ;;  %v11507_v59 = vrot.slane %v1514_v11, 5  ;;  %v1519_v19 = vrot.slane %v1517_v2, 4  ;;  %1488 = vst [vmem:[#allocation2 + $0x20] sm:$0x8] %v1487_v6 }
 0x278   : > { %v1500_v56 = vor.u32 %v1498_v7, %v11498_v42  ;;  %v8736_v14 = vpack.c.bf16 %v1318_v31, %v1318_v31  ;;  %1468 = vst [vmem:[#allocation2 + $0x1c] sm:$0xc] %v1467_v57  ;;  %v1323_v52 = vmul.f32 %v10501_v36, %v11403_v9  ;;  %v8737_v28 = vpack.c.bf16 %v1319_v22, %v1319_v22  ;;  %v1450_v27 = vld [vmem:[#allocation2 + $0x1c] sm:$0x3]  ;;  %v1507_v6 = vld [vmem:[#allocation2 + $0x2c] sm:$0x1] }
 0x279   : > { %v1483_v60 = vrot.slane %v1482_v25, 4  ;;  %v8738_v16 = vpack.c.bf16 %v1320_v48, %v1320_v48  ;;  %v1324_v53 = vmul.f32 %v10503_v3, %v11406_v13  ;;  %v1444_v45 = vrot.slane %v11490_v37, 4  ;;  %v11530_v25 = vld [vmem:[#allocation2 + $0x8] sm:$0xff]  }
 0x27a   : > { %v1505_v15 = vsel %vm11450_vm8, %v1500_v56, %v1504_v58  ;;  %v8739_v29 = vpack.c.bf16 %v1321_v12, %v1321_v12  ;;  %v1552_v23 = vshrl.u32 %v8737_v28, 16  ;;  %v1555_v31 = vshll.u32 %v8737_v28, 16  ;;  %v1527_v28 = vld [vmem:[#allocation2 + $0x38] sm:$0xf] }
 0x27b   : > { %v1490_v46 = vsel %vm11468_vm11, %v1483_v60, %v1489_v8  ;;  %v1571_v20 = vshrl.u32 %v8738_v16, 16  ;;  %1506 = vst [vmem:[#allocation2 + $0x28] sm:$0xf] %v1505_v15  ;;  %v1463_v9 = vrot.slane %v11492_v34, 4  ;;  %v1520_v22 = vor.u32 %v1519_v19, %v11507_v59  ;;  %v1524_v60 = vld [vmem:[#allocation2 + $0x34] sm:$0x8] }
 0x27c   : > { %v1533_v24 = vshrl.u32 %v8736_v14, 16  ;;  %v1574_v13 = vshll.u32 %v8738_v16, 16  ;;  %1491 = vst [vmem:[#allocation2 + $0x24] sm:$0xf] %v1490_v46  ;;  %v1554_v0 = vrot.slane %v1552_v23, 6  ;;  %v1557_v39 = vrot.slane %v1555_v31, 7 }
 0x27d   : > { %v1573_v30 = vrot.slane %v1571_v20, 5  ;;  %v1591_v35 = vshll.u32 %v8739_v29, 16  ;;  %v1594_v40 = vshrl.u32 %v8739_v29, 16  ;;  %v8740_v10 = vpack.c.bf16 %v1322_v38, %v1322_v38  ;;  %v1542_v29 = vld [vmem:[#allocation2 + $0x3c] sm:$0xf] }
 0x27e   : > { %v1576_v33 = vrot.slane %v1574_v13, 6  ;;  %v8741_v26 = vpack.c.bf16 %v1323_v52, %v1323_v52  ;;  %v1501_v48 = vrot.slane %v11498_v42, 4  ;;  %v8742_v49 = vpack.c.bf16 %v1324_v53, %v1324_v53  ;;  %v1469_v42 = vld [vmem:[#allocation2 + $0x20] sm:$0x7] }
 0x27f   : > { %v1593_v5 = vrot.slane %v1591_v35, 5  ;;  %v1351_v50 = vsel %vm11485_vm0, %v11429_v62, %v1350_v61  ;;  %v11522_v11 = vrot.slane %v1533_v24, 7  ;;  %v11524_v36 = vor.u32 %v1557_v39, %v1554_v0  ;;  %v1664_v52 = vld [vmem:[#allocation2] sm:$0xf]  ;;  %v1565_v39 = vld [vmem:[#allocation2 + $0x44] sm:$0x3] }
 0x280   : > { %v1596_v34 = vrot.slane %v1594_v40, 4  ;;  %v1610_v51 = vshrl.u32 %v8740_v10, 16  ;;  %1352 = vst [vmem:[#allocation2 + $0x4] sm:$0xe] %v1351_v50  ;;  %v11526_v54 = vor.u32 %v1576_v33, %v1573_v30  ;;  %v1629_v3 = vshrl.u32 %v8741_v26, 16 }
 0x281   : > { %v1602_v2 = vsel %vm11425_vm3, %v1593_v5, %v1601_v63  ;;  %v1632_v12 = vshll.u32 %v8741_v26, 16  ;;  %v1521_v7 = vrot.slane %v1520_v22, 4  ;;  %v1536_v38 = vshll.u32 %v8736_v14, 16  ;;  %v1545_v46 = vld [vmem:[#allocation2 + $0x40] sm:$0x1] }
 0x282   : > { %v1597_v57 = vor.u32 %v1596_v34, %v1593_v5  ;;  %v1648_v62 = vshrl.u32 %v8742_v49, 16  ;;  %1603 = vst [vmem:[#allocation2 + $0x48] sm:$0x8] %v1602_v2  ;;  %v11532_v58 = vrot.slane %v1610_v51, 7  ;;  %v1631_v8 = vrot.slane %v1629_v3, 6  ;;  %v10314_v2 = vld [vmem:[%s14576_s6 + $0x78] sm:$0xff]  }
 0x283   : > { %v1634_v56 = vrot.slane %v1632_v12, 7  ;;  %v1651_v19 = vshll.u32 %v8742_v49, 16  ;;  %v1538_v16 = vor.u32 %v1536_v38, %v11522_v11  ;;  %v1539_v53 = vrot.slane %v11522_v11, 4  ;;  %v1562_v23 = vld [vmem:[#allocation2 + $0x40] sm:$0xe] }
 0x284   : > { %v1613_v15 = vshll.u32 %v8740_v10, 16  ;;  %v1650_v14 = vrot.slane %v1648_v62, 5  ;;  %v1559_v31 = vrot.slane %v11524_v36, 4  ;;  %v1578_v20 = vrot.slane %v11526_v54, 4  ;;  %v1581_v30 = vld [vmem:[#allocation2 + $0x44] sm:$0xc] }
 0x285   : > { %v11538_v61 = vor.u32 %v1634_v56, %v1631_v8  ;;  %v1653_v22 = vrot.slane %v1651_v19, 6  ;;  %v1598_v24 = vrot.slane %v1597_v57, 4  ;;  %v1781_v13 = vshll.u32 %v11530_v25, 16  ;;  %v1584_v35 = vld [vmem:[#allocation2 + $0x48] sm:$0x7] }
 0x286   : > { %v1451_v63 = vsel %vm11419_vm5, %v1444_v45, %v1450_v27  ;;  %v1470_v0 = vsel %vm11441_vm12, %v1463_v9, %v1469_v42  ;;  %v1604_v33 = vld [vmem:[#allocation2 + $0x4c] sm:$0xf]  ;;  %v1615_v40 = vor.u32 %v1613_v15, %v11532_v58  ;;  %v1616_v10 = vrot.slane %v11532_v58, 4  ;;  %v1619_v45 = vld [vmem:[#allocation2 + $0x50] sm:$0xf] }
 0x287   : > { %v1654_v26 = vor.u32 %v1653_v22, %v1650_v14  ;;  %v11549_v5 = vld [vmem:[#allocation2 + $0x4] sm:$0xf]  ;;  %1452 = vst [vmem:[#allocation2 + $0x1c] sm:$0x3] %v1451_v63  ;;  %1471 = vst [vmem:[#allocation2 + $0x20] sm:$0x7] %v1470_v0  ;;  %v1508_v37 = vsel %vm11459_vm10, %v1501_v48, %v1507_v6  ;;  %v1525_v50 = vsel %vm11425_vm3, %v11507_v59, %v1524_v60 }
 0x288   : > { %v1636_v49 = vrot.slane %v11538_v61, 4  ;;  %v8209_v9 = vcombine.low %v1664_v52, %v11549_v5  ;;  %1509 = vst [vmem:[#allocation2 + $0x2c] sm:$0x1] %v1508_v37  ;;  %v1528_v11 = vsel %vm11468_vm11, %v1521_v7, %v1527_v28  ;;  %v1622_v34 = vld [vmem:[#allocation2 + $0x54] sm:$0x1]  ;;  %v1543_v3 = vsel %vm11450_vm8, %v1538_v16, %v1542_v29  ;;  %v10300_v52 = vld [vmem:[%s14576_s6 + $0x58] sm:$0xff]  }
 0x289   : > { %v1639_v51 = vld [vmem:[#allocation2 + $0x54] sm:$0xe]  ;;  %v1655_v48 = vrot.slane %v1654_v26, 4  ;;  %1526 = vst [vmem:[#allocation2 + $0x34] sm:$0x8] %v1525_v50  ;;  %v1546_v12 = vsel %vm11459_vm10, %v1539_v53, %v1545_v46  ;;  %v1563_v21 = vsel %vm11485_vm0, %v11524_v36, %v1562_v23  ;;  %v1783_v38 = vrot.slane %v1781_v13, 1 }
 0x28a   : > { %1529 = vst [vmem:[#allocation2 + $0x38] sm:$0xf] %v1528_v11  ;;  %v1642_v59 = vld [vmem:[#allocation2 + $0x58] sm:$0x3]  ;;  %v1658_v27 = vld [vmem:[#allocation2 + $0x58] sm:$0xc]  ;;  %9216 = vmatmul.mubr.msk.bf16.vlgmr.msra.gmra.mxu1 %vm14651_vm2, %v8209_v9  ;;  %v1566_v62 = vsel %vm11419_vm5, %v1559_v31, %v1565_v39  ;;  %v1582_v36 = vsel %vm11433_vm6, %v11526_v54, %v1581_v30  ;;  %v1585_v6 = vsel %vm11441_vm12, %v1578_v20, %v1584_v35 }
 0x28b   : > { %v1774_v42 = vshrl.u32 %v8209_v9, 16  ;;  %v1776_v7 = vshll.u32 %v8209_v9, 16  ;;  %1544 = vst [vmem:[#allocation2 + $0x3c] sm:$0xf] %v1543_v3  ;;  %1547 = vst [vmem:[#allocation2 + $0x40] sm:$0x1] %v1546_v12  ;;  %v1605_v58 = vsel %vm11468_vm11, %v1598_v24, %v1604_v33  ;;  %v1620_v56 = vsel %vm11450_vm8, %v1615_v40, %v1619_v45  ;;  %9328 = vmatpush3.bf16.msra.mxu1 %v10314_v2 }
 0x28c   : > { %1564 = vst [vmem:[#allocation2 + $0x40] sm:$0xe] %v1563_v21  ;;  %v1661_v57 = vld [vmem:[#allocation2 + $0x5c] sm:$0x7]  ;;  %vm14652_vm3 = vmmov 0   ;;  %v1623_v19 = vsel %vm11459_vm10, %v1616_v10, %v1622_v34  ;;  %v1640_v54 = vsel %vm11485_vm0, %v11538_v61, %v1639_v51  ;;  %v1643_v44 = vsel %vm11419_vm5, %v1636_v49, %v1642_v59  ;;  %9329 = vmatprep.subr.bf16.mxu1 %v14597_v1  ;;  %v11602_v28 = vld [vmem:[#allocation2 + $0x10] sm:$0xff]   ;;  %vm14653_vm5 = vmmov %vm14651_vm2 }
 0x28d   : > { %9219 = vmatprep.mubr.msk.bf16.mxu1 %vm14652_vm3, %v14597_v1  ;;  %v1778_v8 = vrot.slane %v1776_v7, 1  ;;  %1567 = vst [vmem:[#allocation2 + $0x44] sm:$0x3] %v1566_v62  ;;  %1583 = vst [vmem:[#allocation2 + $0x44] sm:$0xc] %v1582_v36  ;;  %v1659_v4 = vsel %vm11433_vm6, %v1654_v26, %v1658_v27  ;;  %v1662_v55 = vsel %vm11441_vm12, %v1655_v48, %v1661_v57  ;;  %v1785_v43 = vshrl.u32 %v11530_v25, 16 }
 0x28e   : > { %1586 = vst [vmem:[#allocation2 + $0x48] sm:$0x7] %v1585_v6  ;;  %1606 = vst [vmem:[#allocation2 + $0x4c] sm:$0xf] %v1605_v58  ;;  %vm14612_vm11 = vsmask.f32 7424 }
 0x28f   : > { %1621 = vst [vmem:[#allocation2 + $0x50] sm:$0xf] %v1620_v56  ;;  %1624 = vst [vmem:[#allocation2 + $0x54] sm:$0x1] %v1623_v19  ;;  %v1779_v60 = vor.u32 %v1778_v8, %v1774_v42  ;;  %9330 = vmatpush3.bf16.msra.mxu1 %v10315_v47  ;;  %v1789_v53 = vshll.u32 %v11602_v28, 16  ;;  %v10304_v15 = vld [vmem:[%s14576_s6 + $0x50] sm:$0xff]   ;;  %v1787_v29 = vor.u32 %v1785_v43, %v1783_v38 }
 0x290   : > { %1641 = vst [vmem:[#allocation2 + $0x54] sm:$0xe] %v1640_v54  ;;  %1644 = vst [vmem:[#allocation2 + $0x58] sm:$0x3] %v1643_v44  ;;  %9331 = vmatprep.subr.bf16.mxu1 %v14597_v1  ;;  %v2851_v14 = vld [vmem:[#allocation2 + $0x68] sm:$0x3] }
 0x291   : > { %1660 = vst [vmem:[#allocation2 + $0x58] sm:$0xc] %v1659_v4  ;;  %1663 = vst [vmem:[#allocation2 + $0x5c] sm:$0x7] %v1662_v55  ;;  %v1784_v16 = vsel %vm14612_vm11, %v1779_v60, %v1783_v38  ;;  %v10319_v46 = vld [vmem:[%s14576_s6 + $0x60] sm:$0xff]   ;;  %v11627_v31 = vld [vmem:[#allocation2 + $0x18] sm:$0xff]   ;;  %v11634_v22 = vcombine.low %v11610_v32, %v2851_v14 }
 0x292   : > { %9156 = vmatmul.mubr.msk.bf16.vlgmr.msra.gmra.mxu0 %vm14653_vm5, %v1784_v16  ;;  %vm14654_vm6 = vmmov %vm14651_vm2  ;;  %v2255_v23 = vld [vmem:[#allocation2] sm:$0xe]  ;;  %v1791_v20 = vrot.slane %v1789_v53, 1  ;;  %v10308_v61 = vld [vmem:[%s14576_s6 + $0x48] sm:$0xff]   ;;  %v1797_v39 = vshll.u32 %v11627_v31, 16  ;;  %v2270_v30 = vrot.slane %v11530_v25, 1 }
 0x293   : > { %9268 = vmatpush3.bf16.msra.mxu0 %v10300_v52  ;;  %9220 = vmatmul.mubr.msk.bf16.gmra.mxu1 %vm14654_vm6, %v11530_v25  ;;  %14655 = vst [vmem:[#allocation20_spill] sm:$0xff] %v11634_v22  ;;  %v11636_v24 = vld [vmem:[#allocation2 + $0x20] sm:$0xff]   ;;  %v11638_v13 = vld [vmem:[#allocation2 + $0x28] sm:$0xff]   ;;  %v8265_v63 = vcombine.low %v2255_v23, %v11549_v5  ;;  %vm14656_vm12 = vmmov %vm14651_vm2  ;;  %v1793_v35 = vshrl.u32 %v11602_v28, 16  ;;  %vm14611_vm10 = vcmask 1046528   ;;  %v2973_v40 = vshrl.u32 %v11634_v22, 16 }
 0x294   : > { %9159 = vmatprep.mubr.msk.bf16.mxu0 %vm14652_vm3, %v14597_v1  ;;  %9223 = vmatprep.mubr.msk.bf16.mxu1 %vm14652_vm3, %v14597_v1  ;;  %v1792_v0 = vsel %vm14612_vm11, %v1787_v29, %v1791_v20  ;;  %vm14657_vm8 = vmmov %vm14651_vm2  ;;  %v1805_v25 = vshll.u32 %v11636_v24, 16  ;;  %v1813_v10 = vshll.u32 %v11638_v13, 16  ;;  %v10312_v26 = vld [vmem:[%s14576_s6 + $0x40] sm:$0xff]   ;;  %v2511_v5 = vld [vmem:[#allocation2 + $0x8] sm:$0xf]  ;;  %v2272_v49 = vrot.slane %v11602_v28, 1 }
 0x295   : > { %9269 = vmatprep.subr.bf16.mxu0 %v14597_v1  ;;  %9332 = vmatpush3.bf16.msra.mxu1 %v10318_v17  ;;  %v2269_v37 = vrot.slane %v8265_v63, 1  ;;  %v1795_v45 = vor.u32 %v1793_v35, %v1791_v20  ;;  %v2976_v9 = vshll.u32 %v11634_v22, 16  ;;  %v1799_v50 = vrot.slane %v1797_v39, 1  ;;  %v11664_v11 = vld [vmem:[#allocation2 + $0x30] sm:$0xff]   ;;  %v3197_v51 = vld [vmem:[#allocation2 + $0x4] sm:$0xc]  ;;  %vm14658_vm5 = vmmov %vm14651_vm2 }
 0x296   : > { %9333 = vmatprep.subr.bf16.mxu1 %v14597_v1  ;;  %v11669_v2 = vld [vmem:[#allocation2 + $0x38] sm:$0xff]   ;;  %v11672_v48 = vsel %vm14611_vm10, %v2270_v30, %v2272_v49  ;;  %v2274_v3 = vrot.slane %v11627_v31, 1  ;;  %v1807_v12 = vrot.slane %v1805_v25, 1  ;;  %v1815_v21 = vrot.slane %v1813_v10, 1  ;;  %v11675_v59 = vld [vmem:[#allocation2 + $0x40] sm:$0xff]   ;;  %v11679_v7 = vld [vmem:[#allocation2 + $0x48] sm:$0xff]  }
 0x297   : > { %9270 = vmatpush3.bf16.msra.mxu0 %v10304_v15  ;;  %v11667_v34 = vsel %vm14611_vm10, %v2269_v37, %v2270_v30  ;;  %v2276_v27 = vrot.slane %v11636_v24, 1  ;;  %v1800_v42 = vsel %vm14612_vm11, %v1795_v45, %v1799_v50  ;;  %v2278_v57 = vrot.slane %v11638_v13, 1  ;;  %v11699_v54 = vld [vmem:[#allocation2 + $0xc] sm:$0xff]   ;;  %v2510_v17 = vld [vmem:[#allocation2 + $0x4] sm:$0xe]  ;;  %v11728_v20 = vld [vmem:[#allocation2 + $0x14] sm:$0xff]  }
 0x298   : > { %9271 = vmatprep.subr.bf16.mxu0 %v14597_v1  ;;  %v11683_v38 = vsel %vm14611_vm10, %v2272_v49, %v2274_v3  ;;  %v8355_v62 = vcombine.low %v3197_v51, %v2511_v5  ;;  %vm3210_vm0 = vcmask 1045504   ;;  %v1801_v36 = vshrl.u32 %v11627_v31, 16  ;;  %v11757_v45 = vld [vmem:[#allocation2 + $0x24] sm:$0xff]   ;;  %v11759_v49 = vld [vmem:[#allocation2 + $0x2c] sm:$0xff]  }
 0x299   : > { %9334 = vmatpush3.bf16.msra.mxu1 %v10319_v46  ;;  %v1809_v6 = vshrl.u32 %v11636_v24, 16  ;;  %v11690_v58 = vsel %vm14611_vm10, %v2274_v3, %v2276_v27  ;;  %v2280_v8 = vrot.slane %v11664_v11, 1  ;;  %v1817_v56 = vshrl.u32 %v11638_v13, 16 }
 0x29a   : > { %9160 = vmatmul.mubr.msk.bf16.gmra.mxu0 %vm14656_vm12, %v1792_v0  ;;  %9447 = vmatprep.subr.bf16.mxu1 %v14597_v1  ;;  %v1821_v19 = vshll.u32 %v11664_v11, 16  ;;  %v11702_v47 = vsel %vm14611_vm10, %v2276_v27, %v2278_v57  ;;  %v2282_v52 = vrot.slane %v11669_v2, 1  ;;  %v1803_v44 = vor.u32 %v1801_v36, %v1799_v50  ;;  %vm14659_vm12 = vmmov %vm14651_vm2 }
 0x29b   : > { %9224 = vmatmul.mubr.msk.bf16.gmra.mxu1 %vm14657_vm8, %v11602_v28  ;;  %9163 = vmatprep.mubr.msk.bf16.mxu0 %vm14652_vm3, %v14597_v1  ;;  %v1829_v4 = vshll.u32 %v11669_v2, 16  ;;  %v11709_v55 = vsel %vm14611_vm10, %v2278_v57, %v2280_v8  ;;  %v2284_v60 = vrot.slane %v11675_v59, 1  ;;  %v1811_v28 = vor.u32 %v1809_v6, %v1807_v12  ;;  %vm14660_vm8 = vmmov %vm14651_vm2 }
 0x29c   : > { %9227 = vmatprep.mubr.msk.bf16.mxu1 %vm14652_vm3, %v14597_v1  ;;  %9272 = vmatpush3.bf16.msra.mxu0 %v10308_v61  ;;  %v1819_v16 = vor.u32 %v1817_v56, %v1815_v21  ;;  %v11713_v43 = vsel %vm14611_vm10, %v2280_v8, %v2282_v52  ;;  %v14592_v53 = vrot.slane %v11679_v7, 1  ;;  %v11716_v15 = vcombine.low %v2510_v17, %v2511_v5  ;;  %v11730_v61 = vld [vmem:[#allocation2 + $0x1c] sm:$0xff]  }
 0x29d   : > { %9273 = vmatprep.subr.bf16.mxu0 %v14597_v1  ;;  %v11719_v14 = vsel %vm14611_vm10, %v2282_v52, %v2284_v60  ;;  %vm14608_vm6 = vsmask.f32 6400  ;;  %v11721_v29 = vrot.slane %v2973_v40, 1  ;;  %v11723_v46 = vrot.slane %v2976_v9, 2  ;;  %v11776_v52 = vld [vmem:[#allocation2 + $0x34] sm:$0xff]  }
 0x29e   : > { %v11725_v23 = vrot.slane %v1821_v19, 1  ;;  %v11735_v63 = vsel %vm14611_vm10, %v2284_v60, %v14592_v53  ;;  %v3211_v0 = vrot.slane %v8355_v62, 2  ;;  %v3212_v39 = vrot.slane %v11699_v54, 2 }
 0x29f   : > { %v1808_v30 = vsel %vm14612_vm11, %v1803_v44, %v1807_v12  ;;  %v1816_v35 = vsel %vm14612_vm11, %v1811_v28, %v1815_v21  ;;  %v11744_v25 = vrot.slane %v1829_v4, 1  ;;  %v2869_v5 = vshll.u32 %v11716_v15, 16 }
 0x2a0   : > { %9274 = vmatpush3.bf16.msra.mxu0 %v10312_v26  ;;  %v11742_v40 = vsel %vm14612_vm11, %v1819_v16, %v11725_v23  ;;  %v11748_v10 = vsel %vm3210_vm0, %v3211_v0, %v3212_v39  ;;  %v2866_v26 = vshrl.u32 %v11716_v15, 16  ;;  %v2874_v37 = vshrl.u32 %v11699_v54, 16  ;;  %v11780_v16 = vld [vmem:[#allocation2 + $0x3c] sm:$0xff]  }
 0x2a1   : > { %9387 = vmatprep.subr.bf16.mxu0 %v14597_v1  ;;  %v2877_v9 = vshll.u32 %v11699_v54, 16  ;;  %v3214_v50 = vrot.slane %v11728_v20, 2  ;;  %v2883_v51 = vshrl.u32 %v11728_v20, 16  ;;  %v2886_v3 = vshll.u32 %v11728_v20, 16 }
 0x2a2   : > { %9164 = vmatmul.mubr.msk.bf16.gmra.mxu0 %vm14651_vm2, %v1800_v42  ;;  %v2868_v12 = vrot.slane %v2866_v26, 1  ;;  %v2876_v21 = vrot.slane %v2874_v37, 1  ;;  %v3216_v27 = vrot.slane %v11730_v61, 2  ;;  %v2892_v56 = vshrl.u32 %v11730_v61, 16 }
 0x2a3   : > { %9228 = vmatmul.mubr.msk.bf16.gmra.mxu1 %vm14658_vm5, %v11627_v31  ;;  %9167 = vmatprep.mubr.msk.bf16.mxu0 %vm14652_vm3, %v14597_v1  ;;  %v2879_v42 = vrot.slane %v2877_v9, 2  ;;  %v11769_v57 = vsel %vm3210_vm0, %v3212_v39, %v3214_v50  ;;  %v2885_v62 = vrot.slane %v2883_v51, 1  ;;  %v2888_v36 = vrot.slane %v2886_v3, 2  ;;  %vm14661_vm5 = vmmov %vm14651_vm2 }
 0x2a4   : > { %9231 = vmatprep.mubr.msk.bf16.mxu1 %vm14652_vm3, %v14597_v1  ;;  %v11772_v8 = vsel %vm3210_vm0, %v3214_v50, %v3216_v27  ;;  %v2895_v19 = vshll.u32 %v11730_v61, 16  ;;  %v3218_v60 = vrot.slane %v11757_v45, 2  ;;  %v2901_v28 = vshrl.u32 %v11757_v45, 16 }
 0x2a5   : > { %v2880_v44 = vor.u32 %v2879_v42, %v2876_v21  ;;  %v2889_v4 = vor.u32 %v2888_v36, %v2885_v62  ;;  %v2894_v17 = vrot.slane %v2892_v56, 1  ;;  %v2904_v39 = vshll.u32 %v11757_v45, 16  ;;  %v11810_v62 = vld [vmem:[#allocation2 + $0x4c] sm:$0xff]  }
 0x2a6   : > { %v2897_v0 = vrot.slane %v2895_v19, 2  ;;  %v11791_v37 = vsel %vm3210_vm0, %v3216_v27, %v3218_v60  ;;  %v2903_v9 = vrot.slane %v2901_v28, 1  ;;  %v2913_v21 = vshll.u32 %v11759_v49, 16 }
 0x2a7   : > { %v2906_v51 = vrot.slane %v2904_v39, 2  ;;  %v3222_v27 = vrot.slane %v11776_v52, 2  ;;  %v2922_v42 = vshll.u32 %v11776_v52, 16  ;;  %v3224_v56 = vrot.slane %v11780_v16, 2 }
 0x2a8   : > { %v2898_v50 = vor.u32 %v2897_v0, %v2894_v17  ;;  %v2915_v19 = vrot.slane %v2913_v21, 2  ;;  %v2928_v39 = vshrl.u32 %v11780_v16, 16 }
 0x2a9   : > { %v2907_v36 = vor.u32 %v2906_v51, %v2903_v9  ;;  %v2924_v28 = vrot.slane %v2922_v42, 2  ;;  %v11823_v0 = vsel %vm3210_vm0, %v3222_v27, %v3224_v56  ;;  %v11827_v9 = vld [vmem:[#allocation2 + $0x54] sm:$0xff]  }
 0x2aa   : > { %9168 = vmatmul.mubr.msk.bf16.gmra.mxu0 %vm14659_vm12, %v1808_v30  ;;  %v3220_v30 = vrot.slane %v11759_v49, 2  ;;  %14662 = vst [vmem:[#allocation21_spill] sm:$0xff] %v11823_v0  ;;  %v2930_v42 = vrot.slane %v2928_v39, 1  ;;  %vm14664_vm12 = vmmov %vm14651_vm2 }
 0x2ab   : > { %9232 = vmatmul.mubr.msk.bf16.gmra.mxu1 %vm14660_vm8, %v11636_v24  ;;  %9171 = vmatprep.mubr.msk.bf16.mxu0 %vm14652_vm3, %v14597_v1  ;;  %v2871_v24 = vrot.slane %v2869_v5, 2  ;;  %v11788_v5 = vsel %vm14608_vm6, %v2880_v44, %v2889_v4  ;;  %v11820_v17 = vsel %vm14608_vm6, %v2898_v50, %v2907_v36  ;;  %vm14666_vm8 = vmmov %vm14651_vm2 }
 0x2ac   : > { %9235 = vmatprep.mubr.msk.bf16.mxu1 %vm14652_vm3, %v14597_v1  ;;  %v11795_v3 = vsel %vm3210_vm0, %v3218_v60, %v3220_v30 }
 0x2ad   : > { %v2872_v6 = vor.u32 %v2871_v24, %v2868_v12  ;;  %v2910_v12 = vshrl.u32 %v11759_v49, 16  ;;  %v11802_v24 = vld [vmem:[#allocation2 + $0x44] sm:$0xff]  }
 0x2ae   : > { %v3226_v21 = vrot.slane %v11802_v24, 2  ;;  %v2940_v53 = vshll.u32 %v11802_v24, 16 }
 0x2af   : > { %v11785_v26 = vsel %vm14608_vm6, %v2872_v6, %v2880_v44  ;;  %v2912_v6 = vrot.slane %v2910_v12, 1  ;;  %v11817_v44 = vsel %vm3210_vm0, %v3220_v30, %v3222_v27  ;;  %v2937_v30 = vshrl.u32 %v11802_v24, 16 }
 0x2b0   : > { %v3228_v27 = vrot.slane %v11810_v62, 2 }
 0x2b1   : > { %v2916_v51 = vor.u32 %v2915_v19, %v2912_v6  ;;  %v11842_v6 = vsel %vm3210_vm0, %v3224_v56, %v3226_v21  ;;  %v2939_v19 = vrot.slane %v2937_v30, 1  ;;  %v3230_v56 = vrot.slane %v11827_v9, 2 }
 0x2b2   : > { %9172 = vmatmul.mubr.msk.bf16.gmra.mxu0 %vm14651_vm2, %v1816_v35  ;;  %v2919_v35 = vshrl.u32 %v11776_v52, 16  ;;  %14663 = vst [vmem:[#allocation22_spill] sm:$0xff] %v11842_v6  ;;  %v11847_v39 = vsel %vm3210_vm0, %v3226_v21, %v3228_v27 }
 0x2b3   : > { %9236 = vmatmul.mubr.msk.bf16.gmra.mxu1 %vm14661_vm5, %v11638_v13  ;;  %9175 = vmatprep.mubr.msk.bf16.mxu0 %vm14652_vm3, %v14597_v1  ;;  %v11813_v13 = vsel %vm14608_vm6, %v2889_v4, %v2898_v50  ;;  %v2931_v4 = vshll.u32 %v11780_v16, 16  ;;  %v11836_v33 = vsel %vm14608_vm6, %v2907_v36, %v2916_v51  ;;  %14665 = vst [vmem:[#allocation23_spill] sm:$0xff] %v11847_v39  ;;  %v2949_v36 = vshll.u32 %v11810_v62, 16  ;;  %vm14675_vm5 = vmmov %vm14651_vm2 }
 0x2b4   : > { %9239 = vmatprep.mubr.msk.bf16.mxu1 %vm14652_vm3, %v14597_v1  ;;  %v2921_v60 = vrot.slane %v2919_v35, 1  ;;  %v11831_v35 = vld [vmem:[#allocation2 + $0x5c] sm:$0xff]   ;;  %v11865_v18 = vsel %vm3210_vm0, %v3228_v27, %v3230_v56  ;;  %v14670_v27 = vrot.slane %v11634_v22, 2  ;;  %v10362_v22 = vld [vmem:[#allocation2 + $0x48] sm:$0xff]  }
 0x2b5   : > { %v2933_v50 = vrot.slane %v2931_v4, 2  ;;  %v2946_v4 = vshrl.u32 %v11810_v62, 16  ;;  %14667 = vst [vmem:[#allocation24_spill] sm:$0xff] %v11865_v18 }
 0x2b6   : > { %v2925_v12 = vor.u32 %v2924_v28, %v2921_v60  ;;  %v2942_v28 = vrot.slane %v2940_v53, 2 }
 0x2b7   : > { %v2934_v60 = vor.u32 %v2933_v50, %v2930_v42  ;;  %v2948_v30 = vrot.slane %v2946_v4, 1  ;;  %v3232_v42 = vrot.slane %v11831_v35, 2  ;;  %v2951_v50 = vrot.slane %v2949_v36, 2 }
 0x2b8   : > { %v11839_v31 = vsel %vm14608_vm6, %v2916_v51, %v2925_v12  ;;  %v2955_v51 = vshrl.u32 %v11827_v9, 16  ;;  %v2943_v21 = vor.u32 %v2942_v28, %v2939_v19  ;;  %v14669_v19 = vshrl.u32 %v11664_v11, 16 }
 0x2b9   : > { %v11861_v53 = vsel %vm14608_vm6, %v2925_v12, %v2934_v60  ;;  %v11871_v0 = vsel %vm3210_vm0, %v3230_v56, %v3232_v42  ;;  %v2967_v12 = vshll.u32 %v11831_v35, 16  ;;  %v2952_v4 = vor.u32 %v2951_v50, %v2948_v30 }
 0x2ba   : > { %9176 = vmatmul.mubr.msk.bf16.gmra.mxu0 %vm14664_vm12, %v11742_v40  ;;  %v2958_v40 = vshll.u32 %v11827_v9, 16  ;;  %v2957_v41 = vrot.slane %v2955_v51, 1  ;;  %v11868_v6 = vsel %vm14608_vm6, %v2934_v60, %v2943_v21  ;;  %14668 = vst [vmem:[#allocation25_spill] sm:$0xff] %v11871_v0  ;;  %v1827_v28 = vor.u32 %v14669_v19, %v11725_v23  ;;  %vm14679_vm12 = vmmov %vm14651_vm2 }
 0x2bb   : > { %9240 = vmatmul.mubr.msk.bf16.gmra.mxu1 %vm14666_vm8, %v11664_v11  ;;  %9179 = vmatprep.mubr.msk.bf16.mxu0 %vm14652_vm3, %v14597_v1  ;;  %v11881_v51 = vsel %vm3210_vm0, %v3232_v42, %v14670_v27  ;;  %v11885_v56 = vor.u32 %v11723_v46, %v11721_v29  ;;  %v11890_v18 = vsel %vm14608_vm6, %v2943_v21, %v2952_v4  ;;  %v1833_v29 = vshrl.u32 %v11669_v2, 16  ;;  %vm14680_vm8 = vmmov %vm14651_vm2  ;;  %v11930_v27 = vld [vmem:[#allocation2 + $0x10] sm:$0xff]  }
 0x2bc   : > { %9243 = vmatprep.mubr.msk.bf16.mxu1 %vm14652_vm3, %v14597_v1  ;;  %v2960_v39 = vrot.slane %v2958_v40, 2  ;;  %v2964_v1 = vshrl.u32 %v11831_v35, 16  ;;  %14671 = vst [vmem:[#allocation26_spill] sm:$0xff] %v11881_v51  ;;  %v2969_v40 = vrot.slane %v2967_v12, 2  ;;  %v1832_v0 = vsel %vm14612_vm11, %v1827_v28, %v11744_v25  ;;  %14673 = vst [vmem:[#allocation28_spill] sm:$0xff] %v11890_v18  ;;  %v10365_v51 = vld [vmem:[#allocation2 + $0x58] sm:$0xff]  }
 0x2bd   : > { %14672 = vst [vmem:[#allocation27_spill] sm:$0xff] %v11885_v56  ;;  %v1837_v46 = vshll.u32 %v11675_v59, 16  ;;  %v1845_v42 = vshll.u32 %v11679_v7, 16  ;;  %v11924_v12 = vld [vmem:[#allocation2 + $0xc] sm:$0xf]  ;;  %14682 = vst [vmem:[#allocation33_spill] sm:$0xff] %v11930_v27 }
 0x2be   : > { %v2961_v36 = vor.u32 %v2960_v39, %v2957_v41  ;;  %v2966_v60 = vrot.slane %v2964_v1, 1  ;;  %v14676_v1 = vmov 0.0   ;;  %v1835_v39 = vor.u32 %v1833_v29, %v11744_v25  ;;  %v11922_v25 = vld [vmem:[#allocation2 + $0x50] sm:$0xff]   ;;  %14681 = vst [vmem:[#allocation32_spill] sm:$0xff] %v11924_v12  ;;  %v4139_v28 = vld [vmem:[#allocation2 + $0x8] sm:$0x8] }
 0x2bf   : > { %v1839_v21 = vrot.slane %v1837_v46, 1  ;;  %v1847_v19 = vrot.slane %v1845_v42, 1  ;;  %v11941_v29 = vld [vmem:[#allocation2 + $0x20] sm:$0xff]   ;;  %v11943_v46 = vld [vmem:[#allocation2 + $0x28] sm:$0xff]  }
 0x2c0   : > { %v11893_v11 = vsel %vm14608_vm6, %v2952_v4, %v2961_v36  ;;  %v2970_v41 = vor.u32 %v2969_v40, %v2966_v60  ;;  %v11932_v60 = vld [vmem:[#allocation2 + $0x60] sm:$0xff]   ;;  %v1849_v40 = vshrl.u32 %v11679_v7, 16  ;;  %14684 = vst [vmem:[#allocation34_spill] sm:$0xff] %v11941_v29  ;;  %14685 = vst [vmem:[#allocation35_spill] sm:$0xff] %v11943_v46 }
 0x2c1   : > { %14674 = vst [vmem:[#allocation29_spill] sm:$0xff] %v11893_v11  ;;  %v1840_v30 = vsel %vm14612_vm11, %v1835_v39, %v1839_v21  ;;  %v11947_v39 = vld [vmem:[#allocation2 + $0x58] sm:$0xff]   ;;  %v4160_v11 = vrot.slane %v11943_v46, 3 }
 0x2c2   : > { %9180 = vmatmul.mubr.msk.bf16.gmra.mxu0 %vm14651_vm2, %v1832_v0  ;;  %v11905_v23 = vsel %vm14608_vm6, %v2961_v36, %v2970_v41  ;;  %v11909_v0 = vsel %vm14608_vm6, %v2970_v41, %v11885_v56  ;;  %v8445_v36 = vcombine.low %v4139_v28, %v11924_v12  ;;  %v11939_v41 = vld [vmem:[#allocation2 + $0x18] sm:$0xff]   ;;  %v10361_v28 = vld [vmem:[#allocation2 + $0x40] sm:$0xff]   ;;  %v1861_v18 = vshll.u32 %v11947_v39, 16  ;;  %vm14701_vm6 = vmmov %vm14651_vm2 }
 0x2c3   : > { %9244 = vmatmul.mubr.msk.bf16.gmra.mxu1 %vm14675_vm5, %v11669_v2  ;;  %9183 = vmatprep.mubr.msk.bf16.mxu0 %vm14652_vm3, %v14676_v1  ;;  %14677 = vst [vmem:[#allocation30_spill] sm:$0xff] %v11905_v23  ;;  %14678 = vst [vmem:[#allocation31_spill] sm:$0xff] %v11909_v0  ;;  %v1841_v2 = vshrl.u32 %v11675_v59, 16  ;;  %v10364_v0 = vld [vmem:[#allocation2 + $0x50] sm:$0xff]   ;;  %v4156_v12 = vrot.slane %v11939_v41, 3  ;;  %v4158_v23 = vrot.slane %v11941_v29, 3 }
 0x2c4   : > { %9247 = vmatprep.mubr.msk.bf16.mxu1 %vm14652_vm3, %v14676_v1  ;;  %vm14683_vm5 = vmmov %vm14651_vm2  ;;  %v4153_v42 = vrot.slane %v8445_v36, 3  ;;  %v1857_v56 = vshrl.u32 %v11922_v25, 16 }
 0x2c5   : > { %v1843_v50 = vor.u32 %v1841_v2, %v1839_v21  ;;  %v11949_v21 = vld [vmem:[#allocation2 + $0x30] sm:$0xff]   ;;  %v1851_v2 = vor.u32 %v1849_v40, %v1847_v19 }
 0x2c6   : > { %v4162_v36 = vrot.slane %v11949_v21, 3 }
 0x2c7   : > { %v1848_v4 = vsel %vm14612_vm11, %v1843_v50, %v1847_v19 }
 0x2ca   : > { %9184 = vmatmul.mubr.msk.bf16.gmra.mxu0 %vm14679_vm12, %v1840_v30  ;;  %v11951_v30 = vld [vmem:[#allocation2 + $0x38] sm:$0xff]   ;;  %vm14610_vm12 = vcmask 1044480  }
 0x2cb   : > { %9248 = vmatmul.mubr.msk.bf16.gmra.mxu1 %vm14680_vm8, %v11675_v59  ;;  %9187 = vmatprep.mubr.msk.bf16.mxu0 %vm14652_vm3, %v14676_v1  ;;  %v1853_v59 = vshll.u32 %v11922_v25, 16  ;;  %v11970_v29 = vsel %vm14610_vm12, %v4156_v12, %v4158_v23  ;;  %vm14689_vm8 = vmmov %vm14651_vm2  ;;  %v11974_v46 = vsel %vm14610_vm12, %v4158_v23, %v4160_v11  ;;  %v1697_v23 = vld [vmem:[#allocation2 + $0x64] sm:$0x1] }
 0x2cc   : > { %9251 = vmatprep.mubr.msk.bf16.mxu1 %vm14652_vm3, %v14676_v1  ;;  %14688 = vst [vmem:[#allocation38_spill] sm:$0xff] %v11970_v29  ;;  %v4172_v29 = vrot.slane %v10365_v51, 3  ;;  %v14691_v51 = vrot.slane %v11932_v60, 3 }
 0x2cd   : > { %v1855_v50 = vrot.slane %v1853_v59, 1  ;;  %v4164_v59 = vrot.slane %v11951_v30, 3 }
 0x2cf   : > { %v1856_v40 = vsel %vm14612_vm11, %v1851_v2, %v1855_v50  ;;  %v4166_v2 = vrot.slane %v10361_v28, 3 }
 0x2d2   : > { %9188 = vmatmul.mubr.msk.bf16.gmra.mxu0 %vm14651_vm2, %v1848_v4  ;;  %v4154_v4 = vrot.slane %v11930_v27, 3 }
 0x2d3   : > { %9252 = vmatmul.mubr.msk.bf16.gmra.mxu1 %vm14683_vm5, %v11679_v7  ;;  %9191 = vmatprep.mubr.msk.bf16.mxu0 %vm14652_vm3, %v14676_v1  ;;  %vm14692_vm5 = vmmov %vm14651_vm2 }
 0x2d4   : > { %9255 = vmatprep.mubr.msk.bf16.mxu1 %vm14652_vm3, %v14676_v1  ;;  %v11960_v19 = vsel %vm14610_vm12, %v4153_v42, %v4154_v4  ;;  %v11967_v27 = vsel %vm14610_vm12, %v4154_v4, %v4156_v12  ;;  %v11977_v42 = vsel %vm14610_vm12, %v4160_v11, %v4162_v36  ;;  %v4168_v12 = vrot.slane %v10362_v22, 3  ;;  %v1688_v11 = vld [vmem:[#allocation2 + $0x60] sm:$0xf] }
 0x2d5   : > { %14686 = vst [vmem:[#allocation36_spill] sm:$0xff] %v11960_v19  ;;  %14687 = vst [vmem:[#allocation37_spill] sm:$0xff] %v11967_v27  ;;  %v11980_v19 = vsel %vm14610_vm12, %v4162_v36, %v4164_v59  ;;  %v4170_v4 = vrot.slane %v10364_v0, 3  ;;  %v1863_v27 = vrot.slane %v1861_v18, 1  ;;  %v11989_v36 = vsel %vm14610_vm12, %v4164_v59, %v4166_v2 }
 0x2d6   : > { %14690 = vst [vmem:[#allocation39_spill] sm:$0xff] %v11980_v19  ;;  %v11992_v28 = vsel %vm14610_vm12, %v4166_v2, %v4168_v12  ;;  %v12003_v18 = vsel %vm14610_vm12, %v4172_v29, %v14691_v51  ;;  %v1865_v59 = vshrl.u32 %v11947_v39, 16  ;;  %v2610_v51 = vrot.slane %v11716_v15, 1  ;;  %v10323_v15 = vld [vmem:[%s14576_s6 + $0x98] sm:$0xff]  }
 0x2d7   : > { %v11995_v19 = vsel %vm14610_vm12, %v4168_v12, %v4170_v4  ;;  %v11998_v22 = vsel %vm14610_vm12, %v4170_v4, %v4172_v29  ;;  %v8239_v12 = vcombine.low %v1688_v11, %v1688_v11 }
 0x2d8   : > { %v1867_v29 = vor.u32 %v1865_v59, %v1863_v27  ;;  %v10341_v59 = vld [vmem:[%s14576_s6 + $0xa8] sm:$0xff]  }
 0x2da   : > { %9192 = vmatmul.mubr.msk.bf16.gmra.mxu0 %vm14689_vm8, %v1856_v40  ;;  %v1859_v40 = vor.u32 %v1857_v56, %v1855_v50  ;;  %v12005_v56 = vcombine.low %v1688_v11, %v1697_v23  ;;  %vm14693_vm8 = vmmov %vm14651_vm2  ;;  %v10339_v11 = vld [vmem:[%s14576_s6 + $0xb8] sm:$0xff]  }
 0x2db   : > { %9256 = vmatmul.mubr.msk.bf16.gmra.mxu1 %vm14651_vm2, %v11922_v25  ;;  %9195 = vmatprep.mubr.msk.bf16.mxu0 %vm14652_vm3, %v14676_v1 }
 0x2dc   : > { %9259 = vmatprep.mubr.msk.bf16.mxu1 %vm14652_vm3, %v14676_v1  ;;  %v1864_v0 = vsel %vm14612_vm11, %v1859_v40, %v1863_v27  ;;  %v1869_v50 = vshll.u32 %v12005_v56, 16  ;;  %v1873_v40 = vshrl.u32 %v12005_v56, 16  ;;  %v2611_v27 = vrot.slane %v11699_v54, 1  ;;  %v10340_v54 = vld [vmem:[%s14576_s6 + $0xb0] sm:$0xff]  }
 0x2de   : > { %v1871_v2 = vrot.slane %v1869_v50, 1  ;;  %v2613_v50 = vrot.slane %v11728_v20, 1  ;;  %v2615_v20 = vrot.slane %v11730_v61, 1  ;;  %v10336_v61 = vld [vmem:[%s14576_s6 + $0x80] sm:$0xff]  }
 0x2e0   : > { %v1872_v4 = vsel %vm14612_vm11, %v1867_v29, %v1871_v2  ;;  %v1875_v23 = vor.u32 %v1873_v40, %v1871_v2  ;;  %v2614_v29 = vsel %vm14611_vm10, %v2611_v27, %v2613_v50  ;;  %v10328_v2 = vld [vmem:[%s14576_s6 + $0x90] sm:$0xff]  }
 0x2e2   : > { %9196 = vmatmul.mubr.msk.bf16.gmra.mxu0 %vm14692_vm5, %v1864_v0  ;;  %vm14694_vm5 = vmmov %vm14651_vm2  ;;  %v2612_v0 = vsel %vm14611_vm10, %v2610_v51, %v2611_v27  ;;  %v2288_v51 = vrot.slane %v11922_v25, 1  ;;  %v2535_v27 = vld [vmem:[#allocation2 + $0x68] sm:$0x1] }
 0x2e3   : > { %9260 = vmatmul.mubr.msk.bf16.gmra.mxu1 %vm14693_vm8, %v11947_v39  ;;  %9199 = vmatprep.mubr.msk.bf16.mxu0 %vm14652_vm3, %v14676_v1  ;;  %vm14695_vm8 = vmmov %vm14651_vm2 }
 0x2e4   : > { %9263 = vmatprep.mubr.msk.bf16.mxu1 %vm14652_vm3, %v14676_v1 }
 0x2ea   : > { %9200 = vmatmul.mubr.msk.bf16.gmra.mxu0 %vm14651_vm2, %v1872_v4  ;;  %v2616_v4 = vsel %vm14611_vm10, %v2613_v50, %v2615_v20  ;;  %v2292_v50 = vrot.slane %v12005_v56, 1 }
 0x2eb   : > { %9264 = vmatmul.mubr.msk.bf16.gmra.mxu1 %vm14694_vm5, %v8239_v12  ;;  %9203 = vmatprep.mubr.msk.bf16.mxu0 %vm14652_vm3, %v14676_v1  ;;  %vm14696_vm5 = vmmov %vm14651_vm2  ;;  %v10332_v12 = vld [vmem:[%s14576_s6 + $0x88] sm:$0xff]  }
 0x2ec   : > { %9335 = vmatprep.mubr.msk.bf16.mxu1 %vm14652_vm3, %v14676_v1 }
 0x2f2   : > { %9204 = vmatmul.mubr.msk.bf16.gmra.mxu0 %vm14695_vm8, %v1875_v23  ;;  %vm14697_vm8 = vmmov %vm14651_vm2  ;;  %v2619_v23 = vrot.slane %v11759_v49, 1 }
 0x2f3   : > { %9336 = vmatmul.mubr.msk.bf16.vlgmr.msra.gmra.mxu1 %vm14651_vm2, %v2612_v0  ;;  %9275 = vmatprep.mubr.msk.bf16.mxu0 %vm14652_vm3, %v14676_v1  ;;  %v8303_v0 = vcombine.low %v11610_v32, %v2535_v27 }
 0x2f4   : > { %9339 = vmatprep.mubr.msk.bf16.mxu1 %vm14652_vm3, %v14676_v1  ;;  %9448 = vmatpush3.bf16.msra.mxu1 %v10339_v11 }
 0x2f5   : > { %9449 = vmatprep.subr.bf16.mxu1 %v14676_v1  ;;  %v2633_v25 = vrot.slane %v8303_v0, 1 }
 0x2f8   : > { %9450 = vmatpush3.bf16.msra.mxu1 %v10340_v54 }
 0x2f9   : > { %9451 = vmatprep.subr.bf16.mxu1 %v14676_v1 }
 0x2fa   : > { %9276 = vmatmul.mubr.msk.bf16.vlgmr.msra.gmra.mxu0 %vm14696_vm5, %v11667_v34  ;;  %v10342_v34 = vld [vmem:[%s14576_s6 + $0xa0] sm:$0xff]   ;;  %vm14698_vm5 = vmmov %vm14651_vm2 }
 0x2fb   : > { %9388 = vmatpush3.bf16.msra.mxu0 %v10323_v15  ;;  %9340 = vmatmul.mubr.msk.bf16.gmra.mxu1 %vm14697_vm8, %v2614_v29  ;;  %vm14699_vm8 = vmmov %vm14651_vm2 }
 0x2fc   : > { %9279 = vmatprep.mubr.msk.bf16.mxu0 %vm14652_vm3, %v14676_v1  ;;  %9343 = vmatprep.mubr.msk.bf16.mxu1 %vm14652_vm3, %v14676_v1 }
 0x2fd   : > { %9389 = vmatprep.subr.bf16.mxu0 %v14676_v1  ;;  %9452 = vmatpush3.bf16.msra.mxu1 %v10341_v59 }
 0x2fe   : > { %9453 = vmatprep.subr.bf16.mxu1 %v14676_v1 }
 0x2ff   : > { %9390 = vmatpush3.bf16.msra.mxu0 %v10328_v2 }
 0x300   : > { %9391 = vmatprep.subr.bf16.mxu0 %v14676_v1 }
 0x301   : > { %9454 = vmatpush3.bf16.msra.mxu1 %v10342_v34 }
 0x302   : > { %9280 = vmatmul.mubr.msk.bf16.gmra.mxu0 %vm14651_vm2, %v11672_v48  ;;  %9567 = vmatprep.subr.bf16.mxu1 %v14676_v1  ;;  %v2617_v48 = vrot.slane %v11757_v45, 1 }
 0x303   : > { %9344 = vmatmul.mubr.msk.bf16.gmra.mxu1 %vm14698_vm5, %v2616_v4  ;;  %9283 = vmatprep.mubr.msk.bf16.mxu0 %vm14652_vm3, %v14676_v1  ;;  %vm14700_vm5 = vmmov %vm14651_vm2 }
 0x304   : > { %9347 = vmatprep.mubr.msk.bf16.mxu1 %vm14652_vm3, %v14676_v1  ;;  %9392 = vmatpush3.bf16.msra.mxu0 %v10332_v12  ;;  %v2618_v40 = vsel %vm14611_vm10, %v2615_v20, %v2617_v48  ;;  %v2620_v45 = vsel %vm14611_vm10, %v2617_v48, %v2619_v23 }
 0x305   : > { %9393 = vmatprep.subr.bf16.mxu0 %v14676_v1 }
 0x308   : > { %9394 = vmatpush3.bf16.msra.mxu0 %v10336_v61 }
 0x309   : > { %9507 = vmatprep.subr.bf16.mxu0 %v14676_v1 }
 0x30a   : > { %9284 = vmatmul.mubr.msk.bf16.gmra.mxu0 %vm14699_vm8, %v11683_v38  ;;  %v2621_v38 = vrot.slane %v11776_v52, 1  ;;  %vm14702_vm8 = vmmov %vm14651_vm2 }
 0x30b   : > { %9348 = vmatmul.mubr.msk.bf16.gmra.mxu1 %vm14651_vm2, %v2618_v40  ;;  %9287 = vmatprep.mubr.msk.bf16.mxu0 %vm14652_vm3, %v14676_v1 }
 0x30c   : > { %9351 = vmatprep.mubr.msk.bf16.mxu1 %vm14652_vm3, %v14676_v1  ;;  %v2622_v49 = vsel %vm14611_vm10, %v2619_v23, %v2621_v38  ;;  %v10348_v23 = vld [vmem:[%s14576_s6 + $0xf8] sm:$0xff]  }
 0x312   : > { %9288 = vmatmul.mubr.msk.bf16.gmra.mxu0 %vm14700_vm5, %v11690_v58  ;;  %v2623_v58 = vrot.slane %v11780_v16, 1  ;;  %vm14704_vm5 = vmmov %vm14651_vm2 }
 0x313   : > { %9352 = vmatmul.mubr.msk.bf16.gmra.mxu1 %vm14701_vm6, %v2620_v45  ;;  %9291 = vmatprep.mubr.msk.bf16.mxu0 %vm14652_vm3, %v14676_v1  ;;  %vm14703_vm6 = vmmov %vm14651_vm2 }
 0x314   : > { %9355 = vmatprep.mubr.msk.bf16.mxu1 %vm14652_vm3, %v14676_v1  ;;  %v2624_v52 = vsel %vm14611_vm10, %v2621_v38, %v2623_v58 }
 0x31a   : > { %9292 = vmatmul.mubr.msk.bf16.gmra.mxu0 %vm14702_vm8, %v11702_v47  ;;  %v2625_v47 = vrot.slane %v11802_v24, 1  ;;  %vm14705_vm8 = vmmov %vm14651_vm2 }
 0x31b   : > { %9356 = vmatmul.mubr.msk.bf16.gmra.mxu1 %vm14651_vm2, %v2622_v49  ;;  %9295 = vmatprep.mubr.msk.bf16.mxu0 %vm14652_vm3, %v14676_v1 }
 0x31c   : > { %9359 = vmatprep.mubr.msk.bf16.mxu1 %vm14652_vm3, %v14676_v1  ;;  %v2626_v16 = vsel %vm14611_vm10, %v2623_v58, %v2625_v47 }
 0x322   : > { %9296 = vmatmul.mubr.msk.bf16.gmra.mxu0 %vm14703_vm6, %v11709_v55  ;;  %v2627_v55 = vrot.slane %v11810_v62, 1  ;;  %vm14706_vm6 = vmmov %vm14651_vm2 }
 0x323   : > { %9360 = vmatmul.mubr.msk.bf16.gmra.mxu1 %vm14704_vm5, %v2624_v52  ;;  %9299 = vmatprep.mubr.msk.bf16.mxu0 %vm14652_vm3, %v14676_v1  ;;  %vm14707_vm5 = vmmov %vm14651_vm2 }
 0x324   : > { %9363 = vmatprep.mubr.msk.bf16.mxu1 %vm14652_vm3, %v14676_v1  ;;  %v2628_v24 = vsel %vm14611_vm10, %v2625_v47, %v2627_v55  ;;  %v10349_v47 = vld [vmem:[%s14576_s6 + $0xf0] sm:$0xff]  }
 0x32a   : > { %9300 = vmatmul.mubr.msk.bf16.gmra.mxu0 %vm14705_vm8, %v11713_v43  ;;  %v2629_v43 = vrot.slane %v11827_v9, 1  ;;  %vm14708_vm8 = vmmov %vm14651_vm2  ;;  %v14709_v9 = vrot.slane %v11679_v7, 1 }
 0x32b   : > { %9364 = vmatmul.mubr.msk.bf16.gmra.mxu1 %vm14651_vm2, %v2626_v16  ;;  %9303 = vmatprep.mubr.msk.bf16.mxu0 %vm14652_vm3, %v14676_v1 }
 0x32c   : > { %9367 = vmatprep.mubr.msk.bf16.mxu1 %vm14652_vm3, %v14676_v1  ;;  %v2630_v62 = vsel %vm14611_vm10, %v2627_v55, %v2629_v43  ;;  %v2289_v11 = vsel %vm14611_vm10, %v14709_v9, %v2288_v51 }
 0x332   : > { %9304 = vmatmul.mubr.msk.bf16.gmra.mxu0 %vm14706_vm6, %v11719_v14  ;;  %v2631_v14 = vrot.slane %v11831_v35, 1  ;;  %vm14710_vm6 = vmmov %vm14651_vm2  ;;  %v2290_v35 = vrot.slane %v11947_v39, 1 }
 0x333   : > { %9368 = vmatmul.mubr.msk.bf16.gmra.mxu1 %vm14707_vm5, %v2628_v24  ;;  %9307 = vmatprep.mubr.msk.bf16.mxu0 %vm14652_vm3, %v14676_v1  ;;  %vm14711_vm5 = vmmov %vm14651_vm2 }
 0x334   : > { %9371 = vmatprep.mubr.msk.bf16.mxu1 %vm14652_vm3, %v14676_v1  ;;  %v2291_v7 = vsel %vm14611_vm10, %v2288_v51, %v2290_v35  ;;  %v2634_v54 = vsel %vm14611_vm10, %v2631_v14, %v2633_v25  ;;  %v2293_v29 = vsel %vm14611_vm10, %v2290_v35, %v2292_v50  ;;  %v10350_v51 = vld [vmem:[%s14576_s6 + $0xe8] sm:$0xff]  }
 0x33a   : > { %9308 = vmatmul.mubr.msk.bf16.gmra.mxu0 %vm14708_vm8, %v11735_v63  ;;  %v2632_v63 = vsel %vm14611_vm10, %v2629_v43, %v2631_v14  ;;  %vm14712_vm8 = vmmov %vm14651_vm2 }
 0x33b   : > { %9372 = vmatmul.mubr.msk.bf16.gmra.mxu1 %vm14651_vm2, %v2630_v62  ;;  %9311 = vmatprep.mubr.msk.bf16.mxu0 %vm14652_vm3, %v14676_v1 }
 0x33c   : > { %9375 = vmatprep.mubr.msk.bf16.mxu1 %vm14652_vm3, %v14676_v1 }
 0x342   : > { %9312 = vmatmul.mubr.msk.bf16.gmra.mxu0 %vm14710_vm6, %v2289_v11  ;;  %vm14713_vm6 = vmmov %vm14651_vm2 }
 0x343   : > { %9376 = vmatmul.mubr.msk.bf16.gmra.mxu1 %vm14711_vm5, %v2632_v63  ;;  %9315 = vmatprep.mubr.msk.bf16.mxu0 %vm14652_vm3, %v14676_v1  ;;  %vm14714_vm5 = vmmov %vm14651_vm2  ;;  %v10345_v63 = vld [vmem:[%s14576_s6 + $0xd0] sm:$0xff]  }
 0x344   : > { %9379 = vmatprep.mubr.msk.bf16.mxu1 %vm14652_vm3, %v14676_v1 }
 0x34a   : > { %9316 = vmatmul.mubr.msk.bf16.gmra.mxu0 %vm14712_vm8, %v2291_v7  ;;  %v2157_v15 = vpop.f32.mrf.mxu1  ;;  %vm14715_vm8 = vmmov %vm14651_vm2 }
 0x34b   : > { %9380 = vmatmul.mubr.msk.bf16.gmra.mxu1 %vm14651_vm2, %v2634_v54  ;;  %9319 = vmatprep.mubr.msk.bf16.mxu0 %vm14652_vm3, %v14676_v1 }
 0x34c   : > { %9383 = vmatprep.mubr.msk.bf16.mxu1 %vm14652_vm3, %v14676_v1  ;;  %v9217_v32 = vpop.f32.mrf.mxu1 }
 0x34e   : > { %v2160_v39 = vpop.f32.mrf.mxu1 }
 0x350   : > { %v9218_v59 = vpop.f32.mrf.mxu1 }
 0x352   : > { %v1973_v2 = vpop.f32.mrf.mxu0  ;;  %9320 = vmatmul.mubr.msk.bf16.gmra.mxu0 %vm14713_vm6, %v2293_v29  ;;  %vm14716_vm6 = vmmov %vm14651_vm2 }
 0x353   : > { %v12172_v34 = vadd.f32 %v2157_v15, %v1973_v2  ;;  %v2165_v20 = vpop.f32.mrf.mxu1  ;;  %9384 = vmatmul.mubr.msk.bf16.gmra.mxu1 %vm14714_vm5, %v2633_v25  ;;  %9323 = vmatprep.mubr.msk.bf16.mxu0 %vm14652_vm3, %v14676_v1  ;;  %vm14717_vm5 = vmmov %vm14651_vm2  ;;  %v10346_v15 = vld [vmem:[%s14576_s6 + $0xc8] sm:$0xff]  }
 0x354   : > { %v9157_v12 = vpop.f32.mrf.mxu0  ;;  %9455 = vmatprep.mubr.msk.bf16.mxu1 %vm14652_vm3, %v14676_v1 }
 0x355   : > { %v9221_v56 = vpop.f32.mrf.mxu1 }
 0x356   : > { %v1976_v4 = vpop.f32.mrf.mxu0 }
 0x357   : > { %v12179_v61 = vadd.f32 %v2160_v39, %v1976_v4  ;;  %v2168_v48 = vpop.f32.mrf.mxu1 }
 0x358   : > { %v9158_v40 = vpop.f32.mrf.mxu0 }
 0x359   : > { %v9222_v45 = vpop.f32.mrf.mxu1 }
 0x35a   : > { %v1981_v38 = vpop.f32.mrf.mxu0  ;;  %9324 = vmatmul.mubr.msk.bf16.gmra.mxu0 %vm14715_vm8, %v2292_v50  ;;  %vm14718_vm8 = vmmov %vm14651_vm2 }
 0x35b   : > { %v12185_v49 = vadd.f32 %v2165_v20, %v1981_v38  ;;  %v2173_v58 = vpop.f32.mrf.mxu1  ;;  %9456 = vmatmul.mubr.msk.bf16.vlgmr.msra.gmra.mxu1 %vm14651_vm2, %v11748_v10  ;;  %9395 = vmatprep.mubr.msk.bf16.mxu0 %vm14652_vm3, %v14676_v1  ;;  %v10344_v10 = vld [vmem:[%s14576_s6 + $0xd8] sm:$0xff]  }
 0x35c   : > { %v9161_v52 = vpop.f32.mrf.mxu0  ;;  %9459 = vmatprep.mubr.msk.bf16.mxu1 %vm14652_vm3, %v14676_v1  ;;  %9568 = vmatpush3.bf16.msra.mxu1 %v10348_v23 }
 0x35d   : > { %v9225_v16 = vpop.f32.mrf.mxu1  ;;  %9569 = vmatprep.subr.bf16.mxu1 %v14676_v1 }
 0x35e   : > { %v1984_v55 = vpop.f32.mrf.mxu0 }
 0x35f   : > { %v12197_v24 = vadd.f32 %v2168_v48, %v1984_v55  ;;  %v2176_v43 = vpop.f32.mrf.mxu1 }
 0x360   : > { %v9162_v62 = vpop.f32.mrf.mxu0  ;;  %9570 = vmatpush3.bf16.msra.mxu1 %v10349_v47 }
 0x361   : > { %v9226_v14 = vpop.f32.mrf.mxu1  ;;  %9571 = vmatprep.subr.bf16.mxu1 %v14676_v1 }
 0x362   : > { %v1989_v27 = vpop.f32.mrf.mxu0  ;;  %9396 = vmatmul.mubr.msk.bf16.vlgmr.msra.gmra.mxu0 %vm14716_vm6, %v11785_v26  ;;  %v10351_v26 = vld [vmem:[%s14576_s6 + $0xe0] sm:$0xff]   ;;  %vm14719_vm6 = vmmov %vm14651_vm2 }
 0x363   : > { %v12208_v9 = vadd.f32 %v2173_v58, %v1989_v27  ;;  %9508 = vmatpush3.bf16.msra.mxu0 %v10344_v10  ;;  %v2181_v11 = vpop.f32.mrf.mxu1  ;;  %9460 = vmatmul.mubr.msk.bf16.gmra.mxu1 %vm14717_vm5, %v11769_v57  ;;  %vm14720_vm5 = vmmov %vm14651_vm2 }
 0x364   : > { %v9165_v0 = vpop.f32.mrf.mxu0  ;;  %9399 = vmatprep.mubr.msk.bf16.mxu0 %vm14652_vm3, %v14676_v1  ;;  %9463 = vmatprep.mubr.msk.bf16.mxu1 %vm14652_vm3, %v14676_v1 }
 0x365   : > { %v9229_v35 = vpop.f32.mrf.mxu1  ;;  %9509 = vmatprep.subr.bf16.mxu0 %v14676_v1  ;;  %9572 = vmatpush3.bf16.msra.mxu1 %v10350_v51 }
 0x366   : > { %v1992_v57 = vpop.f32.mrf.mxu0  ;;  %9573 = vmatprep.subr.bf16.mxu1 %v14676_v1 }
 0x367   : > { %v12224_v25 = vadd.f32 %v2176_v43, %v1992_v57  ;;  %v2184_v7 = vpop.f32.mrf.mxu1  ;;  %9510 = vmatpush3.bf16.msra.mxu0 %v10345_v63 }
 0x368   : > { %v9166_v54 = vpop.f32.mrf.mxu0  ;;  %9511 = vmatprep.subr.bf16.mxu0 %v14676_v1 }
 0x369   : > { %v9230_v32 = vpop.f32.mrf.mxu1  ;;  %9574 = vmatpush3.bf16.msra.mxu1 %v10351_v26 }
 0x36a   : > { %v1997_v50 = vpop.f32.mrf.mxu0  ;;  %9400 = vmatmul.mubr.msk.bf16.gmra.mxu0 %vm14718_vm8, %v11788_v5  ;;  %9687 = vmatprep.subr.bf16.mxu1 %v14676_v1  ;;  %v10347_v5 = vld [vmem:[%s14576_s6 + $0xc0] sm:$0xff]   ;;  %vm14721_vm8 = vmmov %vm14651_vm2  ;;  %v14725_v32 = vld [vmem:[#allocation21_spill] sm:$0xff] }
 0x36b   : > { %v12233_v39 = vadd.f32 %v2181_v11, %v1997_v50  ;;  %v2189_v59 = vpop.f32.mrf.mxu1  ;;  %9464 = vmatmul.mubr.msk.bf16.gmra.mxu1 %vm14651_vm2, %v11772_v8  ;;  %9403 = vmatprep.mubr.msk.bf16.mxu0 %vm14652_vm3, %v14676_v1 }
 0x36c   : > { %v9169_v29 = vpop.f32.mrf.mxu0  ;;  %9467 = vmatprep.mubr.msk.bf16.mxu1 %vm14652_vm3, %v14676_v1  ;;  %9512 = vmatpush3.bf16.msra.mxu0 %v10346_v15 }
 0x36d   : > { %v9233_v2 = vpop.f32.mrf.mxu1  ;;  %9513 = vmatprep.subr.bf16.mxu0 %v14676_v1 }
 0x36e   : > { %v2000_v20 = vpop.f32.mrf.mxu0 }
 0x36f   : > { %v12245_v12 = vadd.f32 %v2184_v7, %v2000_v20  ;;  %v2192_v56 = vpop.f32.mrf.mxu1 }
 0x370   : > { %v9170_v8 = vpop.f32.mrf.mxu0  ;;  %9514 = vmatpush3.bf16.msra.mxu0 %v10347_v5 }
 0x371   : > { %v9234_v4 = vpop.f32.mrf.mxu1  ;;  %9627 = vmatprep.subr.bf16.mxu0 %v14676_v1 }
 0x372   : > { %v2005_v48 = vpop.f32.mrf.mxu0  ;;  %9404 = vmatmul.mubr.msk.bf16.gmra.mxu0 %vm14719_vm6, %v11813_v13  ;;  %vm14722_vm6 = vmmov %vm14651_vm2 }
 0x373   : > { %v12250_v40 = vadd.f32 %v2189_v59, %v2005_v48  ;;  %v2197_v23 = vpop.f32.mrf.mxu1  ;;  %9468 = vmatmul.mubr.msk.bf16.gmra.mxu1 %vm14720_vm5, %v11791_v37  ;;  %9407 = vmatprep.mubr.msk.bf16.mxu0 %vm14652_vm3, %v14676_v1  ;;  %vm14723_vm5 = vmmov %vm14651_vm2  ;;  %v14727_v48 = vld [vmem:[#allocation22_spill] sm:$0xff] }
 0x374   : > { %v9173_v45 = vpop.f32.mrf.mxu0  ;;  %9471 = vmatprep.mubr.msk.bf16.mxu1 %vm14652_vm3, %v14676_v1 }
 0x375   : > { %v9237_v38 = vpop.f32.mrf.mxu1 }
 0x376   : > { %v2008_v58 = vpop.f32.mrf.mxu0 }
 0x377   : > { %v12258_v52 = vadd.f32 %v2192_v56, %v2008_v58  ;;  %v2199_v47 = vpop.f32.mrf.mxu1 }
 0x378   : > { %v9174_v16 = vpop.f32.mrf.mxu0 }
 0x379   : > { %v9238_v13 = vpop.f32.mrf.mxu1 }
 0x37a   : > { %v2013_v55 = vpop.f32.mrf.mxu0  ;;  %9408 = vmatmul.mubr.msk.bf16.gmra.mxu0 %vm14721_vm8, %v11820_v17  ;;  %vm14724_vm8 = vmmov %vm14651_vm2 }
 0x37b   : > { %v2203_v43 = vpop.f32.mrf.mxu1  ;;  %9472 = vmatmul.mubr.msk.bf16.gmra.mxu1 %vm14651_vm2, %v11795_v3  ;;  %9411 = vmatprep.mubr.msk.bf16.mxu0 %vm14652_vm3, %v14676_v1 }
 0x37c   : > { %v9177_v37 = vpop.f32.mrf.mxu0  ;;  %9475 = vmatprep.mubr.msk.bf16.mxu1 %vm14652_vm3, %v14676_v1 }
 0x37d   : > { %v9241_v10 = vpop.f32.mrf.mxu1  ;;  %v14730_v37 = vld [vmem:[#allocation23_spill] sm:$0xff] }
 0x37e   : > { %v2015_v62 = vpop.f32.mrf.mxu0 }
 0x37f   : > { %v2206_v14 = vpop.f32.mrf.mxu1 }
 0x380   : > { %v9178_v51 = vpop.f32.mrf.mxu0 }
 0x381   : > { %v9242_v27 = vpop.f32.mrf.mxu1 }
 0x382   : > { %v2019_v11 = vpop.f32.mrf.mxu0  ;;  %9412 = vmatmul.mubr.msk.bf16.gmra.mxu0 %vm14722_vm6, %v11836_v33  ;;  %vm14726_vm6 = vmmov %vm14651_vm2 }
 0x383   : > { %v12270_v17 = vadd.f32 %v2203_v43, %v2019_v11  ;;  %v2211_v63 = vpop.f32.mrf.mxu1  ;;  %9476 = vmatmul.mubr.msk.bf16.gmra.mxu1 %vm14723_vm5, %v11817_v44  ;;  %9415 = vmatprep.mubr.msk.bf16.mxu0 %vm14652_vm3, %v14676_v1  ;;  %vm14728_vm5 = vmmov %vm14651_vm2 }
 0x384   : > { %v9181_v3 = vpop.f32.mrf.mxu0  ;;  %9479 = vmatprep.mubr.msk.bf16.mxu1 %vm14652_vm3, %v14676_v1 }
 0x385   : > { %v9245_v0 = vpop.f32.mrf.mxu1  ;;  %v14731_v3 = vld [vmem:[#allocation28_spill] sm:$0xff] }
 0x386   : > { %v2022_v35 = vpop.f32.mrf.mxu0 }
 0x387   : > { %v12278_v26 = vadd.f32 %v2206_v14, %v2022_v35  ;;  %v2214_v57 = vpop.f32.mrf.mxu1 }
 0x388   : > { %v9182_v7 = vpop.f32.mrf.mxu0 }
 0x389   : > { %v9246_v33 = vpop.f32.mrf.mxu1 }
 0x38a   : > { %v2027_v54 = vpop.f32.mrf.mxu0  ;;  %9416 = vmatmul.mubr.msk.bf16.gmra.mxu0 %vm14724_vm8, %v11839_v31  ;;  %vm14729_vm8 = vmmov %vm14651_vm2 }
 0x38b   : > { %v12282_v15 = vadd.f32 %v2211_v63, %v2027_v54  ;;  %v2219_v44 = vpop.f32.mrf.mxu1  ;;  %9480 = vmatmul.mubr.msk.bf16.gmra.mxu1 %vm14651_vm2, %v14725_v32  ;;  %9419 = vmatprep.mubr.msk.bf16.mxu0 %vm14652_vm3, %v14676_v1 }
 0x38c   : > { %v9185_v50 = vpop.f32.mrf.mxu0  ;;  %9483 = vmatprep.mubr.msk.bf16.mxu1 %vm14652_vm3, %v14676_v1 }
 0x38d   : > { %v9249_v59 = vpop.f32.mrf.mxu1 }
 0x38e   : > { %v2030_v29 = vpop.f32.mrf.mxu0 }
 0x38f   : > { %v12290_v5 = vadd.f32 %v2214_v57, %v2030_v29  ;;  %v2222_v2 = vpop.f32.mrf.mxu1  ;;  %v14733_v57 = vld [vmem:[#allocation24_spill] sm:$0xff] }
 0x390   : > { %v9186_v20 = vpop.f32.mrf.mxu0 }
 0x391   : > { %v9250_v31 = vpop.f32.mrf.mxu1 }
 0x392   : > { %v2035_v56 = vpop.f32.mrf.mxu0  ;;  %9420 = vmatmul.mubr.msk.bf16.gmra.mxu0 %vm14726_vm6, %v11861_v53  ;;  %vm14732_vm6 = vmmov %vm14651_vm2 }
 0x393   : > { %v12294_v8 = vadd.f32 %v2219_v44, %v2035_v56  ;;  %v2227_v4 = vpop.f32.mrf.mxu1  ;;  %9484 = vmatmul.mubr.msk.bf16.gmra.mxu1 %vm14728_vm5, %v14727_v48  ;;  %9423 = vmatprep.mubr.msk.bf16.mxu0 %vm14652_vm3, %v14676_v1  ;;  %vm14734_vm5 = vmmov %vm14651_vm2  ;;  %v14737_v56 = vld [vmem:[#allocation25_spill] sm:$0xff] }
 0x394   : > { %v9189_v23 = vpop.f32.mrf.mxu0  ;;  %9487 = vmatprep.mubr.msk.bf16.mxu1 %vm14652_vm3, %v14676_v1 }
 0x395   : > { %v9253_v45 = vpop.f32.mrf.mxu1 }
 0x396   : > { %v2038_v38 = vpop.f32.mrf.mxu0 }
 0x397   : > { %v12302_v58 = vadd.f32 %v2222_v2, %v2038_v38  ;;  %v2230_v47 = vpop.f32.mrf.mxu1  ;;  %v14735_v2 = vld [vmem:[#allocation29_spill] sm:$0xff] }
 0x398   : > { %v9190_v16 = vpop.f32.mrf.mxu0 }
 0x399   : > { %v9254_v53 = vpop.f32.mrf.mxu1  ;;  %v3452_v16 = vld [vmem:[#allocation2 + $0x8] sm:$0xc] }
 0x39a   : > { %v2043_v13 = vpop.f32.mrf.mxu0  ;;  %9424 = vmatmul.mubr.msk.bf16.gmra.mxu0 %vm14729_vm8, %v11868_v6  ;;  %vm14736_vm8 = vmmov %vm14651_vm2 }
 0x39b   : > { %v12306_v55 = vadd.f32 %v2227_v4, %v2043_v13  ;;  %v2235_v43 = vpop.f32.mrf.mxu1  ;;  %9488 = vmatmul.mubr.msk.bf16.gmra.mxu1 %vm14651_vm2, %v14730_v37  ;;  %9427 = vmatprep.mubr.msk.bf16.mxu0 %vm14652_vm3, %v14676_v1  ;;  %v14738_v13 = vld [vmem:[#allocation30_spill] sm:$0xff] }
 0x39c   : > { %v9193_v10 = vpop.f32.mrf.mxu0  ;;  %9491 = vmatprep.mubr.msk.bf16.mxu1 %vm14652_vm3, %v14676_v1 }
 0x39d   : > { %v9257_v62 = vpop.f32.mrf.mxu1 }
 0x39e   : > { %v2046_v14 = vpop.f32.mrf.mxu0  ;;  %v14741_v62 = vld [vmem:[#allocation26_spill] sm:$0xff] }
 0x39f   : > { %v12314_v51 = vadd.f32 %v2230_v47, %v2046_v14  ;;  %v2238_v27 = vpop.f32.mrf.mxu1 }
 0x3a0   : > { %v9194_v11 = vpop.f32.mrf.mxu0 }
 0x3a1   : > { %v9258_v6 = vpop.f32.mrf.mxu1 }
 0x3a2   : > { %v2051_v63 = vpop.f32.mrf.mxu0  ;;  %9428 = vmatmul.mubr.msk.bf16.gmra.mxu0 %vm14732_vm6, %v14731_v3  ;;  %vm14739_vm6 = vmmov %vm14651_vm2  ;;  %v14743_v3 = vld [vmem:[#allocation33_spill] sm:$0xff] }
 0x3a3   : > { %v12318_v0 = vadd.f32 %v2235_v43, %v2051_v63  ;;  %v2243_v35 = vpop.f32.mrf.mxu1  ;;  %9492 = vmatmul.mubr.msk.bf16.gmra.mxu1 %vm14734_vm5, %v14733_v57  ;;  %9431 = vmatprep.mubr.msk.bf16.mxu0 %vm14652_vm3, %v14676_v1  ;;  %v14740_v43 = vld [vmem:[#allocation32_spill] sm:$0xff]  ;;  %vm14742_vm5 = vmmov %vm14651_vm2  ;;  %v3819_v57 = vshll.u32 %v14743_v3, 16 }
 0x3a4   : > { %v9197_v7 = vpop.f32.mrf.mxu0  ;;  %9495 = vmatprep.mubr.msk.bf16.mxu1 %vm14652_vm3, %v14676_v1  ;;  %v12341_v37 = vcombine.low %v3452_v16, %v14740_v43  ;;  %v3828_v43 = vshll.u32 %v11939_v41, 16 }
 0x3a5   : > { %v9261_v33 = vpop.f32.mrf.mxu1 }
 0x3a6   : > { %v2054_v54 = vpop.f32.mrf.mxu0  ;;  %v3808_v6 = vshrl.u32 %v12341_v37, 16  ;;  %v3811_v63 = vshll.u32 %v12341_v37, 16 }
 0x3a7   : > { %v12326_v44 = vadd.f32 %v2238_v27, %v2054_v54  ;;  %v2246_v32 = vpop.f32.mrf.mxu1 }
 0x3a8   : > { %v9198_v50 = vpop.f32.mrf.mxu0 }
 0x3a9   : > { %v9262_v59 = vpop.f32.mrf.mxu1  ;;  %v14744_v50 = vld [vmem:[#allocation31_spill] sm:$0xff] }
 0x3aa   : > { %v2059_v29 = vpop.f32.mrf.mxu0  ;;  %9432 = vmatmul.mubr.msk.bf16.gmra.mxu0 %vm14736_vm8, %v14735_v2  ;;  %vm14745_vm8 = vmmov %vm14651_vm2  ;;  %v3810_v59 = vrot.slane %v3808_v6, 2 }
 0x3ab   : > { %v12330_v20 = vadd.f32 %v2243_v35, %v2059_v29  ;;  %v2250_v31 = vpop.f32.mrf.mxu1  ;;  %9496 = vmatmul.mubr.msk.bf16.gmra.mxu1 %vm14651_vm2, %v14737_v56  ;;  %9435 = vmatprep.mubr.msk.bf16.mxu0 %vm14652_vm3, %v14676_v1  ;;  %v3816_v35 = vshrl.u32 %v14743_v3, 16  ;;  %v3813_v29 = vrot.slane %v3811_v63, 3 }
 0x3ac   : > { %v9201_v4 = vpop.f32.mrf.mxu0  ;;  %9499 = vmatprep.mubr.msk.bf16.mxu1 %vm14652_vm3, %v14676_v1  ;;  %v3821_v31 = vrot.slane %v3819_v57, 3 }
 0x3ad   : > { %v9265_v48 = vpop.f32.mrf.mxu1  ;;  %v3818_v2 = vrot.slane %v3816_v35, 2  ;;  %v14748_v35 = vld [vmem:[#allocation27_spill] sm:$0xff] }
 0x3ae   : > { %v2062_v23 = vpop.f32.mrf.mxu0  ;;  %v14746_v48 = vld [vmem:[#allocation20_spill] sm:$0xff] }
 0x3af   : > { %v2252_v45 = vpop.f32.mrf.mxu1  ;;  %v14747_v23 = vrot.slane %v14746_v48, 2 }
 0x3b0   : > { %v9202_v38 = vpop.f32.mrf.mxu0 }
 0x3b1   : > { %v9266_v47 = vpop.f32.mrf.mxu1 }
 0x3b2   : > { %v2066_v53 = vpop.f32.mrf.mxu0  ;;  %9436 = vmatmul.mubr.msk.bf16.gmra.mxu0 %vm14739_vm6, %v14738_v13  ;;  %v3822_v13 = vor.u32 %v3821_v31, %v3818_v2  ;;  %vm14609_vm6 = vsmask.f32 5376 }
 0x3b3   : > { %v2732_v10 = vpop.f32.mrf.mxu1  ;;  %9500 = vmatmul.mubr.msk.bf16.gmra.mxu1 %vm14742_vm5, %v14741_v62  ;;  %9439 = vmatprep.mubr.msk.bf16.mxu0 %vm14652_vm3, %v14676_v1  ;;  %v3814_v53 = vor.u32 %v3813_v29, %v3810_v59  ;;  %vm14749_vm5 = vmmov %vm14651_vm2  ;;  %v3553_v59 = vrot.slane %v14743_v3, 2 }
 0x3b4   : > { %v9205_v14 = vpop.f32.mrf.mxu0  ;;  %9503 = vmatprep.mubr.msk.bf16.mxu1 %vm14652_vm3, %v14676_v1 }
 0x3b5   : > { %v9337_v27 = vpop.f32.mrf.mxu1 }
 0x3b6   : > { %v2068_v11 = vpop.f32.mrf.mxu0 }
 0x3b7   : > { %v2735_v7 = vpop.f32.mrf.mxu1 }
 0x3b8   : > { %v9206_v33 = vpop.f32.mrf.mxu0 }
 0x3b9   : > { %v9338_v54 = vpop.f32.mrf.mxu1  ;;  %v3830_v33 = vrot.slane %v3828_v43, 3 }
 0x3ba   : > { %v2391_v32 = vpop.f32.mrf.mxu0  ;;  %9440 = vmatmul.mubr.msk.bf16.gmra.mxu0 %vm14745_vm8, %v14744_v50  ;;  %vm14750_vm8 = vmmov %vm14651_vm2  ;;  %v3552_v50 = vrot.slane %v12341_v37, 2 }
 0x3bb   : > { %v2489_v56 = vadd.f32 %v2391_v32, %v12172_v34  ;;  %v2740_v4 = vpop.f32.mrf.mxu1  ;;  %9504 = vmatmul.mubr.msk.bf16.gmra.mxu1 %vm14651_vm2, %v14747_v23  ;;  %9443 = vmatprep.mubr.msk.bf16.mxu0 %vm14652_vm3, %v14676_v1  ;;  %v3825_v34 = vshrl.u32 %v11939_v41, 16 }
 0x3bc   : > { %v9277_v45 = vpop.f32.mrf.mxu0  ;;  %9575 = vmatprep.mubr.msk.bf16.mxu1 %vm14652_vm3, %v14676_v1  ;;  %v3554_v37 = vsel %vm3210_vm0, %v3552_v50, %v3553_v59 }
 0x3bd   : > { %v9341_v38 = vpop.f32.mrf.mxu1  ;;  %v12363_v47 = vadd.f32 %v2732_v10, %v2489_v56  ;;  %v3823_v10 = vsel %vm14609_vm6, %v3814_v53, %v3822_v13  ;;  %v3827_v57 = vrot.slane %v3825_v34, 2 }
 0x3be   : > { %v2394_v16 = vpop.f32.mrf.mxu0  ;;  %v10354_v38 = vld [vmem:[%s14576_s6 + $0x118] sm:$0xff]  }
 0x3bf   : > { %v2490_v62 = vadd.f32 %v2394_v16, %v12179_v61  ;;  %v2743_v14 = vpop.f32.mrf.mxu1  ;;  %v3831_v31 = vor.u32 %v3830_v33, %v3827_v57 }
 0x3c0   : > { %v9278_v27 = vpop.f32.mrf.mxu0 }
 0x3c1   : > { %v9342_v11 = vpop.f32.mrf.mxu1  ;;  %v12368_v6 = vadd.f32 %v2735_v7, %v2490_v62  ;;  %v3832_v34 = vsel %vm14609_vm6, %v3822_v13, %v3831_v31 }
 0x3c2   : > { %v2399_v63 = vpop.f32.mrf.mxu0  ;;  %9444 = vmatmul.mubr.msk.bf16.gmra.mxu0 %vm14749_vm5, %v14748_v35  ;;  %vm14752_vm5 = vmmov %vm14651_vm2  ;;  %v10359_v11 = vld [vmem:[%s14576_s6 + $0x110] sm:$0xff]  }
 0x3c3   : > { %v2491_v54 = vadd.f32 %v2399_v63, %v12185_v49  ;;  %v2748_v32 = vpop.f32.mrf.mxu1  ;;  %9576 = vmatmul.mubr.msk.bf16.vlgmr.msra.gmra.mxu1 %vm14750_vm8, %v3823_v10  ;;  %9515 = vmatprep.mubr.msk.bf16.mxu0 %vm14652_vm3, %v14676_v1  ;;  %v14751_v49 = vld [vmem:[#allocation34_spill] sm:$0xff]  ;;  %vm14754_vm8 = vmmov %vm14651_vm2 }
 0x3c4   : > { %v9281_v61 = vpop.f32.mrf.mxu0  ;;  %9579 = vmatprep.mubr.msk.bf16.mxu1 %vm14652_vm3, %v14676_v1  ;;  %v3834_v56 = vshrl.u32 %v14751_v49, 16  ;;  %v3837_v48 = vshll.u32 %v14751_v49, 16 }
 0x3c5   : > { %v9345_v7 = vpop.f32.mrf.mxu1  ;;  %v12381_v29 = vadd.f32 %v2740_v4, %v2491_v54  ;;  %v14753_v61 = vld [vmem:[#allocation35_spill] sm:$0xff] }
 0x3c6   : > { %v2402_v2 = vpop.f32.mrf.mxu0  ;;  %v3836_v43 = vrot.slane %v3834_v56, 2  ;;  %v3839_v62 = vrot.slane %v3837_v48, 3  ;;  %v3843_v7 = vshrl.u32 %v14753_v61, 16  ;;  %v3846_v50 = vshll.u32 %v14753_v61, 16 }
 0x3c7   : > { %v2492_v23 = vadd.f32 %v2402_v2, %v12197_v24  ;;  %v2751_v45 = vpop.f32.mrf.mxu1 }
 0x3c8   : > { %v9282_v16 = vpop.f32.mrf.mxu0  ;;  %v3840_v10 = vor.u32 %v3839_v62, %v3836_v43  ;;  %v3855_v43 = vshll.u32 %v11949_v21, 16 }
 0x3c9   : > { %v9346_v53 = vpop.f32.mrf.mxu1  ;;  %v12390_v3 = vadd.f32 %v2743_v14, %v2492_v23  ;;  %v3555_v14 = vrot.slane %v11939_v41, 2  ;;  %v10363_v41 = vld [vmem:[%s14576_s6 + $0x108] sm:$0xff]  }
 0x3ca   : > { %v2407_v4 = vpop.f32.mrf.mxu0  ;;  %9516 = vmatmul.mubr.msk.bf16.vlgmr.msra.gmra.mxu0 %vm14651_vm2, %v3554_v37  ;;  %v10367_v53 = vld [vmem:[%s14576_s6 + $0x100] sm:$0xff]  }
 0x3cb   : > { %v2493_v24 = vadd.f32 %v2407_v4, %v12208_v9  ;;  %9628 = vmatpush3.bf16.msra.mxu0 %v10354_v38  ;;  %v2756_v27 = vpop.f32.mrf.mxu1  ;;  %9580 = vmatmul.mubr.msk.bf16.gmra.mxu1 %vm14752_vm5, %v3832_v34  ;;  %v3852_v34 = vshrl.u32 %v11949_v21, 16  ;;  %vm14755_vm5 = vmmov %vm14651_vm2  ;;  %v3857_v21 = vrot.slane %v3855_v43, 3 }
 0x3cc   : > { %v9285_v63 = vpop.f32.mrf.mxu0  ;;  %9519 = vmatprep.mubr.msk.bf16.mxu0 %vm14652_vm3, %v14676_v1  ;;  %9583 = vmatprep.mubr.msk.bf16.mxu1 %vm14652_vm3, %v14676_v1 }
 0x3cd   : > { %v9349_v13 = vpop.f32.mrf.mxu1  ;;  %9629 = vmatprep.subr.bf16.mxu0 %v14676_v1  ;;  %v12405_v9 = vadd.f32 %v2748_v32, %v2493_v24  ;;  %v3556_v32 = vsel %vm3210_vm0, %v3553_v59, %v3555_v14  ;;  %v3845_v59 = vrot.slane %v3843_v7, 2 }
 0x3ce   : > { %v2410_v35 = vpop.f32.mrf.mxu0 }
 0x3cf   : > { %v2494_v57 = vadd.f32 %v2410_v35, %v12224_v25  ;;  %v2759_v33 = vpop.f32.mrf.mxu1  ;;  %9630 = vmatpush3.bf16.msra.mxu0 %v10359_v11  ;;  %v3841_v25 = vsel %vm14609_vm6, %v3831_v31, %v3840_v10 }
 0x3d0   : > { %v9286_v54 = vpop.f32.mrf.mxu0  ;;  %9631 = vmatprep.subr.bf16.mxu0 %v14676_v1 }
 0x3d1   : > { %v9350_v2 = vpop.f32.mrf.mxu1  ;;  %v12415_v56 = vadd.f32 %v2751_v45, %v2494_v57  ;;  %v3848_v45 = vrot.slane %v3846_v50, 3  ;;  %v3854_v54 = vrot.slane %v3852_v34, 2 }
 0x3d2   : > { %v2415_v48 = vpop.f32.mrf.mxu0  ;;  %9520 = vmatmul.mubr.msk.bf16.gmra.mxu0 %vm14754_vm8, %v3556_v32  ;;  %vm14756_vm8 = vmmov %vm14651_vm2  ;;  %v3864_v32 = vshll.u32 %v11951_v30, 16 }
 0x3d3   : > { %v2495_v23 = vadd.f32 %v2415_v48, %v12233_v39  ;;  %v2764_v38 = vpop.f32.mrf.mxu1  ;;  %9584 = vmatmul.mubr.msk.bf16.gmra.mxu1 %vm14651_vm2, %v3841_v25  ;;  %9523 = vmatprep.mubr.msk.bf16.mxu0 %vm14652_vm3, %v14676_v1  ;;  %v3557_v39 = vrot.slane %v14751_v49, 2  ;;  %v3849_v63 = vor.u32 %v3848_v45, %v3845_v59  ;;  %v3858_v2 = vor.u32 %v3857_v21, %v3854_v54 }
 0x3d4   : > { %v9289_v16 = vpop.f32.mrf.mxu0  ;;  %9587 = vmatprep.mubr.msk.bf16.mxu1 %vm14652_vm3, %v14676_v1  ;;  %9632 = vmatpush3.bf16.msra.mxu0 %v10363_v41  ;;  %v3559_v25 = vrot.slane %v14753_v61, 2  ;;  %v10572_v61 = vld [vmem:[#allocation2 + $0x30] sm:$0xff]  }
 0x3d5   : > { %v9353_v31 = vpop.f32.mrf.mxu1  ;;  %9633 = vmatprep.subr.bf16.mxu0 %v14676_v1  ;;  %v12430_v37 = vadd.f32 %v2756_v27, %v2495_v23  ;;  %v3558_v35 = vsel %vm3210_vm0, %v3555_v14, %v3557_v39  ;;  %v3850_v27 = vsel %vm14609_vm6, %v3840_v10, %v3849_v63  ;;  %v3861_v10 = vshrl.u32 %v11951_v30, 16 }
 0x3d6   : > { %v2418_v4 = vpop.f32.mrf.mxu0  ;;  %v3560_v59 = vsel %vm3210_vm0, %v3557_v39, %v3559_v25  ;;  %v3561_v39 = vrot.slane %v10572_v61, 2 }
 0x3d7   : > { %v2496_v62 = vadd.f32 %v2418_v4, %v12245_v12  ;;  %v2767_v24 = vpop.f32.mrf.mxu1  ;;  %v3863_v31 = vrot.slane %v3861_v10, 2  ;;  %v3866_v4 = vrot.slane %v3864_v32, 3  ;;  %v10574_v32 = vld [vmem:[#allocation2 + $0x38] sm:$0xff]  }
 0x3d8   : > { %v9290_v11 = vpop.f32.mrf.mxu0  ;;  %9634 = vmatpush3.bf16.msra.mxu0 %v10367_v53 }
 0x3d9   : > { %v9354_v13 = vpop.f32.mrf.mxu1  ;;  %v12436_v57 = vadd.f32 %v2759_v33, %v2496_v62  ;;  %9743 = vmatprep.subr.bf16.mxu0 %v14676_v1  ;;  %v3867_v62 = vor.u32 %v3866_v4, %v3863_v31 }
 0x3da   : > { %v2423_v49 = vpop.f32.mrf.mxu0  ;;  %9524 = vmatmul.mubr.msk.bf16.gmra.mxu0 %vm14755_vm5, %v3558_v35  ;;  %vm14757_vm5 = vmmov %vm14651_vm2 }
 0x3db   : > { %v2497_v12 = vadd.f32 %v2423_v49, %v12250_v40  ;;  %v2772_v7 = vpop.f32.mrf.mxu1  ;;  %9588 = vmatmul.mubr.msk.bf16.gmra.mxu1 %vm14756_vm8, %v3850_v27  ;;  %9527 = vmatprep.mubr.msk.bf16.mxu0 %vm14652_vm3, %v14676_v1  ;;  %v3562_v27 = vsel %vm3210_vm0, %v3559_v25, %v3561_v39  ;;  %vm14758_vm8 = vmmov %vm14651_vm2  ;;  %v3868_v21 = vsel %vm14609_vm6, %v3858_v2, %v3867_v62 }
 0x3dc   : > { %v9293_v14 = vpop.f32.mrf.mxu0  ;;  %9591 = vmatprep.mubr.msk.bf16.mxu1 %vm14652_vm3, %v14676_v1 }
 0x3dd   : > { %v9357_v33 = vpop.f32.mrf.mxu1  ;;  %v12447_v50 = vadd.f32 %v2764_v38, %v2497_v12  ;;  %v3859_v38 = vsel %vm14609_vm6, %v3849_v63, %v3858_v2 }
 0x3de   : > { %v2426_v41 = vpop.f32.mrf.mxu0 }
 0x3df   : > { %v2498_v40 = vadd.f32 %v2426_v41, %v12258_v52  ;;  %v2774_v48 = vpop.f32.mrf.mxu1 }
 0x3e0   : > { %v9294_v23 = vpop.f32.mrf.mxu0 }
 0x3e1   : > { %v9358_v16 = vpop.f32.mrf.mxu1  ;;  %v12454_v45 = vadd.f32 %v2767_v24, %v2498_v40  ;;  %v12463_v24 = vld [vmem:[#allocation2 + $0x40] sm:$0xff]   ;;  %v3563_v40 = vrot.slane %v10574_v32, 2  ;;  %v12478_v23 = vld [vmem:[#allocation2 + $0x48] sm:$0xff]  }
 0x3e2   : > { %v2431_v53 = vpop.f32.mrf.mxu0  ;;  %9528 = vmatmul.mubr.msk.bf16.gmra.mxu0 %vm14651_vm2, %v3560_v59  ;;  %v3870_v11 = vshrl.u32 %v12463_v24, 16  ;;  %v3873_v63 = vshll.u32 %v12463_v24, 16  ;;  %v3882_v16 = vshll.u32 %v12478_v23, 16 }
 0x3e3   : > { %v2778_v34 = vpop.f32.mrf.mxu1  ;;  %9592 = vmatmul.mubr.msk.bf16.gmra.mxu1 %vm14757_vm5, %v3859_v38  ;;  %9531 = vmatprep.mubr.msk.bf16.mxu0 %vm14652_vm3, %v14676_v1  ;;  %v3564_v4 = vsel %vm3210_vm0, %v3561_v39, %v3563_v40  ;;  %vm14759_vm5 = vmmov %vm14651_vm2 }
 0x3e4   : > { %v9297_v30 = vpop.f32.mrf.mxu0  ;;  %9595 = vmatprep.mubr.msk.bf16.mxu1 %vm14652_vm3, %v14676_v1  ;;  %v3872_v12 = vrot.slane %v3870_v11, 2  ;;  %v3875_v7 = vrot.slane %v3873_v63, 3 }
 0x3e5   : > { %v9361_v52 = vpop.f32.mrf.mxu1 }
 0x3e6   : > { %v2433_v43 = vpop.f32.mrf.mxu0  ;;  %v3876_v25 = vor.u32 %v3875_v7, %v3872_v12 }
 0x3e7   : > { %v2781_v13 = vpop.f32.mrf.mxu1  ;;  %v3884_v43 = vrot.slane %v3882_v16, 3 }
 0x3e8   : > { %v9298_v35 = vpop.f32.mrf.mxu0 }
 0x3e9   : > { %v9362_v49 = vpop.f32.mrf.mxu1 }
 0x3ea   : > { %v2437_v54 = vpop.f32.mrf.mxu0  ;;  %9532 = vmatmul.mubr.msk.bf16.gmra.mxu0 %vm14758_vm8, %v3562_v27  ;;  %vm14760_vm8 = vmmov %vm14651_vm2 }
 0x3eb   : > { %v2499_v14 = vadd.f32 %v2437_v54, %v12270_v17  ;;  %v2786_v33 = vpop.f32.mrf.mxu1  ;;  %9596 = vmatmul.mubr.msk.bf16.gmra.mxu1 %vm14651_vm2, %v3868_v21  ;;  %9535 = vmatprep.mubr.msk.bf16.mxu0 %vm14652_vm3, %v14676_v1  ;;  %v3879_v17 = vshrl.u32 %v12478_v23, 16  ;;  %v12498_v21 = vld [vmem:[#allocation2 + $0x50] sm:$0xff]  }
 0x3ec   : > { %v9301_v41 = vpop.f32.mrf.mxu0  ;;  %9599 = vmatprep.mubr.msk.bf16.mxu1 %vm14652_vm3, %v14676_v1  ;;  %v3888_v12 = vshrl.u32 %v12498_v21, 16  ;;  %v3891_v7 = vshll.u32 %v12498_v21, 16 }
 0x3ed   : > { %v9365_v10 = vpop.f32.mrf.mxu1  ;;  %v12476_v48 = vadd.f32 %v2778_v34, %v2499_v14  ;;  %v3877_v34 = vsel %vm14609_vm6, %v3867_v62, %v3876_v25  ;;  %v3881_v61 = vrot.slane %v3879_v17, 2 }
 0x3ee   : > { %v2440_v2 = vpop.f32.mrf.mxu0  ;;  %v3893_v17 = vrot.slane %v3891_v7, 3 }
 0x3ef   : > { %v2500_v59 = vadd.f32 %v2440_v2, %v12278_v26  ;;  %v2789_v53 = vpop.f32.mrf.mxu1  ;;  %v3885_v49 = vor.u32 %v3884_v43, %v3881_v61 }
 0x3f0   : > { %v9302_v38 = vpop.f32.mrf.mxu0 }
 0x3f1   : > { %v9366_v31 = vpop.f32.mrf.mxu1  ;;  %v12484_v30 = vadd.f32 %v2781_v13, %v2500_v59  ;;  %v3565_v13 = vrot.slane %v12463_v24, 2  ;;  %v3567_v59 = vrot.slane %v12478_v23, 2  ;;  %v12516_v38 = vld [vmem:[#allocation2 + $0x58] sm:$0xff]  }
 0x3f2   : > { %v2445_v52 = vpop.f32.mrf.mxu0  ;;  %9536 = vmatmul.mubr.msk.bf16.gmra.mxu0 %vm14759_vm5, %v3564_v4  ;;  %vm14761_vm5 = vmmov %vm14651_vm2  ;;  %v3900_v31 = vshll.u32 %v12516_v38, 16 }
 0x3f3   : > { %v2501_v11 = vadd.f32 %v2445_v52, %v12282_v15  ;;  %v2794_v63 = vpop.f32.mrf.mxu1  ;;  %9600 = vmatmul.mubr.msk.bf16.gmra.mxu1 %vm14760_vm8, %v3877_v34  ;;  %9539 = vmatprep.mubr.msk.bf16.mxu0 %vm14652_vm3, %v14676_v1  ;;  %v3566_v41 = vsel %vm3210_vm0, %v3563_v40, %v3565_v13  ;;  %v3890_v40 = vrot.slane %v3888_v12, 2  ;;  %vm14762_vm8 = vmmov %vm14651_vm2  ;;  %v3793_v12 = vld [vmem:[#allocation2 + $0x6c] sm:$0x7] }
 0x3f4   : > { %v9305_v26 = vpop.f32.mrf.mxu0  ;;  %9603 = vmatprep.mubr.msk.bf16.mxu1 %vm14652_vm3, %v14676_v1 }
 0x3f5   : > { %v9369_v39 = vpop.f32.mrf.mxu1  ;;  %v12495_v35 = vadd.f32 %v2786_v33, %v2501_v11  ;;  %v3886_v33 = vsel %vm14609_vm6, %v3876_v25, %v3885_v49  ;;  %v3894_v61 = vor.u32 %v3893_v17, %v3890_v40  ;;  %v3568_v11 = vsel %vm3210_vm0, %v3565_v13, %v3567_v59 }
 0x3f6   : > { %v2448_v62 = vpop.f32.mrf.mxu0 }
 0x3f7   : > { %v2502_v27 = vadd.f32 %v2448_v62, %v12290_v5  ;;  %v2797_v15 = vpop.f32.mrf.mxu1  ;;  %v3902_v62 = vrot.slane %v3900_v31, 3 }
 0x3f8   : > { %v9306_v54 = vpop.f32.mrf.mxu0 }
 0x3f9   : > { %v9370_v14 = vpop.f32.mrf.mxu1  ;;  %v12503_v10 = vadd.f32 %v2789_v53, %v2502_v27 }
 0x3fa   : > { %v2453_v24 = vpop.f32.mrf.mxu0  ;;  %9540 = vmatmul.mubr.msk.bf16.gmra.mxu0 %vm14651_vm2, %v3566_v41  ;;  %v12536_v41 = vld [vmem:[#allocation2 + $0x60] sm:$0xff]  }
 0x3fb   : > { %v2503_v5 = vadd.f32 %v2453_v24, %v12294_v8  ;;  %v2802_v32 = vpop.f32.mrf.mxu1  ;;  %9604 = vmatmul.mubr.msk.bf16.gmra.mxu1 %vm14761_vm5, %v3886_v33  ;;  %9543 = vmatprep.mubr.msk.bf16.mxu0 %vm14652_vm3, %v14676_v1  ;;  %v3897_v8 = vshrl.u32 %v12516_v38, 16  ;;  %v3909_v24 = vshll.u32 %v12536_v41, 16  ;;  %vm14763_vm5 = vmmov %vm14651_vm2 }
 0x3fc   : > { %v9309_v2 = vpop.f32.mrf.mxu0  ;;  %9607 = vmatprep.mubr.msk.bf16.mxu1 %vm14652_vm3, %v14676_v1 }
 0x3fd   : > { %v9373_v16 = vpop.f32.mrf.mxu1  ;;  %v12514_v53 = vadd.f32 %v2794_v63, %v2503_v5  ;;  %v3895_v63 = vsel %vm14609_vm6, %v3885_v49, %v3894_v61  ;;  %v3899_v39 = vrot.slane %v3897_v8, 2  ;;  %v3569_v2 = vrot.slane %v12498_v21, 2 }
 0x3fe   : > { %v2456_v25 = vpop.f32.mrf.mxu0 }
 0x3ff   : > { %v2504_v4 = vadd.f32 %v2456_v25, %v12302_v58  ;;  %v2805_v52 = vpop.f32.mrf.mxu1  ;;  %v3903_v14 = vor.u32 %v3902_v62, %v3899_v39 }
 0x400   : > { %v9310_v34 = vpop.f32.mrf.mxu0 }
 0x401   : > { %v9374_v43 = vpop.f32.mrf.mxu1  ;;  %v12522_v26 = vadd.f32 %v2797_v15, %v2504_v4  ;;  %v12532_v15 = vld [vmem:[#allocation2 + $0x68] sm:$0xf]  ;;  %v3904_v31 = vsel %vm14609_vm6, %v3894_v61, %v3903_v14  ;;  %v3911_v34 = vrot.slane %v3909_v24, 3  ;;  %v3571_v61 = vrot.slane %v12516_v38, 2 }
 0x402   : > { %v2461_v23 = vpop.f32.mrf.mxu0  ;;  %9544 = vmatmul.mubr.msk.bf16.gmra.mxu0 %vm14762_vm8, %v3568_v11  ;;  %v12543_v17 = vcombine.low %v12532_v15, %v3793_v12  ;;  %vm14764_vm8 = vmmov %vm14651_vm2 }
 0x403   : > { %v2505_v27 = vadd.f32 %v2461_v23, %v12306_v55  ;;  %v2810_v54 = vpop.f32.mrf.mxu1  ;;  %9608 = vmatmul.mubr.msk.bf16.gmra.mxu1 %vm14651_vm2, %v3895_v63  ;;  %9547 = vmatprep.mubr.msk.bf16.mxu0 %vm14652_vm3, %v14676_v1  ;;  %v3906_v55 = vshrl.u32 %v12536_v41, 16 }
 0x404   : > { %v9313_v58 = vpop.f32.mrf.mxu0  ;;  %9611 = vmatprep.mubr.msk.bf16.mxu1 %vm14652_vm3, %v14676_v1 }
 0x405   : > { %v9377_v13 = vpop.f32.mrf.mxu1  ;;  %v12534_v7 = vadd.f32 %v2802_v32, %v2505_v27  ;;  %v3570_v32 = vsel %vm3210_vm0, %v3567_v59, %v3569_v2  ;;  %v3908_v4 = vrot.slane %v3906_v55, 2  ;;  %v3915_v59 = vshrl.u32 %v12543_v17, 16 }
 0x406   : > { %v2464_v49 = vpop.f32.mrf.mxu0 }
 0x407   : > { %v2506_v33 = vadd.f32 %v2464_v49, %v12314_v51  ;;  %v2813_v5 = vpop.f32.mrf.mxu1  ;;  %v3912_v63 = vor.u32 %v3911_v34, %v3908_v4  ;;  %v3917_v58 = vrot.slane %v3915_v59, 2  ;;  %v3572_v49 = vsel %vm3210_vm0, %v3569_v2, %v3571_v61 }
 0x408   : > { %v9314_v40 = vpop.f32.mrf.mxu0 }
 0x409   : > { %v9378_v16 = vpop.f32.mrf.mxu1  ;;  %v12546_v25 = vadd.f32 %v2805_v52, %v2506_v33  ;;  %v3918_v52 = vshll.u32 %v12543_v17, 16  ;;  %v3913_v38 = vsel %vm14609_vm6, %v3903_v14, %v3912_v63  ;;  %v3477_v40 = vld [vmem:[#allocation2 + $0x6c] sm:$0x3] }
 0x40a   : > { %v2469_v8 = vpop.f32.mrf.mxu0  ;;  %9548 = vmatmul.mubr.msk.bf16.gmra.mxu0 %vm14763_vm5, %v3570_v32  ;;  %vm14765_vm5 = vmmov %vm14651_vm2  ;;  %v3573_v16 = vrot.slane %v12536_v41, 2 }
 0x40b   : > { %v2507_v51 = vadd.f32 %v2469_v8, %v12318_v0  ;;  %v2818_v43 = vpop.f32.mrf.mxu1  ;;  %9612 = vmatmul.mubr.msk.bf16.gmra.mxu1 %vm14764_vm8, %v3904_v31  ;;  %9551 = vmatprep.mubr.msk.bf16.mxu0 %vm14652_vm3, %v14676_v1  ;;  %v3920_v13 = vrot.slane %v3918_v52, 3  ;;  %vm14766_vm8 = vmmov %vm14651_vm2 }
 0x40c   : > { %v9317_v21 = vpop.f32.mrf.mxu0  ;;  %9615 = vmatprep.mubr.msk.bf16.mxu1 %vm14652_vm3, %v14676_v1 }
 0x40d   : > { %v9381_v11 = vpop.f32.mrf.mxu1  ;;  %v12559_v23 = vadd.f32 %v2810_v54, %v2507_v51  ;;  %v3574_v51 = vsel %vm3210_vm0, %v3571_v61, %v3573_v16 }
 0x40e   : > { %v2472_v0 = vpop.f32.mrf.mxu0 }
 0x40f   : > { %v2508_v39 = vadd.f32 %v2472_v0, %v12326_v44  ;;  %v2821_v62 = vpop.f32.mrf.mxu1 }
 0x410   : > { %v9318_v27 = vpop.f32.mrf.mxu0 }
 0x411   : > { %v9382_v12 = vpop.f32.mrf.mxu1  ;;  %v12563_v55 = vadd.f32 %v2813_v5, %v2508_v39  ;;  %v3921_v5 = vor.u32 %v3920_v13, %v3917_v58 }
 0x412   : > { %v2477_v24 = vpop.f32.mrf.mxu0  ;;  %9552 = vmatmul.mubr.msk.bf16.gmra.mxu0 %vm14651_vm2, %v3572_v49 }
 0x413   : > { %v2509_v54 = vadd.f32 %v2477_v24, %v12330_v20  ;;  %v2825_v33 = vpop.f32.mrf.mxu1  ;;  %9616 = vmatmul.mubr.msk.bf16.gmra.mxu1 %vm14765_vm5, %v3913_v38  ;;  %9555 = vmatprep.mubr.msk.bf16.mxu0 %vm14652_vm3, %v14676_v1  ;;  %v8393_v20 = vcombine.low %v12532_v15, %v3477_v40  ;;  %v3922_v4 = vsel %vm14609_vm6, %v3912_v63, %v3921_v5  ;;  %vm14767_vm5 = vmmov %vm14651_vm2 }
 0x414   : > { %v9321_v44 = vpop.f32.mrf.mxu0  ;;  %9619 = vmatprep.mubr.msk.bf16.mxu1 %vm14652_vm3, %v14676_v1 }
 0x415   : > { %v9385_v2 = vpop.f32.mrf.mxu1  ;;  %v12574_v32 = vadd.f32 %v2818_v43, %v2509_v54  ;;  %v3575_v41 = vrot.slane %v8393_v20, 2 }
 0x416   : > { %v2480_v14 = vpop.f32.mrf.mxu0 }
 0x417   : > { %v2827_v8 = vpop.f32.mrf.mxu1  ;;  %v3576_v0 = vsel %vm3210_vm0, %v3573_v16, %v3575_v41 }
 0x418   : > { %v9322_v31 = vpop.f32.mrf.mxu0 }
 0x419   : > { %v9386_v34 = vpop.f32.mrf.mxu1 }
 0x41a   : > { %v2484_v21 = vpop.f32.mrf.mxu0  ;;  %9556 = vmatmul.mubr.msk.bf16.gmra.mxu0 %vm14766_vm8, %v3574_v51  ;;  %vm14768_vm8 = vmmov %vm14651_vm2 }
 0x41b   : > { %v3333_v59 = vpop.f32.mrf.mxu1  ;;  %9559 = vmatprep.mubr.msk.bf16.mxu0 %vm14652_vm3, %v14676_v1  ;;  %9620 = vmatmul.mubr.msk.bf16.gmra.mxu1 %vm14651_vm2, %v3922_v4  ;;  %v14769_v21 = vld [vmem:[#allocation36_spill] sm:$0xff] }
 0x41c   : > { %v9325_v43 = vpop.f32.mrf.mxu0  ;;  %9623 = vmatprep.mubr.msk.bf16.mxu1 %vm14652_vm3, %v14676_v1 }
 0x41d   : > { %v9457_v15 = vpop.f32.mrf.mxu1 }
 0x41e   : > { %v2486_v52 = vpop.f32.mrf.mxu0 }
 0x41f   : > { %v3336_v11 = vpop.f32.mrf.mxu1 }
 0x420   : > { %v9326_v61 = vpop.f32.mrf.mxu0 }
 0x421   : > { %v9458_v63 = vpop.f32.mrf.mxu1 }
 0x422   : > { %v3078_v39 = vpop.f32.mrf.mxu0  ;;  %9560 = vmatmul.mubr.msk.bf16.gmra.mxu0 %vm14767_vm5, %v3576_v0  ;;  %vm14770_vm5 = vmmov %vm14651_vm2 }
 0x423   : > { %v3176_v62 = vadd.f32 %v3078_v39, %v12363_v47  ;;  %v3341_v27 = vpop.f32.mrf.mxu1  ;;  %9563 = vmatprep.mubr.msk.bf16.mxu0 %vm14652_vm3, %v14676_v1  ;;  %9624 = vmatmul.mubr.msk.bf16.gmra.mxu1 %vm14768_vm8, %v3921_v5  ;;  %vm14772_vm8 = vmmov %vm14651_vm2 }
 0x424   : > { %v9397_v58 = vpop.f32.mrf.mxu0  ;;  %9691 = vmatprep.mubr.msk.bf16.mxu1 %vm14652_vm3, %v14676_v1 }
 0x425   : > { %v9461_v13 = vpop.f32.mrf.mxu1  ;;  %v12593_v12 = vadd.f32 %v3333_v59, %v3176_v62  ;;  %v14771_v62 = vld [vmem:[#allocation37_spill] sm:$0xff] }
 0x426   : > { %v3081_v49 = vpop.f32.mrf.mxu0 }
 0x427   : > { %v3177_v24 = vadd.f32 %v3081_v49, %v12368_v6  ;;  %v3344_v38 = vpop.f32.mrf.mxu1 }
 0x428   : > { %v9398_v54 = vpop.f32.mrf.mxu0 }
 0x429   : > { %v9462_v33 = vpop.f32.mrf.mxu1  ;;  %v12596_v47 = vadd.f32 %v3336_v11, %v3177_v24 }
 0x42a   : > { %v3086_v44 = vpop.f32.mrf.mxu0  ;;  %9564 = vmatmul.mubr.msk.bf16.gmra.mxu0 %vm14651_vm2, %v3575_v41 }
 0x42b   : > { %v3178_v40 = vadd.f32 %v3086_v44, %v12381_v29  ;;  %v3349_v5 = vpop.f32.mrf.mxu1  ;;  %9635 = vmatprep.mubr.msk.bf16.mxu0 %vm14652_vm3, %v14676_v1 }
 0x42c   : > { %v9401_v2 = vpop.f32.mrf.mxu0 }
 0x42d   : > { %v9465_v16 = vpop.f32.mrf.mxu1  ;;  %v12602_v14 = vadd.f32 %v3341_v27, %v3178_v40 }
 0x42e   : > { %v3089_v8 = vpop.f32.mrf.mxu0 }
 0x42f   : > { %v3179_v6 = vadd.f32 %v3089_v8, %v12390_v3  ;;  %v3352_v20 = vpop.f32.mrf.mxu1 }
 0x430   : > { %v9402_v31 = vpop.f32.mrf.mxu0 }
 0x431   : > { %v9466_v4 = vpop.f32.mrf.mxu1  ;;  %v12605_v34 = vadd.f32 %v3344_v38, %v3179_v6 }
 0x432   : > { %v3094_v51 = vpop.f32.mrf.mxu0  ;;  %9636 = vmatmul.mubr.msk.bf16.vlgmr.msra.gmra.mxu0 %vm14770_vm5, %v14769_v21  ;;  %vm14774_vm5 = vmmov %vm14651_vm2 }
 0x433   : > { %v3180_v29 = vadd.f32 %v3094_v51, %v12405_v9  ;;  %v3357_v59 = vpop.f32.mrf.mxu1  ;;  %9639 = vmatprep.mubr.msk.bf16.mxu0 %vm14652_vm3, %v14676_v1 }
 0x434   : > { %v9405_v41 = vpop.f32.mrf.mxu0 }
 0x435   : > { %v9469_v43 = vpop.f32.mrf.mxu1  ;;  %v12612_v15 = vadd.f32 %v3349_v5, %v3180_v29  ;;  %v14773_v5 = vld [vmem:[#allocation38_spill] sm:$0xff] }
 0x436   : > { %v3097_v3 = vpop.f32.mrf.mxu0 }
 0x437   : > { %v3181_v52 = vadd.f32 %v3097_v3, %v12415_v56  ;;  %v3360_v11 = vpop.f32.mrf.mxu1 }
 0x438   : > { %v9406_v0 = vpop.f32.mrf.mxu0 }
 0x439   : > { %v9470_v61 = vpop.f32.mrf.mxu1  ;;  %v12615_v63 = vadd.f32 %v3352_v20, %v3181_v52 }
 0x43a   : > { %v3102_v39 = vpop.f32.mrf.mxu0  ;;  %9640 = vmatmul.mubr.msk.bf16.gmra.mxu0 %vm14772_vm8, %v14771_v62  ;;  %vm14775_vm8 = vmmov %vm14651_vm2 }
 0x43b   : > { %v3182_v9 = vadd.f32 %v3102_v39, %v12430_v37  ;;  %v3365_v27 = vpop.f32.mrf.mxu1  ;;  %9643 = vmatprep.mubr.msk.bf16.mxu0 %vm14652_vm3, %v14676_v1 }
 0x43c   : > { %v9409_v58 = vpop.f32.mrf.mxu0 }
 0x43d   : > { %v9473_v13 = vpop.f32.mrf.mxu1  ;;  %v12622_v49 = vadd.f32 %v3357_v59, %v3182_v9 }
 0x43e   : > { %v3105_v56 = vpop.f32.mrf.mxu0 }
 0x43f   : > { %v3183_v24 = vadd.f32 %v3105_v56, %v12436_v57  ;;  %v3368_v38 = vpop.f32.mrf.mxu1 }
 0x440   : > { %v9410_v54 = vpop.f32.mrf.mxu0 }
 0x441   : > { %v9474_v33 = vpop.f32.mrf.mxu1  ;;  %v12625_v44 = vadd.f32 %v3360_v11, %v3183_v24 }
 0x442   : > { %v3110_v40 = vpop.f32.mrf.mxu0  ;;  %9644 = vmatmul.mubr.msk.bf16.gmra.mxu0 %vm14651_vm2, %v14773_v5 }
 0x443   : > { %v3184_v37 = vadd.f32 %v3110_v40, %v12447_v50  ;;  %v3373_v2 = vpop.f32.mrf.mxu1  ;;  %9647 = vmatprep.mubr.msk.bf16.mxu0 %vm14652_vm3, %v14676_v1 }
 0x444   : > { %v9413_v16 = vpop.f32.mrf.mxu0 }
 0x445   : > { %v9477_v8 = vpop.f32.mrf.mxu1  ;;  %v12632_v6 = vadd.f32 %v3365_v27, %v3184_v37 }
 0x446   : > { %v3113_v57 = vpop.f32.mrf.mxu0 }
 0x447   : > { %v3185_v20 = vadd.f32 %v3113_v57, %v12454_v45  ;;  %v3375_v31 = vpop.f32.mrf.mxu1 }
 0x448   : > { %v9414_v4 = vpop.f32.mrf.mxu0 }
 0x449   : > { %v9478_v51 = vpop.f32.mrf.mxu1  ;;  %v12635_v21 = vadd.f32 %v3368_v38, %v3185_v20 }
 0x44a   : > { %v3118_v29 = vpop.f32.mrf.mxu0  ;;  %9648 = vmatmul.mubr.msk.bf16.gmra.mxu0 %vm14774_vm5, %v11974_v46  ;;  %vm14777_vm5 = vmmov %vm14651_vm2 }
 0x44b   : > { %v3379_v50 = vpop.f32.mrf.mxu1  ;;  %9651 = vmatprep.mubr.msk.bf16.mxu0 %vm14652_vm3, %v14676_v1 }
 0x44c   : > { %v9417_v59 = vpop.f32.mrf.mxu0 }
 0x44d   : > { %v9481_v41 = vpop.f32.mrf.mxu1 }
 0x44e   : > { %v3120_v43 = vpop.f32.mrf.mxu0 }
 0x44f   : > { %v3382_v3 = vpop.f32.mrf.mxu1 }
 0x450   : > { %v9418_v52 = vpop.f32.mrf.mxu0 }
 0x451   : > { %v9482_v11 = vpop.f32.mrf.mxu1 }
 0x452   : > { %v3124_v45 = vpop.f32.mrf.mxu0  ;;  %9652 = vmatmul.mubr.msk.bf16.gmra.mxu0 %vm14775_vm8, %v11977_v42  ;;  %v14776_v42 = vld [vmem:[#allocation39_spill] sm:$0xff]  ;;  %vm14778_vm8 = vmmov %vm14651_vm2 }
 0x453   : > { %v3186_v0 = vadd.f32 %v3124_v45, %v12476_v48  ;;  %v3387_v61 = vpop.f32.mrf.mxu1  ;;  %9655 = vmatprep.mubr.msk.bf16.mxu0 %vm14652_vm3, %v14676_v1 }
 0x454   : > { %v9421_v46 = vpop.f32.mrf.mxu0 }
 0x455   : > { %v9485_v39 = vpop.f32.mrf.mxu1  ;;  %v12646_v62 = vadd.f32 %v3379_v50, %v3186_v0 }
 0x456   : > { %v3127_v9 = vpop.f32.mrf.mxu0 }
 0x457   : > { %v3187_v27 = vadd.f32 %v3127_v9, %v12484_v30  ;;  %v3390_v58 = vpop.f32.mrf.mxu1 }
 0x458   : > { %v9422_v13 = vpop.f32.mrf.mxu0 }
 0x459   : > { %v9486_v56 = vpop.f32.mrf.mxu1  ;;  %v12649_v24 = vadd.f32 %v3382_v3, %v3187_v27 }
 0x45a   : > { %v3132_v38 = vpop.f32.mrf.mxu0  ;;  %9656 = vmatmul.mubr.msk.bf16.gmra.mxu0 %vm14651_vm2, %v14776_v42 }
 0x45b   : > { %v3188_v48 = vadd.f32 %v3132_v38, %v12495_v35  ;;  %v3395_v54 = vpop.f32.mrf.mxu1  ;;  %9659 = vmatprep.mubr.msk.bf16.mxu0 %vm14652_vm3, %v14676_v1 }
 0x45c   : > { %v9425_v33 = vpop.f32.mrf.mxu0 }
 0x45d   : > { %v9489_v40 = vpop.f32.mrf.mxu1  ;;  %v12656_v5 = vadd.f32 %v3387_v61, %v3188_v48 }
 0x45e   : > { %v3135_v30 = vpop.f32.mrf.mxu0 }
 0x45f   : > { %v3189_v37 = vadd.f32 %v3135_v30, %v12503_v10  ;;  %v3398_v2 = vpop.f32.mrf.mxu1 }
 0x460   : > { %v9426_v16 = vpop.f32.mrf.mxu0 }
 0x461   : > { %v9490_v8 = vpop.f32.mrf.mxu1  ;;  %v12659_v57 = vadd.f32 %v3390_v58, %v3189_v37 }
 0x462   : > { %v3140_v20 = vpop.f32.mrf.mxu0  ;;  %9660 = vmatmul.mubr.msk.bf16.gmra.mxu0 %vm14777_vm5, %v11989_v36  ;;  %vm14779_vm5 = vmmov %vm14651_vm2 }
 0x463   : > { %v3190_v35 = vadd.f32 %v3140_v20, %v12514_v53  ;;  %v3403_v31 = vpop.f32.mrf.mxu1  ;;  %9663 = vmatprep.mubr.msk.bf16.mxu0 %vm14652_vm3, %v14676_v1 }
 0x464   : > { %v9429_v4 = vpop.f32.mrf.mxu0 }
 0x465   : > { %v9493_v51 = vpop.f32.mrf.mxu1  ;;  %v12666_v29 = vadd.f32 %v3395_v54, %v3190_v35 }
 0x466   : > { %v3143_v10 = vpop.f32.mrf.mxu0 }
 0x467   : > { %v3191_v50 = vadd.f32 %v3143_v10, %v12522_v26  ;;  %v3406_v59 = vpop.f32.mrf.mxu1 }
 0x468   : > { %v9430_v41 = vpop.f32.mrf.mxu0 }
 0x469   : > { %v9494_v43 = vpop.f32.mrf.mxu1  ;;  %v12669_v3 = vadd.f32 %v3398_v2, %v3191_v50 }
 0x46a   : > { %v3148_v52 = vpop.f32.mrf.mxu0  ;;  %9664 = vmatmul.mubr.msk.bf16.gmra.mxu0 %vm14778_vm8, %v11992_v28  ;;  %vm14780_vm8 = vmmov %vm14651_vm2 }
 0x46b   : > { %v3192_v36 = vadd.f32 %v3148_v52, %v12534_v7  ;;  %v3411_v53 = vpop.f32.mrf.mxu1  ;;  %9667 = vmatprep.mubr.msk.bf16.mxu0 %vm14652_vm3, %v14676_v1 }
 0x46c   : > { %v9433_v11 = vpop.f32.mrf.mxu0 }
 0x46d   : > { %v9497_v45 = vpop.f32.mrf.mxu1  ;;  %v12676_v0 = vadd.f32 %v3403_v31, %v3192_v36 }
 0x46e   : > { %v3151_v26 = vpop.f32.mrf.mxu0 }
 0x46f   : > { %v3193_v61 = vadd.f32 %v3151_v26, %v12546_v25  ;;  %v3414_v46 = vpop.f32.mrf.mxu1 }
 0x470   : > { %v9434_v39 = vpop.f32.mrf.mxu0 }
 0x471   : > { %v9498_v9 = vpop.f32.mrf.mxu1  ;;  %v12679_v27 = vadd.f32 %v3406_v59, %v3193_v61  ;;  %v14781_v59 = vrot.slane %v11932_v60, 3 }
 0x472   : > { %v3156_v58 = vpop.f32.mrf.mxu0  ;;  %9668 = vmatmul.mubr.msk.bf16.gmra.mxu0 %vm14651_vm2, %v11995_v19 }
 0x473   : > { %v3194_v28 = vadd.f32 %v3156_v58, %v12559_v23  ;;  %v3419_v7 = vpop.f32.mrf.mxu1  ;;  %9671 = vmatprep.mubr.msk.bf16.mxu0 %vm14652_vm3, %v14676_v1 }
 0x474   : > { %v9437_v13 = vpop.f32.mrf.mxu0 }
 0x475   : > { %v9501_v56 = vpop.f32.mrf.mxu1  ;;  %v12686_v38 = vadd.f32 %v3411_v53, %v3194_v28 }
 0x476   : > { %v3159_v25 = vpop.f32.mrf.mxu0 }
 0x477   : > { %v3195_v42 = vadd.f32 %v3159_v25, %v12563_v55  ;;  %v3422_v48 = vpop.f32.mrf.mxu1 }
 0x478   : > { %v9438_v54 = vpop.f32.mrf.mxu0 }
 0x479   : > { %v9502_v33 = vpop.f32.mrf.mxu1  ;;  %v12689_v40 = vadd.f32 %v3414_v46, %v3195_v42 }
 0x47a   : > { %v3164_v30 = vpop.f32.mrf.mxu0  ;;  %9672 = vmatmul.mubr.msk.bf16.gmra.mxu0 %vm14779_vm5, %v11998_v22  ;;  %v4176_v22 = vrot.slane %v12543_v17, 3  ;;  %vm14782_vm5 = vmmov %vm14651_vm2 }
 0x47b   : > { %v3196_v19 = vadd.f32 %v3164_v30, %v12574_v32  ;;  %v3426_v23 = vpop.f32.mrf.mxu1  ;;  %9675 = vmatprep.mubr.msk.bf16.mxu0 %vm14652_vm3, %v14676_v1 }
 0x47c   : > { %v9441_v37 = vpop.f32.mrf.mxu0  ;;  %v4177_v41 = vsel %vm14610_vm12, %v14781_v59, %v4176_v22 }
 0x47d   : > { %v9505_v2 = vpop.f32.mrf.mxu1  ;;  %v12696_v16 = vadd.f32 %v3419_v7, %v3196_v19 }
 0x47e   : > { %v3167_v55 = vpop.f32.mrf.mxu0 }
 0x47f   : > { %v3428_v8 = vpop.f32.mrf.mxu1 }
 0x480   : > { %v9442_v20 = vpop.f32.mrf.mxu0 }
 0x481   : > { %v9506_v35 = vpop.f32.mrf.mxu1 }
 0x482   : > { %v3171_v31 = vpop.f32.mrf.mxu0  ;;  %9676 = vmatmul.mubr.msk.bf16.gmra.mxu0 %vm14780_vm8, %v12003_v18  ;;  %vm14614_vm8 = vcmask 1043456  }
 0x483   : > { %v4020_v4 = vpop.f32.mrf.mxu1  ;;  %9679 = vmatprep.mubr.msk.bf16.mxu0 %vm14652_vm3, %v14676_v1 }
 0x484   : > { %v9445_v32 = vpop.f32.mrf.mxu0 }
 0x485   : > { %v9577_v51 = vpop.f32.mrf.mxu1 }
 0x486   : > { %v3173_v10 = vpop.f32.mrf.mxu0 }
 0x487   : > { %v4023_v50 = vpop.f32.mrf.mxu1 }
 0x488   : > { %v9446_v43 = vpop.f32.mrf.mxu0 }
 0x489   : > { %v9578_v52 = vpop.f32.mrf.mxu1 }
 0x48a   : > { %v3674_v36 = vpop.f32.mrf.mxu0  ;;  %9680 = vmatmul.mubr.msk.bf16.gmra.mxu0 %vm14651_vm2, %v4177_v41  ;;  %vm14785_vm2 = vcmask 261120  }
 0x48b   : > { %v3772_v18 = vadd.f32 %v3674_v36, %v12593_v12  ;;  %v4028_v53 = vpop.f32.mrf.mxu1  ;;  %9683 = vmatprep.mubr.msk.bf16.mxu0 %vm14652_vm3, %v14676_v1  ;;  %vm14787_vm6 = vmmov %vm14785_vm2 }
 0x48c   : > { %v9517_v17 = vpop.f32.mrf.mxu0  ;;  %vm14788_vm12 = vmmov %vm14785_vm2 }
 0x48d   : > { %v9581_v11 = vpop.f32.mrf.mxu1  ;;  %v12710_v45 = vadd.f32 %v4020_v4, %v3772_v18 }
 0x48e   : > { %v3677_v26 = vpop.f32.mrf.mxu0 }
 0x48f   : > { %v3773_v60 = vadd.f32 %v3677_v26, %v12596_v47  ;;  %v4031_v61 = vpop.f32.mrf.mxu1 }
 0x490   : > { %v9518_v46 = vpop.f32.mrf.mxu0 }
 0x491   : > { %v9582_v39 = vpop.f32.mrf.mxu1  ;;  %v12713_v9 = vadd.f32 %v4023_v50, %v3773_v60 }
 0x492   : > { %v3682_v58 = vpop.f32.mrf.mxu0  ;;  %9684 = vmatmul.mubr.msk.bf16.gmra.mxu0 %vm14782_vm5, %v4176_v22  ;;  %vm14786_vm5 = vmmov %vm14785_vm2 }
 0x493   : > { %v3774_v12 = vadd.f32 %v3682_v58, %v12602_v14  ;;  %v4036_v28 = vpop.f32.mrf.mxu1  ;;  %9747 = vmatprep.mubr.msk.bf16.mxu0 %vm14652_vm3, %v14676_v1  ;;  %vm14792_vm10 = vmmov %vm14786_vm5 }
 0x494   : > { %v9521_v7 = vpop.f32.mrf.mxu0  ;;  %vm14801_vm11 = vmmov %vm14786_vm5 }
 0x495   : > { %v9585_v13 = vpop.f32.mrf.mxu1  ;;  %v12719_v56 = vadd.f32 %v4028_v53, %v3774_v12 }
 0x496   : > { %v3685_v25 = vpop.f32.mrf.mxu0 }
 0x497   : > { %v3775_v47 = vadd.f32 %v3685_v25, %v12605_v34  ;;  %v4039_v42 = vpop.f32.mrf.mxu1 }
 0x498   : > { %v9522_v48 = vpop.f32.mrf.mxu0 }
 0x499   : > { %v9586_v54 = vpop.f32.mrf.mxu1  ;;  %v12722_v33 = vadd.f32 %v4031_v61, %v3775_v47 }
 0x49a   : > { %v3690_v30 = vpop.f32.mrf.mxu0 }
 0x49b   : > { %v3776_v19 = vadd.f32 %v3690_v30, %v12612_v15  ;;  %v4044_v14 = vpop.f32.mrf.mxu1 }
 0x49c   : > { %v9525_v23 = vpop.f32.mrf.mxu0 }
 0x49d   : > { %v9589_v37 = vpop.f32.mrf.mxu1  ;;  %v12725_v2 = vadd.f32 %v4036_v28, %v3776_v19 }
 0x49e   : > { %v3693_v55 = vpop.f32.mrf.mxu0 }
 0x49f   : > { %v3777_v8 = vadd.f32 %v3693_v55, %v12615_v63  ;;  %v4047_v20 = vpop.f32.mrf.mxu1 }
 0x4a0   : > { %v9526_v35 = vpop.f32.mrf.mxu0 }
 0x4a1   : > { %v9590_v31 = vpop.f32.mrf.mxu1  ;;  %v12728_v34 = vadd.f32 %v4039_v42, %v3777_v8 }
 0x4a2   : > { %v3698_v4 = vpop.f32.mrf.mxu0 }
 0x4a3   : > { %v3778_v22 = vadd.f32 %v3698_v4, %v12622_v49  ;;  %v4052_v32 = vpop.f32.mrf.mxu1 }
 0x4a4   : > { %v9529_v51 = vpop.f32.mrf.mxu0 }
 0x4a5   : > { %v9593_v10 = vpop.f32.mrf.mxu1  ;;  %v12731_v15 = vadd.f32 %v4044_v14, %v3778_v22 }
 0x4a6   : > { %v3701_v50 = vpop.f32.mrf.mxu0 }
 0x4a7   : > { %v3779_v59 = vadd.f32 %v3701_v50, %v12625_v44  ;;  %v4055_v41 = vpop.f32.mrf.mxu1 }
 0x4a8   : > { %v9530_v43 = vpop.f32.mrf.mxu0 }
 0x4a9   : > { %v9594_v52 = vpop.f32.mrf.mxu1  ;;  %v12734_v63 = vadd.f32 %v4047_v20, %v3779_v59 }
 0x4aa   : > { %v3706_v36 = vpop.f32.mrf.mxu0 }
 0x4ab   : > { %v3780_v18 = vadd.f32 %v3706_v36, %v12632_v6  ;;  %v4060_v53 = vpop.f32.mrf.mxu1 }
 0x4ac   : > { %v9533_v17 = vpop.f32.mrf.mxu0 }
 0x4ad   : > { %v9597_v11 = vpop.f32.mrf.mxu1  ;;  %v12737_v49 = vadd.f32 %v4052_v32, %v3780_v18 }
 0x4ae   : > { %v3709_v26 = vpop.f32.mrf.mxu0 }
 0x4af   : > { %v3781_v60 = vadd.f32 %v3709_v26, %v12635_v21  ;;  %v4062_v61 = vpop.f32.mrf.mxu1 }
 0x4b0   : > { %v9534_v46 = vpop.f32.mrf.mxu0 }
 0x4b1   : > { %v9598_v39 = vpop.f32.mrf.mxu1  ;;  %v12740_v44 = vadd.f32 %v4055_v41, %v3781_v60 }
 0x4b2   : > { %v3714_v58 = vpop.f32.mrf.mxu0 }
 0x4b3   : > { %v4066_v12 = vpop.f32.mrf.mxu1 }
 0x4b4   : > { %v9537_v28 = vpop.f32.mrf.mxu0 }
 0x4b5   : > { %v9601_v7 = vpop.f32.mrf.mxu1 }
 0x4b6   : > { %v3716_v13 = vpop.f32.mrf.mxu0 }
 0x4b7   : > { %v4069_v25 = vpop.f32.mrf.mxu1 }
 0x4b8   : > { %v9538_v6 = vpop.f32.mrf.mxu0 }
 0x4b9   : > { %v9602_v47 = vpop.f32.mrf.mxu1 }
 0x4ba   : > { %v3720_v42 = vpop.f32.mrf.mxu0 }
 0x4bb   : > { %v3782_v48 = vadd.f32 %v3720_v42, %v12646_v62  ;;  %v4074_v54 = vpop.f32.mrf.mxu1 }
 0x4bc   : > { %v9541_v30 = vpop.f32.mrf.mxu0 }
 0x4bd   : > { %v9605_v19 = vpop.f32.mrf.mxu1  ;;  %v12743_v21 = vadd.f32 %v4066_v12, %v3782_v48 }
 0x4be   : > { %v3723_v14 = vpop.f32.mrf.mxu0 }
 0x4bf   : > { %v3783_v23 = vadd.f32 %v3723_v14, %v12649_v24  ;;  %v4077_v37 = vpop.f32.mrf.mxu1 }
 0x4c0   : > { %v9542_v55 = vpop.f32.mrf.mxu0 }
 0x4c1   : > { %v9606_v8 = vpop.f32.mrf.mxu1  ;;  %v12746_v20 = vadd.f32 %v4069_v25, %v3783_v23 }
 0x4c2   : > { %v3728_v35 = vpop.f32.mrf.mxu0 }
 0x4c3   : > { %v3784_v31 = vadd.f32 %v3728_v35, %v12656_v5  ;;  %v4082_v4 = vpop.f32.mrf.mxu1 }
 0x4c4   : > { %v9545_v22 = vpop.f32.mrf.mxu0 }
 0x4c5   : > { %v9609_v32 = vpop.f32.mrf.mxu1  ;;  %v12749_v62 = vadd.f32 %v4074_v54, %v3784_v31 }
 0x4c6   : > { %v3731_v51 = vpop.f32.mrf.mxu0 }
 0x4c7   : > { %v3785_v10 = vadd.f32 %v3731_v51, %v12659_v57  ;;  %v4085_v50 = vpop.f32.mrf.mxu1 }
 0x4c8   : > { %v9546_v59 = vpop.f32.mrf.mxu0 }
 0x4c9   : > { %v9610_v41 = vpop.f32.mrf.mxu1  ;;  %v12752_v24 = vadd.f32 %v4077_v37, %v3785_v10 }
 0x4ca   : > { %v3736_v43 = vpop.f32.mrf.mxu0 }
 0x4cb   : > { %v3786_v52 = vadd.f32 %v3736_v43, %v12666_v29  ;;  %v4090_v36 = vpop.f32.mrf.mxu1 }
 0x4cc   : > { %v9549_v18 = vpop.f32.mrf.mxu0 }
 0x4cd   : > { %v9613_v53 = vpop.f32.mrf.mxu1  ;;  %v12755_v5 = vadd.f32 %v4082_v4, %v3786_v52  ;;  %v12780_v52 = vld.sshfl [vmem:[%s565_s18] sm:$0x11 pattern:$0x75316420]  ;;  %v14783_v18 = vld [vmem:[#allocation18_spill] sm:$0xff] }
 0x4ce   : > { %v3739_v17 = vpop.f32.mrf.mxu0  ;;  %v4478_v53 = vrot.slane %v12780_v52, %v14783_v18 }
 0x4cf   : > { %v3787_v11 = vadd.f32 %v3739_v17, %v12669_v3  ;;  %v4093_v26 = vpop.f32.mrf.mxu1 }
 0x4d0   : > { %v9550_v60 = vpop.f32.mrf.mxu0 }
 0x4d1   : > { %v9614_v61 = vpop.f32.mrf.mxu1  ;;  %v12758_v57 = vadd.f32 %v4085_v50, %v3787_v11  ;;  %v14784_v60 = vld [vmem:[#allocation19_spill] sm:$0xff] }
 0x4d2   : > { %v3744_v46 = vpop.f32.mrf.mxu0  ;;  %v12786_v61 = vrot.slane %v4478_v53, %v14784_v60 }
 0x4d3   : > { %v3788_v39 = vadd.f32 %v3744_v46, %v12676_v0  ;;  %v4098_v58 = vpop.f32.mrf.mxu1 }
 0x4d4   : > { %v9553_v12 = vpop.f32.mrf.mxu0 }
 0x4d5   : > { %v9617_v28 = vpop.f32.mrf.mxu1  ;;  %v12761_v29 = vadd.f32 %v4090_v36, %v3788_v39 }
 0x4d6   : > { %v3747_v7 = vpop.f32.mrf.mxu0 }
 0x4d7   : > { %v3789_v13 = vadd.f32 %v3747_v7, %v12679_v27  ;;  %v4101_v25 = vpop.f32.mrf.mxu1 }
 0x4d8   : > { %v9554_v6 = vpop.f32.mrf.mxu0 }
 0x4d9   : > { %v9618_v47 = vpop.f32.mrf.mxu1  ;;  %v12764_v3 = vadd.f32 %v4093_v26, %v3789_v13 }
 0x4da   : > { %v3752_v42 = vpop.f32.mrf.mxu0 }
 0x4db   : > { %v3790_v48 = vadd.f32 %v3752_v42, %v12686_v38  ;;  %v4106_v54 = vpop.f32.mrf.mxu1 }
 0x4dc   : > { %v9557_v30 = vpop.f32.mrf.mxu0 }
 0x4dd   : > { %v12767_v0 = vadd.f32 %v4098_v58, %v3790_v48  ;;  %v9621_v19 = vpop.f32.mrf.mxu1  ;;  %v10371_v58 = vld [vmem:[%s14581_s11 + $0x18] sm:$0xff]  }
 0x4de   : > { %v3755_v14 = vpop.f32.mrf.mxu0  ;;  %9688 = vmatpush3.bf16.msra.mxu1 %v10371_v58 }
 0x4df   : > { %v3791_v23 = vadd.f32 %v3755_v14, %v12689_v40  ;;  %v4109_v37 = vpop.f32.mrf.mxu1  ;;  %9689 = vmatprep.subr.bf16.mxu1 %v14676_v1 }
 0x4e0   : > { %v9558_v27 = vpop.f32.mrf.mxu0 }
 0x4e1   : > { %v12770_v55 = vadd.f32 %v4101_v25, %v3791_v23  ;;  %v9622_v8 = vpop.f32.mrf.mxu1 }
 0x4e2   : > { %v3760_v35 = vpop.f32.mrf.mxu0 }
 0x4e3   : > { %v3792_v31 = vadd.f32 %v3760_v35, %v12696_v16  ;;  %v4113_v4 = vpop.f32.mrf.mxu1 }
 0x4e4   : > { %v9561_v38 = vpop.f32.mrf.mxu0 }
 0x4e5   : > { %v12774_v22 = vadd.f32 %v4106_v54, %v3792_v31  ;;  %v9625_v32 = vpop.f32.mrf.mxu1 }
 0x4e6   : > { %v3763_v51 = vpop.f32.mrf.mxu0 }
 0x4e7   : > { %v4115_v10 = vpop.f32.mrf.mxu1 }
 0x4e8   : > { %v9562_v50 = vpop.f32.mrf.mxu0 }
 0x4e9   : > { %v9626_v59 = vpop.f32.mrf.mxu1 }
 0x4ea   : > { %v3767_v40 = vpop.f32.mrf.mxu0 }
 0x4ec   : > { %v9565_v41 = vpop.f32.mrf.mxu0 }
 0x4ee   : > { %v3769_v43 = vpop.f32.mrf.mxu0 }
 0x4f0   : > { %v9566_v16 = vpop.f32.mrf.mxu0 }
 0x4f2   : > { %v4275_v36 = vpop.f32.mrf.mxu0 }
 0x4f3   : > { %v4373_v26 = vadd.f32 %v4275_v36, %v12710_v45 }
 0x4f4   : > { %v9637_v17 = vpop.f32.mrf.mxu0 }
 0x4f5   : > { %v12794_v7 = vadd.f32 %v12786_v61, %v4373_v26 }
 0x4f6   : > { %v4278_v11 = vpop.f32.mrf.mxu0 }
 0x4f7   : > { %v4374_v39 = vadd.f32 %v4278_v11, %v12713_v9  ;;  %v4556_v42 = vmul.f32 %v12794_v7, %v12794_v7  ;;  %v4514_v19 = vsel %vm14785_vm2, %v12794_v7, 0.0  ;;  %vm14613_vm2 = vcmask 1041408  }
 0x4f8   : > { %v9638_v46 = vpop.f32.mrf.mxu0 }
 0x4f9   : > { %v4397_v45 = vrot.slane %v4374_v39, 2  ;;  %v4572_v35 = vsel %vm14787_vm6, %v4556_v42, 0.0  ;;  %vm14790_vm6 = vmmov %vm14786_vm5 }
 0x4fa   : > { %v4283_v12 = vpop.f32.mrf.mxu0 }
 0x4fb   : > { %v4375_v28 = vadd.f32 %v4283_v12, %v12719_v56 }
 0x4fc   : > { %v9641_v13 = vpop.f32.mrf.mxu0 }
 0x4fd   : > { %v4398_v25 = vrot.slane %v4375_v28, 2  ;;  %v4403_v54 = vrot.slane %v4375_v28, 4 }
 0x4fe   : > { %v4286_v6 = vpop.f32.mrf.mxu0 }
 0x4ff   : > { %v4399_v47 = vsel %vm3210_vm0, %v4397_v45, %v4398_v25  ;;  %v4376_v9 = vadd.f32 %v4286_v6, %v12722_v33 }
 0x500   : > { %v12802_v48 = vadd.f32 %v12786_v61, %v4399_v47  ;;  %v9642_v56 = vpop.f32.mrf.mxu0 }
 0x501   : > { %v4404_v30 = vrot.slane %v4376_v9, 4  ;;  %v4409_v51 = vrot.slane %v4376_v9, 6 }
 0x502   : > { %v4515_v14 = vsel %vm14786_vm5, %v12802_v48, 0.0  ;;  %v4557_v23 = vmul.f32 %v12802_v48, %v12802_v48  ;;  %v4291_v33 = vpop.f32.mrf.mxu0 }
 0x503   : > { %v4516_v37 = vadd.f32 %v4515_v14, %v4514_v19  ;;  %v4405_v27 = vsel %vm14614_vm8, %v4403_v54, %v4404_v30  ;;  %v4377_v8 = vadd.f32 %v4291_v33, %v12725_v2 }
 0x504   : > { %v4573_v31 = vsel %vm14788_vm12, %v4557_v23, 0.0  ;;  %v12815_v4 = vadd.f32 %v12786_v61, %v4405_v27  ;;  %v9645_v38 = vpop.f32.mrf.mxu0  ;;  %vm14789_vm12 = vmmov %vm14786_vm5 }
 0x505   : > { %v4574_v32 = vadd.f32 %v4573_v31, %v4572_v35  ;;  %v4410_v10 = vrot.slane %v4377_v8, 6 }
 0x506   : > { %v4517_v50 = vsel %vm14786_vm5, %v12815_v4, 0.0  ;;  %v4558_v59 = vmul.f32 %v12815_v4, %v12815_v4  ;;  %v4294_v40 = vpop.f32.mrf.mxu0 }
 0x507   : > { %v4411_v2 = vsel %vm14613_vm2, %v4409_v51, %v4410_v10  ;;  %v4378_v41 = vadd.f32 %v4294_v40, %v12728_v34  ;;  %v4518_v43 = vadd.f32 %v4517_v50, %v4516_v37 }
 0x508   : > { %v4575_v16 = vsel %vm14789_vm12, %v4558_v59, 0.0  ;;  %v12825_v36 = vadd.f32 %v12786_v61, %v4411_v2  ;;  %v9646_v53 = vpop.f32.mrf.mxu0  ;;  %vm14791_vm12 = vmmov %vm14786_vm5 }
 0x509   : > { %v12828_v17 = vadd.f32 %v12786_v61, %v4378_v41  ;;  %v4576_v11 = vadd.f32 %v4575_v16, %v4574_v32 }
 0x50a   : > { %v4559_v26 = vmul.f32 %v12825_v36, %v12825_v36  ;;  %v4519_v46 = vsel %vm14790_vm6, %v12825_v36, 0.0  ;;  %v4299_v39 = vpop.f32.mrf.mxu0  ;;  %vm14794_vm6 = vmmov %vm14786_vm5 }
 0x50b   : > { %v4520_v58 = vadd.f32 %v4519_v46, %v4518_v43  ;;  %v4521_v34 = vsel %vm14786_vm5, %v12828_v17, 0.0  ;;  %v4560_v12 = vmul.f32 %v12828_v17, %v12828_v17  ;;  %v4379_v47 = vadd.f32 %v4299_v39, %v12731_v15 }
 0x50c   : > { %v4577_v28 = vsel %vm14791_vm12, %v4559_v26, 0.0  ;;  %v9649_v13 = vpop.f32.mrf.mxu0  ;;  %vm14795_vm12 = vmmov %vm14786_vm5 }
 0x50d   : > { %v4522_v45 = vadd.f32 %v4521_v34, %v4520_v58  ;;  %v4578_v25 = vadd.f32 %v4577_v28, %v4576_v11  ;;  %v4579_v6 = vsel %vm14792_vm10, %v4560_v12, 0.0  ;;  %v4415_v30 = vrot.slane %v4379_v47, 2  ;;  %vm14793_vm10 = vmmov %vm14786_vm5 }
 0x50e   : > { %v4302_v9 = vpop.f32.mrf.mxu0  ;;  %v4471_v13 = vcombine.high %v12780_v52, %v12780_v52 }
 0x50f   : > { %v4580_v42 = vadd.f32 %v4579_v6, %v4578_v25  ;;  %v4380_v56 = vadd.f32 %v4302_v9, %v12734_v63 }
 0x510   : > { %v9650_v54 = vpop.f32.mrf.mxu0 }
 0x511   : > { %v4416_v19 = vrot.slane %v4380_v56, 2  ;;  %v4420_v8 = vrot.slane %v4380_v56, 4  ;;  %v4485_v54 = vrot.slane %v4471_v13, %v14783_v18 }
 0x512   : > { %v4307_v14 = vpop.f32.mrf.mxu0 }
 0x513   : > { %v4417_v23 = vsel %vm3210_vm0, %v4415_v30, %v4416_v19  ;;  %v4381_v33 = vadd.f32 %v4307_v14, %v12737_v49 }
 0x514   : > { %v12845_v37 = vadd.f32 %v12786_v61, %v4417_v23  ;;  %v9653_v27 = vpop.f32.mrf.mxu0 }
 0x515   : > { %v4421_v35 = vrot.slane %v4381_v33, 4  ;;  %v4425_v40 = vrot.slane %v4381_v33, 6 }
 0x516   : > { %v4523_v15 = vsel %vm14793_vm10, %v12845_v37, 0.0  ;;  %v4561_v63 = vmul.f32 %v12845_v37, %v12845_v37  ;;  %v4310_v31 = vpop.f32.mrf.mxu0  ;;  %vm14796_vm10 = vmmov %vm14786_vm5 }
 0x517   : > { %v4524_v38 = vadd.f32 %v4523_v15, %v4522_v45  ;;  %v4422_v32 = vsel %vm14614_vm8, %v4420_v8, %v4421_v35  ;;  %v4382_v51 = vadd.f32 %v4310_v31, %v12740_v44  ;;  %v12877_v8 = vrot.slane %v4485_v54, %v14784_v60 }
 0x518   : > { %v4581_v49 = vsel %vm14794_vm6, %v4561_v63, 0.0  ;;  %v12855_v10 = vadd.f32 %v12786_v61, %v4422_v32  ;;  %v9654_v50 = vpop.f32.mrf.mxu0  ;;  %vm14797_vm6 = vmmov %vm14786_vm5 }
 0x519   : > { %v4582_v59 = vadd.f32 %v4581_v49, %v4580_v42  ;;  %v4426_v2 = vrot.slane %v4382_v51, 6 }
 0x51a   : > { %v4525_v41 = vsel %vm14786_vm5, %v12855_v10, 0.0  ;;  %v4562_v43 = vmul.f32 %v12855_v10, %v12855_v10  ;;  %v4315_v16 = vpop.f32.mrf.mxu0 }
 0x51b   : > { %v4526_v53 = vadd.f32 %v4525_v41, %v4524_v38  ;;  %v4427_v11 = vsel %vm14613_vm2, %v4425_v40, %v4426_v2 }
 0x51c   : > { %v4583_v44 = vsel %vm14795_vm12, %v4562_v43, 0.0  ;;  %v12864_v26 = vadd.f32 %v12786_v61, %v4427_v11  ;;  %v9657_v46 = vpop.f32.mrf.mxu0  ;;  %vm14798_vm12 = vmmov %vm14786_vm5 }
 0x51d   : > { %v4584_v39 = vadd.f32 %v4583_v44, %v4582_v59 }
 0x51e   : > { %v4527_v58 = vsel %vm14796_vm10, %v12864_v26, 0.0  ;;  %v4563_v34 = vmul.f32 %v12864_v26, %v12864_v26  ;;  %v4317_v12 = vpop.f32.mrf.mxu0  ;;  %vm14799_vm10 = vmmov %vm14786_vm5 }
 0x51f   : > { %v4528_v28 = vadd.f32 %v4527_v58, %v4526_v53  ;;  %v10373_v12 = vld [vmem:[%s14581_s11 + $0x8] sm:$0xff]  }
 0x520   : > { %v4585_v45 = vsel %vm14797_vm6, %v4563_v34, 0.0  ;;  %v9658_v25 = vpop.f32.mrf.mxu0  ;;  %v10372_v34 = vld [vmem:[%s14581_s11 + $0x10] sm:$0xff]   ;;  %9744 = vmatpush3.bf16.msra.mxu0 %v10373_v12  ;;  %vm14800_vm6 = vmmov %vm14786_vm5 }
 0x521   : > { %v4529_v6 = vrot.slane %v4528_v28, 4  ;;  %v4586_v47 = vadd.f32 %v4585_v45, %v4584_v39  ;;  %9690 = vmatpush3.bf16.msra.mxu1 %v10372_v34  ;;  %9745 = vmatprep.subr.bf16.mxu0 %v14676_v1 }
 0x522   : > { %v4321_v61 = vpop.f32.mrf.mxu0  ;;  %9799 = vmatprep.subr.bf16.mxu1 %v14676_v1 }
 0x523   : > { %v4530_v9 = vadd.f32 %v4529_v6, %v4528_v28  ;;  %v4587_v42 = vrot.slane %v4586_v47, 4  ;;  %v4383_v14 = vadd.f32 %v4321_v61, %v12743_v21 }
 0x524   : > { %v9661_v56 = vpop.f32.mrf.mxu0 }
 0x525   : > { %v4531_v30 = vrot.slane %v4530_v9, 2  ;;  %v4588_v19 = vadd.f32 %v4587_v42, %v4586_v47  ;;  %v4431_v31 = vrot.slane %v4383_v14, 4  ;;  %v10374_v42 = vld [vmem:[%s14581_s11] sm:$0xff]  }
 0x526   : > { %v4324_v23 = vpop.f32.mrf.mxu0  ;;  %9746 = vmatpush3.bf16.msra.mxu0 %v10374_v42 }
 0x527   : > { %v4532_v33 = vadd.f32 %v4531_v30, %v4530_v9  ;;  %v4589_v27 = vrot.slane %v4588_v19, 2  ;;  %v4384_v52 = vadd.f32 %v4324_v23, %v12746_v20  ;;  %9855 = vmatprep.subr.bf16.mxu0 %v14676_v1 }
 0x528   : > { %v9662_v35 = vpop.f32.mrf.mxu0 }
 0x529   : > { %v4533_v15 = vrot.slane %v4532_v33, 1  ;;  %v4590_v63 = vadd.f32 %v4589_v27, %v4588_v19  ;;  %v4432_v38 = vrot.slane %v4384_v52, 4  ;;  %v4436_v2 = vrot.slane %v4384_v52, 6 }
 0x52a   : > { %v4329_v32 = vpop.f32.mrf.mxu0 }
 0x52b   : > { %v4534_v51 = vadd.f32 %v4533_v15, %v4532_v33  ;;  %v4591_v18 = vrot.slane %v4590_v63, 1  ;;  %v4433_v49 = vsel %vm14614_vm8, %v4431_v31, %v4432_v38  ;;  %v4385_v21 = vadd.f32 %v4329_v32, %v12749_v62 }
 0x52c   : > { %v9665_v50 = vpop.f32.mrf.mxu0  ;;  %v12884_v20 = vadd.f32 %v12877_v8, %v4433_v49 }
 0x52d   : > { %v4592_v59 = vadd.f32 %v4591_v18, %v4590_v63  ;;  %v12881_v40 = vmul.f32 0.015625, %v4534_v51  ;;  %v4437_v60 = vrot.slane %v4385_v21, 6 }
 0x52e   : > { %v4332_v41 = vpop.f32.mrf.mxu0  ;;  %v4564_v13 = vmul.f32 %v12884_v20, %v12884_v20  ;;  %v4535_v30 = vsel %vm14786_vm5, %v12884_v20, 0.0 }
 0x52f   : > { %v4617_v43 = vmul.f32 0.015625, %v4592_v59  ;;  %v4619_v16 = vmul.f32 %v12881_v40, %v12881_v40  ;;  %v4629_v53 = vsub.f32 %v12794_v7, %v12881_v40  ;;  %v4631_v62 = vsub.f32 %v12815_v4, %v12881_v40 }
 0x530   : > { %v4632_v11 = vsub.f32 %v12825_v36, %v12881_v40  ;;  %v4633_v44 = vsub.f32 %v12828_v17, %v12881_v40  ;;  %v4635_v46 = vsub.f32 %v12855_v10, %v12881_v40  ;;  %v4636_v39 = vsub.f32 %v12864_v26, %v12881_v40  ;;  %v9666_v58 = vpop.f32.mrf.mxu0 }
 0x531   : > { %v4621_v28 = vsub.f32 %v4617_v43, %v4619_v16  ;;  %v4438_v45 = vsel %vm14613_vm2, %v4436_v2, %v4437_v60  ;;  %v4386_v25 = vadd.f32 %v4332_v41, %v12752_v24  ;;  %v4630_v61 = vsub.f32 %v12802_v48, %v12881_v40 }
 0x532   : > { %v12911_v6 = vadd.f32 %v12877_v8, %v4438_v45  ;;  %v4337_v47 = vpop.f32.mrf.mxu0  ;;  %v4634_v9 = vsub.f32 %v12845_v37, %v12881_v40  ;;  %v4593_v35 = vsel %vm14800_vm6, %v4564_v13, 0.0  ;;  %vm14805_vm6 = vmmov %vm14786_vm5 }
 0x533   : > { %v4623_v56 = vmax.f32 %v4621_v28, 0.0  ;;  %v12921_v54 = vadd.f32 %v12877_v8, %v4386_v25  ;;  %v4387_v63 = vadd.f32 %v4337_v47, %v12755_v5 }
 0x534   : > { %v4565_v24 = vmul.f32 %v12911_v6, %v12911_v6  ;;  %v4536_v19 = vsel %vm14798_vm12, %v12911_v6, 0.0  ;;  %v9669_v14 = vpop.f32.mrf.mxu0  ;;  %vm14803_vm12 = vmmov %vm14786_vm5 }
 0x535   : > { %v4625_v23 = vadd.f32 1e-05, %v4623_v56  ;;  %v4537_v33 = vadd.f32 %v4536_v19, %v4535_v30  ;;  %v4538_v27 = vsel %vm14799_vm10, %v12921_v54, 0.0  ;;  %v4566_v52 = vmul.f32 %v12921_v54, %v12921_v54  ;;  %vm14804_vm10 = vmmov %vm14786_vm5 }
 0x536   : > { %v4594_v15 = vsel %vm14801_vm11, %v4565_v24, 0.0  ;;  %v4340_v31 = vpop.f32.mrf.mxu0  ;;  %v4442_v50 = vrot.slane %v4387_v63, 2  ;;  %vm14802_vm11 = vmmov %vm14786_vm5 }
 0x537   : > { %10504 = vrsqrt.f32 %v4625_v23  ;;  %v4539_v38 = vadd.f32 %v4538_v27, %v4537_v33  ;;  %v4595_v32 = vadd.f32 %v4594_v15, %v4593_v35  ;;  %v4596_v51 = vsel %vm14786_vm5, %v4566_v52, 0.0  ;;  %v12962_v52 = vld [vmem:[#allocation6] ss:$0 sm:$0xff] }
 0x538   : > { %v4388_v18 = vadd.f32 %v4340_v31, %v12758_v57  ;;  %v9670_v49 = vpop.f32.mrf.mxu0 }
 0x539   : > { %v4597_v21 = vadd.f32 %v4596_v51, %v4595_v32  ;;  %v12980_v51 = vld [vmem:[#allocation8] ss:$0 sm:$0xff] }
 0x53a   : > { %v4443_v59 = vrot.slane %v4388_v18, 2  ;;  %v4345_v60 = vpop.f32.mrf.mxu0  ;;  %v4447_v43 = vrot.slane %v4388_v18, 4 }
 0x53b   : > { %v4389_v2 = vadd.f32 %v4345_v60, %v12761_v29 }
 0x53c   : > { %v4444_v5 = vsel %vm3210_vm0, %v4442_v50, %v4443_v59  ;;  %v9673_v41 = vpop.f32.mrf.mxu0 }
 0x53d   : > { %v12944_v16 = vadd.f32 %v12877_v8, %v4444_v5  ;;  %v4448_v58 = vrot.slane %v4389_v2, 4  ;;  %v4452_v42 = vrot.slane %v4389_v2, 6 }
 0x53e   : > { %v4348_v34 = vpop.f32.mrf.mxu0 }
 0x53f   : > { %v4540_v12 = vsel %vm14802_vm11, %v12944_v16, 0.0  ;;  %v4567_v57 = vmul.f32 %v12944_v16, %v12944_v16  ;;  %v4449_v28 = vsel %vm14614_vm8, %v4447_v43, %v4448_v58  ;;  %v4390_v13 = vadd.f32 %v4348_v34, %v12764_v3  ;;  %vm14806_vm11 = vmmov %vm14786_vm5 }
 0x540   : > { %v4541_v29 = vadd.f32 %v4540_v12, %v4539_v38  ;;  %v12953_v45 = vadd.f32 %v12877_v8, %v4449_v28  ;;  %v9674_v25 = vpop.f32.mrf.mxu0 }
 0x541   : > { %v4598_v47 = vsel %vm14803_vm12, %v4567_v57, 0.0  ;;  %v4453_v56 = vrot.slane %v4390_v13, 6  ;;  %vm14807_vm12 = vmmov %vm14786_vm5 }
 0x542   : > { %v4599_v24 = vadd.f32 %v4598_v47, %v4597_v21  ;;  %v4542_v30 = vsel %vm14804_vm10, %v12953_v45, 0.0  ;;  %v4568_v19 = vmul.f32 %v12953_v45, %v12953_v45  ;;  %v4353_v14 = vpop.f32.mrf.mxu0  ;;  %vm14808_vm10 = vmmov %vm14786_vm5 }
 0x543   : > { %v4454_v23 = vsel %vm14613_vm2, %v4452_v42, %v4453_v56  ;;  %v4391_v3 = vadd.f32 %v4353_v14, %v12767_v0  ;;  %v4543_v33 = vadd.f32 %v4542_v30, %v4541_v29  ;;  %vm14812_vm2 = vcmask 257024  }
 0x544   : > { %v10505_v27 = vpop.eup %10504  ;;  %v4600_v35 = vsel %vm14805_vm6, %v4568_v19, 0.0  ;;  %v12966_v15 = vadd.f32 %v12877_v8, %v4454_v23  ;;  %v9677_v63 = vpop.f32.mrf.mxu0  ;;  %vm14809_vm6 = vmmov %vm14786_vm5 }
 0x545   : > { %v4645_v31 = vmul.f32 %v10505_v27, %v4629_v53  ;;  %v4647_v38 = vmul.f32 %v10505_v27, %v4631_v62  ;;  %v4648_v0 = vmul.f32 %v10505_v27, %v4632_v11  ;;  %v4649_v32 = vmul.f32 %v10505_v27, %v4633_v44  ;;  %vm13090_vm8 = vmand %vm14812_vm2, %vm1422_vm4 }
 0x546   : > { %v4651_v18 = vmul.f32 %v10505_v27, %v4635_v46  ;;  %v4652_v7 = vmul.f32 %v10505_v27, %v4636_v39  ;;  %v4569_v4 = vmul.f32 %v12966_v15, %v12966_v15  ;;  %v12991_v36 = vadd.f32 %v12877_v8, %v4391_v3  ;;  %v4356_v53 = vpop.f32.mrf.mxu0 }
 0x547   : > { %v4667_v17 = vmul.f32 %v12962_v52, %v4645_v31  ;;  %v4669_v62 = vmul.f32 %v12962_v52, %v4647_v38  ;;  %v4670_v11 = vmul.f32 %v12962_v52, %v4648_v0  ;;  %v4671_v10 = vmul.f32 %v12962_v52, %v4649_v32 }
 0x548   : > { %v4673_v44 = vmul.f32 %v12962_v52, %v4651_v18  ;;  %v4674_v26 = vmul.f32 %v12962_v52, %v4652_v7  ;;  %v4544_v46 = vsel %vm14786_vm5, %v12966_v15, 0.0  ;;  %v4546_v39 = vsel %vm14806_vm11, %v12991_v36, 0.0  ;;  %v9678_v49 = vpop.f32.mrf.mxu0 }
 0x549   : > { %v13004_v21 = vadd.f32 %v12980_v51, %v4667_v17  ;;  %v13007_v50 = vadd.f32 %v12980_v51, %v4670_v11  ;;  %v13010_v59 = vadd.f32 %v12980_v51, %v4671_v10  ;;  %v4545_v60 = vadd.f32 %v4544_v46, %v4543_v33 }
 0x54a   : > { %v13013_v2 = vadd.f32 %v12980_v51, %v4674_v26  ;;  %v4570_v5 = vmul.f32 %v12991_v36, %v12991_v36  ;;  %v4601_v41 = vadd.f32 %v4600_v35, %v4599_v24  ;;  %v4602_v43 = vsel %vm14807_vm12, %v4569_v4, 0.0  ;;  %v4361_v58 = vpop.f32.mrf.mxu0 }
 0x54b   : > { %v8466_v34 = vmul.f32 -1.442695, %v13004_v21  ;;  %v8469_v12 = vmul.f32 -1.442695, %v13007_v50  ;;  %v8470_v57 = vmul.f32 -1.442695, %v13010_v59  ;;  %v4547_v28 = vadd.f32 %v4546_v39, %v4545_v60 }
 0x54c   : > { %v8473_v13 = vmul.f32 -1.442695, %v13013_v2  ;;  %v4603_v29 = vadd.f32 %v4602_v43, %v4601_v41  ;;  %v4604_v25 = vsel %vm14808_vm10, %v4570_v5, 0.0  ;;  %v4392_v47 = vadd.f32 %v4356_v53, %v12770_v55  ;;  %v9681_v42 = vpop.f32.mrf.mxu0 }
 0x54d   : > { %10506 = vpow2.f32 %v8466_v34  ;;  %v4393_v56 = vadd.f32 %v4361_v58, %v12774_v22  ;;  %v4646_v24 = vmul.f32 %v10505_v27, %v4630_v61  ;;  %v4650_v30 = vmul.f32 %v10505_v27, %v4634_v9 }
 0x54e   : > { %10508 = vpow2.f32 %v8469_v12  ;;  %v4605_v19 = vadd.f32 %v4604_v25, %v4603_v29  ;;  %v4458_v14 = vrot.slane %v4392_v47, 2  ;;  %v13032_v23 = vadd.f32 %v12980_v51, %v4669_v62  ;;  %v4364_v3 = vpop.f32.mrf.mxu0 }
 0x54f   : > { %10510 = vpow2.f32 %v8470_v57  ;;  %v4459_v55 = vrot.slane %v4393_v56, 2  ;;  %v4668_v33 = vmul.f32 %v12962_v52, %v4646_v24  ;;  %v4672_v22 = vmul.f32 %v12962_v52, %v4650_v30 }
 0x550   : > { %10512 = vpow2.f32 %v8473_v13  ;;  %v13037_v48 = vadd.f32 %v12980_v51, %v4673_v44  ;;  %v8468_v37 = vmul.f32 -1.442695, %v13032_v23  ;;  %v9682_v40 = vpop.f32.mrf.mxu0  ;;  %vm4886_vm11 = vcmask 257027  }
 0x551   : > { %v4460_v61 = vsel %vm3210_vm0, %v4458_v14, %v4459_v55  ;;  %v13042_v9 = vadd.f32 %v12980_v51, %v4668_v33  ;;  %v13045_v27 = vadd.f32 %v12980_v51, %v4672_v22  ;;  %vm4839_vm12 = vcmask 257025   ;;  %vm13115_vm2 = vmand %vm4886_vm11, %vm1399_vm13 }
 0x552   : > { %v13048_v35 = vadd.f32 %v12877_v8, %v4460_v61  ;;  %10514 = vpow2.f32 %v8468_v37  ;;  %v8472_v63 = vmul.f32 -1.442695, %v13037_v48  ;;  %v4368_v31 = vpop.f32.mrf.mxu0  ;;  %vm4912_vm10 = vcmask 253952  }
 0x553   : > { %v8467_v38 = vmul.f32 -1.442695, %v13042_v9  ;;  %v8471_v0 = vmul.f32 -1.442695, %v13045_v27  ;;  %vm14826_vm11 = vcmask 257024  }
 0x554   : > { %v4548_v32 = vsel %vm14809_vm6, %v13048_v35, 0.0  ;;  %v4571_v18 = vmul.f32 %v13048_v35, %v13048_v35  ;;  %10516 = vpow2.f32 %v8472_v63  ;;  %v9685_v7 = vpop.f32.mrf.mxu0  ;;  %vm4844_vm6 = vcmask 254976  }
 0x555   : > { %v4549_v4 = vadd.f32 %v4548_v32, %v4547_v28  ;;  %10518 = vpow2.f32 %v8467_v38  ;;  %vm13105_vm4 = vmand %vm4844_vm6, %vm1354_vm7 }
 0x556   : > { %v4606_v8 = vsel %vm14786_vm5, %v4571_v18, 0.0  ;;  %10520 = vpow2.f32 %v8471_v0  ;;  %v4370_v53 = vpop.f32.mrf.mxu0  ;;  %vm13084_vm5 = vmand %vm4839_vm12, %vm1348_vm14  ;;  %vm4862_vm12 = vcmask 257026  }
 0x557   : > { %v4550_v17 = vrot.slane %v4549_v4, 4  ;;  %v4607_v62 = vadd.f32 %v4606_v8, %v4605_v19  ;;  %vm13097_vm14 = vmand %vm4912_vm10, %vm1428_vm1  ;;  %vm4867_vm1 = vcmask 256000  }
 0x558   : > { %v9686_v11 = vpop.f32.mrf.mxu0  ;;  %vm13180_vm7 = vmand %vm4862_vm12, %vm1373_vm9  ;;  %vm14823_vm9 = vsmask.f32 2304  ;;  %vm14831_vm12 = vsmask.f32 7424 }
 0x559   : > { %v4551_v10 = vadd.f32 %v4550_v17, %v4549_v4  ;;  %v4608_v44 = vrot.slane %v4607_v62, 4  ;;  %vm13195_vm13 = vmand %vm4867_vm1, %vm14823_vm9 }
 0x55a   : > { %v10507_v26 = vpop.eup %10506  ;;  %vm13210_vm10 = vmand %vm14826_vm11, %vm1405_vm15  ;;  %vm14829_vm15 = vcmask 261120   ;;  %vm14834_vm11 = vcmask 1046528  }
 0x55b   : > { %v10509_v46 = vpop.eup %10508  ;;  %v4753_v39 = vadd.f32 1.0, %v10507_v26  ;;  %v4552_v49 = vrot.slane %v4551_v10, 2  ;;  %v4609_v60 = vadd.f32 %v4608_v44, %v4607_v62  ;;  %vm14830_vm6 = vmmov %vm14829_vm15 }
 0x55c   : > { %v10511_v5 = vpop.eup %10510  ;;  %v4756_v41 = vadd.f32 1.0, %v10509_v46  ;;  %vm14832_vm1 = vmmov %vm14830_vm6 }
 0x55d   : > { %v10513_v43 = vpop.eup %10512  ;;  %v4757_v58 = vadd.f32 1.0, %v10511_v5  ;;  %10522 = vrcp.f32 %v4753_v39  ;;  %v4553_v34 = vadd.f32 %v4552_v49, %v4551_v10  ;;  %v4610_v12 = vrot.slane %v4609_v60, 2  ;;  %vm14833_vm9 = vmmov %vm14832_vm1 }
 0x55e   : > { %v4760_v57 = vadd.f32 1.0, %v10513_v43  ;;  %10524 = vrcp.f32 %v4756_v41 }
 0x55f   : > { %v10515_v28 = vpop.eup %10514  ;;  %10526 = vrcp.f32 %v4757_v58  ;;  %v4554_v13 = vrot.slane %v4553_v34, 1  ;;  %v4611_v29 = vadd.f32 %v4610_v12, %v4609_v60 }
 0x560   : > { %10528 = vrcp.f32 %v4760_v57  ;;  %v4755_v25 = vadd.f32 1.0, %v10515_v28 }
 0x561   : > { %v10517_v47 = vpop.eup %10516  ;;  %v4555_v42 = vadd.f32 %v4554_v13, %v4553_v34  ;;  %v4612_v56 = vrot.slane %v4611_v29, 1 }
 0x562   : > { %v10519_v24 = vpop.eup %10518  ;;  %v4759_v30 = vadd.f32 1.0, %v10517_v47  ;;  %10530 = vrcp.f32 %v4755_v25 }
 0x563   : > { %v10521_v19 = vpop.eup %10520  ;;  %v4613_v14 = vadd.f32 %v4612_v56, %v4611_v29  ;;  %v13058_v3 = vmul.f32 0.015625, %v4555_v42  ;;  %v4754_v55 = vadd.f32 1.0, %v10519_v24  ;;  %v4909_v56 = vld [vmem:[#allocation3 + $0x14] sm:$0xf] }
 0x564   : > { %v4758_v33 = vadd.f32 1.0, %v10521_v19  ;;  %10532 = vrcp.f32 %v4759_v30  ;;  %v4914_v30 = vld [vmem:[#allocation3 + $0x18] sm:$0x1] }
 0x565   : > { %v4618_v22 = vmul.f32 0.015625, %v4613_v14  ;;  %v4620_v37 = vmul.f32 %v13058_v3, %v13058_v3  ;;  %v4637_v40 = vsub.f32 %v12884_v20, %v13058_v3  ;;  %v4638_v61 = vsub.f32 %v12911_v6, %v13058_v3 }
 0x566   : > { %v4639_v63 = vsub.f32 %v12921_v54, %v13058_v3  ;;  %v4640_v31 = vsub.f32 %v12944_v16, %v13058_v3  ;;  %v4641_v38 = vsub.f32 %v12953_v45, %v13058_v3  ;;  %v4642_v0 = vsub.f32 %v12966_v15, %v13058_v3 }
 0x567   : > { %v4622_v32 = vsub.f32 %v4618_v22, %v4620_v37  ;;  %v4643_v18 = vsub.f32 %v12991_v36, %v13058_v3  ;;  %v4644_v7 = vsub.f32 %v13048_v35, %v13058_v3  ;;  %10534 = vrcp.f32 %v4754_v55 }
 0x568   : > { %10536 = vrcp.f32 %v4758_v33 }
 0x569   : > { %v4624_v4 = vmax.f32 %v4622_v32, 0.0 }
 0x56a   : > { %v10523_v8 = vpop.eup %10522 }
 0x56b   : > { %v10525_v53 = vpop.eup %10524  ;;  %v4626_v17 = vadd.f32 1e-05, %v4624_v4  ;;  %v4801_v62 = vmul.f32 %v10523_v8, %v13004_v21  ;;  %v4931_v4 = vld [vmem:[#allocation3 + $0x18] sm:$0xe] }
 0x56c   : > { %v10527_v11 = vpop.eup %10526  ;;  %v4804_v10 = vmul.f32 %v10525_v53, %v13007_v50  ;;  %v4846_v53 = vld [vmem:[#allocation3 + $0x8] sm:$0x3] }
 0x56d   : > { %v10529_v44 = vpop.eup %10528  ;;  %v4805_v26 = vmul.f32 %v10527_v11, %v13010_v59  ;;  %10538 = vrsqrt.f32 %v4626_v17  ;;  %v8743_v46 = vpack.c.bf16 %v4801_v62, %v4801_v62 }
 0x56e   : > { %v4808_v39 = vmul.f32 %v10529_v44, %v13013_v2  ;;  %v8746_v49 = vpack.c.bf16 %v4804_v10, %v4804_v10  ;;  %v4988_v10 = vld [vmem:[#allocation3 + $0x28] sm:$0xf]  ;;  %v4991_v44 = vld [vmem:[#allocation3 + $0x2c] sm:$0x1] }
 0x56f   : > { %v10531_v60 = vpop.eup %10530  ;;  %v8747_v5 = vpack.c.bf16 %v4805_v26, %v4805_v26  ;;  %v4829_v41 = vshrl.u32 %v8743_v46, 16  ;;  %v4832_v43 = vshll.u32 %v8743_v46, 16 }
 0x570   : > { %v4899_v21 = vshrl.u32 %v8746_v49, 16  ;;  %v4902_v58 = vshll.u32 %v8746_v49, 16  ;;  %v8750_v34 = vpack.c.bf16 %v4808_v39, %v4808_v39  ;;  %v4803_v50 = vmul.f32 %v10531_v60, %v13032_v23 }
 0x571   : > { %v10533_v12 = vpop.eup %10532  ;;  %v4921_v2 = vshrl.u32 %v8747_v5, 16  ;;  %v4924_v57 = vshll.u32 %v8747_v5, 16  ;;  %v4831_v28 = vrot.slane %v4829_v41, 6  ;;  %v4834_v13 = vrot.slane %v4832_v43, 7 }
 0x572   : > { %v4901_v29 = vrot.slane %v4899_v21, 7  ;;  %v4979_v47 = vshrl.u32 %v8750_v34, 16  ;;  %v4982_v42 = vshll.u32 %v8750_v34, 16  ;;  %v4807_v23 = vmul.f32 %v10533_v12, %v13037_v48  ;;  %v4934_v12 = vld [vmem:[#allocation3 + $0x1c] sm:$0x3] }
 0x573   : > { %v4923_v19 = vrot.slane %v4921_v2, 6  ;;  %v4926_v14 = vrot.slane %v4924_v57, 7  ;;  %v4835_v55 = vor.u32 %v4834_v13, %v4831_v28  ;;  %v13101_v33 = vpack.c.bf16 %v4803_v50, %v4803_v50  ;;  %v4888_v50 = vld [vmem:[#allocation3 + $0xc] sm:$0x8]  ;;  %v4841_v2 = vld [vmem:[#allocation3 + $0x4] sm:$0xe] }
 0x574   : > { %v10535_v22 = vpop.eup %10534  ;;  %v4904_v37 = vor.u32 %v4902_v58, %v4901_v29  ;;  %v4905_v32 = vrot.slane %v4901_v29, 4  ;;  %v4981_v8 = vrot.slane %v4979_v47, 7  ;;  %v13109_v17 = vpack.c.bf16 %v4807_v23, %v4807_v23 }
 0x575   : > { %v10537_v62 = vpop.eup %10536  ;;  %v4927_v11 = vor.u32 %v4926_v14, %v4923_v19  ;;  %v4802_v26 = vmul.f32 %v10535_v22, %v13042_v9  ;;  %v4836_v46 = vrot.slane %v4835_v55, 4  ;;  %v4876_v39 = vshll.u32 %v13101_v33, 16 }
 0x576   : > { %v4910_v60 = vsel %vm13090_vm8, %v4904_v37, %v4909_v56  ;;  %v4915_v5 = vsel %vm13097_vm14, %v4905_v32, %v4914_v30  ;;  %v4984_v41 = vor.u32 %v4982_v42, %v4981_v8  ;;  %v4985_v43 = vrot.slane %v4981_v8, 4 }
 0x577   : > { %4911 = vst [vmem:[#allocation3 + $0x14] sm:$0xf] %v4910_v60  ;;  %4916 = vst [vmem:[#allocation3 + $0x18] sm:$0x1] %v4915_v5  ;;  %v4932_v9 = vsel %vm13084_vm5, %v4927_v11, %v4931_v4  ;;  %v4806_v21 = vmul.f32 %v10537_v62, %v13045_v27  ;;  %v4847_v58 = vsel %vm13105_vm4, %v4836_v46, %v4846_v53  ;;  %v13132_v13 = vrot.slane %v4876_v39, 5 }
 0x578   : > { %v8744_v34 = vpack.c.bf16 %v4802_v26, %v4802_v26  ;;  %4933 = vst [vmem:[#allocation3 + $0x18] sm:$0xe] %v4932_v9  ;;  %v4989_v57 = vsel %vm13090_vm8, %v4984_v41, %v4988_v10  ;;  %v4992_v28 = vsel %vm13097_vm14, %v4985_v43, %v4991_v44  ;;  %4848 = vst [vmem:[#allocation3 + $0x8] sm:$0x3] %v4847_v58  ;;  %v4928_v29 = vrot.slane %v4927_v11, 4 }
 0x579   : > { %4990 = vst [vmem:[#allocation3 + $0x28] sm:$0xf] %v4989_v57  ;;  %4993 = vst [vmem:[#allocation3 + $0x2c] sm:$0x1] %v4992_v28  ;;  %v8748_v42 = vpack.c.bf16 %v4806_v21, %v4806_v21  ;;  %v4960_v23 = vshll.u32 %v13109_v17, 16  ;;  %v4889_v30 = vsel %vm13115_vm2, %v13132_v13, %v4888_v50  ;;  %v4842_v14 = vsel %vm13084_vm5, %v4835_v55, %v4841_v2  ;;  %v10388_v21 = vld [vmem:[%s14581_s11 + $0x38] sm:$0xff]  }
 0x57a   : > { %v4852_v27 = vshrl.u32 %v8744_v34, 16  ;;  %v4855_v47 = vshll.u32 %v8744_v34, 16  ;;  %v10539_v56 = vpop.eup %10538  ;;  %v4935_v19 = vsel %vm13105_vm4, %v4928_v29, %v4934_v12  ;;  %v4879_v22 = vshrl.u32 %v13101_v33, 16  ;;  %4890 = vst [vmem:[#allocation3 + $0xc] sm:$0x8] %v4889_v30 }
 0x57b   : > { %v4653_v37 = vmul.f32 %v10539_v56, %v4637_v40  ;;  %v13149_v32 = vmul.f32 %v10539_v56, %v4638_v61  ;;  %v13154_v4 = vmul.f32 %v10539_v56, %v4639_v63  ;;  %v4656_v55 = vmul.f32 %v10539_v56, %v4640_v31  ;;  %4936 = vst [vmem:[#allocation3 + $0x1c] sm:$0x3] %v4935_v19  ;;  %v4864_v40 = vld [vmem:[#allocation3 + $0x8] sm:$0xc]  ;;  %v4950_v62 = vld [vmem:[#allocation3 + $0x1c] sm:$0xc] }
 0x57c   : > { %4843 = vst [vmem:[#allocation3 + $0x4] sm:$0xe] %v4842_v14  ;;  %v13162_v20 = vmul.f32 %v10539_v56, %v4641_v38  ;;  %v13167_v6 = vmul.f32 %v10539_v56, %v4642_v0  ;;  %v4659_v54 = vmul.f32 %v10539_v56, %v4643_v18  ;;  %v4660_v16 = vmul.f32 %v10539_v56, %v4644_v7  ;;  %v4970_v38 = vld [vmem:[#allocation3 + $0x20] sm:$0x8]  ;;  %v4869_v0 = vld [vmem:[#allocation3 + $0xc] sm:$0x7] }
 0x57d   : > { %v4678_v61 = vmul.f32 %v12962_v52, %v4656_v55  ;;  %v4854_v63 = vrot.slane %v4852_v27, 5  ;;  %v4857_v45 = vrot.slane %v4855_v47, 6  ;;  %v4940_v31 = vshrl.u32 %v8748_v42, 16  ;;  %v5148_v18 = vld [vmem:[#allocation3] sm:$0xf] }
 0x57e   : > { %v4681_v33 = vmul.f32 %v12962_v52, %v4659_v54  ;;  %v4682_v15 = vmul.f32 %v12962_v52, %v4660_v16  ;;  %v4943_v35 = vshll.u32 %v8748_v42, 16  ;;  %v4962_v3 = vrot.slane %v4960_v23, 5  ;;  %v4893_v9 = vld [vmem:[#allocation3 + $0x10] sm:$0xf] }
 0x57f   : > { %v13185_v7 = vadd.f32 %v12980_v51, %v4678_v61  ;;  %v4858_v8 = vor.u32 %v4857_v45, %v4854_v63  ;;  %v4942_v53 = vrot.slane %v4940_v31, 5  ;;  %v4881_v11 = vrot.slane %v4879_v22, 4  ;;  %v4973_v63 = vld [vmem:[#allocation3 + $0x24] sm:$0xf] }
 0x580   : > { %v13188_v10 = vadd.f32 %v12980_v51, %v4681_v33  ;;  %v13191_v44 = vadd.f32 %v12980_v51, %v4682_v15  ;;  %v4945_v46 = vrot.slane %v4943_v35, 6  ;;  %v4971_v39 = vsel %vm13115_vm2, %v4962_v3, %v4970_v38 }
 0x581   : > { %v8477_v60 = vmul.f32 -1.442695, %v13185_v7  ;;  %v4859_v5 = vrot.slane %v4858_v8, 4  ;;  %v4865_v41 = vsel %vm13180_vm7, %v4858_v8, %v4864_v40  ;;  %4972 = vst [vmem:[#allocation3 + $0x20] sm:$0x8] %v4971_v39  ;;  %v4882_v43 = vor.u32 %v4881_v11, %v13132_v13 }
 0x582   : > { %v8480_v34 = vmul.f32 -1.442695, %v13188_v10  ;;  %v8481_v50 = vmul.f32 -1.442695, %v13191_v44  ;;  %4866 = vst [vmem:[#allocation3 + $0x8] sm:$0xc] %v4865_v41  ;;  %v4946_v12 = vor.u32 %v4945_v46, %v4942_v53  ;;  %v4675_v57 = vmul.f32 %v12962_v52, %v4653_v37 }
 0x583   : > { %v13216_v2 = vld [vmem:[#allocation3 + $0x4] sm:$0xf]  ;;  %10540 = vpow2.f32 %v8477_v60  ;;  %v4870_v28 = vsel %vm13195_vm13, %v4859_v5, %v4869_v0  ;;  %v4953_v13 = vld [vmem:[#allocation3 + $0x20] sm:$0x7]  ;;  %v4883_v27 = vrot.slane %v4882_v43, 4  ;;  %v4963_v23 = vshrl.u32 %v13109_v17, 16 }
 0x584   : > { %v8502_v29 = vcombine.low %v5148_v18, %v13216_v2  ;;  %10542 = vpow2.f32 %v8480_v34  ;;  %4871 = vst [vmem:[#allocation3 + $0xc] sm:$0x7] %v4870_v28  ;;  %v4947_v47 = vrot.slane %v4946_v12, 4  ;;  %v4951_v42 = vsel %vm13180_vm7, %v4946_v12, %v4950_v62  ;;  %v10392_v17 = vld [vmem:[%s14581_s11 + $0x30] sm:$0xff]   ;;  %v10378_v46 = vld [vmem:[%s14581_s11 + $0x28] sm:$0xff]   ;;  %v13285_v28 = vld [vmem:[#allocation3 + $0x28] sm:$0xff]  }
 0x585   : > { %10544 = vpow2.f32 %v8481_v50  ;;  %4952 = vst [vmem:[#allocation3 + $0x1c] sm:$0xc] %v4951_v42  ;;  %v4894_v30 = vsel %vm13210_vm10, %v4883_v27, %v4893_v9  ;;  %v4965_v14 = vrot.slane %v4963_v23, 4  ;;  %v13233_v22 = vadd.f32 %v12980_v51, %v4675_v57  ;;  %v10385_v27 = vld [vmem:[%s14581_s11 + $0x20] sm:$0xff]  }
 0x586   : > { %9748 = vmatmul.mubr.msk.bf16.vlgmr.msra.gmra.mxu0 %vm14829_vm15, %v8502_v29  ;;  %v5251_v56 = vshll.u32 %v8502_v29, 16  ;;  %v4954_v19 = vsel %vm13195_vm13, %v4947_v47, %v4953_v13  ;;  %4895 = vst [vmem:[#allocation3 + $0x10] sm:$0xf] %v4894_v30  ;;  %v4676_v37 = vmul.f32 %v12962_v52, %v13149_v32  ;;  %v4677_v55 = vmul.f32 %v12962_v52, %v13154_v4  ;;  %vm14835_vm15 = vmmov %vm14834_vm11 }
 0x587   : > { %9751 = vmatprep.mubr.msk.bf16.mxu0 %vm14652_vm3, %v14676_v1  ;;  %9856 = vmatpush3.bf16.msra.mxu0 %v10388_v21  ;;  %4955 = vst [vmem:[#allocation3 + $0x20] sm:$0x7] %v4954_v19  ;;  %v4966_v54 = vor.u32 %v4965_v14, %v4962_v3  ;;  %v8474_v16 = vmul.f32 -1.442695, %v13233_v22  ;;  %v4679_v40 = vmul.f32 %v12962_v52, %v13162_v20  ;;  %v5249_v20 = vshrl.u32 %v8502_v29, 16 }
 0x588   : > { %9857 = vmatprep.subr.bf16.mxu0 %v14676_v1  ;;  %v5253_v61 = vrot.slane %v5251_v56, 1  ;;  %v13247_v45 = vadd.f32 %v12980_v51, %v4676_v37  ;;  %v13250_v31 = vadd.f32 %v12980_v51, %v4677_v55  ;;  %v4680_v32 = vmul.f32 %v12962_v52, %v13167_v6 }
 0x589   : > { %v4967_v4 = vrot.slane %v4966_v54, 4  ;;  %10546 = vpow2.f32 %v8474_v16  ;;  %v13255_v38 = vadd.f32 %v12980_v51, %v4679_v40  ;;  %v5945_v30 = vld [vmem:[#allocation3 + $0x8] sm:$0xf] }
 0x58a   : > { %v8475_v15 = vmul.f32 -1.442695, %v13247_v45  ;;  %v13261_v0 = vadd.f32 %v12980_v51, %v4680_v32  ;;  %v8476_v6 = vmul.f32 -1.442695, %v13250_v31  ;;  %v5254_v3 = vor.u32 %v5253_v61, %v5249_v20  ;;  %v5706_v51 = vld [vmem:[#allocation3] sm:$0xe] }
 0x58b   : > { %9858 = vmatpush3.bf16.msra.mxu0 %v10392_v17  ;;  %v13257_v33 = vld [vmem:[#allocation3 + $0x8] sm:$0xff]   ;;  %v4974_v52 = vsel %vm13210_vm10, %v4967_v4, %v4973_v63  ;;  %v8478_v53 = vmul.f32 -1.442695, %v13255_v38  ;;  %v8550_v41 = vcombine.low %v5706_v51, %v13216_v2  ;;  %v5288_v17 = vshll.u32 %v13285_v28, 16 }
 0x58c   : > { %9967 = vmatprep.subr.bf16.mxu0 %v14676_v1  ;;  %v13264_v35 = vld [vmem:[#allocation3 + $0x18] sm:$0xff]   ;;  %v5256_v18 = vshll.u32 %v13257_v33, 16  ;;  %4975 = vst [vmem:[#allocation3 + $0x24] sm:$0xf] %v4974_v52  ;;  %10548 = vpow2.f32 %v8475_v15  ;;  %v8479_v60 = vmul.f32 -1.442695, %v13261_v0 }
 0x58d   : > { %v10377_v8 = vld [vmem:[#allocation3 + $0x10] sm:$0xff]   ;;  %10550 = vpow2.f32 %v8476_v6  ;;  %v5272_v39 = vshll.u32 %v13264_v35, 16  ;;  %v5260_v12 = vshrl.u32 %v13257_v33, 16  ;;  %v5276_v57 = vshrl.u32 %v13264_v35, 16 }
 0x58e   : > { %9752 = vmatmul.mubr.msk.bf16.gmra.mxu0 %vm14830_vm6, %v13257_v33  ;;  %v5258_v62 = vrot.slane %v5256_v18, 1  ;;  %v5264_v11 = vshll.u32 %v10377_v8, 16  ;;  %10552 = vpow2.f32 %v8478_v53  ;;  %v5715_v42 = vrot.slane %v8550_v41, 1  ;;  %vm14836_vm6 = vmmov %vm14834_vm11  ;;  %v13318_v18 = vld [vmem:[#allocation3 + $0x14] sm:$0xff]  }
 0x58f   : > { %9755 = vmatprep.mubr.msk.bf16.mxu0 %vm14652_vm3, %v14676_v1  ;;  %10554 = vpow2.f32 %v8479_v60  ;;  %v5274_v29 = vrot.slane %v5272_v39, 1  ;;  %v5268_v56 = vshrl.u32 %v10377_v8, 16  ;;  %v5716_v19 = vrot.slane %v13257_v33, 1  ;;  %v5944_v33 = vld [vmem:[#allocation3 + $0x4] sm:$0xe] }
 0x590   : > { %v10541_v5 = vpop.eup %10540  ;;  %v5259_v21 = vsel %vm14831_vm12, %v5254_v3, %v5258_v62  ;;  %v5266_v2 = vrot.slane %v5264_v11, 1  ;;  %v5262_v23 = vor.u32 %v5260_v12, %v5258_v62  ;;  %v5718_v37 = vrot.slane %v10377_v8, 1  ;;  %v13316_v3 = vld [vmem:[#allocation3 + $0xc] sm:$0xff]  }
 0x591   : > { %v10543_v43 = vpop.eup %10542  ;;  %v4764_v9 = vadd.f32 1.0, %v10541_v5  ;;  %9692 = vmatmul.mubr.msk.bf16.vlgmr.msra.gmra.mxu1 %vm14832_vm1, %v5259_v21  ;;  %v5720_v55 = vrot.slane %v13264_v35, 1  ;;  %v5278_v40 = vor.u32 %v5276_v57, %v5274_v29  ;;  %v13304_v63 = vsel %vm14834_vm11, %v5715_v42, %v5716_v19  ;;  %vm14838_vm11 = vmmov %vm14836_vm6  ;;  %v13345_v57 = vld [vmem:[#allocation3 + $0x1c] sm:$0xff]  }
 0x592   : > { %v10545_v34 = vpop.eup %10544  ;;  %v4767_v50 = vadd.f32 1.0, %v10543_v43  ;;  %9695 = vmatprep.mubr.msk.bf16.mxu1 %vm14652_vm3, %v14676_v1  ;;  %9800 = vmatpush3.bf16.msra.mxu1 %v10378_v46  ;;  %v5270_v16 = vor.u32 %v5268_v56, %v5266_v2  ;;  %v13308_v20 = vsel %vm14835_vm15, %v5716_v19, %v5718_v37  ;;  %v5267_v52 = vsel %vm14831_vm12, %v5262_v23, %v5266_v2  ;;  %vm14839_vm15 = vmmov %vm14836_vm6  ;;  %v6598_v43 = vld [vmem:[#allocation3 + $0x4] sm:$0xc] }
 0x593   : > { %v4768_v13 = vadd.f32 1.0, %v10545_v34  ;;  %10556 = vrcp.f32 %v4764_v9  ;;  %v13292_v47 = vld [vmem:[#allocation3 + $0x20] sm:$0xff]   ;;  %9801 = vmatprep.subr.bf16.mxu1 %v14676_v1  ;;  %v13311_v15 = vsel %vm14836_vm6, %v5718_v37, %v5720_v55  ;;  %v13314_v6 = vcombine.low %v5944_v33, %v5945_v30 }
 0x594   : > { %10558 = vrcp.f32 %v4767_v50  ;;  %v5280_v14 = vshll.u32 %v13292_v47, 16  ;;  %v5284_v61 = vshrl.u32 %v13292_v47, 16  ;;  %v5724_v51 = vrot.slane %v13285_v28, 1 }
 0x595   : > { %10560 = vrcp.f32 %v4768_v13  ;;  %v13323_v11 = vrot.slane %v5288_v17, 1  ;;  %v8622_v50 = vcombine.low %v6598_v43, %v5945_v30  ;;  %v6608_v13 = vrot.slane %v13316_v3, 2 }
 0x596   : > { %9756 = vmatmul.mubr.msk.bf16.gmra.mxu0 %vm14833_vm9, %v10377_v8  ;;  %v10547_v54 = vpop.eup %10546  ;;  %9802 = vmatpush3.bf16.msra.mxu1 %v10385_v27  ;;  %v5282_v32 = vrot.slane %v5280_v14, 1  ;;  %v5722_v8 = vrot.slane %v13292_v47, 1  ;;  %vm14837_vm9 = vmmov %vm14831_vm12  ;;  %v6610_v2 = vrot.slane %v13318_v18, 2  ;;  %v6282_v23 = vshll.u32 %v13314_v6, 16 }
 0x597   : > { %9759 = vmatprep.mubr.msk.bf16.mxu0 %vm14652_vm3, %v14676_v1  ;;  %v4761_v4 = vadd.f32 1.0, %v10547_v54  ;;  %9911 = vmatprep.subr.bf16.mxu1 %v14676_v1  ;;  %v5275_v39 = vsel %vm14837_vm9, %v5270_v16, %v5274_v29  ;;  %vm14840_vm6 = vmmov %vm14837_vm9  ;;  %v6279_v29 = vshrl.u32 %v13314_v6, 16  ;;  %v6607_v42 = vrot.slane %v8622_v50, 2 }
 0x598   : > { %v5286_v62 = vor.u32 %v5284_v61, %v5282_v32  ;;  %v13329_v5 = vsel %vm14838_vm11, %v5720_v55, %v5722_v8  ;;  %v13334_v41 = vsel %vm14839_vm15, %v5722_v8, %v5724_v51  ;;  %v13337_v9 = vsel %vm14840_vm6, %v5278_v40, %v5282_v32  ;;  %vm14841_vm12 = vmmov %vm14840_vm6  ;;  %v13358_v55 = vld [vmem:[#allocation3 + $0x24] sm:$0xff]  }
 0x599   : > { %v10549_v53 = vpop.eup %10548  ;;  %9696 = vmatmul.mubr.msk.bf16.gmra.mxu1 %vm14832_vm1, %v5267_v52  ;;  %10562 = vrcp.f32 %v4761_v4  ;;  %v6281_v30 = vrot.slane %v6279_v29, 1  ;;  %v6287_v19 = vshrl.u32 %v13316_v3, 16  ;;  %v6290_v14 = vshll.u32 %v13316_v3, 16  ;;  %vm14842_vm9 = vmmov %vm14832_vm1 }
 0x59a   : > { %v10551_v46 = vpop.eup %10550  ;;  %9699 = vmatprep.mubr.msk.bf16.mxu1 %vm14652_vm3, %v14676_v1  ;;  %v4762_v60 = vadd.f32 1.0, %v10549_v53  ;;  %v13341_v21 = vsel %vm14841_vm12, %v5286_v62, %v13323_v11  ;;  %v13361_v54 = vsel %vm3210_vm0, %v6607_v42, %v6608_v13  ;;  %v6284_v16 = vrot.slane %v6282_v23, 2  ;;  %vm14843_vm11 = vmmov %vm14832_vm1 }
 0x59b   : > { %v4763_v34 = vadd.f32 1.0, %v10551_v46  ;;  %v10553_v12 = vpop.eup %10552  ;;  %v6289_v32 = vrot.slane %v6287_v19, 1  ;;  %v6292_v4 = vrot.slane %v6290_v14, 2  ;;  %v6612_v33 = vrot.slane %v13345_v57, 2  ;;  %vm14845_vm6 = vmmov %vm14832_vm1 }
 0x59c   : > { %10564 = vrcp.f32 %v4762_v60  ;;  %v4765_v27 = vadd.f32 1.0, %v10553_v12  ;;  %v10555_v56 = vpop.eup %10554  ;;  %v6285_v53 = vor.u32 %v6284_v16, %v6281_v30  ;;  %v6296_v62 = vshrl.u32 %v13318_v18, 16 }
 0x59d   : > { %10566 = vrcp.f32 %v4763_v34  ;;  %v4766_v37 = vadd.f32 1.0, %v10555_v56  ;;  %v13372_v43 = vsel %vm3210_vm0, %v6610_v2, %v6612_v33  ;;  %vm14844_vm15 = vsmask.f32 6400 }
 0x59e   : > { %9760 = vmatmul.mubr.msk.bf16.gmra.mxu0 %vm14832_vm1, %v13264_v35  ;;  %v13354_v35 = vsel %vm3210_vm0, %v6608_v13, %v6610_v2  ;;  %10568 = vrcp.f32 %v4765_v27  ;;  %v6298_v50 = vrot.slane %v6296_v62, 1  ;;  %vm14846_vm12 = vmmov %vm14844_vm15 }
 0x59f   : > { %9763 = vmatprep.mubr.msk.bf16.mxu0 %vm14652_vm3, %v14676_v1  ;;  %10570 = vrcp.f32 %v4766_v37 }
 0x5a0   : > { %v10557_v17 = vpop.eup %10556 }
 0x5a1   : > { %v10559_v40 = vpop.eup %10558  ;;  %v4812_v61 = vmul.f32 %v10557_v17, %v13185_v7  ;;  %9700 = vmatmul.mubr.msk.bf16.gmra.mxu1 %vm14842_vm9, %v5275_v39  ;;  %v6293_v7 = vor.u32 %v6292_v4, %v6289_v32  ;;  %v6614_v39 = vrot.slane %v13358_v55, 2 }
 0x5a2   : > { %v10561_v52 = vpop.eup %10560  ;;  %v4815_v8 = vmul.f32 %v10559_v40, %v13188_v10  ;;  %9703 = vmatprep.mubr.msk.bf16.mxu1 %vm14652_vm3, %v14676_v1  ;;  %v6299_v10 = vshll.u32 %v13318_v18, 16 }
 0x5a3   : > { %v4816_v46 = vmul.f32 %v10561_v52, %v13191_v44  ;;  %v8754_v60 = vpack.c.bf16 %v4812_v61, %v4812_v61  ;;  %v13379_v44 = vsel %vm14844_vm15, %v6285_v53, %v6293_v7  ;;  %v13386_v23 = vsel %vm3210_vm0, %v6612_v33, %v6614_v39  ;;  %v5068_v33 = vld [vmem:[#allocation3 + $0x48] sm:$0x7] }
 0x5a4   : > { %v8757_v34 = vpack.c.bf16 %v4815_v8, %v4815_v8  ;;  %v6301_v2 = vrot.slane %v6299_v10, 2  ;;  %v6305_v8 = vshrl.u32 %v13345_v57, 16 }
 0x5a5   : > { %v5055_v12 = vshrl.u32 %v8754_v60, 16  ;;  %v5058_v13 = vshll.u32 %v8754_v60, 16  ;;  %v8758_v29 = vpack.c.bf16 %v4816_v46, %v4816_v46  ;;  %v5142_v46 = vld [vmem:[#allocation3 + $0x58] sm:$0xc] }
 0x5a6   : > { %9764 = vmatmul.mubr.msk.bf16.gmra.mxu0 %vm14843_vm11, %v13292_v47  ;;  %v5113_v27 = vshrl.u32 %v8757_v34, 16  ;;  %v5116_v42 = vshll.u32 %v8757_v34, 16  ;;  %v10563_v56 = vpop.eup %10562  ;;  %v5065_v47 = vld [vmem:[#allocation3 + $0x44] sm:$0xc]  ;;  %v13389_v61 = vor.u32 %v6301_v2, %v6298_v50 }
 0x5a7   : > { %9767 = vmatprep.mubr.msk.bf16.mxu0 %vm14652_vm3, %v14676_v1  ;;  %v5057_v30 = vrot.slane %v5055_v12, 5  ;;  %v5060_v19 = vrot.slane %v5058_v13, 6  ;;  %v5132_v14 = vshrl.u32 %v8758_v29, 16  ;;  %v5135_v17 = vshll.u32 %v8758_v29, 16  ;;  %v5126_v13 = vld [vmem:[#allocation3 + $0x58] sm:$0x3] }
 0x5a8   : > { %v5115_v37 = vrot.slane %v5113_v27, 6  ;;  %v5118_v16 = vrot.slane %v5116_v42, 7  ;;  %v4809_v40 = vmul.f32 %v10563_v56, %v13233_v22  ;;  %v13396_v34 = vsel %vm14846_vm12, %v6293_v7, %v13389_v61  ;;  %v5145_v42 = vld [vmem:[#allocation3 + $0x5c] sm:$0x7] }
 0x5a9   : > { %v5061_v32 = vor.u32 %v5060_v19, %v5057_v30  ;;  %v5134_v4 = vrot.slane %v5132_v14, 5  ;;  %v5137_v52 = vrot.slane %v5135_v17, 6  ;;  %v10565_v53 = vpop.eup %10564  ;;  %9704 = vmatmul.mubr.msk.bf16.gmra.mxu1 %vm14845_vm6, %v13337_v9  ;;  %v6308_v22 = vshll.u32 %v13345_v57, 16  ;;  %vm14858_vm6 = vmmov %vm14832_vm1 }
 0x5aa   : > { %v5119_v62 = vor.u32 %v5118_v16, %v5115_v37  ;;  %v8751_v60 = vpack.c.bf16 %v4809_v40, %v4809_v40  ;;  %v10567_v50 = vpop.eup %10566  ;;  %9707 = vmatprep.mubr.msk.bf16.mxu1 %vm14652_vm3, %v14676_v1  ;;  %v4810_v27 = vmul.f32 %v10565_v53, %v13247_v45 }
 0x5ab   : > { %v5062_v10 = vrot.slane %v5061_v32, 4  ;;  %v5066_v12 = vsel %vm13180_vm7, %v5061_v32, %v5065_v47  ;;  %v5138_v29 = vor.u32 %v5137_v52, %v5134_v4  ;;  %v4811_v56 = vmul.f32 %v10567_v50, %v13250_v31  ;;  %v10569_v30 = vpop.eup %10568  ;;  %v5008_v47 = vld [vmem:[#allocation3 + $0x34] sm:$0x8]  ;;  %v5011_v50 = vld [vmem:[#allocation3 + $0x38] sm:$0xf] }
 0x5ac   : > { %5067 = vst [vmem:[#allocation3 + $0x44] sm:$0xc] %v5066_v12  ;;  %v5120_v9 = vrot.slane %v5119_v62, 4  ;;  %v4998_v2 = vshll.u32 %v8751_v60, 16  ;;  %v5001_v7 = vshrl.u32 %v8751_v60, 16  ;;  %v8752_v45 = vpack.c.bf16 %v4810_v27, %v4810_v27  ;;  %v10571_v4 = vpop.eup %10570 }
 0x5ad   : > { %v5069_v19 = vsel %vm13195_vm13, %v5062_v10, %v5068_v33  ;;  %v5139_v14 = vrot.slane %v5138_v29, 4  ;;  %v5143_v17 = vsel %vm13180_vm7, %v5138_v29, %v5142_v46  ;;  %v8753_v40 = vpack.c.bf16 %v4811_v56, %v4811_v56  ;;  %v5123_v32 = vld [vmem:[#allocation3 + $0x54] sm:$0xe]  ;;  %v5026_v10 = vld [vmem:[#allocation3 + $0x3c] sm:$0xf]  ;;  %vm14847_vm7 = vmmov %vm14832_vm1 }
 0x5ae   : > { %9768 = vmatmul.mubr.msk.bf16.gmra.mxu0 %vm14832_vm1, %v13285_v28  ;;  %5070 = vst [vmem:[#allocation3 + $0x48] sm:$0x7] %v5069_v19  ;;  %v5127_v37 = vsel %vm13105_vm4, %v5120_v9, %v5126_v13  ;;  %5144 = vst [vmem:[#allocation3 + $0x58] sm:$0xc] %v5143_v17  ;;  %v5000_v31 = vrot.slane %v4998_v2, 5  ;;  %v5003_v16 = vrot.slane %v5001_v7, 4  ;;  %v4813_v33 = vmul.f32 %v10569_v30, %v13255_v38 }
 0x5af   : > { %9771 = vmatprep.mubr.msk.bf16.mxu0 %vm14652_vm3, %v14676_v1  ;;  %5128 = vst [vmem:[#allocation3 + $0x58] sm:$0x3] %v5127_v37  ;;  %v5146_v36 = vsel %vm13195_vm13, %v5139_v14, %v5145_v42  ;;  %v5017_v52 = vshrl.u32 %v8752_v45, 16  ;;  %v5020_v53 = vshll.u32 %v8752_v45, 16  ;;  %v5036_v12 = vshrl.u32 %v8753_v40, 16 }
 0x5b0   : > { %5147 = vst [vmem:[#allocation3 + $0x5c] sm:$0x7] %v5146_v36  ;;  %v5009_v46 = vsel %vm13115_vm2, %v5000_v31, %v5008_v47  ;;  %v5004_v60 = vor.u32 %v5003_v16, %v5000_v31  ;;  %v5039_v13 = vshll.u32 %v8753_v40, 16  ;;  %v5029_v27 = vld [vmem:[#allocation3 + $0x40] sm:$0x1]  ;;  %v8755_v2 = vpack.c.bf16 %v4813_v33, %v4813_v33 }
 0x5b1   : > { %5010 = vst [vmem:[#allocation3 + $0x34] sm:$0x8] %v5009_v46  ;;  %v5019_v29 = vrot.slane %v5017_v52, 7  ;;  %v5046_v9 = vld [vmem:[#allocation3 + $0x40] sm:$0xe]  ;;  %v4814_v26 = vmul.f32 %v10571_v4, %v13261_v0  ;;  %v5124_v42 = vsel %vm13084_vm5, %v5119_v62, %v5123_v32  ;;  %9708 = vmatmul.mubr.msk.bf16.gmra.mxu1 %vm14847_vm7, %v13341_v21  ;;  %v5038_v7 = vrot.slane %v5036_v12, 6 }
 0x5b2   : > { %v5005_v38 = vrot.slane %v5004_v60, 4  ;;  %v5041_v56 = vrot.slane %v5039_v13, 7  ;;  %5125 = vst [vmem:[#allocation3 + $0x54] sm:$0xe] %v5124_v42  ;;  %v13425_v30 = vld [vmem:[#allocation3 + $0x60] sm:$0xf]  ;;  %9711 = vmatprep.mubr.msk.bf16.mxu1 %vm14652_vm3, %v14676_v1 }
 0x5b3   : > { %v6307_v19 = vrot.slane %v6305_v8, 1  ;;  %v5022_v14 = vor.u32 %v5020_v53, %v5019_v29  ;;  %v5023_v17 = vrot.slane %v5019_v29, 4  ;;  %v5075_v47 = vshll.u32 %v8755_v2, 16  ;;  %v5177_v45 = vld [vmem:[#allocation3 + $0x64] sm:$0x1]  ;;  %v13442_v60 = vld [vmem:[#allocation3 + $0x2c] sm:$0xff]  }
 0x5b4   : > { %v5078_v0 = vshrl.u32 %v8755_v2, 16  ;;  %v5012_v62 = vsel %vm13210_vm10, %v5005_v38, %v5011_v50  ;;  %v5042_v37 = vor.u32 %v5041_v56, %v5038_v7  ;;  %v5085_v21 = vld [vmem:[#allocation3 + $0x48] sm:$0x8]  ;;  %v8756_v31 = vpack.c.bf16 %v4814_v26, %v4814_v26  ;;  %v5049_v32 = vld [vmem:[#allocation3 + $0x44] sm:$0x3] }
 0x5b5   : > { %v6310_v16 = vrot.slane %v6308_v22, 2  ;;  %5013 = vst [vmem:[#allocation3 + $0x38] sm:$0xf] %v5012_v62  ;;  %v5027_v8 = vsel %vm13090_vm8, %v5022_v14, %v5026_v10  ;;  %v5030_v40 = vsel %vm13097_vm14, %v5023_v17, %v5029_v27  ;;  %v5077_v4 = vrot.slane %v5075_v47, 5  ;;  %v5088_v33 = vld [vmem:[#allocation3 + $0x4c] sm:$0xf] }
 0x5b6   : > { %v5080_v36 = vrot.slane %v5078_v0, 4  ;;  %5028 = vst [vmem:[#allocation3 + $0x3c] sm:$0xf] %v5027_v8  ;;  %5031 = vst [vmem:[#allocation3 + $0x40] sm:$0x1] %v5030_v40  ;;  %v5043_v52 = vrot.slane %v5042_v37, 4  ;;  %v5047_v53 = vsel %vm13084_vm5, %v5042_v37, %v5046_v9  ;;  %v13440_v22 = vcombine.low %v13425_v30, %v5177_v45 }
 0x5b7   : > { %v5094_v46 = vshrl.u32 %v8756_v31, 16  ;;  %5048 = vst [vmem:[#allocation3 + $0x40] sm:$0xe] %v5047_v53  ;;  %v5086_v10 = vsel %vm13115_vm2, %v5077_v4, %v5085_v21  ;;  %v5097_v12 = vshll.u32 %v8756_v31, 16  ;;  %v5103_v13 = vld [vmem:[#allocation3 + $0x50] sm:$0xf]  ;;  %v13446_v27 = vor.u32 %v6310_v16, %v6307_v19  ;;  %vm14848_vm5 = vmmov %vm14846_vm12 }
 0x5b8   : > { %v5081_v50 = vor.u32 %v5080_v36, %v5077_v4  ;;  %v5106_v29 = vld [vmem:[#allocation3 + $0x54] sm:$0x1]  ;;  %v5050_v59 = vsel %vm13105_vm4, %v5043_v52, %v5049_v32  ;;  %5087 = vst [vmem:[#allocation3 + $0x48] sm:$0x8] %v5086_v10  ;;  %v5292_v26 = vshrl.u32 %v13285_v28, 16  ;;  %v13451_v38 = vld [vmem:[#allocation3 + $0x58] sm:$0xff]   ;;  %vm14849_vm2 = vmmov %vm14832_vm1 }
 0x5b9   : > { %v10382_v2 = vld [vmem:[#allocation3 + $0x30] sm:$0xff]   ;;  %v5096_v9 = vrot.slane %v5094_v46, 7  ;;  %5051 = vst [vmem:[#allocation3 + $0x44] sm:$0x3] %v5050_v59  ;;  %v13456_v49 = vsel %vm14848_vm5, %v13389_v61, %v13446_v27  ;;  %v6616_v48 = vrot.slane %v13442_v60, 2  ;;  %v14615_v0 = vrot.slane %v13440_v22, 1  ;;  %vm14860_vm12 = vmmov %vm14832_vm1 }
 0x5ba   : > { %v5082_v42 = vrot.slane %v5081_v50, 4  ;;  %9772 = vmatmul.mubr.msk.bf16.gmra.mxu0 %vm14849_vm2, %v10382_v2  ;;  %v5296_v7 = vshll.u32 %v10382_v2, 16  ;;  %v5294_v14 = vor.u32 %v5292_v26, %v13323_v11  ;;  %v5726_v47 = vrot.slane %v10382_v2, 1 }
 0x5bb   : > { %v5099_v56 = vor.u32 %v5097_v12, %v5096_v9  ;;  %v5100_v19 = vrot.slane %v5096_v9, 4  ;;  %9775 = vmatprep.mubr.msk.bf16.mxu0 %vm14652_vm3, %v14676_v1  ;;  %v13475_v11 = vsel %vm3210_vm0, %v6614_v39, %v6616_v48  ;;  %vm14850_vm4 = vcmask 1046528   ;;  %v13507_v12 = vld [vmem:[#allocation3 + $0x64] sm:$0xf] }
 0x5bc   : > { %v5089_v17 = vsel %vm13210_vm10, %v5082_v42, %v5088_v33  ;;  %v5298_v61 = vrot.slane %v5296_v7, 1  ;;  %v13480_v37 = vsel %vm14850_vm4, %v5724_v51, %v5726_v47  ;;  %v5736_v25 = vrot.slane %v13451_v38, 1  ;;  %vm14853_vm13 = vmmov %vm14850_vm4  ;;  %v13512_v26 = vld [vmem:[#allocation3 + $0x34] sm:$0xff]  }
 0x5bd   : > { %5090 = vst [vmem:[#allocation3 + $0x4c] sm:$0xf] %v5089_v17  ;;  %v5104_v45 = vsel %vm13090_vm8, %v5099_v56, %v5103_v13  ;;  %v5107_v62 = vsel %vm13097_vm14, %v5100_v19, %v5106_v29  ;;  %v10383_v58 = vld [vmem:[#allocation3 + $0x38] sm:$0xff]   ;;  %vm14851_vm8 = vsmask.f32 7424  ;;  %vm14852_vm14 = vmmov %vm14832_vm1  ;;  %v5300_v28 = vshrl.u32 %v10382_v2, 16 }
 0x5be   : > { %5105 = vst [vmem:[#allocation3 + $0x50] sm:$0xf] %v5104_v45  ;;  %5108 = vst [vmem:[#allocation3 + $0x54] sm:$0x1] %v5107_v62  ;;  %v5299_v24 = vsel %vm14851_vm8, %v5294_v14, %v5298_v61  ;;  %v5304_v21 = vshll.u32 %v10383_v58, 16  ;;  %v13488_v39 = vsel %vm14853_vm13, %v5736_v25, %v14615_v0  ;;  %v5308_v16 = vshrl.u32 %v10383_v58, 16 }
 0x5bf   : > { %9712 = vmatmul.mubr.msk.bf16.gmra.mxu1 %vm14852_vm14, %v5299_v24  ;;  %v5728_v51 = vrot.slane %v10383_v58, 1  ;;  %vm14854_vm10 = vmmov %vm14832_vm1  ;;  %v6314_v4 = vshrl.u32 %v13358_v55, 16  ;;  %v6317_v53 = vshll.u32 %v13358_v55, 16  ;;  %v5302_v33 = vor.u32 %v5300_v28, %v5298_v61  ;;  %v6269_v13 = vld [vmem:[#allocation3 + $0x68] sm:$0x3]  ;;  %v13517_v56 = vld [vmem:[#allocation3 + $0x3c] sm:$0xff]  }
 0x5c0   : > { %9715 = vmatprep.mubr.msk.bf16.mxu1 %vm14652_vm3, %v14676_v1  ;;  %v10384_v31 = vld [vmem:[#allocation3 + $0x40] sm:$0xff]   ;;  %v5306_v8 = vrot.slane %v5304_v21, 1  ;;  %vm14855_vm9 = vmmov %vm14850_vm4  ;;  %v13522_v61 = vcombine.low %v13507_v12, %v6269_v13  ;;  %v6335_v13 = vshll.u32 %v13512_v26, 16 }
 0x5c1   : > { %v5312_v40 = vshll.u32 %v10384_v31, 16  ;;  %v5730_v32 = vrot.slane %v10384_v31, 1  ;;  %v13499_v52 = vsel %vm14855_vm9, %v5726_v47, %v5728_v51  ;;  %vm14856_vm11 = vmmov %vm14850_vm4  ;;  %v5316_v59 = vshrl.u32 %v10384_v31, 16 }
 0x5c2   : > { %9776 = vmatmul.mubr.msk.bf16.gmra.mxu0 %vm14854_vm10, %v10383_v58  ;;  %vm14857_vm15 = vmmov %vm14851_vm8  ;;  %v5310_v2 = vor.u32 %v5308_v16, %v5306_v8  ;;  %v6316_v14 = vrot.slane %v6314_v4, 1  ;;  %v6319_v17 = vrot.slane %v6317_v53, 2  ;;  %14859 = vst [vmem:[#allocation21_spill] sm:$0xff] %v13522_v61  ;;  %v13528_v58 = vld [vmem:[#allocation3 + $0x44] sm:$0xff]   ;;  %v6326_v4 = vshll.u32 %v13442_v60, 16 }
 0x5c3   : > { %9779 = vmatprep.mubr.msk.bf16.mxu0 %vm14652_vm3, %v14676_v1  ;;  %v5314_v46 = vrot.slane %v5312_v40, 1  ;;  %v13505_v10 = vsel %vm14856_vm11, %v5728_v51, %v5730_v32  ;;  %v5307_v29 = vsel %vm14857_vm15, %v5302_v33, %v5306_v8  ;;  %vm14861_vm1 = vmmov %vm14851_vm8  ;;  %v6618_v51 = vrot.slane %v13512_v26, 2 }
 0x5c4   : > { %v13496_v36 = vld [vmem:[#allocation3 + $0x48] sm:$0xff]   ;;  %vm14862_vm7 = vmmov %vm14850_vm4  ;;  %v6620_v53 = vrot.slane %v13517_v56, 2  ;;  %vm14866_vm8 = vsmask.f32 6400  ;;  %v6353_v0 = vshll.u32 %v13528_v58, 16 }
 0x5c5   : > { %v13502_v50 = vld [vmem:[#allocation3 + $0x50] sm:$0xff]   ;;  %v5320_v9 = vshll.u32 %v13496_v36, 16  ;;  %v5732_v42 = vrot.slane %v13496_v36, 1  ;;  %v5318_v7 = vor.u32 %v5316_v59, %v5314_v46  ;;  %v5315_v45 = vsel %vm14861_vm1, %v5310_v2, %v5314_v46  ;;  %vm14863_vm5 = vmmov %vm14850_vm4 }
 0x5c6   : > { %v5734_v19 = vrot.slane %v13502_v50, 1  ;;  %vm14864_vm2 = vmmov %vm14850_vm4  ;;  %v13545_v40 = vld [vmem:[#allocation3 + $0x4c] sm:$0xff]   ;;  %v6332_v46 = vshrl.u32 %v13512_v26, 16  ;;  %v6328_v59 = vrot.slane %v6326_v4, 2  ;;  %v6350_v4 = vshrl.u32 %v13528_v58, 16 }
 0x5c7   : > { %9716 = vmatmul.mubr.msk.bf16.gmra.mxu1 %vm14858_vm6, %v5307_v29  ;;  %v13526_v62 = vrot.slane %v5320_v9, 1  ;;  %v13531_v24 = vsel %vm14862_vm7, %v5730_v32, %v5732_v42  ;;  %vm14865_vm4 = vmmov %vm14861_vm1  ;;  %v6323_v32 = vshrl.u32 %v13442_v60, 16  ;;  %v13561_v29 = vld [vmem:[#allocation3 + $0x54] sm:$0xff]   ;;  %v13564_v9 = vsel %vm3210_vm0, %v6618_v51, %v6620_v53 }
 0x5c8   : > { %9719 = vmatprep.mubr.msk.bf16.mxu1 %vm14652_vm3, %v14676_v1  ;;  %v13534_v21 = vsel %vm14863_vm5, %v5732_v42, %v5734_v19  ;;  %v13540_v16 = vsel %vm14864_vm2, %v5734_v19, %v5736_v25  ;;  %v13557_v25 = vsel %vm3210_vm0, %v6616_v48, %v6618_v51  ;;  %14867 = vst [vmem:[#allocation22_spill] sm:$0xff] %v13564_v9  ;;  %v6622_v42 = vrot.slane %v13528_v58, 2  ;;  %vm14868_vm14 = vmmov %vm14858_vm6 }
 0x5c9   : > { %v5323_v8 = vsel %vm14865_vm4, %v5318_v7, %v13526_v62  ;;  %v6325_v2 = vrot.slane %v6323_v32, 1  ;;  %v6337_v7 = vrot.slane %v6335_v13, 2  ;;  %v6341_v48 = vshrl.u32 %v13517_v56, 16  ;;  %vm14870_vm13 = vmmov %vm14858_vm6 }
 0x5ca   : > { %9780 = vmatmul.mubr.msk.bf16.gmra.mxu0 %vm14860_vm12, %v10384_v31  ;;  %v6320_v31 = vor.u32 %v6319_v17, %v6316_v14  ;;  %v6344_v19 = vshll.u32 %v13517_v56, 16  ;;  %v13572_v14 = vld [vmem:[#allocation3 + $0x5c] sm:$0xff]   ;;  %v13575_v32 = vsel %vm3210_vm0, %v6620_v53, %v6622_v42  ;;  %v6624_v51 = vrot.slane %v13545_v40, 2  ;;  %vm14871_vm10 = vmmov %vm14866_vm8 }
 0x5cb   : > { %9783 = vmatprep.mubr.msk.bf16.mxu0 %vm14652_vm3, %v14676_v1  ;;  %v6329_v17 = vor.u32 %v6328_v59, %v6325_v2  ;;  %14869 = vst [vmem:[#allocation23_spill] sm:$0xff] %v13575_v32  ;;  %v6352_v53 = vrot.slane %v6350_v4, 1  ;;  %v6626_v59 = vrot.slane %v13561_v29, 2  ;;  %vm14873_vm9 = vmmov %vm14866_vm8  ;;  %v6368_v4 = vshrl.u32 %v13561_v29, 16 }
 0x5cc   : > { %v13552_v33 = vsel %vm14866_vm8, %v13446_v27, %v6320_v31  ;;  %v6334_v27 = vrot.slane %v6332_v46, 1  ;;  %v6343_v46 = vrot.slane %v6341_v48, 1  ;;  %v6346_v13 = vrot.slane %v6344_v19, 2  ;;  %vm14876_vm11 = vmmov %vm14866_vm8 }
 0x5cd   : > { %v13583_v28 = vsel %vm14871_vm10, %v6320_v31, %v6329_v17  ;;  %v13586_v2 = vsel %vm3210_vm0, %v6622_v42, %v6624_v51  ;;  %v6355_v48 = vrot.slane %v6353_v0, 2  ;;  %v6359_v19 = vshrl.u32 %v13545_v40, 16  ;;  %vm14878_vm15 = vmmov %vm14858_vm6 }
 0x5ce   : > { %14872 = vst [vmem:[#allocation28_spill] sm:$0xff] %v13586_v2  ;;  %v13596_v47 = vsel %vm3210_vm0, %v6624_v51, %v6626_v59  ;;  %v6362_v31 = vshll.u32 %v13545_v40, 16  ;;  %v6628_v42 = vrot.slane %v13572_v14, 2  ;;  %v14616_v51 = vrot.slane %v13522_v61, 2  ;;  %vm14879_vm6 = vmmov %vm14866_vm8 }
 0x5cf   : > { %9720 = vmatmul.mubr.msk.bf16.gmra.mxu1 %vm14868_vm14, %v5315_v45  ;;  %v6338_v45 = vor.u32 %v6337_v7, %v6334_v27  ;;  %v6347_v7 = vor.u32 %v6346_v13, %v6343_v46  ;;  %14875 = vst [vmem:[#allocation29_spill] sm:$0xff] %v13596_v47  ;;  %v6356_v32 = vor.u32 %v6355_v48, %v6352_v53  ;;  %v6361_v9 = vrot.slane %v6359_v19, 1  ;;  %vm14882_vm1 = vmmov %vm14879_vm6 }
 0x5d0   : > { %9723 = vmatprep.mubr.msk.bf16.mxu1 %vm14652_vm3, %v14676_v1  ;;  %v6364_v46 = vrot.slane %v6362_v31, 2  ;;  %v13606_v0 = vsel %vm3210_vm0, %v6626_v59, %v6628_v42  ;;  %v6370_v13 = vrot.slane %v6368_v4, 1  ;;  %v6380_v53 = vshll.u32 %v13572_v14, 16  ;;  %vm14883_vm7 = vmmov %vm14882_vm1 }
 0x5d1   : > { %v13592_v27 = vsel %vm14873_vm9, %v6329_v17, %v6338_v45  ;;  %v13602_v2 = vsel %vm14876_vm11, %v6338_v45, %v6347_v7  ;;  %v6371_v17 = vshll.u32 %v13561_v29, 16  ;;  %14877 = vst [vmem:[#allocation25_spill] sm:$0xff] %v13606_v0  ;;  %v13611_v47 = vsel %vm14879_vm6, %v6347_v7, %v6356_v32  ;;  %vm14886_vm5 = vmmov %vm14882_vm1 }
 0x5d2   : > { %9784 = vmatmul.mubr.msk.bf16.gmra.mxu0 %vm14870_vm13, %v13496_v36  ;;  %14874 = vst [vmem:[#allocation24_spill] sm:$0xff] %v13592_v27  ;;  %v6377_v45 = vshrl.u32 %v13572_v14, 16  ;;  %v6365_v48 = vor.u32 %v6364_v46, %v6361_v9  ;;  %v13620_v59 = vsel %vm3210_vm0, %v6628_v42, %v14616_v51  ;;  %v6386_v19 = vshrl.u32 %v13522_v61, 16  ;;  %vm14888_vm2 = vmmov %vm14865_vm4 }
 0x5d3   : > { %9787 = vmatprep.mubr.msk.bf16.mxu0 %vm14652_vm3, %v14676_v1  ;;  %v6373_v27 = vrot.slane %v6371_v17, 2  ;;  %14880 = vst [vmem:[#allocation30_spill] sm:$0xff] %v13620_v59  ;;  %v6382_v4 = vrot.slane %v6380_v53, 2  ;;  %v14881_v17 = vshrl.u32 %v13496_v36, 16  ;;  %vm14889_vm4 = vmmov %vm14882_vm1  ;;  %vm14903_vm6 = vcmask 1046528  }
 0x5d4   : > { %v6379_v31 = vrot.slane %v6377_v45, 1  ;;  %v13630_v9 = vsel %vm14882_vm1, %v6356_v32, %v6365_v48  ;;  %v6388_v46 = vrot.slane %v6386_v19, 1  ;;  %v5336_v32 = vshll.u32 %v13451_v38, 16  ;;  %vm14891_vm8 = vmmov %vm14860_vm12 }
 0x5d5   : > { %v6374_v7 = vor.u32 %v6373_v27, %v6370_v13  ;;  %v5326_v0 = vor.u32 %v14881_v17, %v13526_v62  ;;  %v14884_v13 = vshll.u32 %v13502_v50, 16  ;;  %vm14892_vm14 = vmmov %vm14891_vm8  ;;  %v13666_v17 = vld [vmem:[#allocation3 + $0xc] sm:$0xf]  ;;  %vm14905_vm1 = vcmask 1044480  }
 0x5d6   : > { %v6383_v27 = vor.u32 %v6382_v4, %v6379_v31  ;;  %vm14893_vm13 = vmmov %vm14888_vm2  ;;  %v8530_v31 = vcombine.low %v13425_v30, %v13425_v30  ;;  %v5344_v4 = vshll.u32 %v13440_v22, 16  ;;  %14895 = vst [vmem:[#allocation31_spill] sm:$0xff] %v13666_v17 }
 0x5d7   : > { %9724 = vmatmul.mubr.msk.bf16.gmra.mxu1 %vm14878_vm15, %v5323_v8  ;;  %v6389_v8 = vshll.u32 %v13522_v61, 16  ;;  %v13635_v51 = vsel %vm14883_vm7, %v6365_v48, %v6374_v7  ;;  %v5330_v45 = vrot.slane %v14884_v13, 1  ;;  %v5332_v48 = vshrl.u32 %v13502_v50, 16  ;;  %vm14894_vm10 = vmmov %vm14891_vm8 }
 0x5d8   : > { %9727 = vmatprep.mubr.msk.bf16.mxu1 %vm14652_vm3, %v14676_v1  ;;  %v13642_v36 = vsel %vm14886_vm5, %v6374_v7, %v6383_v27  ;;  %v5338_v7 = vrot.slane %v5336_v32, 1  ;;  %vm14896_vm9 = vmmov %vm14891_vm8  ;;  %v6040_v13 = vrot.slane %v13314_v6, 1  ;;  %v13675_v32 = vld [vmem:[#allocation3 + $0x10] sm:$0xff]   ;;  %v13688_v6 = vld [vmem:[#allocation3 + $0x28] sm:$0xff]  }
 0x5d9   : > { %v6391_v42 = vrot.slane %v6389_v8, 2  ;;  %14887 = vst [vmem:[#allocation26_spill] sm:$0xff] %v13642_v36  ;;  %v5331_v62 = vsel %vm14888_vm2, %v5326_v0, %v5330_v45  ;;  %v5334_v8 = vor.u32 %v5332_v48, %v5330_v45  ;;  %v6041_v45 = vrot.slane %v13316_v3, 1  ;;  %vm14897_vm11 = vmmov %vm14888_vm2  ;;  %v10408_v48 = vld [vmem:[%s14581_s11 + $0x58] sm:$0xff]   ;;  %v13690_v3 = vld [vmem:[#allocation3 + $0x30] sm:$0xff]  }
 0x5da   : > { %9788 = vmatmul.mubr.msk.bf16.gmra.mxu0 %vm14860_vm12, %v13502_v50  ;;  %v5340_v50 = vshrl.u32 %v13451_v38, 16  ;;  %14898 = vst [vmem:[#allocation20_spill] sm:$0xff] %v13675_v32  ;;  %vm14899_vm15 = vmmov %vm14891_vm8 }
 0x5db   : > { %9791 = vmatprep.mubr.msk.bf16.mxu0 %vm14652_vm3, %v14676_v1  ;;  %v13639_v53 = vor.u32 %v6391_v42, %v6388_v46  ;;  %v5339_v0 = vsel %vm14893_vm13, %v5334_v8, %v5338_v7  ;;  %v5346_v42 = vrot.slane %v5344_v4, 1  ;;  %v13682_v8 = vld [vmem:[#allocation3 + $0x18] sm:$0xff]   ;;  %v6042_v4 = vsel %vm14903_vm6, %v6040_v13, %v6041_v45  ;;  %vm14904_vm12 = vmmov %vm14891_vm8  ;;  %v13708_v13 = vld [vmem:[#allocation3 + $0x50] sm:$0xff]  }
 0x5dc   : > { %v5342_v46 = vor.u32 %v5340_v50, %v5338_v7  ;;  %14900 = vst [vmem:[#allocation27_spill] sm:$0xff] %v13682_v8  ;;  %v13684_v7 = vld [vmem:[#allocation3 + $0x20] sm:$0xff]   ;;  %vm14907_vm7 = vmmov %vm14905_vm1 }
 0x5dd   : > { %14885 = vst [vmem:[#allocation32_spill] sm:$0xff] %v13639_v53  ;;  %v13648_v19 = vsel %vm14889_vm4, %v6383_v27, %v13639_v53  ;;  %v7490_v27 = vld [vmem:[#allocation3 + $0x8] sm:$0x8]  ;;  %14901 = vst [vmem:[#allocation34_spill] sm:$0xff] %v13684_v7  ;;  %v13695_v50 = vld [vmem:[#allocation3 + $0x40] sm:$0xff]   ;;  %v7504_v61 = vrot.slane %v13684_v7, 3 }
 0x5de   : > { %14890 = vst [vmem:[#allocation33_spill] sm:$0xff] %v13648_v19  ;;  %v8694_v30 = vcombine.low %v7490_v27, %v13666_v17  ;;  %v13700_v27 = vld [vmem:[#allocation3 + $0x60] sm:$0xff]   ;;  %v13710_v19 = vld [vmem:[#allocation3 + $0x58] sm:$0xff]   ;;  %vm14908_vm5 = vmmov %vm14905_vm1  ;;  %v7512_v7 = vrot.slane %v13695_v50, 3 }
 0x5df   : > { %9728 = vmatmul.mubr.msk.bf16.gmra.mxu1 %vm14891_vm8, %v5331_v62  ;;  %v5347_v62 = vsel %vm14897_vm11, %v5342_v46, %v5346_v42  ;;  %v13698_v46 = vld [vmem:[#allocation3 + $0x48] sm:$0xff]   ;;  %vm14909_vm2 = vmmov %vm14905_vm1 }
 0x5e0   : > { %9731 = vmatprep.mubr.msk.bf16.mxu1 %vm14652_vm3, %v14676_v1  ;;  %vm14910_vm4 = vmmov %vm14905_vm1 }
 0x5e1   : > { %vm14911_vm8 = vmmov %vm14905_vm1 }
 0x5e2   : > { %9792 = vmatmul.mubr.msk.bf16.gmra.mxu0 %vm14892_vm14, %v13451_v38  ;;  %v5348_v38 = vshrl.u32 %v13440_v22, 16  ;;  %vm14912_vm14 = vmmov %vm14896_vm9 }
 0x5e3   : > { %9795 = vmatprep.mubr.msk.bf16.mxu0 %vm14652_vm3, %v14676_v1  ;;  %vm14913_vm13 = vmmov %vm14905_vm1 }
 0x5e4   : > { %v5350_v53 = vor.u32 %v5348_v38, %v5346_v42  ;;  %v7506_v38 = vrot.slane %v13688_v6, 3  ;;  %vm14916_vm11 = vmmov %vm14905_vm1 }
 0x5e6   : > { %v13730_v17 = vsel %vm14909_vm2, %v7504_v61, %v7506_v38 }
 0x5e7   : > { %9732 = vmatmul.mubr.msk.bf16.gmra.mxu1 %vm14894_vm10, %v5339_v0  ;;  %v13692_v0 = vld [vmem:[#allocation3 + $0x38] sm:$0xff]   ;;  %vm14914_vm10 = vmmov %vm14905_vm1 }
 0x5e8   : > { %9735 = vmatprep.mubr.msk.bf16.mxu1 %vm14652_vm3, %v14676_v1  ;;  %14902 = vst [vmem:[#allocation35_spill] sm:$0xff] %v13692_v0  ;;  %v7510_v36 = vrot.slane %v13692_v0, 3  ;;  %v7514_v0 = vrot.slane %v13698_v46, 3 }
 0x5ea   : > { %9796 = vmatmul.mubr.msk.bf16.gmra.mxu0 %vm14896_vm9, %v8530_v31  ;;  %v7499_v31 = vrot.slane %v8694_v30, 3  ;;  %v10411_v30 = vld [vmem:[%s14581_s11 + $0x50] sm:$0xff]   ;;  %vm14915_vm9 = vmmov %vm14903_vm6 }
 0x5eb   : > { %9859 = vmatprep.mubr.msk.bf16.mxu0 %vm14652_vm3, %v14676_v1  ;;  %vm14918_vm6 = vmmov %vm14905_vm1 }
 0x5ef   : > { %9736 = vmatmul.mubr.msk.bf16.gmra.mxu1 %vm14899_vm15, %v5347_v62  ;;  %v7500_v62 = vrot.slane %v13675_v32, 3  ;;  %v6043_v32 = vrot.slane %v13318_v18, 1  ;;  %v13741_v18 = vsel %vm14913_vm13, %v7510_v36, %v7512_v7  ;;  %vm14917_vm15 = vmmov %vm14905_vm1 }
 0x5f0   : > { %9739 = vmatprep.mubr.msk.bf16.mxu1 %vm14652_vm3, %v14676_v1 }
 0x5f1   : > { %v13716_v42 = vsel %vm14905_vm1, %v7499_v31, %v7500_v62  ;;  %vm14919_vm1 = vmmov %vm14904_vm12 }
 0x5f2   : > { %9860 = vmatmul.mubr.msk.bf16.vlgmr.msra.gmra.mxu0 %vm14904_vm12, %v6042_v4  ;;  %v7502_v4 = vrot.slane %v13682_v8, 3  ;;  %14906 = vst [vmem:[#allocation36_spill] sm:$0xff] %v13716_v42  ;;  %vm14922_vm2 = vmmov %vm14919_vm1 }
 0x5f3   : > { %9863 = vmatprep.mubr.msk.bf16.mxu0 %vm14652_vm3, %v14676_v1  ;;  %9968 = vmatpush3.bf16.msra.mxu0 %v10408_v48  ;;  %v7508_v48 = vrot.slane %v13690_v3, 3 }
 0x5f4   : > { %9969 = vmatprep.subr.bf16.mxu0 %v14676_v1  ;;  %v13723_v59 = vsel %vm14907_vm7, %v7500_v62, %v7502_v4  ;;  %v13726_v8 = vsel %vm14908_vm5, %v7502_v4, %v7504_v61  ;;  %v7516_v62 = vrot.slane %v13708_v13, 3  ;;  %v7518_v4 = vrot.slane %v13710_v19, 3  ;;  %vm14920_vm7 = vmmov %vm14915_vm9 }
 0x5f5   : > { %v13733_v31 = vsel %vm14910_vm4, %v7506_v38, %v7508_v48  ;;  %v13736_v42 = vsel %vm14911_vm8, %v7508_v48, %v7510_v36  ;;  %v14628_v61 = vrot.slane %v13700_v27, 3  ;;  %v13750_v38 = vsel %vm14914_vm10, %v7512_v7, %v7514_v0  ;;  %vm14921_vm5 = vmmov %vm14919_vm1 }
 0x5f6   : > { %v13757_v36 = vsel %vm14917_vm15, %v7516_v62, %v7518_v4  ;;  %v6045_v7 = vrot.slane %v13345_v57, 1  ;;  %vm14923_vm4 = vmmov %vm14920_vm7 }
 0x5f7   : > { %9740 = vmatmul.mubr.msk.bf16.gmra.mxu1 %vm14912_vm14, %v5350_v53  ;;  %9970 = vmatpush3.bf16.msra.mxu0 %v10411_v30  ;;  %v6044_v53 = vsel %vm14915_vm9, %v6041_v45, %v6043_v32  ;;  %v13754_v30 = vsel %vm14916_vm11, %v7514_v0, %v7516_v62  ;;  %v13762_v48 = vsel %vm14918_vm6, %v7518_v4, %v14628_v61  ;;  %v10397_v45 = vld [vmem:[%s14581_s11 + $0x48] sm:$0xff]   ;;  %v10405_v0 = vld [vmem:[%s14581_s11 + $0x40] sm:$0xff]   ;;  %vm14924_vm8 = vmmov %vm14919_vm1 }
 0x5f8   : > { %9803 = vmatprep.mubr.msk.bf16.mxu1 %vm14652_vm3, %v14676_v1  ;;  %10079 = vmatprep.subr.bf16.mxu0 %v14676_v1  ;;  %v6046_v62 = vsel %vm14920_vm7, %v6043_v32, %v6045_v7  ;;  %vm14925_vm14 = vmmov %vm14919_vm1  ;;  %v6051_v32 = vrot.slane %v13512_v26, 1  ;;  %v6055_v26 = vrot.slane %v13528_v58, 1  ;;  %v6059_v58 = vrot.slane %v13561_v29, 1  ;;  %v5969_v4 = vld [vmem:[#allocation3 + $0x68] sm:$0x1]  ;;  %v14993_v61 = vld [vmem:[#allocation32_spill] sm:$0xff] }
 0x5f9   : > { %vm14926_vm13 = vmmov %vm14923_vm4  ;;  %v8582_v29 = vcombine.low %v13507_v12, %v5969_v4 }
 0x5fa   : > { %9864 = vmatmul.mubr.msk.bf16.gmra.mxu0 %vm14904_vm12, %v6044_v53  ;;  %vm14927_vm10 = vmmov %vm14919_vm1 }
 0x5fb   : > { %9867 = vmatprep.mubr.msk.bf16.mxu0 %vm14652_vm3, %v14676_v1  ;;  %vm14928_vm9 = vmmov %vm14919_vm1 }
 0x5fc   : > { %vm14929_vm11 = vmmov %vm14923_vm4 }
 0x5fd   : > { %vm14930_vm15 = vmmov %vm14919_vm1 }
 0x5fe   : > { %vm14931_vm6 = vmmov %vm14919_vm1 }
 0x5ff   : > { %9804 = vmatmul.mubr.msk.bf16.vlgmr.msra.gmra.mxu1 %vm14919_vm1, %v13304_v63  ;;  %v6047_v63 = vrot.slane %v13358_v55, 1  ;;  %v6049_v55 = vrot.slane %v13442_v60, 1  ;;  %v6053_v60 = vrot.slane %v13517_v56, 1  ;;  %vm14932_vm12 = vmmov %vm14923_vm4  ;;  %v6057_v56 = vrot.slane %v13545_v40, 1 }
 0x600   : > { %9912 = vmatpush3.bf16.msra.mxu1 %v10397_v45  ;;  %9807 = vmatprep.mubr.msk.bf16.mxu1 %vm14652_vm3, %v14676_v1  ;;  %vm14933_vm7 = vmmov %vm14919_vm1  ;;  %v6061_v40 = vrot.slane %v13572_v14, 1  ;;  %v6063_v45 = vrot.slane %v8582_v29, 1 }
 0x601   : > { %9913 = vmatprep.subr.bf16.mxu1 %v14676_v1  ;;  %v6048_v57 = vsel %vm14923_vm4, %v6045_v7, %v6047_v63 }
 0x602   : > { %9868 = vmatmul.mubr.msk.bf16.gmra.mxu0 %vm14921_vm5, %v6046_v62  ;;  %vm14934_vm5 = vmmov %vm14923_vm4 }
 0x603   : > { %9871 = vmatprep.mubr.msk.bf16.mxu0 %vm14652_vm3, %v14676_v1  ;;  %vm14936_vm4 = vmmov %vm14919_vm1 }
 0x604   : > { %9914 = vmatpush3.bf16.msra.mxu1 %v10405_v0 }
 0x605   : > { %10023 = vmatprep.subr.bf16.mxu1 %v14676_v1 }
 0x607   : > { %9808 = vmatmul.mubr.msk.bf16.gmra.mxu1 %vm14922_vm2, %v13308_v20  ;;  %v6050_v20 = vsel %vm14926_vm13, %v6047_v63, %v6049_v55  ;;  %vm14935_vm2 = vmmov %vm14919_vm1 }
 0x608   : > { %9811 = vmatprep.mubr.msk.bf16.mxu1 %vm14652_vm3, %v14676_v1  ;;  %vm14939_vm13 = vmmov %vm14919_vm1 }
 0x60a   : > { %9872 = vmatmul.mubr.msk.bf16.gmra.mxu0 %vm14924_vm8, %v6048_v57  ;;  %vm14937_vm8 = vmmov %vm14934_vm5 }
 0x60b   : > { %9875 = vmatprep.mubr.msk.bf16.mxu0 %vm14652_vm3, %v14676_v1 }
 0x60f   : > { %9812 = vmatmul.mubr.msk.bf16.gmra.mxu1 %vm14925_vm14, %v13311_v15  ;;  %v6052_v15 = vsel %vm14929_vm11, %v6049_v55, %v6051_v32  ;;  %vm14938_vm14 = vmmov %vm14919_vm1 }
 0x610   : > { %9815 = vmatprep.mubr.msk.bf16.mxu1 %vm14652_vm3, %v14676_v1  ;;  %vm14942_vm11 = vmmov %vm14919_vm1 }
 0x612   : > { %9876 = vmatmul.mubr.msk.bf16.gmra.mxu0 %vm14927_vm10, %v6050_v20  ;;  %vm14940_vm10 = vmmov %vm14934_vm5 }
 0x613   : > { %9879 = vmatprep.mubr.msk.bf16.mxu0 %vm14652_vm3, %v14676_v1 }
 0x617   : > { %9816 = vmatmul.mubr.msk.bf16.gmra.mxu1 %vm14928_vm9, %v13329_v5  ;;  %v6054_v5 = vsel %vm14932_vm12, %v6051_v32, %v6053_v60  ;;  %vm14941_vm9 = vmmov %vm14919_vm1 }
 0x618   : > { %9819 = vmatprep.mubr.msk.bf16.mxu1 %vm14652_vm3, %v14676_v1  ;;  %vm14945_vm12 = vmmov %vm14919_vm1 }
 0x61a   : > { %9880 = vmatmul.mubr.msk.bf16.gmra.mxu0 %vm14930_vm15, %v6052_v15  ;;  %vm14943_vm15 = vmmov %vm14934_vm5 }
 0x61b   : > { %9883 = vmatprep.mubr.msk.bf16.mxu0 %vm14652_vm3, %v14676_v1 }
 0x61f   : > { %9820 = vmatmul.mubr.msk.bf16.gmra.mxu1 %vm14931_vm6, %v13334_v41  ;;  %v6056_v41 = vsel %vm14934_vm5, %v6053_v60, %v6055_v26  ;;  %vm14944_vm6 = vmmov %vm14919_vm1 }
 0x620   : > { %9823 = vmatprep.mubr.msk.bf16.mxu1 %vm14652_vm3, %v14676_v1 }
 0x622   : > { %9884 = vmatmul.mubr.msk.bf16.gmra.mxu0 %vm14919_vm1, %v6054_v5  ;;  %vm14946_vm1 = vmmov %vm14934_vm5  ;;  %v10415_v5 = vld [vmem:[%s14581_s11 + $0x78] sm:$0xff]  }
 0x623   : > { %9887 = vmatprep.mubr.msk.bf16.mxu0 %vm14652_vm3, %v14676_v1  ;;  %vm14948_vm5 = vmmov %vm14935_vm2 }
 0x627   : > { %9824 = vmatmul.mubr.msk.bf16.gmra.mxu1 %vm14933_vm7, %v13480_v37  ;;  %v6058_v37 = vsel %vm14937_vm8, %v6055_v26, %v6057_v56  ;;  %vm14947_vm7 = vmmov %vm14935_vm2 }
 0x628   : > { %9827 = vmatprep.mubr.msk.bf16.mxu1 %vm14652_vm3, %v14676_v1  ;;  %vm14950_vm8 = vmmov %vm14935_vm2 }
 0x62a   : > { %9888 = vmatmul.mubr.msk.bf16.gmra.mxu0 %vm14935_vm2, %v6056_v41 }
 0x62b   : > { %9891 = vmatprep.mubr.msk.bf16.mxu0 %vm14652_vm3, %v14676_v1 }
 0x62f   : > { %9828 = vmatmul.mubr.msk.bf16.gmra.mxu1 %vm14936_vm4, %v13499_v52  ;;  %v6060_v52 = vsel %vm14940_vm10, %v6057_v56, %v6059_v58  ;;  %vm14949_vm4 = vmmov %vm14935_vm2 }
 0x630   : > { %9831 = vmatprep.mubr.msk.bf16.mxu1 %vm14652_vm3, %v14676_v1  ;;  %vm14954_vm10 = vmmov %vm14935_vm2 }
 0x632   : > { %9892 = vmatmul.mubr.msk.bf16.gmra.mxu0 %vm14938_vm14, %v6058_v37  ;;  %vm14952_vm14 = vmmov %vm14935_vm2 }
 0x633   : > { %9895 = vmatprep.mubr.msk.bf16.mxu0 %vm14652_vm3, %v14676_v1 }
 0x637   : > { %9832 = vmatmul.mubr.msk.bf16.gmra.mxu1 %vm14939_vm13, %v13505_v10  ;;  %v6062_v10 = vsel %vm14943_vm15, %v6059_v58, %v6061_v40  ;;  %vm14953_vm13 = vmmov %vm14935_vm2 }
 0x638   : > { %9835 = vmatprep.mubr.msk.bf16.mxu1 %vm14652_vm3, %v14676_v1  ;;  %vm14957_vm15 = vmmov %vm14935_vm2 }
 0x63a   : > { %9896 = vmatmul.mubr.msk.bf16.gmra.mxu0 %vm14941_vm9, %v6060_v52  ;;  %vm14955_vm9 = vmmov %vm14935_vm2 }
 0x63b   : > { %9899 = vmatprep.mubr.msk.bf16.mxu0 %vm14652_vm3, %v14676_v1 }
 0x63f   : > { %9836 = vmatmul.mubr.msk.bf16.gmra.mxu1 %vm14942_vm11, %v13531_v24  ;;  %v6064_v24 = vsel %vm14946_vm1, %v6061_v40, %v6063_v45  ;;  %vm14956_vm11 = vmmov %vm14935_vm2 }
 0x640   : > { %9839 = vmatprep.mubr.msk.bf16.mxu1 %vm14652_vm3, %v14676_v1  ;;  %vm14960_vm1 = vmmov %vm14935_vm2 }
 0x642   : > { %9900 = vmatmul.mubr.msk.bf16.gmra.mxu0 %vm14944_vm6, %v6062_v10  ;;  %vm14958_vm6 = vmmov %vm14935_vm2 }
 0x643   : > { %9903 = vmatprep.mubr.msk.bf16.mxu0 %vm14652_vm3, %v14676_v1 }
 0x646   : > { %v5608_v53 = vpop.f32.mrf.mxu0 }
 0x647   : > { %9840 = vmatmul.mubr.msk.bf16.gmra.mxu1 %vm14945_vm12, %v13534_v21  ;;  %vm14959_vm12 = vmmov %vm14935_vm2 }
 0x648   : > { %v9749_v14 = vpop.f32.mrf.mxu0  ;;  %9843 = vmatprep.mubr.msk.bf16.mxu1 %vm14652_vm3, %v14676_v1 }
 0x64a   : > { %v5611_v7 = vpop.f32.mrf.mxu0  ;;  %9904 = vmatmul.mubr.msk.bf16.gmra.mxu0 %vm14947_vm7, %v6064_v24  ;;  %vm14961_vm7 = vmmov %vm14960_vm1 }
 0x64b   : > { %9907 = vmatprep.mubr.msk.bf16.mxu0 %vm14652_vm3, %v14676_v1 }
 0x64c   : > { %v9750_v12 = vpop.f32.mrf.mxu0 }
 0x64d   : > { %v10413_v12 = vld [vmem:[%s14581_s11 + $0x68] sm:$0xff]  }
 0x64e   : > { %v5616_v0 = vpop.f32.mrf.mxu0 }
 0x64f   : > { %9844 = vmatmul.mubr.msk.bf16.gmra.mxu1 %vm14948_vm5, %v13540_v16  ;;  %vm14962_vm5 = vmmov %vm14960_vm1 }
 0x650   : > { %v9753_v62 = vpop.f32.mrf.mxu0  ;;  %9847 = vmatprep.mubr.msk.bf16.mxu1 %vm14652_vm3, %v14676_v1 }
 0x651   : > { %v5436_v63 = vpop.f32.mrf.mxu1 }
 0x652   : > { %v5619_v21 = vpop.f32.mrf.mxu0  ;;  %9908 = vmatmul.mubr.msk.bf16.gmra.mxu0 %vm14935_vm2, %v6063_v45  ;;  %v13870_v57 = vadd.f32 %v5608_v53, %v5436_v63  ;;  %vm14964_vm2 = vmmov %vm14960_vm1 }
 0x653   : > { %9971 = vmatprep.mubr.msk.bf16.mxu0 %vm14652_vm3, %v14676_v1  ;;  %v9693_v20 = vpop.f32.mrf.mxu1 }
 0x654   : > { %v9754_v55 = vpop.f32.mrf.mxu0 }
 0x655   : > { %v5439_v15 = vpop.f32.mrf.mxu1  ;;  %v10414_v55 = vld [vmem:[%s14581_s11 + $0x60] sm:$0xff]  }
 0x656   : > { %v5624_v32 = vpop.f32.mrf.mxu0  ;;  %v13874_v60 = vadd.f32 %v5611_v7, %v5439_v15 }
 0x657   : > { %9848 = vmatmul.mubr.msk.bf16.gmra.mxu1 %vm14949_vm4, %v13488_v39  ;;  %v9694_v26 = vpop.f32.mrf.mxu1  ;;  %v10416_v39 = vld [vmem:[%s14581_s11 + $0x70] sm:$0xff]   ;;  %vm14966_vm4 = vmmov %vm14960_vm1 }
 0x658   : > { %v9757_v16 = vpop.f32.mrf.mxu0  ;;  %9851 = vmatprep.mubr.msk.bf16.mxu1 %vm14652_vm3, %v14676_v1 }
 0x659   : > { %v5444_v56 = vpop.f32.mrf.mxu1 }
 0x65a   : > { %v5627_v41 = vpop.f32.mrf.mxu0  ;;  %9972 = vmatmul.mubr.msk.bf16.vlgmr.msra.gmra.mxu0 %vm14950_vm8, %v13361_v54  ;;  %v13885_v37 = vadd.f32 %v5616_v0, %v5444_v56  ;;  %v14951_v54 = vrot.slane %v13440_v22, 1  ;;  %vm14968_vm8 = vmmov %vm14960_vm1 }
 0x65b   : > { %9975 = vmatprep.mubr.msk.bf16.mxu0 %vm14652_vm3, %v14676_v1  ;;  %10080 = vmatpush3.bf16.msra.mxu0 %v10415_v5  ;;  %v9697_v52 = vpop.f32.mrf.mxu1 }
 0x65c   : > { %v9758_v58 = vpop.f32.mrf.mxu0  ;;  %10081 = vmatprep.subr.bf16.mxu0 %v14676_v1 }
 0x65d   : > { %v5447_v4 = vpop.f32.mrf.mxu1 }
 0x65e   : > { %v5632_v40 = vpop.f32.mrf.mxu0  ;;  %v13893_v10 = vadd.f32 %v5619_v21, %v5447_v4 }
 0x65f   : > { %9852 = vmatmul.mubr.msk.bf16.gmra.mxu1 %vm14952_vm14, %v14951_v54  ;;  %10082 = vmatpush3.bf16.msra.mxu0 %v10416_v39  ;;  %v9698_v53 = vpop.f32.mrf.mxu1  ;;  %vm14969_vm14 = vmmov %vm14960_vm1 }
 0x660   : > { %v9761_v29 = vpop.f32.mrf.mxu0  ;;  %9915 = vmatprep.mubr.msk.bf16.mxu1 %vm14652_vm3, %v14676_v1 }
 0x661   : > { %v5452_v14 = vpop.f32.mrf.mxu1 }
 0x662   : > { %v5635_v45 = vpop.f32.mrf.mxu0  ;;  %9976 = vmatmul.mubr.msk.bf16.gmra.mxu0 %vm14953_vm13, %v13354_v35  ;;  %v13902_v24 = vadd.f32 %v5624_v32, %v5452_v14  ;;  %vm14971_vm13 = vmmov %vm14960_vm1 }
 0x663   : > { %9979 = vmatprep.mubr.msk.bf16.mxu0 %vm14652_vm3, %v14676_v1  ;;  %v9701_v22 = vpop.f32.mrf.mxu1 }
 0x664   : > { %v9762_v7 = vpop.f32.mrf.mxu0 }
 0x665   : > { %v5455_v62 = vpop.f32.mrf.mxu1 }
 0x666   : > { %v5640_v0 = vpop.f32.mrf.mxu0  ;;  %v13909_v21 = vadd.f32 %v5627_v41, %v5455_v62 }
 0x667   : > { %9916 = vmatmul.mubr.msk.bf16.vlgmr.msra.gmra.mxu1 %vm14954_vm10, %v13379_v44  ;;  %v9702_v35 = vpop.f32.mrf.mxu1  ;;  %vm14972_vm10 = vmmov %vm14960_vm1 }
 0x668   : > { %v9765_v63 = vpop.f32.mrf.mxu0  ;;  %10024 = vmatpush3.bf16.msra.mxu1 %v10413_v12  ;;  %9919 = vmatprep.mubr.msk.bf16.mxu1 %vm14652_vm3, %v14676_v1 }
 0x669   : > { %10025 = vmatprep.subr.bf16.mxu1 %v14676_v1  ;;  %v5460_v32 = vpop.f32.mrf.mxu1 }
 0x66a   : > { %v5643_v20 = vpop.f32.mrf.mxu0  ;;  %9980 = vmatmul.mubr.msk.bf16.gmra.mxu0 %vm14955_vm9, %v13372_v43  ;;  %v13921_v15 = vadd.f32 %v5632_v40, %v5460_v32  ;;  %vm14974_vm9 = vmmov %vm14960_vm1 }
 0x66b   : > { %9983 = vmatprep.mubr.msk.bf16.mxu0 %vm14652_vm3, %v14676_v1  ;;  %v9705_v16 = vpop.f32.mrf.mxu1 }
 0x66c   : > { %v9766_v44 = vpop.f32.mrf.mxu0  ;;  %10026 = vmatpush3.bf16.msra.mxu1 %v10414_v55 }
 0x66d   : > { %10135 = vmatprep.subr.bf16.mxu1 %v14676_v1  ;;  %v5463_v26 = vpop.f32.mrf.mxu1 }
 0x66e   : > { %v5648_v5 = vpop.f32.mrf.mxu0  ;;  %v13926_v41 = vadd.f32 %v5635_v45, %v5463_v26 }
 0x66f   : > { %9920 = vmatmul.mubr.msk.bf16.gmra.mxu1 %vm14956_vm11, %v13396_v34  ;;  %v9706_v58 = vpop.f32.mrf.mxu1  ;;  %vm14975_vm11 = vmmov %vm14960_vm1 }
 0x670   : > { %v9769_v56 = vpop.f32.mrf.mxu0  ;;  %9923 = vmatprep.mubr.msk.bf16.mxu1 %vm14652_vm3, %v14676_v1 }
 0x671   : > { %v5468_v39 = vpop.f32.mrf.mxu1  ;;  %v14965_v56 = vld [vmem:[#allocation24_spill] sm:$0xff] }
 0x672   : > { %v5650_v43 = vpop.f32.mrf.mxu0  ;;  %9984 = vmatmul.mubr.msk.bf16.gmra.mxu0 %vm14957_vm15, %v13386_v23  ;;  %v13934_v52 = vadd.f32 %v5640_v0, %v5468_v39  ;;  %vm14977_vm15 = vmmov %vm14960_vm1 }
 0x673   : > { %9987 = vmatprep.mubr.msk.bf16.mxu0 %vm14652_vm3, %v14676_v1  ;;  %v9709_v4 = vpop.f32.mrf.mxu1 }
 0x674   : > { %v9770_v40 = vpop.f32.mrf.mxu0 }
 0x675   : > { %v5471_v54 = vpop.f32.mrf.mxu1  ;;  %v13977_v40 = vld [vmem:[%s14582_s12 + $0x18] sm:$0xff]  }
 0x676   : > { %v13938_v29 = vadd.f32 %v5643_v20, %v5471_v54  ;;  %v14967_v54 = vld [vmem:[#allocation23_spill] sm:$0xff]  ;;  %10191 = vmatprep.subr.bf16.mxu0 %v13977_v40 }
 0x677   : > { %9924 = vmatmul.mubr.msk.bf16.gmra.mxu1 %vm14958_vm6, %v13456_v49  ;;  %v9710_v34 = vpop.f32.mrf.mxu1  ;;  %vm14978_vm6 = vmmov %vm14960_vm1 }
 0x678   : > { %9927 = vmatprep.mubr.msk.bf16.mxu1 %vm14652_vm3, %v14676_v1 }
 0x67a   : > { %v5654_v53 = vpop.f32.mrf.mxu0  ;;  %9988 = vmatmul.mubr.msk.bf16.gmra.mxu0 %vm14959_vm12, %v13475_v11  ;;  %vm14981_vm12 = vmmov %vm14960_vm1 }
 0x67b   : > { %9991 = vmatprep.mubr.msk.bf16.mxu0 %vm14652_vm3, %v14676_v1 }
 0x67c   : > { %v9773_v23 = vpop.f32.mrf.mxu0 }
 0x67e   : > { %v5657_v45 = vpop.f32.mrf.mxu0 }
 0x67f   : > { %v5476_v14 = vpop.f32.mrf.mxu1  ;;  %9928 = vmatmul.mubr.msk.bf16.gmra.mxu1 %vm14960_vm1, %v13552_v33 }
 0x680   : > { %v9774_v7 = vpop.f32.mrf.mxu0  ;;  %9931 = vmatprep.mubr.msk.bf16.mxu1 %vm14652_vm3, %v14676_v1 }
 0x681   : > { %v9713_v49 = vpop.f32.mrf.mxu1 }
 0x682   : > { %v5662_v22 = vpop.f32.mrf.mxu0  ;;  %9992 = vmatmul.mubr.msk.bf16.gmra.mxu0 %vm14961_vm7, %v13557_v25  ;;  %v14963_v25 = vld [vmem:[#allocation22_spill] sm:$0xff]  ;;  %vm14986_vm7 = vmmov %vm14960_vm1 }
 0x683   : > { %v5478_v12 = vpop.f32.mrf.mxu1  ;;  %9995 = vmatprep.mubr.msk.bf16.mxu0 %vm14652_vm3, %v14676_v1 }
 0x684   : > { %v9777_v11 = vpop.f32.mrf.mxu0 }
 0x685   : > { %v9714_v0 = vpop.f32.mrf.mxu1 }
 0x686   : > { %v5665_v62 = vpop.f32.mrf.mxu0  ;;  %v14970_v0 = vld [vmem:[#allocation28_spill] sm:$0xff] }
 0x687   : > { %v5482_v63 = vpop.f32.mrf.mxu1  ;;  %9932 = vmatmul.mubr.msk.bf16.gmra.mxu1 %vm14962_vm5, %v13583_v28  ;;  %vm14989_vm5 = vmmov %vm14960_vm1 }
 0x688   : > { %v13958_v33 = vadd.f32 %v5654_v53, %v5482_v63  ;;  %v9778_v35 = vpop.f32.mrf.mxu0  ;;  %9935 = vmatprep.mubr.msk.bf16.mxu1 %vm14652_vm3, %v14676_v1 }
 0x689   : > { %v9717_v55 = vpop.f32.mrf.mxu1 }
 0x68a   : > { %v5670_v20 = vpop.f32.mrf.mxu0  ;;  %9996 = vmatmul.mubr.msk.bf16.gmra.mxu0 %vm14964_vm2, %v14963_v25  ;;  %vm14990_vm2 = vsmask.f32 5376 }
 0x68b   : > { %v5485_v32 = vpop.f32.mrf.mxu1  ;;  %9999 = vmatprep.mubr.msk.bf16.mxu0 %vm14652_vm3, %v14676_v1 }
 0x68c   : > { %v13966_v44 = vadd.f32 %v5657_v45, %v5485_v32  ;;  %v9781_v16 = vpop.f32.mrf.mxu0 }
 0x68d   : > { %v9718_v5 = vpop.f32.mrf.mxu1 }
 0x68e   : > { %v5673_v28 = vpop.f32.mrf.mxu0 }
 0x68f   : > { %v5490_v26 = vpop.f32.mrf.mxu1  ;;  %9936 = vmatmul.mubr.msk.bf16.gmra.mxu1 %vm14966_vm4, %v14965_v56  ;;  %vm14991_vm4 = vmmov %vm14960_vm1 }
 0x690   : > { %v13970_v58 = vadd.f32 %v5662_v22, %v5490_v26  ;;  %v9782_v43 = vpop.f32.mrf.mxu0  ;;  %9939 = vmatprep.mubr.msk.bf16.mxu1 %vm14652_vm3, %v14676_v1  ;;  %v14973_v26 = vld [vmem:[#allocation29_spill] sm:$0xff] }
 0x691   : > { %v9721_v39 = vpop.f32.mrf.mxu1 }
 0x692   : > { %v5678_v4 = vpop.f32.mrf.mxu0  ;;  %10000 = vmatmul.mubr.msk.bf16.gmra.mxu0 %vm14968_vm8, %v14967_v54  ;;  %vm14994_vm8 = vmmov %vm14960_vm1 }
 0x693   : > { %v5493_v34 = vpop.f32.mrf.mxu1  ;;  %10003 = vmatprep.mubr.msk.bf16.mxu0 %vm14652_vm3, %v14676_v1 }
 0x694   : > { %v13984_v53 = vadd.f32 %v5665_v62, %v5493_v34  ;;  %v9785_v23 = vpop.f32.mrf.mxu0 }
 0x695   : > { %v9722_v45 = vpop.f32.mrf.mxu1 }
 0x696   : > { %v5681_v14 = vpop.f32.mrf.mxu0 }
 0x697   : > { %v5498_v7 = vpop.f32.mrf.mxu1  ;;  %9940 = vmatmul.mubr.msk.bf16.gmra.mxu1 %vm14969_vm14, %v13602_v2  ;;  %vm14995_vm14 = vmmov %vm14990_vm2 }
 0x698   : > { %v13988_v49 = vadd.f32 %v5670_v20, %v5498_v7  ;;  %v9786_v22 = vpop.f32.mrf.mxu0  ;;  %9943 = vmatprep.mubr.msk.bf16.mxu1 %vm14652_vm3, %v14676_v1  ;;  %v14976_v7 = vld [vmem:[#allocation25_spill] sm:$0xff] }
 0x699   : > { %v9725_v12 = vpop.f32.mrf.mxu1 }
 0x69a   : > { %v5686_v11 = vpop.f32.mrf.mxu0  ;;  %10004 = vmatmul.mubr.msk.bf16.gmra.mxu0 %vm14971_vm13, %v14970_v0  ;;  %vm14996_vm13 = vmmov %vm14960_vm1 }
 0x69b   : > { %v5501_v62 = vpop.f32.mrf.mxu1  ;;  %10007 = vmatprep.mubr.msk.bf16.mxu0 %vm14652_vm3, %v14676_v1 }
 0x69c   : > { %v13996_v63 = vadd.f32 %v5673_v28, %v5501_v62  ;;  %v9789_v35 = vpop.f32.mrf.mxu0 }
 0x69d   : > { %v9726_v55 = vpop.f32.mrf.mxu1 }
 0x69e   : > { %v5689_v2 = vpop.f32.mrf.mxu0  ;;  %v6836_v55 = vld [vmem:[#allocation3 + $0x8] sm:$0xc] }
 0x69f   : > { %v5506_v20 = vpop.f32.mrf.mxu1  ;;  %9944 = vmatmul.mubr.msk.bf16.gmra.mxu1 %vm14972_vm10, %v13611_v47  ;;  %vm14997_vm10 = vmmov %vm14960_vm1 }
 0x6a0   : > { %v14000_v25 = vadd.f32 %v5678_v4, %v5506_v20  ;;  %v9790_v32 = vpop.f32.mrf.mxu0  ;;  %9947 = vmatprep.mubr.msk.bf16.mxu1 %vm14652_vm3, %v14676_v1 }
 0x6a1   : > { %v9729_v16 = vpop.f32.mrf.mxu1  ;;  %v14979_v32 = vld [vmem:[#allocation31_spill] sm:$0xff] }
 0x6a2   : > { %v5694_v5 = vpop.f32.mrf.mxu0  ;;  %10008 = vmatmul.mubr.msk.bf16.gmra.mxu0 %vm14974_vm9, %v14973_v26  ;;  %v14029_v16 = vcombine.low %v6836_v55, %v14979_v32  ;;  %v14980_v26 = vld [vmem:[#allocation30_spill] sm:$0xff]  ;;  %vm14998_vm9 = vmmov %vm14990_vm2 }
 0x6a3   : > { %v5509_v28 = vpop.f32.mrf.mxu1  ;;  %10011 = vmatprep.mubr.msk.bf16.mxu0 %vm14652_vm3, %v14676_v1 }
 0x6a4   : > { %v14008_v56 = vadd.f32 %v5681_v14, %v5509_v28  ;;  %v9793_v43 = vpop.f32.mrf.mxu0 }
 0x6a5   : > { %v9730_v39 = vpop.f32.mrf.mxu1  ;;  %v7171_v43 = vshrl.u32 %v14029_v16, 16 }
 0x6a6   : > { %v5697_v47 = vpop.f32.mrf.mxu0  ;;  %v7174_v39 = vshll.u32 %v14029_v16, 16 }
 0x6a7   : > { %v5514_v4 = vpop.f32.mrf.mxu1  ;;  %9948 = vmatmul.mubr.msk.bf16.gmra.mxu1 %vm14975_vm11, %v13630_v9  ;;  %v14982_v47 = vld [vmem:[#allocation20_spill] sm:$0xff]  ;;  %vm14999_vm11 = vmmov %vm14960_vm1 }
 0x6a8   : > { %v14012_v54 = vadd.f32 %v5686_v11, %v5514_v4  ;;  %v9794_v34 = vpop.f32.mrf.mxu0  ;;  %9951 = vmatprep.mubr.msk.bf16.mxu1 %vm14652_vm3, %v14676_v1  ;;  %v7179_v4 = vshrl.u32 %v14982_v47, 16 }
 0x6a9   : > { %v9733_v23 = vpop.f32.mrf.mxu1  ;;  %v7182_v34 = vshll.u32 %v14982_v47, 16 }
 0x6aa   : > { %v5701_v45 = vpop.f32.mrf.mxu0  ;;  %10012 = vmatmul.mubr.msk.bf16.gmra.mxu0 %vm14977_vm15, %v14976_v7  ;;  %v14983_v7 = vld [vmem:[#allocation26_spill] sm:$0xff]  ;;  %vm15000_vm15 = vmmov %vm14960_vm1 }
 0x6ab   : > { %v5517_v14 = vpop.f32.mrf.mxu1  ;;  %10015 = vmatprep.mubr.msk.bf16.mxu0 %vm14652_vm3, %v14676_v1 }
 0x6ac   : > { %v14020_v22 = vadd.f32 %v5689_v2, %v5517_v14  ;;  %v9797_v12 = vpop.f32.mrf.mxu0 }
 0x6ad   : > { %v9734_v0 = vpop.f32.mrf.mxu1 }
 0x6ae   : > { %v5703_v9 = vpop.f32.mrf.mxu0  ;;  %v7173_v0 = vrot.slane %v7171_v43, 2 }
 0x6af   : > { %v5522_v11 = vpop.f32.mrf.mxu1  ;;  %9952 = vmatmul.mubr.msk.bf16.gmra.mxu1 %vm14978_vm6, %v13635_v51  ;;  %v7176_v9 = vrot.slane %v7174_v39, 3  ;;  %vm15001_vm6 = vmmov %vm14990_vm2 }
 0x6b0   : > { %v14024_v62 = vadd.f32 %v5694_v5, %v5522_v11  ;;  %v9798_v35 = vpop.f32.mrf.mxu0  ;;  %9955 = vmatprep.mubr.msk.bf16.mxu1 %vm14652_vm3, %v14676_v1  ;;  %v7181_v11 = vrot.slane %v7179_v4, 2 }
 0x6b1   : > { %v9737_v20 = vpop.f32.mrf.mxu1  ;;  %v7184_v35 = vrot.slane %v7182_v34, 3  ;;  %v14988_v34 = vld [vmem:[#allocation33_spill] sm:$0xff] }
 0x6b2   : > { %v6150_v2 = vpop.f32.mrf.mxu0  ;;  %10016 = vmatmul.mubr.msk.bf16.gmra.mxu0 %vm14981_vm12, %v14980_v26  ;;  %v14984_v20 = vld [vmem:[#allocation21_spill] sm:$0xff]  ;;  %vm15002_vm12 = vmmov %vm14960_vm1 }
 0x6b3   : > { %v5525_v28 = vpop.f32.mrf.mxu1  ;;  %10019 = vmatprep.mubr.msk.bf16.mxu0 %vm14652_vm3, %v14676_v1  ;;  %v14985_v32 = vrot.slane %v14984_v20, 2 }
 0x6b4   : > { %v9861_v51 = vpop.f32.mrf.mxu0 }
 0x6b5   : > { %v9738_v5 = vpop.f32.mrf.mxu1 }
 0x6b6   : > { %v6153_v23 = vpop.f32.mrf.mxu0  ;;  %v7177_v5 = vor.u32 %v7176_v9, %v7173_v0  ;;  %v10434_v0 = vld [vmem:[%s14582_s12 + $0x10] sm:$0xff]  }
 0x6b7   : > { %v5529_v45 = vpop.f32.mrf.mxu1  ;;  %9956 = vmatmul.mubr.msk.bf16.gmra.mxu1 %vm14960_vm1, %v14983_v7  ;;  %v14987_v7 = vld [vmem:[#allocation27_spill] sm:$0xff] }
 0x6b8   : > { %v9862_v14 = vpop.f32.mrf.mxu0  ;;  %9959 = vmatprep.mubr.msk.bf16.mxu1 %vm14652_vm3, %v14676_v1  ;;  %v7185_v45 = vor.u32 %v7184_v35, %v7181_v11  ;;  %v7191_v43 = vshll.u32 %v14987_v7, 16 }
 0x6b9   : > { %v9741_v12 = vpop.f32.mrf.mxu1  ;;  %v7188_v14 = vshrl.u32 %v14987_v7, 16 }
 0x6ba   : > { %v6158_v55 = vpop.f32.mrf.mxu0  ;;  %10020 = vmatmul.mubr.msk.bf16.gmra.mxu0 %vm14986_vm7, %v14985_v32  ;;  %v7186_v11 = vsel %vm14990_vm2, %v7177_v5, %v7185_v45  ;;  %v7193_v32 = vrot.slane %v7191_v43, 3  ;;  %v10435_v5 = vld [vmem:[%s14582_s12 + $0x8] sm:$0xff]   ;;  %vm15004_vm7 = vmmov %vm14990_vm2 }
 0x6bb   : > { %v5531_v26 = vpop.f32.mrf.mxu1  ;;  %10083 = vmatprep.mubr.msk.bf16.mxu0 %vm14652_vm3, %v14676_v1  ;;  %v7190_v35 = vrot.slane %v7188_v14, 2  ;;  %vm15006_vm2 = vmmov %vm14960_vm1 }
 0x6bc   : > { %v9865_v28 = vpop.f32.mrf.mxu0 }
 0x6bd   : > { %v9742_v51 = vpop.f32.mrf.mxu1  ;;  %v7194_v43 = vor.u32 %v7193_v32, %v7190_v35  ;;  %v10436_v35 = vld [vmem:[%s14582_s12] sm:$0xff]  }
 0x6be   : > { %v6161_v39 = vpop.f32.mrf.mxu0 }
 0x6bf   : > { %v5825_v4 = vpop.f32.mrf.mxu1  ;;  %9960 = vmatmul.mubr.msk.bf16.gmra.mxu1 %vm14989_vm5, %v14988_v34  ;;  %v14992_v34 = vld [vmem:[#allocation34_spill] sm:$0xff]  ;;  %vm15005_vm5 = vmmov %vm14960_vm1 }
 0x6c0   : > { %v5923_v12 = vadd.f32 %v5825_v4, %v13870_v57  ;;  %v9866_v20 = vpop.f32.mrf.mxu0  ;;  %9963 = vmatprep.mubr.msk.bf16.mxu1 %vm14652_vm3, %v14676_v1 }
 0x6c1   : > { %v9805_v9 = vpop.f32.mrf.mxu1  ;;  %v7197_v20 = vshrl.u32 %v14992_v34, 16 }
 0x6c2   : > { %v6166_v26 = vpop.f32.mrf.mxu0  ;;  %10084 = vmatmul.mubr.msk.bf16.vlgmr.msra.gmra.mxu0 %vm14991_vm4, %v7186_v11  ;;  %v14060_v28 = vadd.f32 %v6150_v2, %v5923_v12  ;;  %v7200_v2 = vshll.u32 %v14992_v34, 16  ;;  %vm15007_vm4 = vmmov %vm15001_vm6 }
 0x6c3   : > { %v5828_v51 = vpop.f32.mrf.mxu1  ;;  %10087 = vmatprep.mubr.msk.bf16.mxu0 %vm14652_vm3, %v14676_v1  ;;  %10192 = vmatpush3.bf16.msra.mxu0 %v13977_v40 }
 0x6c4   : > { %v5924_v57 = vadd.f32 %v5828_v51, %v13874_v60  ;;  %v9869_v4 = vpop.f32.mrf.mxu0  ;;  %10193 = vmatprep.subr.bf16.mxu0 %v10434_v0  ;;  %v7199_v51 = vrot.slane %v7197_v20, 2 }
 0x6c5   : > { %v9806_v14 = vpop.f32.mrf.mxu1 }
 0x6c6   : > { %v6169_v12 = vpop.f32.mrf.mxu0  ;;  %v14071_v9 = vadd.f32 %v6153_v23, %v5924_v57  ;;  %v7195_v23 = vsel %vm14995_vm14, %v7185_v45, %v7194_v43  ;;  %v7202_v57 = vrot.slane %v7200_v2, 3  ;;  %v10420_v45 = vld [vmem:[%s14581_s11 + $0x88] sm:$0xff]   ;;  %vm15009_vm14 = vmmov %vm14960_vm1 }
 0x6c7   : > { %v5833_v11 = vpop.f32.mrf.mxu1  ;;  %9964 = vmatmul.mubr.msk.bf16.gmra.mxu1 %vm14994_vm8, %v14993_v61  ;;  %10194 = vmatpush3.bf16.msra.mxu0 %v10434_v0  ;;  %v6932_v61 = vrot.slane %v14029_v16, 2  ;;  %vm15008_vm8 = vmmov %vm14960_vm1 }
 0x6c8   : > { %v5925_v60 = vadd.f32 %v5833_v11, %v13885_v37  ;;  %v9870_v40 = vpop.f32.mrf.mxu0  ;;  %10027 = vmatprep.mubr.msk.bf16.mxu1 %vm14652_vm3, %v14676_v1  ;;  %10195 = vmatprep.subr.bf16.mxu0 %v10435_v5  ;;  %v6933_v37 = vrot.slane %v14982_v47, 2  ;;  %v7203_v2 = vor.u32 %v7202_v57, %v7199_v51 }
 0x6c9   : > { %v9809_v32 = vpop.f32.mrf.mxu1 }
 0x6ca   : > { %v6174_v4 = vpop.f32.mrf.mxu0  ;;  %10088 = vmatmul.mubr.msk.bf16.gmra.mxu0 %vm14996_vm13, %v7195_v23  ;;  %v14085_v0 = vadd.f32 %v6158_v55, %v5925_v60  ;;  %v6934_v47 = vsel %vm3210_vm0, %v6932_v61, %v6933_v37  ;;  %v7204_v57 = vsel %vm14998_vm9, %v7194_v43, %v7203_v2  ;;  %vm15010_vm13 = vmmov %vm15007_vm4 }
 0x6cb   : > { %v5836_v14 = vpop.f32.mrf.mxu1  ;;  %10091 = vmatprep.mubr.msk.bf16.mxu0 %vm14652_vm3, %v14676_v1  ;;  %10196 = vmatpush3.bf16.msra.mxu0 %v10435_v5  ;;  %v7206_v5 = vshrl.u32 %v13688_v6, 16  ;;  %vm15012_vm9 = vmmov %vm14960_vm1 }
 0x6cc   : > { %v5926_v11 = vadd.f32 %v5836_v14, %v13893_v10  ;;  %v9873_v40 = vpop.f32.mrf.mxu0  ;;  %10197 = vmatprep.subr.bf16.mxu0 %v10436_v35  ;;  %v7209_v10 = vshll.u32 %v13688_v6, 16 }
 0x6cd   : > { %v9810_v20 = vpop.f32.mrf.mxu1 }
 0x6ce   : > { %v6177_v16 = vpop.f32.mrf.mxu0  ;;  %v14094_v55 = vadd.f32 %v6161_v39, %v5926_v11  ;;  %v10428_v39 = vld [vmem:[%s14581_s11 + $0x80] sm:$0xff]   ;;  %v7208_v11 = vrot.slane %v7206_v5, 2  ;;  %v7211_v40 = vrot.slane %v7209_v10, 3 }
 0x6cf   : > { %v5841_v60 = vpop.f32.mrf.mxu1  ;;  %10028 = vmatmul.mubr.msk.bf16.vlgmr.msra.gmra.mxu1 %vm14997_vm10, %v6934_v47  ;;  %10198 = vmatpush3.bf16.msra.mxu0 %v10436_v35  ;;  %v6935_v35 = vrot.slane %v14987_v7, 2  ;;  %v7215_v47 = vshrl.u32 %v13690_v3, 16  ;;  %vm15011_vm10 = vmmov %vm14960_vm1 }
 0x6d0   : > { %v5927_v32 = vadd.f32 %v5841_v60, %v13902_v24  ;;  %10136 = vmatpush3.bf16.msra.mxu1 %v10420_v45  ;;  %v9874_v23 = vpop.f32.mrf.mxu0  ;;  %10031 = vmatprep.mubr.msk.bf16.mxu1 %vm14652_vm3, %v14676_v1  ;;  %v7218_v60 = vshll.u32 %v13690_v3, 16 }
 0x6d1   : > { %v9813_v51 = vpop.f32.mrf.mxu1  ;;  %10137 = vmatprep.subr.bf16.mxu1 %v14676_v1  ;;  %v6936_v7 = vsel %vm3210_vm0, %v6933_v37, %v6935_v35 }
 0x6d2   : > { %v6182_v61 = vpop.f32.mrf.mxu0  ;;  %10092 = vmatmul.mubr.msk.bf16.gmra.mxu0 %vm14999_vm11, %v7204_v57  ;;  %v14109_v24 = vadd.f32 %v6166_v26, %v5927_v32  ;;  %v7212_v51 = vor.u32 %v7211_v40, %v7208_v11  ;;  %v7217_v57 = vrot.slane %v7215_v47, 2  ;;  %vm15013_vm11 = vmmov %vm15007_vm4 }
 0x6d3   : > { %v5844_v14 = vpop.f32.mrf.mxu1  ;;  %10095 = vmatprep.mubr.msk.bf16.mxu0 %vm14652_vm3, %v14676_v1 }
 0x6d4   : > { %v5928_v45 = vadd.f32 %v5844_v14, %v13909_v21  ;;  %v9877_v20 = vpop.f32.mrf.mxu0  ;;  %10138 = vmatpush3.bf16.msra.mxu1 %v10428_v39  ;;  %v7213_v39 = vsel %vm15001_vm6, %v7203_v2, %v7212_v51  ;;  %v7220_v14 = vrot.slane %v7218_v60, 3  ;;  %vm15015_vm6 = vmmov %vm14960_vm1 }
 0x6d5   : > { %v9814_v43 = vpop.f32.mrf.mxu1 }
 0x6d6   : > { %v6185_v23 = vpop.f32.mrf.mxu0  ;;  %v14117_v26 = vadd.f32 %v6169_v12, %v5928_v45  ;;  %v6937_v12 = vrot.slane %v14992_v34, 2  ;;  %v7221_v43 = vor.u32 %v7220_v14, %v7217_v57 }
 0x6d7   : > { %v5849_v32 = vpop.f32.mrf.mxu1  ;;  %10032 = vmatmul.mubr.msk.bf16.gmra.mxu1 %vm15000_vm15, %v6936_v7  ;;  %v15003_v7 = vld [vmem:[#allocation35_spill] sm:$0xff]  ;;  %vm15014_vm15 = vmmov %vm14960_vm1 }
 0x6d8   : > { %v5929_v5 = vadd.f32 %v5849_v32, %v13921_v15  ;;  %v9878_v10 = vpop.f32.mrf.mxu0  ;;  %10035 = vmatprep.mubr.msk.bf16.mxu1 %vm14652_vm3, %v14676_v1  ;;  %v7224_v2 = vshrl.u32 %v15003_v7, 16  ;;  %v7227_v47 = vshll.u32 %v15003_v7, 16  ;;  %v6938_v32 = vsel %vm3210_vm0, %v6935_v35, %v6937_v12 }
 0x6d9   : > { %v9817_v21 = vpop.f32.mrf.mxu1 }
 0x6da   : > { %v6190_v20 = vpop.f32.mrf.mxu0  ;;  %10096 = vmatmul.mubr.msk.bf16.gmra.mxu0 %vm15002_vm12, %v7213_v39  ;;  %v14126_v37 = vadd.f32 %v6174_v4, %v5929_v5  ;;  %v7222_v21 = vsel %vm15004_vm7, %v7212_v51, %v7221_v43  ;;  %v7226_v39 = vrot.slane %v7224_v2, 2  ;;  %v7229_v57 = vrot.slane %v7227_v47, 3  ;;  %vm15016_vm12 = vmmov %vm15007_vm4 }
 0x6db   : > { %v5852_v45 = vpop.f32.mrf.mxu1  ;;  %10099 = vmatprep.mubr.msk.bf16.mxu0 %vm14652_vm3, %v14676_v1  ;;  %v7233_v51 = vshrl.u32 %v13695_v50, 16  ;;  %vm15017_vm7 = vmmov %vm14960_vm1 }
 0x6dc   : > { %v5930_v15 = vadd.f32 %v5852_v45, %v13926_v41  ;;  %v9881_v11 = vpop.f32.mrf.mxu0  ;;  %v6939_v45 = vrot.slane %v13688_v6, 2 }
 0x6dd   : > { %v9818_v40 = vpop.f32.mrf.mxu1  ;;  %v7230_v11 = vor.u32 %v7229_v57, %v7226_v39  ;;  %v7242_v57 = vshrl.u32 %v13698_v46, 16 }
 0x6de   : > { %v6192_v60 = vpop.f32.mrf.mxu0  ;;  %v14134_v10 = vadd.f32 %v6177_v16, %v5930_v15  ;;  %v7236_v40 = vshll.u32 %v13695_v50, 16  ;;  %v6940_v47 = vsel %vm3210_vm0, %v6937_v12, %v6939_v45 }
 0x6df   : > { %v5857_v34 = vpop.f32.mrf.mxu1  ;;  %10036 = vmatmul.mubr.msk.bf16.gmra.mxu1 %vm14960_vm1, %v6938_v32  ;;  %v7231_v6 = vsel %vm15007_vm4, %v7221_v43, %v7230_v11 }
 0x6e0   : > { %v5931_v4 = vadd.f32 %v5857_v34, %v13934_v52  ;;  %v9882_v5 = vpop.f32.mrf.mxu0  ;;  %10039 = vmatprep.mubr.msk.bf16.mxu1 %vm14652_vm3, %v14676_v1  ;;  %v7235_v34 = vrot.slane %v7233_v51, 2 }
 0x6e1   : > { %v9821_v41 = vpop.f32.mrf.mxu1 }
 0x6e2   : > { %v6196_v14 = vpop.f32.mrf.mxu0  ;;  %10100 = vmatmul.mubr.msk.bf16.gmra.mxu0 %vm15005_vm5, %v7222_v21  ;;  %v14142_v35 = vadd.f32 %v6182_v61, %v5931_v4  ;;  %v7238_v4 = vrot.slane %v7236_v40, 3  ;;  %v6941_v41 = vrot.slane %v13690_v3, 2  ;;  %vm15018_vm5 = vmmov %vm15007_vm4 }
 0x6e3   : > { %v5860_v16 = vpop.f32.mrf.mxu1  ;;  %10103 = vmatprep.mubr.msk.bf16.mxu0 %vm14652_vm3, %v14676_v1  ;;  %vm15020_vm4 = vmmov %vm14960_vm1 }
 0x6e4   : > { %v5932_v52 = vadd.f32 %v5860_v16, %v13938_v29  ;;  %v9885_v20 = vpop.f32.mrf.mxu0  ;;  %v7239_v39 = vor.u32 %v7238_v4, %v7235_v34  ;;  %v7245_v16 = vshll.u32 %v13698_v46, 16  ;;  %v6942_v43 = vsel %vm3210_vm0, %v6939_v45, %v6941_v41 }
 0x6e5   : > { %v9822_v15 = vpop.f32.mrf.mxu1  ;;  %v6943_v46 = vrot.slane %v15003_v7, 2  ;;  %v7251_v7 = vshrl.u32 %v13708_v13, 16 }
 0x6e6   : > { %v6199_v2 = vpop.f32.mrf.mxu0  ;;  %v14151_v61 = vadd.f32 %v6185_v23, %v5932_v52  ;;  %v7240_v40 = vsel %vm15010_vm13, %v7230_v11, %v7239_v39  ;;  %vm15023_vm13 = vmmov %vm14960_vm1 }
 0x6e7   : > { %v5865_v60 = vpop.f32.mrf.mxu1  ;;  %10040 = vmatmul.mubr.msk.bf16.gmra.mxu1 %vm15006_vm2, %v6940_v47  ;;  %v7244_v47 = vrot.slane %v7242_v57, 2  ;;  %v6944_v11 = vsel %vm3210_vm0, %v6941_v41, %v6943_v46  ;;  %vm15019_vm2 = vmmov %vm14960_vm1 }
 0x6e8   : > { %v9886_v32 = vpop.f32.mrf.mxu0  ;;  %10043 = vmatprep.mubr.msk.bf16.mxu1 %vm14652_vm3, %v14676_v1  ;;  %v7247_v60 = vrot.slane %v7245_v16, 3 }
 0x6e9   : > { %v9825_v29 = vpop.f32.mrf.mxu1 }
 0x6ea   : > { %v6204_v5 = vpop.f32.mrf.mxu0  ;;  %10104 = vmatmul.mubr.msk.bf16.gmra.mxu0 %vm15008_vm8, %v7231_v6  ;;  %v7248_v4 = vor.u32 %v7247_v60, %v7244_v47  ;;  %v7260_v47 = vshrl.u32 %v13710_v19, 16  ;;  %vm15021_vm8 = vmmov %vm15018_vm5 }
 0x6eb   : > { %v5867_v12 = vpop.f32.mrf.mxu1  ;;  %10107 = vmatprep.mubr.msk.bf16.mxu0 %vm14652_vm3, %v14676_v1 }
 0x6ec   : > { %v9889_v23 = vpop.f32.mrf.mxu0 }
 0x6ed   : > { %v9826_v21 = vpop.f32.mrf.mxu1 }
 0x6ee   : > { %v6207_v52 = vpop.f32.mrf.mxu0 }
 0x6ef   : > { %v5871_v20 = vpop.f32.mrf.mxu1  ;;  %10044 = vmatmul.mubr.msk.bf16.gmra.mxu1 %vm15009_vm14, %v6942_v43  ;;  %v7249_v43 = vsel %vm15013_vm11, %v7239_v39, %v7248_v4  ;;  %v7263_v39 = vshll.u32 %v13710_v19, 16  ;;  %vm15022_vm14 = vmmov %vm14960_vm1 }
 0x6f0   : > { %v5933_v15 = vadd.f32 %v5871_v20, %v13958_v33  ;;  %v9890_v3 = vpop.f32.mrf.mxu0  ;;  %10047 = vmatprep.mubr.msk.bf16.mxu1 %vm14652_vm3, %v14676_v1  ;;  %vm15026_vm11 = vmmov %vm14960_vm1 }
 0x6f1   : > { %v9829_v51 = vpop.f32.mrf.mxu1  ;;  %v7265_v19 = vrot.slane %v7263_v39, 3 }
 0x6f2   : > { %v6212_v32 = vpop.f32.mrf.mxu0  ;;  %10108 = vmatmul.mubr.msk.bf16.gmra.mxu0 %vm15011_vm10, %v7240_v40  ;;  %v14171_v45 = vadd.f32 %v6196_v14, %v5933_v15  ;;  %v7254_v14 = vshll.u32 %v13708_v13, 16  ;;  %v7253_v13 = vrot.slane %v7251_v7, 2  ;;  %vm15024_vm10 = vmmov %vm15018_vm5 }
 0x6f3   : > { %v5874_v29 = vpop.f32.mrf.mxu1  ;;  %10111 = vmatprep.mubr.msk.bf16.mxu0 %vm14652_vm3, %v14676_v1 }
 0x6f4   : > { %v5934_v33 = vadd.f32 %v5874_v29, %v13966_v44  ;;  %v9893_v6 = vpop.f32.mrf.mxu0 }
 0x6f5   : > { %v9830_v34 = vpop.f32.mrf.mxu1 }
 0x6f6   : > { %v6215_v12 = vpop.f32.mrf.mxu0  ;;  %v14177_v23 = vadd.f32 %v6199_v2, %v5934_v33  ;;  %v6945_v2 = vrot.slane %v13695_v50, 2 }
 0x6f7   : > { %v5879_v21 = vpop.f32.mrf.mxu1  ;;  %10048 = vmatmul.mubr.msk.bf16.gmra.mxu1 %vm15012_vm9, %v6944_v11  ;;  %vm15025_vm9 = vmmov %vm14960_vm1 }
 0x6f8   : > { %v5935_v57 = vadd.f32 %v5879_v21, %v13970_v58  ;;  %v9894_v16 = vpop.f32.mrf.mxu0  ;;  %10051 = vmatprep.mubr.msk.bf16.mxu1 %vm14652_vm3, %v14676_v1  ;;  %v7256_v58 = vrot.slane %v7254_v14, 3  ;;  %v6946_v29 = vsel %vm3210_vm0, %v6943_v46, %v6945_v2  ;;  %v7262_v21 = vrot.slane %v7260_v47, 2 }
 0x6f9   : > { %v9833_v44 = vpop.f32.mrf.mxu1 }
 0x6fa   : > { %v6220_v20 = vpop.f32.mrf.mxu0  ;;  %10112 = vmatmul.mubr.msk.bf16.gmra.mxu0 %vm15014_vm15, %v7249_v43  ;;  %v14188_v41 = vadd.f32 %v6204_v5, %v5935_v57  ;;  %v7257_v33 = vor.u32 %v7256_v58, %v7253_v13  ;;  %v14209_v44 = vld [vmem:[#allocation3 + $0x68] sm:$0xf]  ;;  %v7161_v43 = vld [vmem:[#allocation3 + $0x6c] sm:$0x7]  ;;  %v14211_v13 = vld [vmem:[#allocation3 + $0x60] sm:$0xff]  }
 0x6fb   : > { %v5882_v15 = vpop.f32.mrf.mxu1  ;;  %10115 = vmatprep.mubr.msk.bf16.mxu0 %vm14652_vm3, %v14676_v1  ;;  %v7269_v58 = vshrl.u32 %v14211_v13, 16  ;;  %vm15027_vm15 = vmmov %vm14960_vm1 }
 0x6fc   : > { %v5936_v3 = vadd.f32 %v5882_v15, %v13984_v53  ;;  %v9897_v51 = vpop.f32.mrf.mxu0  ;;  %v7258_v11 = vsel %vm15016_vm12, %v7248_v4, %v7257_v33  ;;  %v7266_v15 = vor.u32 %v7265_v19, %v7262_v21  ;;  %vm15029_vm12 = vmmov %vm14960_vm1 }
 0x6fd   : > { %v9834_v40 = vpop.f32.mrf.mxu1 }
 0x6fe   : > { %v6223_v60 = vpop.f32.mrf.mxu0  ;;  %v14196_v50 = vadd.f32 %v6207_v52, %v5936_v3  ;;  %v10579_v52 = vld [vmem:[#allocation3 + $0x48] sm:$0xff]   ;;  %v7272_v3 = vshll.u32 %v14211_v13, 16 }
 0x6ff   : > { %v5887_v5 = vpop.f32.mrf.mxu1  ;;  %10052 = vmatmul.mubr.msk.bf16.gmra.mxu1 %vm15015_vm6, %v6946_v29  ;;  %v6947_v46 = vrot.slane %v10579_v52, 2  ;;  %vm15028_vm6 = vcmask 523264  }
 0x700   : > { %v5937_v6 = vadd.f32 %v5887_v5, %v13988_v49  ;;  %v9898_v34 = vpop.f32.mrf.mxu0  ;;  %10055 = vmatprep.mubr.msk.bf16.mxu1 %vm14652_vm3, %v14676_v1 }
 0x701   : > { %v9837_v53 = vpop.f32.mrf.mxu1  ;;  %v6948_v51 = vsel %vm3210_vm0, %v6945_v2, %v6947_v46  ;;  %v7271_v34 = vrot.slane %v7269_v58, 2 }
 0x702   : > { %v6228_v7 = vpop.f32.mrf.mxu0  ;;  %10116 = vmatmul.mubr.msk.bf16.gmra.mxu0 %vm14960_vm1, %v7258_v11  ;;  %v14204_v14 = vadd.f32 %v6212_v32, %v5937_v6  ;;  %v7267_v6 = vsel %vm15018_vm5, %v7257_v33, %v7266_v15  ;;  %v7274_v53 = vrot.slane %v7272_v3, 3  ;;  %vm15030_vm1 = vmmov %vm15028_vm6 }
 0x703   : > { %v5890_v57 = vpop.f32.mrf.mxu1  ;;  %10119 = vmatprep.mubr.msk.bf16.mxu0 %vm14652_vm3, %v14676_v1  ;;  %vm15032_vm5 = vmmov %vm15019_vm2 }
 0x704   : > { %v5938_v49 = vadd.f32 %v5890_v57, %v13996_v63  ;;  %v9901_v16 = vpop.f32.mrf.mxu0  ;;  %v14220_v63 = vcombine.low %v14209_v44, %v7161_v43  ;;  %v10581_v57 = vld [vmem:[#allocation3 + $0x50] sm:$0xff]  }
 0x705   : > { %v9838_v4 = vpop.f32.mrf.mxu1  ;;  %v6949_v33 = vrot.slane %v10581_v57, 2  ;;  %v7275_v16 = vor.u32 %v7274_v53, %v7271_v34 }
 0x706   : > { %v6231_v32 = vpop.f32.mrf.mxu0  ;;  %v14216_v40 = vadd.f32 %v6215_v12, %v5938_v49  ;;  %v7281_v21 = vshll.u32 %v14220_v63, 16 }
 0x707   : > { %v5895_v47 = vpop.f32.mrf.mxu1  ;;  %10056 = vmatmul.mubr.msk.bf16.gmra.mxu1 %vm15017_vm7, %v6948_v51  ;;  %v6950_v4 = vsel %vm3210_vm0, %v6947_v46, %v6949_v33  ;;  %v10582_v46 = vld [vmem:[#allocation3 + $0x58] sm:$0xff]   ;;  %vm15031_vm7 = vmmov %vm15030_vm1 }
 0x708   : > { %v5939_v39 = vadd.f32 %v5895_v47, %v14000_v25  ;;  %v9902_v29 = vpop.f32.mrf.mxu0  ;;  %10059 = vmatprep.mubr.msk.bf16.mxu1 %vm14652_vm3, %v14676_v1  ;;  %v7278_v25 = vshrl.u32 %v14220_v63, 16  ;;  %v7283_v51 = vrot.slane %v7281_v21, 3 }
 0x709   : > { %v9841_v5 = vpop.f32.mrf.mxu1  ;;  %v7276_v29 = vsel %vm15021_vm8, %v7266_v15, %v7275_v16  ;;  %vm15036_vm8 = vmmov %vm15032_vm5 }
 0x70a   : > { %v6236_v2 = vpop.f32.mrf.mxu0  ;;  %10120 = vmatmul.mubr.msk.bf16.gmra.mxu0 %vm15019_vm2, %v7267_v6  ;;  %v14227_v12 = vadd.f32 %v6220_v20, %v5939_v39  ;;  %v7280_v3 = vrot.slane %v7278_v25, 2  ;;  %vm15033_vm2 = vmmov %vm15030_vm1 }
 0x70b   : > { %v5898_v11 = vpop.f32.mrf.mxu1  ;;  %10123 = vmatprep.mubr.msk.bf16.mxu0 %vm14652_vm3, %v14676_v1 }
 0x70c   : > { %v5940_v19 = vadd.f32 %v5898_v11, %v14008_v56  ;;  %v9905_v52 = vpop.f32.mrf.mxu0  ;;  %v7284_v53 = vor.u32 %v7283_v51, %v7280_v3 }
 0x70d   : > { %v9842_v49 = vpop.f32.mrf.mxu1 }
 0x70e   : > { %v6239_v43 = vpop.f32.mrf.mxu0  ;;  %v14235_v20 = vadd.f32 %v6223_v60, %v5940_v19  ;;  %v6951_v60 = vrot.slane %v10582_v46, 2 }
 0x70f   : > { %v5903_v58 = vpop.f32.mrf.mxu1  ;;  %10060 = vmatmul.mubr.msk.bf16.gmra.mxu1 %vm15020_vm4, %v6950_v4  ;;  %v6861_v43 = vld [vmem:[#allocation3 + $0x6c] sm:$0x3]  ;;  %vm15034_vm4 = vmmov %vm15030_vm1 }
 0x710   : > { %v5941_v47 = vadd.f32 %v5903_v58, %v14012_v54  ;;  %v9906_v39 = vpop.f32.mrf.mxu0  ;;  %10063 = vmatprep.mubr.msk.bf16.mxu1 %vm14652_vm3, %v14676_v1  ;;  %v6952_v19 = vsel %vm3210_vm0, %v6949_v33, %v6951_v60  ;;  %v6953_v33 = vrot.slane %v14211_v13, 2  ;;  %v10583_v13 = vld [vmem:[%s11060_s24] sm:$0xff] }
 0x711   : > { %v9845_v56 = vpop.f32.mrf.mxu1 }
 0x712   : > { %v6243_v5 = vpop.f32.mrf.mxu0  ;;  %10124 = vmatmul.mubr.msk.bf16.gmra.mxu0 %vm15022_vm14, %v7276_v29  ;;  %v14243_v6 = vadd.f32 %v6228_v7, %v5941_v47  ;;  %v7285_v7 = vsel %vm15024_vm10, %v7275_v16, %v7284_v53  ;;  %v8654_v16 = vcombine.low %v14209_v44, %v6861_v43  ;;  %v6954_v47 = vsel %vm3210_vm0, %v6951_v60, %v6953_v33  ;;  %v10584_v56 = vld [vmem:[%s11060_s24 + $0x8] sm:$0xff]  ;;  %vm15037_vm14 = vmmov %vm15030_vm1 }
 0x713   : > { %v5906_v34 = vpop.f32.mrf.mxu1  ;;  %10127 = vmatprep.mubr.msk.bf16.mxu0 %vm14652_vm3, %v14676_v1  ;;  %vm15039_vm10 = vmmov %vm15032_vm5 }
 0x714   : > { %v5942_v54 = vadd.f32 %v5906_v34, %v14020_v22  ;;  %v9909_v11 = vpop.f32.mrf.mxu0  ;;  %v6955_v5 = vrot.slane %v8654_v16, 2 }
 0x715   : > { %v9846_v25 = vpop.f32.mrf.mxu1 }
 0x716   : > { %v6245_v21 = vpop.f32.mrf.mxu0  ;;  %v14249_v15 = vadd.f32 %v6231_v32, %v5942_v54  ;;  %v6956_v54 = vsel %vm3210_vm0, %v6953_v33, %v6955_v5 }
 0x717   : > { %v5911_v52 = vpop.f32.mrf.mxu1  ;;  %10064 = vmatmul.mubr.msk.bf16.gmra.mxu1 %vm15023_vm13, %v6952_v19  ;;  %v10585_v21 = vld [vmem:[%s11060_s24 + $0x10] sm:$0xff]  ;;  %v10586_v19 = vld [vmem:[%s11060_s24 + $0x18] sm:$0xff]  ;;  %vm15038_vm13 = vmmov %vm15030_vm1 }
 0x718   : > { %v5943_v57 = vadd.f32 %v5911_v52, %v14024_v62  ;;  %v9910_v49 = vpop.f32.mrf.mxu0  ;;  %10067 = vmatprep.mubr.msk.bf16.mxu1 %vm14652_vm3, %v14676_v1  ;;  %v7794_v52 = vpack.c.bf16 %v10586_v19, %v10585_v21 }
 0x719   : > { %v9849_v22 = vpop.f32.mrf.mxu1  ;;  %v10588_v49 = vld [vmem:[%s11060_s24 + $0x28] sm:$0xff] }
 0x71a   : > { %v6717_v4 = vpop.f32.mrf.mxu0  ;;  %10128 = vmatmul.mubr.msk.bf16.gmra.mxu0 %vm15025_vm9, %v7285_v7  ;;  %v14258_v32 = vadd.f32 %v6236_v2, %v5943_v57  ;;  %v7793_v2 = vpack.c.bf16 %v10584_v56, %v10583_v13  ;;  %v10587_v57 = vld [vmem:[%s11060_s24 + $0x20] sm:$0xff]  ;;  %v10589_v13 = vld [vmem:[%s11060_s24 + $0x30] sm:$0xff]  ;;  %v10590_v56 = vld [vmem:[%s11060_s24 + $0x38] sm:$0xff] }
 0x71b   : > { %v5914_v58 = vpop.f32.mrf.mxu1  ;;  %10131 = vmatprep.mubr.msk.bf16.mxu0 %vm14652_vm3, %v14676_v1  ;;  %v7795_v22 = vpack.c.bf16 %v10588_v49, %v10587_v57  ;;  %v10593_v57 = vld [vmem:[%s11060_s24 + $0x50] sm:$0xff]  ;;  %v10594_v49 = vld [vmem:[%s11060_s24 + $0x58] sm:$0xff]  ;;  %vm15040_vm9 = vmmov %vm15030_vm1 }
 0x71c   : > { %v9973_v62 = vpop.f32.mrf.mxu0 }
 0x71d   : > { %v9850_v3 = vpop.f32.mrf.mxu1 }
 0x71e   : > { %v6720_v51 = vpop.f32.mrf.mxu0 }
 0x71f   : > { %v5918_v39 = vpop.f32.mrf.mxu1  ;;  %10068 = vmatmul.mubr.msk.bf16.gmra.mxu1 %vm15026_vm11, %v6954_v47  ;;  %vm15041_vm11 = vmmov %vm15032_vm5 }
 0x720   : > { %v9974_v29 = vpop.f32.mrf.mxu0  ;;  %10071 = vmatprep.mubr.msk.bf16.mxu1 %vm14652_vm3, %v14676_v1 }
 0x721   : > { %v9853_v44 = vpop.f32.mrf.mxu1 }
 0x722   : > { %v6725_v46 = vpop.f32.mrf.mxu0  ;;  %10132 = vmatmul.mubr.msk.bf16.gmra.mxu0 %vm15027_vm15, %v7284_v53  ;;  %vm15042_vm15 = vmmov %vm15032_vm5 }
 0x723   : > { %v5920_v60 = vpop.f32.mrf.mxu1  ;;  %10199 = vmatprep.mubr.msk.bf16.mxu0 %vm15028_vm6, %v7793_v2  ;;  %v7796_v2 = vpack.c.bf16 %v10590_v56, %v10589_v13  ;;  %vm15043_vm6 = vmmov %vm15032_vm5 }
 0x724   : > { %v9977_v34 = vpop.f32.mrf.mxu0  ;;  %v10591_v60 = vld [vmem:[%s11060_s24 + $0x40] sm:$0xff] }
 0x725   : > { %v9854_v11 = vpop.f32.mrf.mxu1 }
 0x726   : > { %v6728_v25 = vpop.f32.mrf.mxu0 }
 0x727   : > { %v6479_v7 = vpop.f32.mrf.mxu1  ;;  %10072 = vmatmul.mubr.msk.bf16.gmra.mxu1 %vm15029_vm12, %v6956_v54  ;;  %vm15044_vm12 = vmmov %vm15032_vm5 }
 0x728   : > { %v6577_v53 = vadd.f32 %v6479_v7, %v14060_v28  ;;  %v9978_v43 = vpop.f32.mrf.mxu0  ;;  %10075 = vmatprep.mubr.msk.bf16.mxu1 %vm14652_vm3, %v14676_v1 }
 0x729   : > { %v9917_v33 = vpop.f32.mrf.mxu1 }
 0x72a   : > { %v6733_v58 = vpop.f32.mrf.mxu0  ;;  %10200 = vmatmul.mubr.msk.bf16.vlgmr.msra.gmra.mxu0 %vm15030_vm1, %v7794_v52  ;;  %v14281_v62 = vadd.f32 %v6717_v4, %v6577_v53  ;;  %v10592_v4 = vld [vmem:[%s11060_s24 + $0x48] sm:$0xff]  ;;  %v15035_v33 = vld [vmem:[#allocation36_spill] sm:$0xff]  ;;  %vm15045_vm1 = vmmov %vm15032_vm5 }
 0x72b   : > { %v6482_v16 = vpop.f32.mrf.mxu1  ;;  %10203 = vmatprep.mubr.msk.bf16.mxu0 %vm15031_vm7, %v7795_v22  ;;  %v7797_v34 = vpack.c.bf16 %v10592_v4, %v10591_v60  ;;  %v7798_v22 = vpack.c.bf16 %v10594_v49, %v10593_v57  ;;  %vm15046_vm7 = vmmov %vm15045_vm1 }
 0x72c   : > { %v6578_v3 = vadd.f32 %v6482_v16, %v14071_v9  ;;  %v9981_v47 = vpop.f32.mrf.mxu0  ;;  %v10595_v16 = vld [vmem:[%s11060_s24 + $0x60] sm:$0xff] }
 0x72d   : > { %v9918_v39 = vpop.f32.mrf.mxu1 }
 0x72e   : > { %v6736_v28 = vpop.f32.mrf.mxu0  ;;  %v14287_v29 = vadd.f32 %v6720_v51, %v6578_v3 }
 0x72f   : > { %v6487_v44 = vpop.f32.mrf.mxu1  ;;  %10076 = vmatmul.mubr.msk.bf16.gmra.mxu1 %vm15032_vm5, %v6955_v5  ;;  %vm15047_vm5 = vmmov %vm15045_vm1 }
 0x730   : > { %v6579_v54 = vadd.f32 %v6487_v44, %v14085_v0  ;;  %v9982_v11 = vpop.f32.mrf.mxu0  ;;  %10139 = vmatprep.mubr.msk.bf16.mxu1 %vm14652_vm3, %v14676_v1 }
 0x731   : > { %v9921_v9 = vpop.f32.mrf.mxu1 }
 0x732   : > { %v6741_v21 = vpop.f32.mrf.mxu0  ;;  %10204 = vmatmul.mubr.msk.bf16.gmra.mxu0 %vm15033_vm2, %v7796_v2  ;;  %v14296_v51 = vadd.f32 %v6725_v46, %v6579_v54  ;;  %v10596_v46 = vld [vmem:[%s11060_s24 + $0x68] sm:$0xff]  ;;  %vm15048_vm2 = vmmov %vm15045_vm1 }
 0x733   : > { %v6490_v5 = vpop.f32.mrf.mxu1  ;;  %10207 = vmatprep.mubr.msk.bf16.mxu0 %vm15034_vm4, %v7797_v34  ;;  %v7799_v3 = vpack.c.bf16 %v10596_v46, %v10595_v16  ;;  %v10597_v34 = vld [vmem:[%s11060_s24 + $0x70] sm:$0xff]  ;;  %vm15049_vm4 = vmmov %vm15045_vm1 }
 0x734   : > { %v6580_v19 = vadd.f32 %v6490_v5, %v14094_v55  ;;  %v9985_v52 = vpop.f32.mrf.mxu0 }
 0x735   : > { %v9922_v7 = vpop.f32.mrf.mxu1 }
 0x736   : > { %v6744_v0 = vpop.f32.mrf.mxu0  ;;  %v14302_v53 = vadd.f32 %v6728_v25, %v6580_v19 }
 0x737   : > { %v6495_v43 = vpop.f32.mrf.mxu1  ;;  %10140 = vmatmul.mubr.msk.bf16.vlgmr.msra.gmra.mxu1 %vm15036_vm8, %v15035_v33  ;;  %vm15051_vm8 = vcmask 1044480  }
 0x738   : > { %v6581_v47 = vadd.f32 %v6495_v43, %v14109_v24  ;;  %v9986_v55 = vpop.f32.mrf.mxu0  ;;  %10143 = vmatprep.mubr.msk.bf16.mxu1 %vm14652_vm3, %v14676_v1  ;;  %v10598_v24 = vld [vmem:[%s11060_s24 + $0x78] sm:$0xff] }
 0x739   : > { %v9925_v39 = vpop.f32.mrf.mxu1  ;;  %v7800_v54 = vpack.c.bf16 %v10598_v24, %v10597_v34 }
 0x73a   : > { %v6749_v13 = vpop.f32.mrf.mxu0  ;;  %10208 = vmatmul.mubr.msk.bf16.gmra.mxu0 %vm15037_vm14, %v7798_v22  ;;  %v14312_v25 = vadd.f32 %v6733_v58, %v6581_v47  ;;  %vm15052_vm14 = vmmov %vm15045_vm1 }
 0x73b   : > { %v6498_v56 = vpop.f32.mrf.mxu1  ;;  %10211 = vmatprep.mubr.msk.bf16.mxu0 %vm15038_vm13, %v7799_v3  ;;  %vm15053_vm13 = vmmov %vm15045_vm1 }
 0x73c   : > { %v6582_v2 = vadd.f32 %v6498_v56, %v14117_v26  ;;  %v9989_v44 = vpop.f32.mrf.mxu0 }
 0x73d   : > { %v9926_v60 = vpop.f32.mrf.mxu1 }
 0x73e   : > { %v6752_v4 = vpop.f32.mrf.mxu0  ;;  %v14318_v11 = vadd.f32 %v6736_v28, %v6582_v2 }
 0x73f   : > { %v6503_v9 = vpop.f32.mrf.mxu1  ;;  %10144 = vmatmul.mubr.msk.bf16.gmra.mxu1 %vm15039_vm10, %v13723_v59  ;;  %vm15055_vm10 = vcmask 1043456  }
 0x740   : > { %v6583_v58 = vadd.f32 %v6503_v9, %v14126_v37  ;;  %v9990_v5 = vpop.f32.mrf.mxu0  ;;  %10147 = vmatprep.mubr.msk.bf16.mxu1 %vm14652_vm3, %v14676_v1 }
 0x741   : > { %v9929_v19 = vpop.f32.mrf.mxu1 }
 0x742   : > { %v6757_v26 = vpop.f32.mrf.mxu0  ;;  %10212 = vmatmul.mubr.msk.bf16.gmra.mxu0 %vm15040_vm9, %v7800_v54  ;;  %v14326_v52 = vadd.f32 %v6741_v21, %v6583_v58  ;;  %vm15056_vm9 = vmmov %vm15045_vm1 }
 0x743   : > { %v6506_v7 = vpop.f32.mrf.mxu1 }
 0x744   : > { %v6584_v28 = vadd.f32 %v6506_v7, %v14134_v10  ;;  %v9993_v57 = vpop.f32.mrf.mxu0 }
 0x745   : > { %v9930_v49 = vpop.f32.mrf.mxu1 }
 0x746   : > { %v6759_v22 = vpop.f32.mrf.mxu0  ;;  %v14329_v43 = vadd.f32 %v6744_v0, %v6584_v28 }
 0x747   : > { %v6511_v59 = vpop.f32.mrf.mxu1  ;;  %10148 = vmatmul.mubr.msk.bf16.gmra.mxu1 %vm15041_vm11, %v13726_v8  ;;  %vm15057_vm11 = vcmask 1041408  }
 0x748   : > { %v6585_v37 = vadd.f32 %v6511_v59, %v14142_v35  ;;  %v9994_v33 = vpop.f32.mrf.mxu0  ;;  %10151 = vmatprep.mubr.msk.bf16.mxu1 %vm14652_vm3, %v14676_v1 }
 0x749   : > { %v9933_v21 = vpop.f32.mrf.mxu1 }
 0x74a   : > { %v6763_v16 = vpop.f32.mrf.mxu0  ;;  %v14336_v46 = vadd.f32 %v6749_v13, %v6585_v37 }
 0x74b   : > { %v6514_v10 = vpop.f32.mrf.mxu1 }
 0x74c   : > { %v6586_v3 = vadd.f32 %v6514_v10, %v14151_v61  ;;  %v9997_v47 = vpop.f32.mrf.mxu0 }
 0x74d   : > { %v9934_v0 = vpop.f32.mrf.mxu1 }
 0x74e   : > { %v6766_v55 = vpop.f32.mrf.mxu0  ;;  %v14339_v39 = vadd.f32 %v6752_v4, %v6586_v3 }
 0x74f   : > { %v6519_v56 = vpop.f32.mrf.mxu1  ;;  %10152 = vmatmul.mubr.msk.bf16.gmra.mxu1 %vm15042_vm15, %v13730_v17  ;;  %vm15058_vm15 = vmmov %vm15045_vm1 }
 0x750   : > { %v9998_v8 = vpop.f32.mrf.mxu0  ;;  %10155 = vmatprep.mubr.msk.bf16.mxu1 %vm14652_vm3, %v14676_v1 }
 0x751   : > { %v9937_v35 = vpop.f32.mrf.mxu1 }
 0x752   : > { %v6771_v2 = vpop.f32.mrf.mxu0 }
 0x753   : > { %v6521_v13 = vpop.f32.mrf.mxu1 }
 0x754   : > { %v10001_v44 = vpop.f32.mrf.mxu0 }
 0x755   : > { %v9938_v60 = vpop.f32.mrf.mxu1 }
 0x756   : > { %v6774_v34 = vpop.f32.mrf.mxu0 }
 0x757   : > { %v6525_v61 = vpop.f32.mrf.mxu1  ;;  %10156 = vmatmul.mubr.msk.bf16.gmra.mxu1 %vm15043_vm6, %v13733_v31  ;;  %vm15059_vm6 = vmmov %vm15045_vm1 }
 0x758   : > { %v6587_v4 = vadd.f32 %v6525_v61, %v14171_v45  ;;  %v10002_v24 = vpop.f32.mrf.mxu0  ;;  %10159 = vmatprep.mubr.msk.bf16.mxu1 %vm14652_vm3, %v14676_v1 }
 0x759   : > { %v9941_v17 = vpop.f32.mrf.mxu1 }
 0x75a   : > { %v6779_v54 = vpop.f32.mrf.mxu0  ;;  %v14350_v9 = vadd.f32 %v6763_v16, %v6587_v4 }
 0x75b   : > { %v6528_v58 = vpop.f32.mrf.mxu1 }
 0x75c   : > { %v6588_v5 = vadd.f32 %v6528_v58, %v14177_v23  ;;  %v10005_v19 = vpop.f32.mrf.mxu0 }
 0x75d   : > { %v9942_v26 = vpop.f32.mrf.mxu1 }
 0x75e   : > { %v6782_v7 = vpop.f32.mrf.mxu0  ;;  %v14353_v28 = vadd.f32 %v6766_v55, %v6588_v5 }
 0x75f   : > { %v6533_v57 = vpop.f32.mrf.mxu1  ;;  %10160 = vmatmul.mubr.msk.bf16.gmra.mxu1 %vm15044_vm12, %v13736_v42  ;;  %vm15060_vm12 = vmmov %vm15045_vm1 }
 0x760   : > { %v6589_v31 = vadd.f32 %v6533_v57, %v14188_v41  ;;  %v10006_v45 = vpop.f32.mrf.mxu0  ;;  %10163 = vmatprep.mubr.msk.bf16.mxu1 %vm14652_vm3, %v14676_v1 }
 0x761   : > { %v9945_v49 = vpop.f32.mrf.mxu1 }
 0x762   : > { %v6787_v22 = vpop.f32.mrf.mxu0  ;;  %v14360_v59 = vadd.f32 %v6771_v2, %v6589_v31 }
 0x763   : > { %v6536_v23 = vpop.f32.mrf.mxu1 }
 0x764   : > { %v6590_v37 = vadd.f32 %v6536_v23, %v14196_v50  ;;  %v10009_v33 = vpop.f32.mrf.mxu0 }
 0x765   : > { %v9946_v21 = vpop.f32.mrf.mxu1 }
 0x766   : > { %v6790_v16 = vpop.f32.mrf.mxu0  ;;  %v14363_v10 = vadd.f32 %v6774_v34, %v6590_v37 }
 0x767   : > { %v6541_v3 = vpop.f32.mrf.mxu1  ;;  %10164 = vmatmul.mubr.msk.bf16.gmra.mxu1 %vm15045_vm1, %v13741_v18 }
 0x768   : > { %v6591_v42 = vadd.f32 %v6541_v3, %v14204_v14  ;;  %v10010_v41 = vpop.f32.mrf.mxu0  ;;  %10167 = vmatprep.mubr.msk.bf16.mxu1 %vm14652_vm3, %v14676_v1 }
 0x769   : > { %v9949_v47 = vpop.f32.mrf.mxu1 }
 0x76a   : > { %v6795_v0 = vpop.f32.mrf.mxu0  ;;  %v14370_v55 = vadd.f32 %v6779_v54, %v6591_v42 }
 0x76b   : > { %v6544_v50 = vpop.f32.mrf.mxu1 }
 0x76c   : > { %v6592_v56 = vadd.f32 %v6544_v50, %v14216_v40  ;;  %v10013_v8 = vpop.f32.mrf.mxu0 }
 0x76d   : > { %v9950_v35 = vpop.f32.mrf.mxu1  ;;  %v15050_v8 = vrot.slane %v13700_v27, 3 }
 0x76e   : > { %v6798_v2 = vpop.f32.mrf.mxu0  ;;  %v14373_v13 = vadd.f32 %v6782_v7, %v6592_v56 }
 0x76f   : > { %v6549_v44 = vpop.f32.mrf.mxu1  ;;  %10168 = vmatmul.mubr.msk.bf16.gmra.mxu1 %vm15046_vm7, %v13750_v38  ;;  %vm15062_vm7 = vmmov %vm15048_vm2 }
 0x770   : > { %v6593_v18 = vadd.f32 %v6549_v44, %v14227_v12  ;;  %v10014_v14 = vpop.f32.mrf.mxu0  ;;  %10171 = vmatprep.mubr.msk.bf16.mxu1 %vm14652_vm3, %v14676_v1 }
 0x771   : > { %v9953_v60 = vpop.f32.mrf.mxu1 }
 0x772   : > { %v6803_v34 = vpop.f32.mrf.mxu0  ;;  %v14380_v61 = vadd.f32 %v6787_v22, %v6593_v18 }
 0x773   : > { %v6552_v40 = vpop.f32.mrf.mxu1 }
 0x774   : > { %v6594_v4 = vadd.f32 %v6552_v40, %v14235_v20  ;;  %v10017_v24 = vpop.f32.mrf.mxu0 }
 0x775   : > { %v9954_v17 = vpop.f32.mrf.mxu1 }
 0x776   : > { %v6806_v54 = vpop.f32.mrf.mxu0  ;;  %v14383_v58 = vadd.f32 %v6790_v16, %v6594_v4 }
 0x777   : > { %v6557_v5 = vpop.f32.mrf.mxu1  ;;  %10172 = vmatmul.mubr.msk.bf16.gmra.mxu1 %vm15047_vm5, %v13754_v30  ;;  %vm15063_vm5 = vmmov %vm15057_vm11 }
 0x778   : > { %v6595_v38 = vadd.f32 %v6557_v5, %v14243_v6  ;;  %v10018_v12 = vpop.f32.mrf.mxu0  ;;  %10175 = vmatprep.mubr.msk.bf16.mxu1 %vm14652_vm3, %v14676_v1 }
 0x779   : > { %v9957_v19 = vpop.f32.mrf.mxu1 }
 0x77a   : > { %v6810_v26 = vpop.f32.mrf.mxu0  ;;  %v14390_v7 = vadd.f32 %v6795_v0, %v6595_v38 }
 0x77b   : > { %v6560_v20 = vpop.f32.mrf.mxu1 }
 0x77c   : > { %v6596_v57 = vadd.f32 %v6560_v20, %v14249_v15  ;;  %v10021_v31 = vpop.f32.mrf.mxu0 }
 0x77d   : > { %v9958_v45 = vpop.f32.mrf.mxu1 }
 0x77e   : > { %v6812_v49 = vpop.f32.mrf.mxu0  ;;  %v14393_v22 = vadd.f32 %v6798_v2, %v6596_v57 }
 0x77f   : > { %v6565_v23 = vpop.f32.mrf.mxu1  ;;  %10176 = vmatmul.mubr.msk.bf16.gmra.mxu1 %vm15048_vm2, %v13757_v36  ;;  %v7522_v36 = vrot.slane %v14220_v63, 3 }
 0x780   : > { %v6597_v30 = vadd.f32 %v6565_v23, %v14258_v32  ;;  %v10022_v6 = vpop.f32.mrf.mxu0  ;;  %10179 = vmatprep.mubr.msk.bf16.mxu1 %vm14652_vm3, %v14676_v1 }
 0x781   : > { %v9961_v37 = vpop.f32.mrf.mxu1  ;;  %v7523_v35 = vsel %vm15051_vm8, %v15050_v8, %v7522_v36 }
 0x782   : > { %v7371_v33 = vpop.f32.mrf.mxu0  ;;  %v14400_v21 = vadd.f32 %v6803_v34, %v6597_v30 }
 0x783   : > { %v6568_v15 = vpop.f32.mrf.mxu1 }
 0x784   : > { %v10085_v16 = vpop.f32.mrf.mxu0 }
 0x785   : > { %v9962_v3 = vpop.f32.mrf.mxu1 }
 0x786   : > { %v7374_v42 = vpop.f32.mrf.mxu0 }
 0x787   : > { %v6572_v41 = vpop.f32.mrf.mxu1  ;;  %10180 = vmatmul.mubr.msk.bf16.gmra.mxu1 %vm15049_vm4, %v13762_v48  ;;  %vm15064_vm4 = vmmov %vm15048_vm2 }
 0x788   : > { %v10086_v47 = vpop.f32.mrf.mxu0  ;;  %10183 = vmatprep.mubr.msk.bf16.mxu1 %vm14652_vm3, %v14676_v1 }
 0x789   : > { %v9965_v32 = vpop.f32.mrf.mxu1 }
 0x78a   : > { %v7379_v0 = vpop.f32.mrf.mxu0 }
 0x78b   : > { %v6574_v50 = vpop.f32.mrf.mxu1 }
 0x78c   : > { %v10089_v56 = vpop.f32.mrf.mxu0 }
 0x78d   : > { %v9966_v2 = vpop.f32.mrf.mxu1 }
 0x78e   : > { %v7382_v44 = vpop.f32.mrf.mxu0 }
 0x78f   : > { %v7042_v18 = vpop.f32.mrf.mxu1  ;;  %10184 = vmatmul.mubr.msk.bf16.gmra.mxu1 %vm15052_vm14, %v7523_v35  ;;  %vm15066_vm14 = vmmov %vm15063_vm5 }
 0x790   : > { %v7140_v48 = vadd.f32 %v7042_v18, %v14281_v62  ;;  %v10090_v14 = vpop.f32.mrf.mxu0  ;;  %10187 = vmatprep.mubr.msk.bf16.mxu1 %vm14652_vm3, %v14676_v1  ;;  %vm15054_vm3 = vmmov %vm15045_vm1 }
 0x791   : > { %v10029_v63 = vpop.f32.mrf.mxu1  ;;  %vm15061_vm1 = vmmov %vm15055_vm10 }
 0x792   : > { %v7387_v60 = vpop.f32.mrf.mxu0  ;;  %v14414_v34 = vadd.f32 %v7371_v33, %v7140_v48  ;;  %vm15065_vm8 = vmmov %vm15061_vm1 }
 0x793   : > { %v7045_v40 = vpop.f32.mrf.mxu1 }
 0x794   : > { %v7141_v27 = vadd.f32 %v7045_v40, %v14287_v29  ;;  %v10093_v4 = vpop.f32.mrf.mxu0 }
 0x795   : > { %v10030_v24 = vpop.f32.mrf.mxu1 }
 0x796   : > { %v7390_v17 = vpop.f32.mrf.mxu0  ;;  %v14417_v54 = vadd.f32 %v7374_v42, %v7141_v27 }
 0x797   : > { %v7050_v5 = vpop.f32.mrf.mxu1  ;;  %10188 = vmatmul.mubr.msk.bf16.gmra.mxu1 %vm15053_vm13, %v7522_v36  ;;  %vm15067_vm13 = vmmov %vm15048_vm2 }
 0x798   : > { %v7142_v62 = vadd.f32 %v7050_v5, %v14296_v51  ;;  %v10094_v38 = vpop.f32.mrf.mxu0 }
 0x799   : > { %v10033_v12 = vpop.f32.mrf.mxu1 }
 0x79a   : > { %v7395_v1 = vpop.f32.mrf.mxu0  ;;  %v14421_v19 = vadd.f32 %v7379_v0, %v7142_v62 }
 0x79b   : > { %v7053_v26 = vpop.f32.mrf.mxu1 }
 0x79c   : > { %v7143_v20 = vadd.f32 %v7053_v26, %v14302_v53  ;;  %v10097_v57 = vpop.f32.mrf.mxu0 }
 0x79d   : > { %v10034_v29 = vpop.f32.mrf.mxu1 }
 0x79e   : > { %v7398_v31 = vpop.f32.mrf.mxu0  ;;  %v14424_v45 = vadd.f32 %v7382_v44, %v7143_v20 }
 0x79f   : > { %v7058_v49 = vpop.f32.mrf.mxu1 }
 0x7a0   : > { %v7144_v23 = vadd.f32 %v7058_v49, %v14312_v25  ;;  %v10098_v30 = vpop.f32.mrf.mxu0 }
 0x7a1   : > { %v10037_v6 = vpop.f32.mrf.mxu1 }
 0x7a2   : > { %v7403_v37 = vpop.f32.mrf.mxu0  ;;  %v14427_v51 = vadd.f32 %v7387_v60, %v7144_v23 }
 0x7a3   : > { %v7061_v33 = vpop.f32.mrf.mxu1 }
 0x7a4   : > { %v7145_v15 = vadd.f32 %v7061_v33, %v14318_v11  ;;  %v10101_v16 = vpop.f32.mrf.mxu0 }
 0x7a5   : > { %v10038_v3 = vpop.f32.mrf.mxu1 }
 0x7a6   : > { %v7406_v42 = vpop.f32.mrf.mxu0  ;;  %v14430_v53 = vadd.f32 %v7390_v17, %v7145_v15 }
 0x7a7   : > { %v7066_v41 = vpop.f32.mrf.mxu1 }
 0x7a8   : > { %v7146_v47 = vadd.f32 %v7066_v41, %v14326_v52  ;;  %v10102_v36 = vpop.f32.mrf.mxu0 }
 0x7a9   : > { %v10041_v32 = vpop.f32.mrf.mxu1 }
 0x7aa   : > { %v7411_v0 = vpop.f32.mrf.mxu0  ;;  %v14433_v25 = vadd.f32 %v7395_v1, %v7146_v47 }
 0x7ab   : > { %v7069_v50 = vpop.f32.mrf.mxu1 }
 0x7ac   : > { %v7147_v56 = vadd.f32 %v7069_v50, %v14329_v43  ;;  %v10105_v8 = vpop.f32.mrf.mxu0 }
 0x7ad   : > { %v10042_v35 = vpop.f32.mrf.mxu1 }
 0x7ae   : > { %v7413_v2 = vpop.f32.mrf.mxu0  ;;  %v14436_v11 = vadd.f32 %v7398_v31, %v7147_v56 }
 0x7af   : > { %v7074_v44 = vpop.f32.mrf.mxu1 }
 0x7b0   : > { %v7148_v18 = vadd.f32 %v7074_v44, %v14336_v46  ;;  %v10106_v48 = vpop.f32.mrf.mxu0 }
 0x7b1   : > { %v10045_v14 = vpop.f32.mrf.mxu1 }
 0x7b2   : > { %v7417_v63 = vpop.f32.mrf.mxu0  ;;  %v14439_v52 = vadd.f32 %v7403_v37, %v7148_v18 }
 0x7b3   : > { %v7077_v60 = vpop.f32.mrf.mxu1 }
 0x7b4   : > { %v7149_v40 = vadd.f32 %v7077_v60, %v14339_v39  ;;  %v10109_v27 = vpop.f32.mrf.mxu0 }
 0x7b5   : > { %v10046_v4 = vpop.f32.mrf.mxu1 }
 0x7b6   : > { %v7420_v24 = vpop.f32.mrf.mxu0  ;;  %v14442_v43 = vadd.f32 %v7406_v42, %v7149_v40 }
 0x7b7   : > { %v7082_v17 = vpop.f32.mrf.mxu1 }
 0x7b8   : > { %v10110_v5 = vpop.f32.mrf.mxu0 }
 0x7b9   : > { %v10049_v62 = vpop.f32.mrf.mxu1 }
 0x7ba   : > { %v7425_v38 = vpop.f32.mrf.mxu0 }
 0x7bb   : > { %v7084_v12 = vpop.f32.mrf.mxu1 }
 0x7bc   : > { %v10113_v1 = vpop.f32.mrf.mxu0 }
 0x7bd   : > { %v10050_v46 = vpop.f32.mrf.mxu1 }
 0x7be   : > { %v7428_v26 = vpop.f32.mrf.mxu0 }
 0x7bf   : > { %v7088_v20 = vpop.f32.mrf.mxu1 }
 0x7c0   : > { %v7150_v57 = vadd.f32 %v7088_v20, %v14350_v9  ;;  %v10114_v29 = vpop.f32.mrf.mxu0 }
 0x7c1   : > { %v10053_v31 = vpop.f32.mrf.mxu1 }
 0x7c2   : > { %v7433_v49 = vpop.f32.mrf.mxu0  ;;  %v14445_v39 = vadd.f32 %v7417_v63, %v7150_v57 }
 0x7c3   : > { %v7091_v23 = vpop.f32.mrf.mxu1 }
 0x7c4   : > { %v7151_v30 = vadd.f32 %v7091_v23, %v14353_v28  ;;  %v10117_v6 = vpop.f32.mrf.mxu0 }
 0x7c5   : > { %v10054_v37 = vpop.f32.mrf.mxu1 }
 0x7c6   : > { %v7436_v33 = vpop.f32.mrf.mxu0  ;;  %v14448_v15 = vadd.f32 %v7420_v24, %v7151_v30 }
 0x7c7   : > { %v7096_v16 = vpop.f32.mrf.mxu1 }
 0x7c8   : > { %v7152_v3 = vadd.f32 %v7096_v16, %v14360_v59  ;;  %v10118_v42 = vpop.f32.mrf.mxu0 }
 0x7c9   : > { %v10057_v41 = vpop.f32.mrf.mxu1 }
 0x7ca   : > { %v7441_v47 = vpop.f32.mrf.mxu0  ;;  %v14451_v9 = vadd.f32 %v7425_v38, %v7152_v3 }
 0x7cb   : > { %v7099_v36 = vpop.f32.mrf.mxu1 }
 0x7cc   : > { %v7153_v32 = vadd.f32 %v7099_v36, %v14363_v10  ;;  %v10121_v0 = vpop.f32.mrf.mxu0 }
 0x7cd   : > { %v10058_v50 = vpop.f32.mrf.mxu1 }
 0x7ce   : > { %v7444_v56 = vpop.f32.mrf.mxu0  ;;  %v14454_v28 = vadd.f32 %v7428_v26, %v7153_v32 }
 0x7cf   : > { %v7104_v8 = vpop.f32.mrf.mxu1 }
 0x7d0   : > { %v7154_v35 = vadd.f32 %v7104_v8, %v14370_v55  ;;  %v10122_v2 = vpop.f32.mrf.mxu0 }
 0x7d1   : > { %v10061_v44 = vpop.f32.mrf.mxu1 }
 0x7d2   : > { %v7449_v18 = vpop.f32.mrf.mxu0  ;;  %v14457_v59 = vadd.f32 %v7433_v49, %v7154_v35  ;;  %v14478_v44 = vld [vmem:[#allocation12] ss:$0 sm:$0xff] }
 0x7d3   : > { %v7107_v48 = vpop.f32.mrf.mxu1 }
 0x7d4   : > { %v7155_v14 = vadd.f32 %v7107_v48, %v14373_v13  ;;  %v10125_v63 = vpop.f32.mrf.mxu0 }
 0x7d5   : > { %v10062_v60 = vpop.f32.mrf.mxu1 }
 0x7d6   : > { %v7452_v40 = vpop.f32.mrf.mxu0  ;;  %v14460_v10 = vadd.f32 %v7436_v33, %v7155_v14 }
 0x7d7   : > { %v7112_v27 = vpop.f32.mrf.mxu1 }
 0x7d8   : > { %v7156_v4 = vadd.f32 %v7112_v27, %v14380_v61  ;;  %v10126_v24 = vpop.f32.mrf.mxu0 }
 0x7d9   : > { %v10065_v17 = vpop.f32.mrf.mxu1 }
 0x7da   : > { %v7457_v5 = vpop.f32.mrf.mxu0  ;;  %v14463_v55 = vadd.f32 %v7441_v47, %v7156_v4 }
 0x7db   : > { %v7115_v62 = vpop.f32.mrf.mxu1 }
 0x7dc   : > { %v7157_v38 = vadd.f32 %v7115_v62, %v14383_v58  ;;  %v10129_v12 = vpop.f32.mrf.mxu0 }
 0x7dd   : > { %v10066_v1 = vpop.f32.mrf.mxu1 }
 0x7de   : > { %v7460_v46 = vpop.f32.mrf.mxu0  ;;  %v14466_v13 = vadd.f32 %v7444_v56, %v7157_v38 }
 0x7df   : > { %v7120_v26 = vpop.f32.mrf.mxu1 }
 0x7e0   : > { %v7158_v20 = vadd.f32 %v7120_v26, %v14390_v7  ;;  %v10130_v57 = vpop.f32.mrf.mxu0 }
 0x7e1   : > { %v10069_v29 = vpop.f32.mrf.mxu1 }
 0x7e2   : > { %v7464_v31 = vpop.f32.mrf.mxu0  ;;  %v14469_v61 = vadd.f32 %v7449_v18, %v7158_v20 }
 0x7e3   : > { %v7123_v49 = vpop.f32.mrf.mxu1 }
 0x7e4   : > { %v7159_v23 = vadd.f32 %v7123_v49, %v14393_v22  ;;  %v10133_v30 = vpop.f32.mrf.mxu0 }
 0x7e5   : > { %v10070_v6 = vpop.f32.mrf.mxu1 }
 0x7e6   : > { %v7466_v37 = vpop.f32.mrf.mxu0  ;;  %v14472_v58 = vadd.f32 %v7452_v40, %v7159_v23 }
 0x7e7   : > { %v7128_v33 = vpop.f32.mrf.mxu1 }
 0x7e8   : > { %v7160_v16 = vadd.f32 %v7128_v33, %v14400_v21  ;;  %v10134_v3 = vpop.f32.mrf.mxu0 }
 0x7e9   : > { %v10073_v42 = vpop.f32.mrf.mxu1 }
 0x7ea   : > { %v14475_v7 = vadd.f32 %v7457_v5, %v7160_v16  ;;  %v10201_v50 = vpop.f32.mrf.mxu0 }
 0x7eb   : > { %v7131_v41 = vpop.f32.mrf.mxu1 }
 0x7ec   : > { %v7891_v8 = vpop.f32.mrf.mxu0 }
 0x7ed   : > { %v10074_v47 = vpop.f32.mrf.mxu1 }
 0x7ef   : > { %v7135_v36 = vpop.f32.mrf.mxu1 }
 0x7f1   : > { %v10077_v32 = vpop.f32.mrf.mxu1 }
 0x7f3   : > { %v7137_v0 = vpop.f32.mrf.mxu1 }
 0x7f5   : > { %v10078_v22 = vpop.f32.mrf.mxu1 }
 0x7f7   : > { %v7609_v56 = vpop.f32.mrf.mxu1 }
 0x7f8   : > { %v7707_v35 = vadd.f32 %v7609_v56, %v14414_v34  ;;  %v10202_v34 = vpop.f32.mrf.mxu0 }
 0x7f9   : > { %v10141_v2 = vpop.f32.mrf.mxu1 }
 0x7fa   : > { %v7954_v21 = vadd.f32 %v7891_v8, %v7707_v35  ;;  %v7894_v17 = vpop.f32.mrf.mxu0 }
 0x7fb   : > { %v7612_v18 = vpop.f32.mrf.mxu1 }
 0x7fc   : > { %v7977_v48 = vadd.f32 %v14478_v44, %v7954_v21  ;;  %v7708_v63 = vadd.f32 %v7612_v18, %v14417_v54  ;;  %v10205_v57 = vpop.f32.mrf.mxu0 }
 0x7fd   : > { %v10142_v14 = vpop.f32.mrf.mxu1 }
 0x7fe   : > { %7993 = vst.msk [vmem:[%s14485_s28] sm:$0xff] %vm15054_vm3, %v7977_v48  ;;  %v7730_v4 = vrot.slane %v7708_v63, 2  ;;  %v7907_v37 = vpop.f32.mrf.mxu0  ;;  %vm15068_vm3 = vmmov %vm15048_vm2 }
 0x7ff   : > { %v7617_v60 = vpop.f32.mrf.mxu1 }
 0x800   : > { %v7709_v40 = vadd.f32 %v7617_v60, %v14421_v19 }
 0x801   : > { %v10145_v27 = vpop.f32.mrf.mxu1 }
 0x802   : > { %v7731_v24 = vrot.slane %v7709_v40, 2  ;;  %v7735_v46 = vrot.slane %v7709_v40, 4 }
 0x803   : > { %v7620_v5 = vpop.f32.mrf.mxu1 }
 0x804   : > { %v7710_v62 = vadd.f32 %v7620_v5, %v14424_v45  ;;  %v7732_v38 = vsel %vm3210_vm0, %v7730_v4, %v7731_v24 }
 0x805   : > { %v7955_v12 = vadd.f32 %v7894_v17, %v7732_v38  ;;  %v10146_v1 = vpop.f32.mrf.mxu1 }
 0x806   : > { %v7736_v26 = vrot.slane %v7710_v62, 4  ;;  %v7740_v49 = vrot.slane %v7710_v62, 6 }
 0x807   : > { %v7978_v54 = vadd.f32 %v14478_v44, %v7955_v12  ;;  %v7625_v20 = vpop.f32.mrf.mxu1 }
 0x808   : > { %v7737_v19 = vsel %vm15055_vm10, %v7735_v46, %v7736_v26  ;;  %v7711_v29 = vadd.f32 %v7625_v20, %v14427_v51  ;;  %vm15069_vm10 = vmmov %vm15048_vm2 }
 0x809   : > { %v7956_v31 = vadd.f32 %v10201_v50, %v7737_v19  ;;  %7994 = vst.msk [vmem:[%s14485_s28 + $0x8] sm:$0xff] %vm15056_vm9, %v7978_v54  ;;  %v10149_v45 = vpop.f32.mrf.mxu1  ;;  %v10206_v50 = vpop.f32.mrf.mxu0  ;;  %vm15070_vm9 = vmmov %vm15061_vm1 }
 0x80a   : > { %v7741_v23 = vrot.slane %v7711_v29, 6 }
 0x80b   : > { %v7979_v30 = vadd.f32 %v14478_v44, %v7956_v31  ;;  %v7628_v6 = vpop.f32.mrf.mxu1  ;;  %v7910_v2 = vpop.f32.mrf.mxu0 }
 0x80c   : > { %v7742_v33 = vsel %vm15057_vm11, %v7740_v49, %v7741_v23  ;;  %v7712_v16 = vadd.f32 %v7628_v6, %v14430_v53  ;;  %vm15071_vm11 = vmmov %vm15048_vm2 }
 0x80d   : > { %7995 = vst.msk [vmem:[%s14485_s28 + $0x10] sm:$0xff] %vm15058_vm15, %v7979_v30  ;;  %v7957_v3 = vadd.f32 %v10202_v34, %v7742_v33  ;;  %v10150_v51 = vpop.f32.mrf.mxu1  ;;  %v10209_v54 = vpop.f32.mrf.mxu0  ;;  %vm15072_vm15 = vmmov %vm15063_vm5 }
 0x80e   : > { %v7958_v42 = vadd.f32 %v7907_v37, %v7712_v16 }
 0x80f   : > { %v7980_v41 = vadd.f32 %v14478_v44, %v7957_v3  ;;  %v7633_v47 = vpop.f32.mrf.mxu1  ;;  %v7923_v29 = vpop.f32.mrf.mxu0 }
 0x810   : > { %v7981_v36 = vadd.f32 %v14478_v44, %v7958_v42  ;;  %v7713_v0 = vadd.f32 %v7633_v47, %v14433_v25 }
 0x811   : > { %7996 = vst.msk [vmem:[%s14485_s28 + $0x18] sm:$0xff] %vm15059_vm6, %v7980_v41  ;;  %v10153_v32 = vpop.f32.mrf.mxu1  ;;  %v10210_v6 = vpop.f32.mrf.mxu0  ;;  %vm15073_vm6 = vmmov %vm15048_vm2 }
 0x812   : > { %7997 = vst.msk [vmem:[%s14485_s28 + $0x20] sm:$0xff] %vm15060_vm12, %v7981_v36  ;;  %v7746_v8 = vrot.slane %v7713_v0, 2  ;;  %vm15074_vm12 = vmmov %vm15048_vm2 }
 0x813   : > { %v7636_v22 = vpop.f32.mrf.mxu1  ;;  %v7926_v41 = vpop.f32.mrf.mxu0 }
 0x814   : > { %v7714_v53 = vadd.f32 %v7636_v22, %v14436_v11 }
 0x815   : > { %v10154_v56 = vpop.f32.mrf.mxu1 }
 0x816   : > { %v7747_v35 = vrot.slane %v7714_v53, 2  ;;  %v7751_v34 = vrot.slane %v7714_v53, 4 }
 0x817   : > { %v7641_v21 = vpop.f32.mrf.mxu1 }
 0x818   : > { %v7715_v18 = vadd.f32 %v7641_v21, %v14439_v52  ;;  %v7748_v48 = vsel %vm3210_vm0, %v7746_v8, %v7747_v35 }
 0x819   : > { %v7959_v14 = vadd.f32 %v7910_v2, %v7748_v48  ;;  %v10157_v63 = vpop.f32.mrf.mxu1 }
 0x81a   : > { %v7752_v60 = vrot.slane %v7715_v18, 4  ;;  %v7756_v52 = vrot.slane %v7715_v18, 6 }
 0x81b   : > { %v7982_v25 = vadd.f32 %v14478_v44, %v7959_v14  ;;  %v7644_v40 = vpop.f32.mrf.mxu1 }
 0x81c   : > { %v7753_v11 = vsel %vm15061_vm1, %v7751_v34, %v7752_v60  ;;  %v7716_v27 = vadd.f32 %v7644_v40, %v14442_v43  ;;  %vm15075_vm1 = vmmov %vm15048_vm2 }
 0x81d   : > { %v7960_v4 = vadd.f32 %v10205_v57, %v7753_v11  ;;  %7998 = vst.msk [vmem:[%s14485_s28 + $0x28] sm:$0xff] %vm15062_vm7, %v7982_v25  ;;  %v10158_v24 = vpop.f32.mrf.mxu1  ;;  %vm15076_vm7 = vmmov %vm15075_vm1 }
 0x81e   : > { %v7757_v17 = vrot.slane %v7716_v27, 6 }
 0x81f   : > { %v7983_v5 = vadd.f32 %v14478_v44, %v7960_v4  ;;  %v7649_v62 = vpop.f32.mrf.mxu1 }
 0x820   : > { %v7758_v38 = vsel %vm15063_vm5, %v7756_v52, %v7757_v17 }
 0x821   : > { %7999 = vst.msk [vmem:[%s14485_s28 + $0x30] sm:$0xff] %vm15048_vm2, %v7983_v5  ;;  %v7961_v12 = vadd.f32 %v10206_v50, %v7758_v38  ;;  %v10161_v1 = vpop.f32.mrf.mxu1 }
 0x823   : > { %v7984_v46 = vadd.f32 %v14478_v44, %v7961_v12  ;;  %v7651_v26 = vpop.f32.mrf.mxu1 }
 0x825   : > { %8000 = vst.msk [vmem:[%s14485_s28 + $0x38] sm:$0xff] %vm15064_vm4, %v7984_v46  ;;  %v10162_v43 = vpop.f32.mrf.mxu1 }
 0x827   : > { %v7655_v20 = vpop.f32.mrf.mxu1 }
 0x828   : > { %v7717_v19 = vadd.f32 %v7655_v20, %v14445_v39 }
 0x829   : > { %v10165_v57 = vpop.f32.mrf.mxu1 }
 0x82a   : > { %v7762_v23 = vrot.slane %v7717_v19, 4 }
 0x82b   : > { %v7658_v31 = vpop.f32.mrf.mxu1 }
 0x82c   : > { %v7718_v45 = vadd.f32 %v7658_v31, %v14448_v15 }
 0x82d   : > { %v10166_v49 = vpop.f32.mrf.mxu1 }
 0x82e   : > { %v7763_v30 = vrot.slane %v7718_v45, 4  ;;  %v7767_v42 = vrot.slane %v7718_v45, 6 }
 0x82f   : > { %v7663_v37 = vpop.f32.mrf.mxu1 }
 0x830   : > { %v7719_v33 = vadd.f32 %v7663_v37, %v14451_v9  ;;  %v7764_v16 = vsel %vm15065_vm8, %v7762_v23, %v7763_v30 }
 0x831   : > { %v7962_v3 = vadd.f32 %v7923_v29, %v7764_v16  ;;  %v10169_v51 = vpop.f32.mrf.mxu1 }
 0x832   : > { %v7768_v39 = vrot.slane %v7719_v33, 6 }
 0x833   : > { %v7985_v47 = vadd.f32 %v14478_v44, %v7962_v3  ;;  %v7666_v15 = vpop.f32.mrf.mxu1 }
 0x834   : > { %v7720_v36 = vadd.f32 %v7666_v15, %v14454_v28  ;;  %v7769_v32 = vsel %vm15066_vm14, %v7767_v42, %v7768_v39  ;;  %v10213_v28 = vpop.f32.mrf.mxu0 }
 0x835   : > { %8001 = vst.msk [vmem:[%s14485_s28 + $0x40] sm:$0xff] %vm15067_vm13, %v7985_v47  ;;  %v7963_v0 = vadd.f32 %v7926_v41, %v7769_v32  ;;  %v10170_v9 = vpop.f32.mrf.mxu1 }
 0x836   : > { %v7964_v50 = vadd.f32 %v10209_v54, %v7720_v36  ;;  %v7939_v63 = vpop.f32.mrf.mxu0 }
 0x837   : > { %v7986_v22 = vadd.f32 %v14478_v44, %v7963_v0  ;;  %v7671_v53 = vpop.f32.mrf.mxu1 }
 0x838   : > { %v7987_v56 = vadd.f32 %v14478_v44, %v7964_v50  ;;  %v7721_v35 = vadd.f32 %v7671_v53, %v14457_v59  ;;  %v10214_v59 = vpop.f32.mrf.mxu0 }
 0x839   : > { %8002 = vst.msk [vmem:[%s14485_s28 + $0x48] sm:$0xff] %vm15068_vm3, %v7986_v22  ;;  %v10173_v8 = vpop.f32.mrf.mxu1 }
 0x83a   : > { %8003 = vst.msk [vmem:[%s14485_s28 + $0x50] sm:$0xff] %vm15069_vm10, %v7987_v56  ;;  %v7773_v48 = vrot.slane %v7721_v35, 2  ;;  %v7942_v12 = vpop.f32.mrf.mxu0 }
 0x83b   : > { %v7674_v2 = vpop.f32.mrf.mxu1 }
 0x83c   : > { %v7722_v21 = vadd.f32 %v7674_v2, %v14460_v10 }
 0x83d   : > { %v10174_v18 = vpop.f32.mrf.mxu1 }
 0x83e   : > { %v7774_v14 = vrot.slane %v7722_v21, 2  ;;  %v7778_v27 = vrot.slane %v7722_v21, 4 }
 0x83f   : > { %v7679_v34 = vpop.f32.mrf.mxu1 }
 0x840   : > { %v7775_v60 = vsel %vm3210_vm0, %v7773_v48, %v7774_v14  ;;  %v7723_v25 = vadd.f32 %v7679_v34, %v14463_v55 }
 0x841   : > { %v7965_v40 = vadd.f32 %v10210_v6, %v7775_v60  ;;  %v10177_v11 = vpop.f32.mrf.mxu1 }
 0x842   : > { %v7779_v4 = vrot.slane %v7723_v25, 4  ;;  %v7783_v38 = vrot.slane %v7723_v25, 6 }
 0x843   : > { %v7988_v24 = vadd.f32 %v14478_v44, %v7965_v40  ;;  %v7682_v52 = vpop.f32.mrf.mxu1 }
 0x844   : > { %v7724_v10 = vadd.f32 %v7682_v52, %v14466_v13  ;;  %v7780_v17 = vsel %vm15070_vm9, %v7778_v27, %v7779_v4 }
 0x845   : > { %8004 = vst.msk [vmem:[%s14485_s28 + $0x58] sm:$0xff] %vm15071_vm11, %v7988_v24  ;;  %v7966_v5 = vadd.f32 %v7939_v63, %v7780_v17  ;;  %v10178_v62 = vpop.f32.mrf.mxu1 }
 0x846   : > { %v7784_v55 = vrot.slane %v7724_v10, 6 }
 0x847   : > { %v7989_v1 = vadd.f32 %v14478_v44, %v7966_v5  ;;  %v7687_v46 = vpop.f32.mrf.mxu1 }
 0x848   : > { %v7725_v26 = vadd.f32 %v7687_v46, %v14469_v61  ;;  %v7785_v43 = vsel %vm15072_vm15, %v7783_v38, %v7784_v55 }
 0x849   : > { %8005 = vst.msk [vmem:[%s14485_s28 + $0x60] sm:$0xff] %vm15073_vm6, %v7989_v1  ;;  %v7967_v13 = vadd.f32 %v7942_v12, %v7785_v43  ;;  %v10181_v54 = vpop.f32.mrf.mxu1 }
 0x84a   : > { %v7968_v20 = vadd.f32 %v10213_v28, %v7725_v26 }
 0x84b   : > { %v7990_v57 = vadd.f32 %v14478_v44, %v7967_v13  ;;  %v7690_v19 = vpop.f32.mrf.mxu1 }
 0x84c   : > { %v7991_v29 = vadd.f32 %v14478_v44, %v7968_v20  ;;  %v7726_v61 = vadd.f32 %v7690_v19, %v14472_v58 }
 0x84d   : > { %8006 = vst.msk [vmem:[%s14485_s28 + $0x68] sm:$0xff] %vm15074_vm12, %v7990_v57  ;;  %v10182_v31 = vpop.f32.mrf.mxu1 }
 0x84e   : > { %8007 = vst.msk [vmem:[%s14485_s28 + $0x70] sm:$0xff] %vm15075_vm1, %v7991_v29  ;;  %v7789_v30 = vrot.slane %v7726_v61, 2 }
 0x84f   : > { %v7695_v45 = vpop.f32.mrf.mxu1 }
 0x850   : > { %v7727_v49 = vadd.f32 %v7695_v45, %v14475_v7 }
 0x851   : > { %v10185_v23 = vpop.f32.mrf.mxu1 }
 0x852   : > { %v7790_v6 = vrot.slane %v7727_v49, 2 }
 0x853   : > { %v7698_v37 = vpop.f32.mrf.mxu1 }
 0x854   : > { %v7791_v33 = vsel %vm3210_vm0, %v7789_v30, %v7790_v6 }
 0x855   : > { %v7969_v16 = vadd.f32 %v10214_v59, %v7791_v33  ;;  %v10186_v3 = vpop.f32.mrf.mxu1 }
 0x857   : > { %v7992_v51 = vadd.f32 %v14478_v44, %v7969_v16  ;;  %v7702_v42 = vpop.f32.mrf.mxu1 }
 0x859   : > { %8008 = vst.msk [vmem:[%s14485_s28 + $0x78] sm:$0xff] %vm15076_vm7, %v7992_v51  ;;  %v10189_v39 = vpop.f32.mrf.mxu1 }
 0x85b   : > { %v7704_v41 = vpop.f32.mrf.mxu1 }
 0x85d   : > { %v10190_v47 = vpop.f32.mrf.mxu1 }
 0x85e PF: > { %s28_s29 = sadd.s32 1, %s10777_s29  }
 0x85f   : > { %p25_p5 = scmp.ge.s32.totalorder %s28_s29, 4  }
 0x861   :  { %27 = sbr.rel (!%p25_p5) target bundleno = 4 (0x4), region = 150 }
 0x866   :  { %8033 = vsyncpa [#allocation5], 1 }
 0x867   :  { %8035 = vsyncpa [#allocation5 + $0x1], 1 }
 0x868   :  { %8036 = vsyncpa [#allocation7], 1 }
 0x869   :  { %8037 = vsyncpa [#allocation10], 1 }
 0x86a   :  { %8038 = vsyncpa [#allocation13], 1 }

</bundles_post_ra>
